<compile_context>
chip_gen: v7x
topology: tpu7x:2x2x1
jax: 0.10.0
libtpu: 0.0.40
codegen_flags: <defaults>
</compile_context>

<pallas_src>
import math
import jax
import jax.numpy as jnp
from jax import lax
from jax.experimental import pallas as pl

# ---------------- static config (small shapes consistent with the module) ----
HIDDEN = 32          # hidden_dim
LAYER = 3            # Layer (kept small for the demo)
VIEW_DEPTH = 3       # view_depth
COMBINATION = ("012", "103", "231", "320")   # ops per chain (global `combination`)
N_COMB = len(COMBINATION)
MAX_OUTPUT = 16      # MAX_OUTPUT
WORD_DIM1 = 40       # input_lang.n_words
WORD_DIM2 = 40       # output_lang.n_words
BATCH = 2
SEQ = 8              # padded sentence length
EPS = 1e-5           # PyTorch LayerNorm default
ITERATION = 1000
NUM_EXAMPLES_SEEN = 1   # <= ITERATION*0.1 -> new_w = w7 (no masking applied)

VEC_W = 128          # lane width; 4 chains x 32 hidden packed across lanes
assert N_COMB * HIDDEN == VEC_W
assert WORD_DIM1 <= VEC_W and WORD_DIM2 <= VEC_W
assert SEQ <= HIDDEN and MAX_OUTPUT <= HIDDEN        # w8[:, :s_cur] validity

# packed per-layer vector rows (gains / biases / masks), lane width 128
R_SUF_B = 0
R_LN_G, R_LN_B = 1, 2          # shared module-level LayerNorm
R_LN4_G, R_LN4_B = 3, 4
R_LN5_G, R_LN5_B = 5, 6
R_LN6_G, R_LN6_B = 7, 8
R_W6_B = 9
R_OUTMASK = 10                 # 1.0 on real out_dim lanes, 0 on padding
NV = 11

# packed per-(layer, depth) rows
DP_TEMPS, DP_G, DP_B, DP_MEXP, DP_MRELU = 0, 1, 2, 3, 4
ND = 5


def _seg_layernorm(x, seg, g, b):
    """Segmented LayerNorm. `seg` is a segment-averaging matrix so both the
    mean and mean-square reduce+broadcast run as (independent) MXU dots."""
    mu = jnp.dot(x, seg, preferred_element_type=jnp.float32)
    ms = jnp.dot(x * x, seg, preferred_element_type=jnp.float32)
    var = jnp.maximum(ms - mu * mu, 0.0)
    return (x - mu) * lax.rsqrt(var + EPS) * g + b


# ---------------- single fused kernel: whole 3-layer forward ------------------
def _fused_forward_kernel(x0_ref, sufw_ref, wd_ref, segH_ref, segO_ref,
                          w6_ref, w7_ref, w8bd0_ref, w8bdR_ref,
                          vec_ref, depth_ref, o_ref):
    segH = segH_ref[...]                               # (128,128) 32-lane-group averager
    seg4 = jnp.full((N_COMB, N_COMB), 1.0 / N_COMB, jnp.float32)
    x = x0_ref[...]                                    # (B*SEQ, 128) one-hot tokens
    total = None
    out_mask = None
    for l in range(LAYER):                             # static unroll over layers
        out_dim = HIDDEN if l != LAYER - 1 else WORD_DIM2
        vl = vec_ref[l]                                # (NV, 128)
        segO = segO_ref[l]                             # (128,128) out_dim averager

        suf_b = vl[R_SUF_B:R_SUF_B + 1, :]
        ln_g, ln_b = vl[R_LN_G:R_LN_G + 1, :], vl[R_LN_B:R_LN_B + 1, :]
        ln4_g = vl[R_LN4_G:R_LN4_G + 1, :N_COMB]
        ln4_b = vl[R_LN4_B:R_LN4_B + 1, :N_COMB]
        ln5_g, ln5_b = vl[R_LN5_G:R_LN5_G + 1, :], vl[R_LN5_B:R_LN5_B + 1, :]
        ln6_g, ln6_b = vl[R_LN6_G:R_LN6_G + 1, :], vl[R_LN6_B:R_LN6_B + 1, :]
        w6_b = vl[R_W6_B:R_W6_B + 1, :N_COMB]
        out_mask = vl[R_OUTMASK:R_OUTMASK + 1, :]

        # ---- suffle Linear (layer 0: embedding folded in) + shared LayerNorm ----
        # Weight is pre-transposed, tiled over the 4 chain groups, zero rows
        # beyond the real input width -> padding lanes of x are harmless.
        y = jnp.dot(x, sufw_ref[l], preferred_element_type=jnp.float32) + suf_b
        z = _seg_layernorm(y, segH, ln_g, ln_b)        # (N,128): 4 identical groups

        # ---- combination chains, all 4 packed across the 128 lanes ----
        out = z
        for d in range(VIEW_DEPTH):                    # static unroll
            ops_d = [COMBINATION[c][d] for c in range(N_COMB)]
            has_mm = any(op == "1" for op in ops_d)
            has_add = any(op == "0" for op in ops_d)
            has_exp = any(op == "2" for op in ops_d)
            has_relu = any(op == "3" for op in ops_d)
            has_ln = any(op in "012" for op in ops_d)

            dv = depth_ref[l, d]                       # (ND, 128)
            temps = dv[DP_TEMPS:DP_TEMPS + 1, :]
            g_d = dv[DP_G:DP_G + 1, :]
            b_d = dv[DP_B:DP_B + 1, :]
            m_exp = dv[DP_MEXP:DP_MEXP + 1, :]
            m_relu = dv[DP_MRELU:DP_MRELU + 1, :]

            lin = (jnp.dot(out, wd_ref[l, d], preferred_element_type=jnp.float32)
                   if has_mm else out)                 # block-diag: w1 / identity
            if has_add:
                lin = lin + temps                      # precomputed w0[c,d] @ w1[c,d]
            cand = jnp.where(m_exp > 0, jnp.exp(lin), lin) if has_exp else lin
            nxt = _seg_layernorm(cand, segH, g_d, b_d) if has_ln else cand
            out = (jnp.where(m_relu > 0, jnp.maximum(lin, 0.0), nxt)
                   if has_relu else nxt)

        # ---- w6: one block-structured (N,128)@(128,4) dot + LN4 over chains ----
        res4 = jnp.dot(out, w6_ref[l], preferred_element_type=jnp.float32) + w6_b
        res4 = _seg_layernorm(res4, seg4, ln4_g, ln4_b)          # (N,4)

        # ---- w7 contraction (4 -> out_dim, lane-padded to 128) + LN5 + residual ----
        acc = jnp.dot(res4, w7_ref[l], preferred_element_type=jnp.float32)  # (N,128)
        acc = _seg_layernorm(acc, segO, ln5_g, ln5_b)
        if out_dim == HIDDEN:
            acc = acc + z * out_mask                   # residual = LN'd suffle output

        # ---- seqmix: block-diagonal w8 @ acc (both batch elements in one dot) ----
        w8bd = w8bd0_ref[...] if l == 0 else w8bdR_ref[l - 1]
        x_new = jnp.dot(w8bd, acc, preferred_element_type=jnp.float32)
        x_new = _seg_layernorm(x_new, segO, ln6_g, ln6_b)        # (B*MAX_OUTPUT,128)

        # ---- running `total` accumulation (all but the last layer) ----
        if l != LAYER - 1:
            if total is None:
                total = jnp.zeros_like(x_new)
            x_new = x_new + total
            total = total + x_new
        x = x_new

    # ---- final softmax over the real vocabulary lanes (padding masked out) ----
    m = jnp.max(x, axis=-1, keepdims=True)             # padding lanes are 0 (shift-safe)
    e = jnp.exp(x - m) * out_mask
    denom = jnp.sum(e, axis=-1, keepdims=True)
    o_ref[...] = e * pl.reciprocal(denom, approx=True)


# ---------------- parameters (deterministic, synthetic; PyTorch layouts) ------
def _xavier(key, shape, fan_in, fan_out):
    std = math.sqrt(2.0 / (fan_in + fan_out))
    return (std * jax.random.normal(key, shape)).astype(jnp.float32)


def init_params(key):
    keys = iter(jax.random.split(key, 64))
    params = {
        "embedding": jax.random.normal(next(keys), (WORD_DIM1, HIDDEN), jnp.float32),
        "suffle_w": [_xavier(next(keys), (HIDDEN, HIDDEN), HIDDEN, HIDDEN)
                     for _ in range(LAYER)],
        "suffle_b": [jnp.zeros((1, HIDDEN), jnp.float32) for _ in range(LAYER)],
        "ln_g": jnp.ones((1, HIDDEN), jnp.float32),
        "ln_b": jnp.zeros((1, HIDDEN), jnp.float32),
    }
    subs = []
    for l in range(LAYER):
        out_dim = HIDDEN if l != LAYER - 1 else WORD_DIM2
        sub = dict(
            w0=_xavier(next(keys), (N_COMB, VIEW_DEPTH, 1, HIDDEN),
                       VIEW_DEPTH * HIDDEN, N_COMB * HIDDEN),
            w1=_xavier(next(keys), (N_COMB, VIEW_DEPTH, HIDDEN, HIDDEN),
                       VIEW_DEPTH * HIDDEN, N_COMB * HIDDEN),
            w6_w=_xavier(next(keys), (1, HIDDEN), HIDDEN, 1),
            w6_b=jnp.zeros((1, 1), jnp.float32),
            w7=_xavier(next(keys), (N_COMB, out_dim), N_COMB, out_dim),
            w8=_xavier(next(keys), (MAX_OUTPUT, out_dim), MAX_OUTPUT, out_dim),
            ln1_g=jnp.ones((1, HIDDEN), jnp.float32), ln1_b=jnp.zeros((1, HIDDEN), jnp.float32),
            ln2_g=jnp.ones((1, HIDDEN), jnp.float32), ln2_b=jnp.zeros((1, HIDDEN), jnp.float32),
            ln3_g=jnp.ones((1, HIDDEN), jnp.float32), ln3_b=jnp.zeros((1, HIDDEN), jnp.float32),
            ln4_g=jnp.ones((1, N_COMB), jnp.float32), ln4_b=jnp.zeros((1, N_COMB), jnp.float32),
            ln5_g=jnp.ones((1, out_dim), jnp.float32), ln5_b=jnp.zeros((1, out_dim), jnp.float32),
            ln6_g=jnp.ones((1, out_dim), jnp.float32), ln6_b=jnp.zeros((1, out_dim), jnp.float32),
        )
        subs.append(sub)
    params["sublayers"] = subs
    return params


def _block_diag(blocks):
    rows = sum(b.shape[0] for b in blocks)
    cols = sum(b.shape[1] for b in blocks)
    out = jnp.zeros((rows, cols), jnp.float32)
    ro = co = 0
    for b in blocks:
        out = out.at[ro:ro + b.shape[0], co:co + b.shape[1]].set(b)
        ro += b.shape[0]
        co += b.shape[1]
    return out


def pack_params(params):
    """One-time packing: chain-packed block-diagonal weights, pre-transposed
    suffle weights (layer 0 folds in the embedding), lane-padded LN params,
    segment-averaging matrices, block-diagonal w8, precomputed w0@w1."""
    f32 = jnp.float32

    def tile4(v):                       # (1,H) -> (1,128), replicated per chain group
        return jnp.tile(jnp.asarray(v, f32).reshape(1, HIDDEN), (1, N_COMB))

    def pad_lanes(v):                   # (1,w) -> (1,128), zero padded
        v = jnp.asarray(v, f32).reshape(1, -1)
        return jnp.pad(v, ((0, 0), (0, VEC_W - v.shape[1])))

    segH = _block_diag([jnp.full((HIDDEN, HIDDEN), 1.0 / HIDDEN, f32)] * N_COMB)

    sufw_list, wd_list, segO_list = [], [], []
    w6_list, w7_list, vec_list, depth_list = [], [], [], []
    w8bd0, w8bd_rest = None, []

    for l in range(LAYER):
        out_dim = HIDDEN if l != LAYER - 1 else WORD_DIM2
        sub = params["sublayers"][l]

        # suffle weight: pre-transposed, tiled over chain groups; layer 0 folds
        # the embedding table in so the kernel's layer-0 input is a one-hot.
        W = params["suffle_w"][l]
        base = (params["embedding"] @ W.T) if l == 0 else W.T
        sp = jnp.zeros((VEC_W, VEC_W), f32)
        sp = sp.at[:base.shape[0], :].set(jnp.tile(base, (1, N_COMB)))
        sufw_list.append(sp)

        # per-depth block-diagonal weights + packed temps / LN params / op masks
        wds, drows = [], []
        for d in range(VIEW_DEPTH):
            blocks, temps, gains, biases, m_exp, m_relu = [], [], [], [], [], []
            for c in range(N_COMB):
                op = COMBINATION[c][d]
                w1cd = sub["w1"][c, d]
                blocks.append(w1cd if op == "1" else jnp.eye(HIDDEN, dtype=f32))
                temps.append((sub["w0"][c, d] @ w1cd).reshape(HIDDEN) if op == "0"
                             else jnp.zeros((HIDDEN,), f32))
                if op == "0":
                    g, b = sub["ln1_g"], sub["ln1_b"]
                elif op == "1":
                    g, b = sub["ln2_g"], sub["ln2_b"]
                elif op == "2":
                    g, b = sub["ln3_g"], sub["ln3_b"]
                else:  # '3' (relu): LN result is discarded by the mask-select
                    g, b = jnp.ones((1, HIDDEN), f32), jnp.zeros((1, HIDDEN), f32)
                gains.append(g.reshape(HIDDEN))
                biases.append(b.reshape(HIDDEN))
                m_exp.append(jnp.full((HIDDEN,), 1.0 if op == "2" else 0.0, f32))
                m_relu.append(jnp.full((HIDDEN,), 1.0 if op == "3" else 0.0, f32))
            wds.append(_block_diag(blocks))
            drows.append(jnp.stack([jnp.concatenate(temps),
                                    jnp.concatenate(gains),
                                    jnp.concatenate(biases),
                                    jnp.concatenate(m_exp),
                                    jnp.concatenate(m_relu)]))
        wd_list.append(jnp.stack(wds))                 # (D, 128, 128)
        depth_list.append(jnp.stack(drows))            # (D, ND, 128)

        # segment-averaging matrix over the real out_dim lanes (LN5 / LN6)
        so = jnp.zeros((VEC_W, VEC_W), f32)
        so = so.at[:out_dim, :out_dim].set(1.0 / out_dim)
        segO_list.append(so)

        # w6 packed: group c's 32 lanes feed output column c
        w6p = jnp.zeros((VEC_W, N_COMB), f32)
        for c in range(N_COMB):
            w6p = w6p.at[c * HIDDEN:(c + 1) * HIDDEN, c].set(sub["w6_w"].reshape(HIDDEN))
        w6_list.append(w6p)

        # w7 lane-padded to 128
        w7_list.append(jnp.pad(sub["w7"], ((0, 0), (0, VEC_W - out_dim))))

        # block-diagonal w8 for the per-batch seqmix (one MXU dot per layer)
        s_cur = SEQ if l == 0 else MAX_OUTPUT
        w8bd = _block_diag([sub["w8"][:, :s_cur]] * BATCH)
        if l == 0:
            w8bd0 = w8bd                               # (B*MAX_OUTPUT, B*SEQ)
        else:
            w8bd_rest.append(w8bd)                     # (B*MAX_OUTPUT, B*MAX_OUTPUT)

        # packed per-layer vectors
        rows_v = [
            tile4(params["suffle_b"][l]),
            tile4(params["ln_g"]), tile4(params["ln_b"]),
            pad_lanes(sub["ln4_g"]), pad_lanes(sub["ln4_b"]),
            pad_lanes(sub["ln5_g"]), pad_lanes(sub["ln5_b"]),
            pad_lanes(sub["ln6_g"]), pad_lanes(sub["ln6_b"]),
            jnp.broadcast_to(jnp.asarray(sub["w6_b"], f32).reshape(1, 1), (1, VEC_W)),
            pad_lanes(jnp.ones((1, out_dim), f32)),    # out_mask
        ]
        vec_list.append(jnp.concatenate(rows_v, axis=0))   # (NV, 128)

    return dict(
        sufwP=jnp.stack(sufw_list),                    # (L, 128, 128)
        wdP=jnp.stack(wd_list),                        # (L, D, 128, 128)
        segH=segH,                                     # (128, 128)
        segO=jnp.stack(segO_list),                     # (L, 128, 128)
        w6P=jnp.stack(w6_list),                        # (L, 128, N_COMB)
        w7P=jnp.stack(w7_list),                        # (L, N_COMB, 128)
        w8bd0=w8bd0,                                   # (B*MAX_OUTPUT, B*SEQ)
        w8bdR=jnp.stack(w8bd_rest),                    # (L-1, B*MAX_OUTPUT, B*MAX_OUTPUT)
        vecP=jnp.stack(vec_list),                      # (L, NV, 128)
        depthP=jnp.stack(depth_list),                  # (L, D, ND, 128)
        w7_raw=tuple(params["sublayers"][l]["w7"] for l in range(LAYER)),
    )


# ---------------- forward: everything fused into one grid-less pallas_call ----
def _forward(tokens, packed):
    # Embedding gather fused into the kernel: lane-dense one-hot @ (emb @ W0^T).
    onehot = jax.nn.one_hot(tokens.reshape(-1), VEC_W, dtype=jnp.float32)  # (B*SEQ,128)

    out = pl.pallas_call(
        _fused_forward_kernel,
        out_shape=jax.ShapeDtypeStruct((BATCH * MAX_OUTPUT, VEC_W), jnp.float32),
    )(onehot, packed["sufwP"], packed["wdP"], packed["segH"], packed["segO"],
      packed["w6P"], packed["w7P"], packed["w8bd0"], packed["w8bdR"],
      packed["vecP"], packed["depthP"])

    result = out[:, :WORD_DIM2].reshape(BATCH, MAX_OUTPUT, WORD_DIM2)
    # TODO(synk): masks depend only on parameters; num_examples_seen <= ITERATION*0.1
    # (host-side training state) -> new_w = w7, masks returned unchanged.
    masks = [1.0 - ((w7 <= 1e-7) & (w7 >= -1e-7)).astype(jnp.float32)
             for w7 in packed["w7_raw"]]
    return result, masks


forward = jax.jit(_forward)


if __name__ == "__main__":
    key = jax.random.PRNGKey(0)
    k_params, k_tokens = jax.random.split(key)
    params = init_params(k_params)
    packed = pack_params(params)
    tokens = jax.random.randint(k_tokens, (BATCH, SEQ), 0, WORD_DIM1)

    result, masks = forward(tokens, packed)
    jax.block_until_ready(result)
    for m in masks:
        jax.block_until_ready(m)

    assert result.shape == (BATCH, MAX_OUTPUT, WORD_DIM2)
    assert bool(jnp.all(jnp.isfinite(result)))
    row_sums = jnp.sum(result, axis=-1)
    assert bool(jnp.all(jnp.abs(row_sums - 1.0) < 1e-2))   # softmax sanity
    assert len(masks) == LAYER
    print("KERNEL_OK")
</pallas_src>

<mosaic_0001>
module attributes {stable_mosaic.version = 11 : i64} {
  func.func @_fused_forward_kernel(%arg0: memref<16x128xf32, #tpu.memory_space<vmem>>, %arg1: memref<3x128x128xf32, #tpu.memory_space<vmem>>, %arg2: memref<3x3x128x128xf32, #tpu.memory_space<vmem>>, %arg3: memref<128x128xf32, #tpu.memory_space<vmem>>, %arg4: memref<3x128x128xf32, #tpu.memory_space<vmem>>, %arg5: memref<3x128x4xf32, #tpu.memory_space<vmem>>, %arg6: memref<3x4x128xf32, #tpu.memory_space<vmem>>, %arg7: memref<32x16xf32, #tpu.memory_space<vmem>>, %arg8: memref<2x32x32xf32, #tpu.memory_space<vmem>>, %arg9: memref<3x11x128xf32, #tpu.memory_space<vmem>>, %arg10: memref<3x3x5x128xf32, #tpu.memory_space<vmem>>, %arg11: memref<32x128xf32, #tpu.memory_space<vmem>>) attributes {dimension_semantics = [], scalar_prefetch = 0 : i64, scratch_operands = 0 : i64, tpu.core_type = #tpu.core_type<tc>} {
    %c0 = arith.constant 0 : index
    %c0_0 = arith.constant 0 : index
    %0 = vector.load %arg3[%c0, %c0_0] : memref<128x128xf32, #tpu.memory_space<vmem>>, vector<128x128xf32>
    %cst = arith.constant 2.500000e-01 : f32
    %1 = vector.broadcast %cst : f32 to vector<4x4xf32>
    %c0_1 = arith.constant 0 : index
    %c0_2 = arith.constant 0 : index
    %2 = vector.load %arg0[%c0_1, %c0_2] : memref<16x128xf32, #tpu.memory_space<vmem>>, vector<16x128xf32>
    %c0_3 = arith.constant 0 : index
    %c0_4 = arith.constant 0 : index
    %c0_5 = arith.constant 0 : index
    %3 = vector.load %arg9[%c0_3, %c0_4, %c0_5] : memref<3x11x128xf32, #tpu.memory_space<vmem>>, vector<1x11x128xf32>
    %4 = vector.shape_cast %3 : vector<1x11x128xf32> to vector<11x128xf32>
    %c0_6 = arith.constant 0 : index
    %c0_7 = arith.constant 0 : index
    %c0_8 = arith.constant 0 : index
    %5 = vector.load %arg4[%c0_6, %c0_7, %c0_8] : memref<3x128x128xf32, #tpu.memory_space<vmem>>, vector<1x128x128xf32>
    %6 = vector.shape_cast %5 : vector<1x128x128xf32> to vector<128x128xf32>
    %7 = vector.extract_strided_slice %4 {offsets = [0, 0], sizes = [1, 128], strides = [1, 1]} : vector<11x128xf32> to vector<1x128xf32>
    %8 = vector.extract_strided_slice %4 {offsets = [1, 0], sizes = [1, 128], strides = [1, 1]} : vector<11x128xf32> to vector<1x128xf32>
    %9 = vector.extract_strided_slice %4 {offsets = [2, 0], sizes = [1, 128], strides = [1, 1]} : vector<11x128xf32> to vector<1x128xf32>
    %10 = vector.extract_strided_slice %4 {offsets = [3, 0], sizes = [1, 4], strides = [1, 1]} : vector<11x128xf32> to vector<1x4xf32>
    %11 = vector.extract_strided_slice %4 {offsets = [4, 0], sizes = [1, 4], strides = [1, 1]} : vector<11x128xf32> to vector<1x4xf32>
    %12 = vector.extract_strided_slice %4 {offsets = [5, 0], sizes = [1, 128], strides = [1, 1]} : vector<11x128xf32> to vector<1x128xf32>
    %13 = vector.extract_strided_slice %4 {offsets = [6, 0], sizes = [1, 128], strides = [1, 1]} : vector<11x128xf32> to vector<1x128xf32>
    %14 = vector.extract_strided_slice %4 {offsets = [7, 0], sizes = [1, 128], strides = [1, 1]} : vector<11x128xf32> to vector<1x128xf32>
    %15 = vector.extract_strided_slice %4 {offsets = [8, 0], sizes = [1, 128], strides = [1, 1]} : vector<11x128xf32> to vector<1x128xf32>
    %16 = vector.extract_strided_slice %4 {offsets = [9, 0], sizes = [1, 4], strides = [1, 1]} : vector<11x128xf32> to vector<1x4xf32>
    %17 = vector.extract_strided_slice %4 {offsets = [10, 0], sizes = [1, 128], strides = [1, 1]} : vector<11x128xf32> to vector<1x128xf32>
    %c0_9 = arith.constant 0 : index
    %c0_10 = arith.constant 0 : index
    %c0_11 = arith.constant 0 : index
    %18 = vector.load %arg1[%c0_9, %c0_10, %c0_11] : memref<3x128x128xf32, #tpu.memory_space<vmem>>, vector<1x128x128xf32>
    %19 = vector.shape_cast %18 : vector<1x128x128xf32> to vector<128x128xf32>
    %cst_12 = arith.constant dense<0.000000e+00> : vector<16x128xf32>
    %20 = tpu.matmul %2, %19, %cst_12 {dimension_numbers = #tpu.dot_dimension_numbers<[1], [0], [0], [1], [0, 0, 1, 1], [], []>} : vector<16x128xf32>, vector<128x128xf32>, vector<16x128xf32> -> vector<16x128xf32>
    %21 = vector.broadcast %7 : vector<1x128xf32> to vector<16x128xf32>
    %22 = arith.addf %20, %21 : vector<16x128xf32>
    %cst_13 = arith.constant dense<0.000000e+00> : vector<16x128xf32>
    %23 = tpu.matmul %22, %0, %cst_13 {dimension_numbers = #tpu.dot_dimension_numbers<[1], [0], [0], [1], [0, 0, 1, 1], [], []>} : vector<16x128xf32>, vector<128x128xf32>, vector<16x128xf32> -> vector<16x128xf32>
    %24 = arith.mulf %22, %22 : vector<16x128xf32>
    %cst_14 = arith.constant dense<0.000000e+00> : vector<16x128xf32>
    %25 = tpu.matmul %24, %0, %cst_14 {dimension_numbers = #tpu.dot_dimension_numbers<[1], [0], [0], [1], [0, 0, 1, 1], [], []>} : vector<16x128xf32>, vector<128x128xf32>, vector<16x128xf32> -> vector<16x128xf32>
    %26 = arith.mulf %23, %23 : vector<16x128xf32>
    %27 = arith.subf %25, %26 : vector<16x128xf32>
    %cst_15 = arith.constant 0.000000e+00 : f32
    %28 = vector.broadcast %cst_15 : f32 to vector<16x128xf32>
    %29 = arith.maximumf %27, %28 : vector<16x128xf32>
    %30 = arith.subf %22, %23 : vector<16x128xf32>
    %cst_16 = arith.constant 9.99999974E-6 : f32
    %31 = vector.broadcast %cst_16 : f32 to vector<16x128xf32>
    %32 = arith.addf %29, %31 : vector<16x128xf32>
    %33 = math.rsqrt %32 : vector<16x128xf32>
    %34 = arith.mulf %30, %33 : vector<16x128xf32>
    %35 = vector.broadcast %8 : vector<1x128xf32> to vector<16x128xf32>
    %36 = arith.mulf %34, %35 : vector<16x128xf32>
    %37 = vector.broadcast %9 : vector<1x128xf32> to vector<16x128xf32>
    %38 = arith.addf %36, %37 : vector<16x128xf32>
    %c0_17 = arith.constant 0 : index
    %c0_18 = arith.constant 0 : index
    %c0_19 = arith.constant 0 : index
    %c0_20 = arith.constant 0 : index
    %39 = vector.load %arg10[%c0_17, %c0_18, %c0_19, %c0_20] : memref<3x3x5x128xf32, #tpu.memory_space<vmem>>, vector<1x1x5x128xf32>
    %40 = vector.shape_cast %39 : vector<1x1x5x128xf32> to vector<5x128xf32>
    %41 = vector.extract_strided_slice %40 {offsets = [0, 0], sizes = [1, 128], strides = [1, 1]} : vector<5x128xf32> to vector<1x128xf32>
    %42 = vector.extract_strided_slice %40 {offsets = [1, 0], sizes = [1, 128], strides = [1, 1]} : vector<5x128xf32> to vector<1x128xf32>
    %43 = vector.extract_strided_slice %40 {offsets = [2, 0], sizes = [1, 128], strides = [1, 1]} : vector<5x128xf32> to vector<1x128xf32>
    %44 = vector.extract_strided_slice %40 {offsets = [3, 0], sizes = [1, 128], strides = [1, 1]} : vector<5x128xf32> to vector<1x128xf32>
    %45 = vector.extract_strided_slice %40 {offsets = [4, 0], sizes = [1, 128], strides = [1, 1]} : vector<5x128xf32> to vector<1x128xf32>
    %c0_21 = arith.constant 0 : index
    %c0_22 = arith.constant 0 : index
    %c0_23 = arith.constant 0 : index
    %c0_24 = arith.constant 0 : index
    %46 = vector.load %arg2[%c0_21, %c0_22, %c0_23, %c0_24] : memref<3x3x128x128xf32, #tpu.memory_space<vmem>>, vector<1x1x128x128xf32>
    %47 = vector.shape_cast %46 : vector<1x1x128x128xf32> to vector<128x128xf32>
    %cst_25 = arith.constant dense<0.000000e+00> : vector<16x128xf32>
    %48 = tpu.matmul %38, %47, %cst_25 {dimension_numbers = #tpu.dot_dimension_numbers<[1], [0], [0], [1], [0, 0, 1, 1], [], []>} : vector<16x128xf32>, vector<128x128xf32>, vector<16x128xf32> -> vector<16x128xf32>
    %49 = vector.broadcast %41 : vector<1x128xf32> to vector<16x128xf32>
    %50 = arith.addf %48, %49 : vector<16x128xf32>
    %cst_26 = arith.constant 0.000000e+00 : f32
    %51 = vector.broadcast %cst_26 : f32 to vector<1x128xf32>
    %52 = arith.cmpf ogt, %44, %51 : vector<1x128xf32>
    %53 = math.exp %50 : vector<16x128xf32>
    %54 = vector.shape_cast %52 : vector<1x128xi1> to vector<1x128xi1>
    %55 = vector.broadcast %54 : vector<1x128xi1> to vector<16x128xi1>
    %56 = arith.select %55, %53, %50 : vector<16x128xi1>, vector<16x128xf32>
    %cst_27 = arith.constant dense<0.000000e+00> : vector<16x128xf32>
    %57 = tpu.matmul %56, %0, %cst_27 {dimension_numbers = #tpu.dot_dimension_numbers<[1], [0], [0], [1], [0, 0, 1, 1], [], []>} : vector<16x128xf32>, vector<128x128xf32>, vector<16x128xf32> -> vector<16x128xf32>
    %58 = arith.mulf %56, %56 : vector<16x128xf32>
    %cst_28 = arith.constant dense<0.000000e+00> : vector<16x128xf32>
    %59 = tpu.matmul %58, %0, %cst_28 {dimension_numbers = #tpu.dot_dimension_numbers<[1], [0], [0], [1], [0, 0, 1, 1], [], []>} : vector<16x128xf32>, vector<128x128xf32>, vector<16x128xf32> -> vector<16x128xf32>
    %60 = arith.mulf %57, %57 : vector<16x128xf32>
    %61 = arith.subf %59, %60 : vector<16x128xf32>
    %cst_29 = arith.constant 0.000000e+00 : f32
    %62 = vector.broadcast %cst_29 : f32 to vector<16x128xf32>
    %63 = arith.maximumf %61, %62 : vector<16x128xf32>
    %64 = arith.subf %56, %57 : vector<16x128xf32>
    %cst_30 = arith.constant 9.99999974E-6 : f32
    %65 = vector.broadcast %cst_30 : f32 to vector<16x128xf32>
    %66 = arith.addf %63, %65 : vector<16x128xf32>
    %67 = math.rsqrt %66 : vector<16x128xf32>
    %68 = arith.mulf %64, %67 : vector<16x128xf32>
    %69 = vector.broadcast %42 : vector<1x128xf32> to vector<16x128xf32>
    %70 = arith.mulf %68, %69 : vector<16x128xf32>
    %71 = vector.broadcast %43 : vector<1x128xf32> to vector<16x128xf32>
    %72 = arith.addf %70, %71 : vector<16x128xf32>
    %cst_31 = arith.constant 0.000000e+00 : f32
    %73 = vector.broadcast %cst_31 : f32 to vector<1x128xf32>
    %74 = arith.cmpf ogt, %45, %73 : vector<1x128xf32>
    %cst_32 = arith.constant 0.000000e+00 : f32
    %75 = vector.broadcast %cst_32 : f32 to vector<16x128xf32>
    %76 = arith.maximumf %50, %75 : vector<16x128xf32>
    %77 = vector.shape_cast %74 : vector<1x128xi1> to vector<1x128xi1>
    %78 = vector.broadcast %77 : vector<1x128xi1> to vector<16x128xi1>
    %79 = arith.select %78, %76, %72 : vector<16x128xi1>, vector<16x128xf32>
    %c0_33 = arith.constant 0 : index
    %c1 = arith.constant 1 : index
    %c0_34 = arith.constant 0 : index
    %c0_35 = arith.constant 0 : index
    %80 = vector.load %arg10[%c0_33, %c1, %c0_34, %c0_35] : memref<3x3x5x128xf32, #tpu.memory_space<vmem>>, vector<1x1x5x128xf32>
    %81 = vector.shape_cast %80 : vector<1x1x5x128xf32> to vector<5x128xf32>
    %82 = vector.extract_strided_slice %81 {offsets = [0, 0], sizes = [1, 128], strides = [1, 1]} : vector<5x128xf32> to vector<1x128xf32>
    %83 = vector.extract_strided_slice %81 {offsets = [1, 0], sizes = [1, 128], strides = [1, 1]} : vector<5x128xf32> to vector<1x128xf32>
    %84 = vector.extract_strided_slice %81 {offsets = [2, 0], sizes = [1, 128], strides = [1, 1]} : vector<5x128xf32> to vector<1x128xf32>
    %85 = vector.extract_strided_slice %81 {offsets = [3, 0], sizes = [1, 128], strides = [1, 1]} : vector<5x128xf32> to vector<1x128xf32>
    %86 = vector.extract_strided_slice %81 {offsets = [4, 0], sizes = [1, 128], strides = [1, 1]} : vector<5x128xf32> to vector<1x128xf32>
    %c0_36 = arith.constant 0 : index
    %c1_37 = arith.constant 1 : index
    %c0_38 = arith.constant 0 : index
    %c0_39 = arith.constant 0 : index
    %87 = vector.load %arg2[%c0_36, %c1_37, %c0_38, %c0_39] : memref<3x3x128x128xf32, #tpu.memory_space<vmem>>, vector<1x1x128x128xf32>
    %88 = vector.shape_cast %87 : vector<1x1x128x128xf32> to vector<128x128xf32>
    %cst_40 = arith.constant dense<0.000000e+00> : vector<16x128xf32>
    %89 = tpu.matmul %79, %88, %cst_40 {dimension_numbers = #tpu.dot_dimension_numbers<[1], [0], [0], [1], [0, 0, 1, 1], [], []>} : vector<16x128xf32>, vector<128x128xf32>, vector<16x128xf32> -> vector<16x128xf32>
    %90 = vector.broadcast %82 : vector<1x128xf32> to vector<16x128xf32>
    %91 = arith.addf %89, %90 : vector<16x128xf32>
    %cst_41 = arith.constant 0.000000e+00 : f32
    %92 = vector.broadcast %cst_41 : f32 to vector<1x128xf32>
    %93 = arith.cmpf ogt, %85, %92 : vector<1x128xf32>
    %94 = math.exp %91 : vector<16x128xf32>
    %95 = vector.shape_cast %93 : vector<1x128xi1> to vector<1x128xi1>
    %96 = vector.broadcast %95 : vector<1x128xi1> to vector<16x128xi1>
    %97 = arith.select %96, %94, %91 : vector<16x128xi1>, vector<16x128xf32>
    %cst_42 = arith.constant dense<0.000000e+00> : vector<16x128xf32>
    %98 = tpu.matmul %97, %0, %cst_42 {dimension_numbers = #tpu.dot_dimension_numbers<[1], [0], [0], [1], [0, 0, 1, 1], [], []>} : vector<16x128xf32>, vector<128x128xf32>, vector<16x128xf32> -> vector<16x128xf32>
    %99 = arith.mulf %97, %97 : vector<16x128xf32>
    %cst_43 = arith.constant dense<0.000000e+00> : vector<16x128xf32>
    %100 = tpu.matmul %99, %0, %cst_43 {dimension_numbers = #tpu.dot_dimension_numbers<[1], [0], [0], [1], [0, 0, 1, 1], [], []>} : vector<16x128xf32>, vector<128x128xf32>, vector<16x128xf32> -> vector<16x128xf32>
    %101 = arith.mulf %98, %98 : vector<16x128xf32>
    %102 = arith.subf %100, %101 : vector<16x128xf32>
    %cst_44 = arith.constant 0.000000e+00 : f32
    %103 = vector.broadcast %cst_44 : f32 to vector<16x128xf32>
    %104 = arith.maximumf %102, %103 : vector<16x128xf32>
    %105 = arith.subf %97, %98 : vector<16x128xf32>
    %cst_45 = arith.constant 9.99999974E-6 : f32
    %106 = vector.broadcast %cst_45 : f32 to vector<16x128xf32>
    %107 = arith.addf %104, %106 : vector<16x128xf32>
    %108 = math.rsqrt %107 : vector<16x128xf32>
    %109 = arith.mulf %105, %108 : vector<16x128xf32>
    %110 = vector.broadcast %83 : vector<1x128xf32> to vector<16x128xf32>
    %111 = arith.mulf %109, %110 : vector<16x128xf32>
    %112 = vector.broadcast %84 : vector<1x128xf32> to vector<16x128xf32>
    %113 = arith.addf %111, %112 : vector<16x128xf32>
    %cst_46 = arith.constant 0.000000e+00 : f32
    %114 = vector.broadcast %cst_46 : f32 to vector<1x128xf32>
    %115 = arith.cmpf ogt, %86, %114 : vector<1x128xf32>
    %cst_47 = arith.constant 0.000000e+00 : f32
    %116 = vector.broadcast %cst_47 : f32 to vector<16x128xf32>
    %117 = arith.maximumf %91, %116 : vector<16x128xf32>
    %118 = vector.shape_cast %115 : vector<1x128xi1> to vector<1x128xi1>
    %119 = vector.broadcast %118 : vector<1x128xi1> to vector<16x128xi1>
    %120 = arith.select %119, %117, %113 : vector<16x128xi1>, vector<16x128xf32>
    %c0_48 = arith.constant 0 : index
    %c2 = arith.constant 2 : index
    %c0_49 = arith.constant 0 : index
    %c0_50 = arith.constant 0 : index
    %121 = vector.load %arg10[%c0_48, %c2, %c0_49, %c0_50] : memref<3x3x5x128xf32, #tpu.memory_space<vmem>>, vector<1x1x5x128xf32>
    %122 = vector.shape_cast %121 : vector<1x1x5x128xf32> to vector<5x128xf32>
    %123 = vector.extract_strided_slice %122 {offsets = [0, 0], sizes = [1, 128], strides = [1, 1]} : vector<5x128xf32> to vector<1x128xf32>
    %124 = vector.extract_strided_slice %122 {offsets = [1, 0], sizes = [1, 128], strides = [1, 1]} : vector<5x128xf32> to vector<1x128xf32>
    %125 = vector.extract_strided_slice %122 {offsets = [2, 0], sizes = [1, 128], strides = [1, 1]} : vector<5x128xf32> to vector<1x128xf32>
    %126 = vector.extract_strided_slice %122 {offsets = [3, 0], sizes = [1, 128], strides = [1, 1]} : vector<5x128xf32> to vector<1x128xf32>
    %127 = vector.extract_strided_slice %122 {offsets = [4, 0], sizes = [1, 128], strides = [1, 1]} : vector<5x128xf32> to vector<1x128xf32>
    %c0_51 = arith.constant 0 : index
    %c2_52 = arith.constant 2 : index
    %c0_53 = arith.constant 0 : index
    %c0_54 = arith.constant 0 : index
    %128 = vector.load %arg2[%c0_51, %c2_52, %c0_53, %c0_54] : memref<3x3x128x128xf32, #tpu.memory_space<vmem>>, vector<1x1x128x128xf32>
    %129 = vector.shape_cast %128 : vector<1x1x128x128xf32> to vector<128x128xf32>
    %cst_55 = arith.constant dense<0.000000e+00> : vector<16x128xf32>
    %130 = tpu.matmul %120, %129, %cst_55 {dimension_numbers = #tpu.dot_dimension_numbers<[1], [0], [0], [1], [0, 0, 1, 1], [], []>} : vector<16x128xf32>, vector<128x128xf32>, vector<16x128xf32> -> vector<16x128xf32>
    %131 = vector.broadcast %123 : vector<1x128xf32> to vector<16x128xf32>
    %132 = arith.addf %130, %131 : vector<16x128xf32>
    %cst_56 = arith.constant 0.000000e+00 : f32
    %133 = vector.broadcast %cst_56 : f32 to vector<1x128xf32>
    %134 = arith.cmpf ogt, %126, %133 : vector<1x128xf32>
    %135 = math.exp %132 : vector<16x128xf32>
    %136 = vector.shape_cast %134 : vector<1x128xi1> to vector<1x128xi1>
    %137 = vector.broadcast %136 : vector<1x128xi1> to vector<16x128xi1>
    %138 = arith.select %137, %135, %132 : vector<16x128xi1>, vector<16x128xf32>
    %cst_57 = arith.constant dense<0.000000e+00> : vector<16x128xf32>
    %139 = tpu.matmul %138, %0, %cst_57 {dimension_numbers = #tpu.dot_dimension_numbers<[1], [0], [0], [1], [0, 0, 1, 1], [], []>} : vector<16x128xf32>, vector<128x128xf32>, vector<16x128xf32> -> vector<16x128xf32>
    %140 = arith.mulf %138, %138 : vector<16x128xf32>
    %cst_58 = arith.constant dense<0.000000e+00> : vector<16x128xf32>
    %141 = tpu.matmul %140, %0, %cst_58 {dimension_numbers = #tpu.dot_dimension_numbers<[1], [0], [0], [1], [0, 0, 1, 1], [], []>} : vector<16x128xf32>, vector<128x128xf32>, vector<16x128xf32> -> vector<16x128xf32>
    %142 = arith.mulf %139, %139 : vector<16x128xf32>
    %143 = arith.subf %141, %142 : vector<16x128xf32>
    %cst_59 = arith.constant 0.000000e+00 : f32
    %144 = vector.broadcast %cst_59 : f32 to vector<16x128xf32>
    %145 = arith.maximumf %143, %144 : vector<16x128xf32>
    %146 = arith.subf %138, %139 : vector<16x128xf32>
    %cst_60 = arith.constant 9.99999974E-6 : f32
    %147 = vector.broadcast %cst_60 : f32 to vector<16x128xf32>
    %148 = arith.addf %145, %147 : vector<16x128xf32>
    %149 = math.rsqrt %148 : vector<16x128xf32>
    %150 = arith.mulf %146, %149 : vector<16x128xf32>
    %151 = vector.broadcast %124 : vector<1x128xf32> to vector<16x128xf32>
    %152 = arith.mulf %150, %151 : vector<16x128xf32>
    %153 = vector.broadcast %125 : vector<1x128xf32> to vector<16x128xf32>
    %154 = arith.addf %152, %153 : vector<16x128xf32>
    %cst_61 = arith.constant 0.000000e+00 : f32
    %155 = vector.broadcast %cst_61 : f32 to vector<1x128xf32>
    %156 = arith.cmpf ogt, %127, %155 : vector<1x128xf32>
    %cst_62 = arith.constant 0.000000e+00 : f32
    %157 = vector.broadcast %cst_62 : f32 to vector<16x128xf32>
    %158 = arith.maximumf %132, %157 : vector<16x128xf32>
    %159 = vector.shape_cast %156 : vector<1x128xi1> to vector<1x128xi1>
    %160 = vector.broadcast %159 : vector<1x128xi1> to vector<16x128xi1>
    %161 = arith.select %160, %158, %154 : vector<16x128xi1>, vector<16x128xf32>
    %c0_63 = arith.constant 0 : index
    %c0_64 = arith.constant 0 : index
    %c0_65 = arith.constant 0 : index
    %162 = vector.load %arg5[%c0_63, %c0_64, %c0_65] : memref<3x128x4xf32, #tpu.memory_space<vmem>>, vector<1x128x4xf32>
    %163 = vector.shape_cast %162 : vector<1x128x4xf32> to vector<128x4xf32>
    %cst_66 = arith.constant dense<0.000000e+00> : vector<16x4xf32>
    %164 = tpu.matmul %161, %163, %cst_66 {dimension_numbers = #tpu.dot_dimension_numbers<[1], [0], [0], [1], [0, 0, 1, 1], [], []>} : vector<16x128xf32>, vector<128x4xf32>, vector<16x4xf32> -> vector<16x4xf32>
    %165 = vector.broadcast %16 : vector<1x4xf32> to vector<16x4xf32>
    %166 = arith.addf %164, %165 : vector<16x4xf32>
    %cst_67 = arith.constant dense<0.000000e+00> : vector<16x4xf32>
    %167 = tpu.matmul %166, %1, %cst_67 {dimension_numbers = #tpu.dot_dimension_numbers<[1], [0], [0], [1], [0, 0, 1, 1], [], []>} : vector<16x4xf32>, vector<4x4xf32>, vector<16x4xf32> -> vector<16x4xf32>
    %168 = arith.mulf %166, %166 : vector<16x4xf32>
    %cst_68 = arith.constant dense<0.000000e+00> : vector<16x4xf32>
    %169 = tpu.matmul %168, %1, %cst_68 {dimension_numbers = #tpu.dot_dimension_numbers<[1], [0], [0], [1], [0, 0, 1, 1], [], []>} : vector<16x4xf32>, vector<4x4xf32>, vector<16x4xf32> -> vector<16x4xf32>
    %170 = arith.mulf %167, %167 : vector<16x4xf32>
    %171 = arith.subf %169, %170 : vector<16x4xf32>
    %cst_69 = arith.constant 0.000000e+00 : f32
    %172 = vector.broadcast %cst_69 : f32 to vector<16x4xf32>
    %173 = arith.maximumf %171, %172 : vector<16x4xf32>
    %174 = arith.subf %166, %167 : vector<16x4xf32>
    %cst_70 = arith.constant 9.99999974E-6 : f32
    %175 = vector.broadcast %cst_70 : f32 to vector<16x4xf32>
    %176 = arith.addf %173, %175 : vector<16x4xf32>
    %177 = math.rsqrt %176 : vector<16x4xf32>
    %178 = arith.mulf %174, %177 : vector<16x4xf32>
    %179 = vector.broadcast %10 : vector<1x4xf32> to vector<16x4xf32>
    %180 = arith.mulf %178, %179 : vector<16x4xf32>
    %181 = vector.broadcast %11 : vector<1x4xf32> to vector<16x4xf32>
    %182 = arith.addf %180, %181 : vector<16x4xf32>
    %c0_71 = arith.constant 0 : index
    %c0_72 = arith.constant 0 : index
    %c0_73 = arith.constant 0 : index
    %183 = vector.load %arg6[%c0_71, %c0_72, %c0_73] : memref<3x4x128xf32, #tpu.memory_space<vmem>>, vector<1x4x128xf32>
    %184 = vector.shape_cast %183 : vector<1x4x128xf32> to vector<4x128xf32>
    %cst_74 = arith.constant dense<0.000000e+00> : vector<16x128xf32>
    %185 = tpu.matmul %182, %184, %cst_74 {dimension_numbers = #tpu.dot_dimension_numbers<[1], [0], [0], [1], [0, 0, 1, 1], [], []>} : vector<16x4xf32>, vector<4x128xf32>, vector<16x128xf32> -> vector<16x128xf32>
    %cst_75 = arith.constant dense<0.000000e+00> : vector<16x128xf32>
    %186 = tpu.matmul %185, %6, %cst_75 {dimension_numbers = #tpu.dot_dimension_numbers<[1], [0], [0], [1], [0, 0, 1, 1], [], []>} : vector<16x128xf32>, vector<128x128xf32>, vector<16x128xf32> -> vector<16x128xf32>
    %187 = arith.mulf %185, %185 : vector<16x128xf32>
    %cst_76 = arith.constant dense<0.000000e+00> : vector<16x128xf32>
    %188 = tpu.matmul %187, %6, %cst_76 {dimension_numbers = #tpu.dot_dimension_numbers<[1], [0], [0], [1], [0, 0, 1, 1], [], []>} : vector<16x128xf32>, vector<128x128xf32>, vector<16x128xf32> -> vector<16x128xf32>
    %189 = arith.mulf %186, %186 : vector<16x128xf32>
    %190 = arith.subf %188, %189 : vector<16x128xf32>
    %cst_77 = arith.constant 0.000000e+00 : f32
    %191 = vector.broadcast %cst_77 : f32 to vector<16x128xf32>
    %192 = arith.maximumf %190, %191 : vector<16x128xf32>
    %193 = arith.subf %185, %186 : vector<16x128xf32>
    %cst_78 = arith.constant 9.99999974E-6 : f32
    %194 = vector.broadcast %cst_78 : f32 to vector<16x128xf32>
    %195 = arith.addf %192, %194 : vector<16x128xf32>
    %196 = math.rsqrt %195 : vector<16x128xf32>
    %197 = arith.mulf %193, %196 : vector<16x128xf32>
    %198 = vector.broadcast %12 : vector<1x128xf32> to vector<16x128xf32>
    %199 = arith.mulf %197, %198 : vector<16x128xf32>
    %200 = vector.broadcast %13 : vector<1x128xf32> to vector<16x128xf32>
    %201 = arith.addf %199, %200 : vector<16x128xf32>
    %202 = vector.broadcast %17 : vector<1x128xf32> to vector<16x128xf32>
    %203 = arith.mulf %38, %202 : vector<16x128xf32>
    %204 = arith.addf %201, %203 : vector<16x128xf32>
    %c0_79 = arith.constant 0 : index
    %c0_80 = arith.constant 0 : index
    %205 = vector.load %arg7[%c0_79, %c0_80] : memref<32x16xf32, #tpu.memory_space<vmem>>, vector<32x16xf32>
    %cst_81 = arith.constant dense<0.000000e+00> : vector<32x128xf32>
    %206 = tpu.matmul %205, %204, %cst_81 {dimension_numbers = #tpu.dot_dimension_numbers<[1], [0], [0], [1], [0, 0, 1, 1], [], []>} : vector<32x16xf32>, vector<16x128xf32>, vector<32x128xf32> -> vector<32x128xf32>
    %cst_82 = arith.constant dense<0.000000e+00> : vector<32x128xf32>
    %207 = tpu.matmul %206, %6, %cst_82 {dimension_numbers = #tpu.dot_dimension_numbers<[1], [0], [0], [1], [0, 0, 1, 1], [], []>} : vector<32x128xf32>, vector<128x128xf32>, vector<32x128xf32> -> vector<32x128xf32>
    %208 = arith.mulf %206, %206 : vector<32x128xf32>
    %cst_83 = arith.constant dense<0.000000e+00> : vector<32x128xf32>
    %209 = tpu.matmul %208, %6, %cst_83 {dimension_numbers = #tpu.dot_dimension_numbers<[1], [0], [0], [1], [0, 0, 1, 1], [], []>} : vector<32x128xf32>, vector<128x128xf32>, vector<32x128xf32> -> vector<32x128xf32>
    %210 = arith.mulf %207, %207 : vector<32x128xf32>
    %211 = arith.subf %209, %210 : vector<32x128xf32>
    %cst_84 = arith.constant 0.000000e+00 : f32
    %212 = vector.broadcast %cst_84 : f32 to vector<32x128xf32>
    %213 = arith.maximumf %211, %212 : vector<32x128xf32>
    %214 = arith.subf %206, %207 : vector<32x128xf32>
    %cst_85 = arith.constant 9.99999974E-6 : f32
    %215 = vector.broadcast %cst_85 : f32 to vector<32x128xf32>
    %216 = arith.addf %213, %215 : vector<32x128xf32>
    %217 = math.rsqrt %216 : vector<32x128xf32>
    %218 = arith.mulf %214, %217 : vector<32x128xf32>
    %219 = vector.broadcast %14 : vector<1x128xf32> to vector<32x128xf32>
    %220 = arith.mulf %218, %219 : vector<32x128xf32>
    %221 = vector.broadcast %15 : vector<1x128xf32> to vector<32x128xf32>
    %222 = arith.addf %220, %221 : vector<32x128xf32>
    %cst_86 = arith.constant 0.000000e+00 : f32
    %223 = vector.broadcast %cst_86 : f32 to vector<32x128xf32>
    %224 = arith.addf %222, %223 : vector<32x128xf32>
    %225 = arith.addf %223, %224 : vector<32x128xf32>
    %c1_87 = arith.constant 1 : index
    %c0_88 = arith.constant 0 : index
    %c0_89 = arith.constant 0 : index
    %226 = vector.load %arg9[%c1_87, %c0_88, %c0_89] : memref<3x11x128xf32, #tpu.memory_space<vmem>>, vector<1x11x128xf32>
    %227 = vector.shape_cast %226 : vector<1x11x128xf32> to vector<11x128xf32>
    %c1_90 = arith.constant 1 : index
    %c0_91 = arith.constant 0 : index
    %c0_92 = arith.constant 0 : index
    %228 = vector.load %arg4[%c1_90, %c0_91, %c0_92] : memref<3x128x128xf32, #tpu.memory_space<vmem>>, vector<1x128x128xf32>
    %229 = vector.shape_cast %228 : vector<1x128x128xf32> to vector<128x128xf32>
    %230 = vector.extract_strided_slice %227 {offsets = [0, 0], sizes = [1, 128], strides = [1, 1]} : vector<11x128xf32> to vector<1x128xf32>
    %231 = vector.extract_strided_slice %227 {offsets = [1, 0], sizes = [1, 128], strides = [1, 1]} : vector<11x128xf32> to vector<1x128xf32>
    %232 = vector.extract_strided_slice %227 {offsets = [2, 0], sizes = [1, 128], strides = [1, 1]} : vector<11x128xf32> to vector<1x128xf32>
    %233 = vector.extract_strided_slice %227 {offsets = [3, 0], sizes = [1, 4], strides = [1, 1]} : vector<11x128xf32> to vector<1x4xf32>
    %234 = vector.extract_strided_slice %227 {offsets = [4, 0], sizes = [1, 4], strides = [1, 1]} : vector<11x128xf32> to vector<1x4xf32>
    %235 = vector.extract_strided_slice %227 {offsets = [5, 0], sizes = [1, 128], strides = [1, 1]} : vector<11x128xf32> to vector<1x128xf32>
    %236 = vector.extract_strided_slice %227 {offsets = [6, 0], sizes = [1, 128], strides = [1, 1]} : vector<11x128xf32> to vector<1x128xf32>
    %237 = vector.extract_strided_slice %227 {offsets = [7, 0], sizes = [1, 128], strides = [1, 1]} : vector<11x128xf32> to vector<1x128xf32>
    %238 = vector.extract_strided_slice %227 {offsets = [8, 0], sizes = [1, 128], strides = [1, 1]} : vector<11x128xf32> to vector<1x128xf32>
    %239 = vector.extract_strided_slice %227 {offsets = [9, 0], sizes = [1, 4], strides = [1, 1]} : vector<11x128xf32> to vector<1x4xf32>
    %240 = vector.extract_strided_slice %227 {offsets = [10, 0], sizes = [1, 128], strides = [1, 1]} : vector<11x128xf32> to vector<1x128xf32>
    %c1_93 = arith.constant 1 : index
    %c0_94 = arith.constant 0 : index
    %c0_95 = arith.constant 0 : index
    %241 = vector.load %arg1[%c1_93, %c0_94, %c0_95] : memref<3x128x128xf32, #tpu.memory_space<vmem>>, vector<1x128x128xf32>
    %242 = vector.shape_cast %241 : vector<1x128x128xf32> to vector<128x128xf32>
    %cst_96 = arith.constant dense<0.000000e+00> : vector<32x128xf32>
    %243 = tpu.matmul %224, %242, %cst_96 {dimension_numbers = #tpu.dot_dimension_numbers<[1], [0], [0], [1], [0, 0, 1, 1], [], []>} : vector<32x128xf32>, vector<128x128xf32>, vector<32x128xf32> -> vector<32x128xf32>
    %244 = vector.broadcast %230 : vector<1x128xf32> to vector<32x128xf32>
    %245 = arith.addf %243, %244 : vector<32x128xf32>
    %cst_97 = arith.constant dense<0.000000e+00> : vector<32x128xf32>
    %246 = tpu.matmul %245, %0, %cst_97 {dimension_numbers = #tpu.dot_dimension_numbers<[1], [0], [0], [1], [0, 0, 1, 1], [], []>} : vector<32x128xf32>, vector<128x128xf32>, vector<32x128xf32> -> vector<32x128xf32>
    %247 = arith.mulf %245, %245 : vector<32x128xf32>
    %cst_98 = arith.constant dense<0.000000e+00> : vector<32x128xf32>
    %248 = tpu.matmul %247, %0, %cst_98 {dimension_numbers = #tpu.dot_dimension_numbers<[1], [0], [0], [1], [0, 0, 1, 1], [], []>} : vector<32x128xf32>, vector<128x128xf32>, vector<32x128xf32> -> vector<32x128xf32>
    %249 = arith.mulf %246, %246 : vector<32x128xf32>
    %250 = arith.subf %248, %249 : vector<32x128xf32>
    %cst_99 = arith.constant 0.000000e+00 : f32
    %251 = vector.broadcast %cst_99 : f32 to vector<32x128xf32>
    %252 = arith.maximumf %250, %251 : vector<32x128xf32>
    %253 = arith.subf %245, %246 : vector<32x128xf32>
    %cst_100 = arith.constant 9.99999974E-6 : f32
    %254 = vector.broadcast %cst_100 : f32 to vector<32x128xf32>
    %255 = arith.addf %252, %254 : vector<32x128xf32>
    %256 = math.rsqrt %255 : vector<32x128xf32>
    %257 = arith.mulf %253, %256 : vector<32x128xf32>
    %258 = vector.broadcast %231 : vector<1x128xf32> to vector<32x128xf32>
    %259 = arith.mulf %257, %258 : vector<32x128xf32>
    %260 = vector.broadcast %232 : vector<1x128xf32> to vector<32x128xf32>
    %261 = arith.addf %259, %260 : vector<32x128xf32>
    %c1_101 = arith.constant 1 : index
    %c0_102 = arith.constant 0 : index
    %c0_103 = arith.constant 0 : index
    %c0_104 = arith.constant 0 : index
    %262 = vector.load %arg10[%c1_101, %c0_102, %c0_103, %c0_104] : memref<3x3x5x128xf32, #tpu.memory_space<vmem>>, vector<1x1x5x128xf32>
    %263 = vector.shape_cast %262 : vector<1x1x5x128xf32> to vector<5x128xf32>
    %264 = vector.extract_strided_slice %263 {offsets = [0, 0], sizes = [1, 128], strides = [1, 1]} : vector<5x128xf32> to vector<1x128xf32>
    %265 = vector.extract_strided_slice %263 {offsets = [1, 0], sizes = [1, 128], strides = [1, 1]} : vector<5x128xf32> to vector<1x128xf32>
    %266 = vector.extract_strided_slice %263 {offsets = [2, 0], sizes = [1, 128], strides = [1, 1]} : vector<5x128xf32> to vector<1x128xf32>
    %267 = vector.extract_strided_slice %263 {offsets = [3, 0], sizes = [1, 128], strides = [1, 1]} : vector<5x128xf32> to vector<1x128xf32>
    %268 = vector.extract_strided_slice %263 {offsets = [4, 0], sizes = [1, 128], strides = [1, 1]} : vector<5x128xf32> to vector<1x128xf32>
    %c1_105 = arith.constant 1 : index
    %c0_106 = arith.constant 0 : index
    %c0_107 = arith.constant 0 : index
    %c0_108 = arith.constant 0 : index
    %269 = vector.load %arg2[%c1_105, %c0_106, %c0_107, %c0_108] : memref<3x3x128x128xf32, #tpu.memory_space<vmem>>, vector<1x1x128x128xf32>
    %270 = vector.shape_cast %269 : vector<1x1x128x128xf32> to vector<128x128xf32>
    %cst_109 = arith.constant dense<0.000000e+00> : vector<32x128xf32>
    %271 = tpu.matmul %261, %270, %cst_109 {dimension_numbers = #tpu.dot_dimension_numbers<[1], [0], [0], [1], [0, 0, 1, 1], [], []>} : vector<32x128xf32>, vector<128x128xf32>, vector<32x128xf32> -> vector<32x128xf32>
    %272 = vector.broadcast %264 : vector<1x128xf32> to vector<32x128xf32>
    %273 = arith.addf %271, %272 : vector<32x128xf32>
    %cst_110 = arith.constant 0.000000e+00 : f32
    %274 = vector.broadcast %cst_110 : f32 to vector<1x128xf32>
    %275 = arith.cmpf ogt, %267, %274 : vector<1x128xf32>
    %276 = math.exp %273 : vector<32x128xf32>
    %277 = vector.shape_cast %275 : vector<1x128xi1> to vector<1x128xi1>
    %278 = vector.broadcast %277 : vector<1x128xi1> to vector<32x128xi1>
    %279 = arith.select %278, %276, %273 : vector<32x128xi1>, vector<32x128xf32>
    %cst_111 = arith.constant dense<0.000000e+00> : vector<32x128xf32>
    %280 = tpu.matmul %279, %0, %cst_111 {dimension_numbers = #tpu.dot_dimension_numbers<[1], [0], [0], [1], [0, 0, 1, 1], [], []>} : vector<32x128xf32>, vector<128x128xf32>, vector<32x128xf32> -> vector<32x128xf32>
    %281 = arith.mulf %279, %279 : vector<32x128xf32>
    %cst_112 = arith.constant dense<0.000000e+00> : vector<32x128xf32>
    %282 = tpu.matmul %281, %0, %cst_112 {dimension_numbers = #tpu.dot_dimension_numbers<[1], [0], [0], [1], [0, 0, 1, 1], [], []>} : vector<32x128xf32>, vector<128x128xf32>, vector<32x128xf32> -> vector<32x128xf32>
    %283 = arith.mulf %280, %280 : vector<32x128xf32>
    %284 = arith.subf %282, %283 : vector<32x128xf32>
    %cst_113 = arith.constant 0.000000e+00 : f32
    %285 = vector.broadcast %cst_113 : f32 to vector<32x128xf32>
    %286 = arith.maximumf %284, %285 : vector<32x128xf32>
    %287 = arith.subf %279, %280 : vector<32x128xf32>
    %cst_114 = arith.constant 9.99999974E-6 : f32
    %288 = vector.broadcast %cst_114 : f32 to vector<32x128xf32>
    %289 = arith.addf %286, %288 : vector<32x128xf32>
    %290 = math.rsqrt %289 : vector<32x128xf32>
    %291 = arith.mulf %287, %290 : vector<32x128xf32>
    %292 = vector.broadcast %265 : vector<1x128xf32> to vector<32x128xf32>
    %293 = arith.mulf %291, %292 : vector<32x128xf32>
    %294 = vector.broadcast %266 : vector<1x128xf32> to vector<32x128xf32>
    %295 = arith.addf %293, %294 : vector<32x128xf32>
    %cst_115 = arith.constant 0.000000e+00 : f32
    %296 = vector.broadcast %cst_115 : f32 to vector<1x128xf32>
    %297 = arith.cmpf ogt, %268, %296 : vector<1x128xf32>
    %cst_116 = arith.constant 0.000000e+00 : f32
    %298 = vector.broadcast %cst_116 : f32 to vector<32x128xf32>
    %299 = arith.maximumf %273, %298 : vector<32x128xf32>
    %300 = vector.shape_cast %297 : vector<1x128xi1> to vector<1x128xi1>
    %301 = vector.broadcast %300 : vector<1x128xi1> to vector<32x128xi1>
    %302 = arith.select %301, %299, %295 : vector<32x128xi1>, vector<32x128xf32>
    %c1_117 = arith.constant 1 : index
    %c1_118 = arith.constant 1 : index
    %c0_119 = arith.constant 0 : index
    %c0_120 = arith.constant 0 : index
    %303 = vector.load %arg10[%c1_117, %c1_118, %c0_119, %c0_120] : memref<3x3x5x128xf32, #tpu.memory_space<vmem>>, vector<1x1x5x128xf32>
    %304 = vector.shape_cast %303 : vector<1x1x5x128xf32> to vector<5x128xf32>
    %305 = vector.extract_strided_slice %304 {offsets = [0, 0], sizes = [1, 128], strides = [1, 1]} : vector<5x128xf32> to vector<1x128xf32>
    %306 = vector.extract_strided_slice %304 {offsets = [1, 0], sizes = [1, 128], strides = [1, 1]} : vector<5x128xf32> to vector<1x128xf32>
    %307 = vector.extract_strided_slice %304 {offsets = [2, 0], sizes = [1, 128], strides = [1, 1]} : vector<5x128xf32> to vector<1x128xf32>
    %308 = vector.extract_strided_slice %304 {offsets = [3, 0], sizes = [1, 128], strides = [1, 1]} : vector<5x128xf32> to vector<1x128xf32>
    %309 = vector.extract_strided_slice %304 {offsets = [4, 0], sizes = [1, 128], strides = [1, 1]} : vector<5x128xf32> to vector<1x128xf32>
    %c1_121 = arith.constant 1 : index
    %c1_122 = arith.constant 1 : index
    %c0_123 = arith.constant 0 : index
    %c0_124 = arith.constant 0 : index
    %310 = vector.load %arg2[%c1_121, %c1_122, %c0_123, %c0_124] : memref<3x3x128x128xf32, #tpu.memory_space<vmem>>, vector<1x1x128x128xf32>
    %311 = vector.shape_cast %310 : vector<1x1x128x128xf32> to vector<128x128xf32>
    %cst_125 = arith.constant dense<0.000000e+00> : vector<32x128xf32>
    %312 = tpu.matmul %302, %311, %cst_125 {dimension_numbers = #tpu.dot_dimension_numbers<[1], [0], [0], [1], [0, 0, 1, 1], [], []>} : vector<32x128xf32>, vector<128x128xf32>, vector<32x128xf32> -> vector<32x128xf32>
    %313 = vector.broadcast %305 : vector<1x128xf32> to vector<32x128xf32>
    %314 = arith.addf %312, %313 : vector<32x128xf32>
    %cst_126 = arith.constant 0.000000e+00 : f32
    %315 = vector.broadcast %cst_126 : f32 to vector<1x128xf32>
    %316 = arith.cmpf ogt, %308, %315 : vector<1x128xf32>
    %317 = math.exp %314 : vector<32x128xf32>
    %318 = vector.shape_cast %316 : vector<1x128xi1> to vector<1x128xi1>
    %319 = vector.broadcast %318 : vector<1x128xi1> to vector<32x128xi1>
    %320 = arith.select %319, %317, %314 : vector<32x128xi1>, vector<32x128xf32>
    %cst_127 = arith.constant dense<0.000000e+00> : vector<32x128xf32>
    %321 = tpu.matmul %320, %0, %cst_127 {dimension_numbers = #tpu.dot_dimension_numbers<[1], [0], [0], [1], [0, 0, 1, 1], [], []>} : vector<32x128xf32>, vector<128x128xf32>, vector<32x128xf32> -> vector<32x128xf32>
    %322 = arith.mulf %320, %320 : vector<32x128xf32>
    %cst_128 = arith.constant dense<0.000000e+00> : vector<32x128xf32>
    %323 = tpu.matmul %322, %0, %cst_128 {dimension_numbers = #tpu.dot_dimension_numbers<[1], [0], [0], [1], [0, 0, 1, 1], [], []>} : vector<32x128xf32>, vector<128x128xf32>, vector<32x128xf32> -> vector<32x128xf32>
    %324 = arith.mulf %321, %321 : vector<32x128xf32>
    %325 = arith.subf %323, %324 : vector<32x128xf32>
    %cst_129 = arith.constant 0.000000e+00 : f32
    %326 = vector.broadcast %cst_129 : f32 to vector<32x128xf32>
    %327 = arith.maximumf %325, %326 : vector<32x128xf32>
    %328 = arith.subf %320, %321 : vector<32x128xf32>
    %cst_130 = arith.constant 9.99999974E-6 : f32
    %329 = vector.broadcast %cst_130 : f32 to vector<32x128xf32>
    %330 = arith.addf %327, %329 : vector<32x128xf32>
    %331 = math.rsqrt %330 : vector<32x128xf32>
    %332 = arith.mulf %328, %331 : vector<32x128xf32>
    %333 = vector.broadcast %306 : vector<1x128xf32> to vector<32x128xf32>
    %334 = arith.mulf %332, %333 : vector<32x128xf32>
    %335 = vector.broadcast %307 : vector<1x128xf32> to vector<32x128xf32>
    %336 = arith.addf %334, %335 : vector<32x128xf32>
    %cst_131 = arith.constant 0.000000e+00 : f32
    %337 = vector.broadcast %cst_131 : f32 to vector<1x128xf32>
    %338 = arith.cmpf ogt, %309, %337 : vector<1x128xf32>
    %cst_132 = arith.constant 0.000000e+00 : f32
    %339 = vector.broadcast %cst_132 : f32 to vector<32x128xf32>
    %340 = arith.maximumf %314, %339 : vector<32x128xf32>
    %341 = vector.shape_cast %338 : vector<1x128xi1> to vector<1x128xi1>
    %342 = vector.broadcast %341 : vector<1x128xi1> to vector<32x128xi1>
    %343 = arith.select %342, %340, %336 : vector<32x128xi1>, vector<32x128xf32>
    %c1_133 = arith.constant 1 : index
    %c2_134 = arith.constant 2 : index
    %c0_135 = arith.constant 0 : index
    %c0_136 = arith.constant 0 : index
    %344 = vector.load %arg10[%c1_133, %c2_134, %c0_135, %c0_136] : memref<3x3x5x128xf32, #tpu.memory_space<vmem>>, vector<1x1x5x128xf32>
    %345 = vector.shape_cast %344 : vector<1x1x5x128xf32> to vector<5x128xf32>
    %346 = vector.extract_strided_slice %345 {offsets = [0, 0], sizes = [1, 128], strides = [1, 1]} : vector<5x128xf32> to vector<1x128xf32>
    %347 = vector.extract_strided_slice %345 {offsets = [1, 0], sizes = [1, 128], strides = [1, 1]} : vector<5x128xf32> to vector<1x128xf32>
    %348 = vector.extract_strided_slice %345 {offsets = [2, 0], sizes = [1, 128], strides = [1, 1]} : vector<5x128xf32> to vector<1x128xf32>
    %349 = vector.extract_strided_slice %345 {offsets = [3, 0], sizes = [1, 128], strides = [1, 1]} : vector<5x128xf32> to vector<1x128xf32>
    %350 = vector.extract_strided_slice %345 {offsets = [4, 0], sizes = [1, 128], strides = [1, 1]} : vector<5x128xf32> to vector<1x128xf32>
    %c1_137 = arith.constant 1 : index
    %c2_138 = arith.constant 2 : index
    %c0_139 = arith.constant 0 : index
    %c0_140 = arith.constant 0 : index
    %351 = vector.load %arg2[%c1_137, %c2_138, %c0_139, %c0_140] : memref<3x3x128x128xf32, #tpu.memory_space<vmem>>, vector<1x1x128x128xf32>
    %352 = vector.shape_cast %351 : vector<1x1x128x128xf32> to vector<128x128xf32>
    %cst_141 = arith.constant dense<0.000000e+00> : vector<32x128xf32>
    %353 = tpu.matmul %343, %352, %cst_141 {dimension_numbers = #tpu.dot_dimension_numbers<[1], [0], [0], [1], [0, 0, 1, 1], [], []>} : vector<32x128xf32>, vector<128x128xf32>, vector<32x128xf32> -> vector<32x128xf32>
    %354 = vector.broadcast %346 : vector<1x128xf32> to vector<32x128xf32>
    %355 = arith.addf %353, %354 : vector<32x128xf32>
    %cst_142 = arith.constant 0.000000e+00 : f32
    %356 = vector.broadcast %cst_142 : f32 to vector<1x128xf32>
    %357 = arith.cmpf ogt, %349, %356 : vector<1x128xf32>
    %358 = math.exp %355 : vector<32x128xf32>
    %359 = vector.shape_cast %357 : vector<1x128xi1> to vector<1x128xi1>
    %360 = vector.broadcast %359 : vector<1x128xi1> to vector<32x128xi1>
    %361 = arith.select %360, %358, %355 : vector<32x128xi1>, vector<32x128xf32>
    %cst_143 = arith.constant dense<0.000000e+00> : vector<32x128xf32>
    %362 = tpu.matmul %361, %0, %cst_143 {dimension_numbers = #tpu.dot_dimension_numbers<[1], [0], [0], [1], [0, 0, 1, 1], [], []>} : vector<32x128xf32>, vector<128x128xf32>, vector<32x128xf32> -> vector<32x128xf32>
    %363 = arith.mulf %361, %361 : vector<32x128xf32>
    %cst_144 = arith.constant dense<0.000000e+00> : vector<32x128xf32>
    %364 = tpu.matmul %363, %0, %cst_144 {dimension_numbers = #tpu.dot_dimension_numbers<[1], [0], [0], [1], [0, 0, 1, 1], [], []>} : vector<32x128xf32>, vector<128x128xf32>, vector<32x128xf32> -> vector<32x128xf32>
    %365 = arith.mulf %362, %362 : vector<32x128xf32>
    %366 = arith.subf %364, %365 : vector<32x128xf32>
    %cst_145 = arith.constant 0.000000e+00 : f32
    %367 = vector.broadcast %cst_145 : f32 to vector<32x128xf32>
    %368 = arith.maximumf %366, %367 : vector<32x128xf32>
    %369 = arith.subf %361, %362 : vector<32x128xf32>
    %cst_146 = arith.constant 9.99999974E-6 : f32
    %370 = vector.broadcast %cst_146 : f32 to vector<32x128xf32>
    %371 = arith.addf %368, %370 : vector<32x128xf32>
    %372 = math.rsqrt %371 : vector<32x128xf32>
    %373 = arith.mulf %369, %372 : vector<32x128xf32>
    %374 = vector.broadcast %347 : vector<1x128xf32> to vector<32x128xf32>
    %375 = arith.mulf %373, %374 : vector<32x128xf32>
    %376 = vector.broadcast %348 : vector<1x128xf32> to vector<32x128xf32>
    %377 = arith.addf %375, %376 : vector<32x128xf32>
    %cst_147 = arith.constant 0.000000e+00 : f32
    %378 = vector.broadcast %cst_147 : f32 to vector<1x128xf32>
    %379 = arith.cmpf ogt, %350, %378 : vector<1x128xf32>
    %cst_148 = arith.constant 0.000000e+00 : f32
    %380 = vector.broadcast %cst_148 : f32 to vector<32x128xf32>
    %381 = arith.maximumf %355, %380 : vector<32x128xf32>
    %382 = vector.shape_cast %379 : vector<1x128xi1> to vector<1x128xi1>
    %383 = vector.broadcast %382 : vector<1x128xi1> to vector<32x128xi1>
    %384 = arith.select %383, %381, %377 : vector<32x128xi1>, vector<32x128xf32>
    %c1_149 = arith.constant 1 : index
    %c0_150 = arith.constant 0 : index
    %c0_151 = arith.constant 0 : index
    %385 = vector.load %arg5[%c1_149, %c0_150, %c0_151] : memref<3x128x4xf32, #tpu.memory_space<vmem>>, vector<1x128x4xf32>
    %386 = vector.shape_cast %385 : vector<1x128x4xf32> to vector<128x4xf32>
    %cst_152 = arith.constant dense<0.000000e+00> : vector<32x4xf32>
    %387 = tpu.matmul %384, %386, %cst_152 {dimension_numbers = #tpu.dot_dimension_numbers<[1], [0], [0], [1], [0, 0, 1, 1], [], []>} : vector<32x128xf32>, vector<128x4xf32>, vector<32x4xf32> -> vector<32x4xf32>
    %388 = vector.broadcast %239 : vector<1x4xf32> to vector<32x4xf32>
    %389 = arith.addf %387, %388 : vector<32x4xf32>
    %cst_153 = arith.constant dense<0.000000e+00> : vector<32x4xf32>
    %390 = tpu.matmul %389, %1, %cst_153 {dimension_numbers = #tpu.dot_dimension_numbers<[1], [0], [0], [1], [0, 0, 1, 1], [], []>} : vector<32x4xf32>, vector<4x4xf32>, vector<32x4xf32> -> vector<32x4xf32>
    %391 = arith.mulf %389, %389 : vector<32x4xf32>
    %cst_154 = arith.constant dense<0.000000e+00> : vector<32x4xf32>
    %392 = tpu.matmul %391, %1, %cst_154 {dimension_numbers = #tpu.dot_dimension_numbers<[1], [0], [0], [1], [0, 0, 1, 1], [], []>} : vector<32x4xf32>, vector<4x4xf32>, vector<32x4xf32> -> vector<32x4xf32>
    %393 = arith.mulf %390, %390 : vector<32x4xf32>
    %394 = arith.subf %392, %393 : vector<32x4xf32>
    %cst_155 = arith.constant 0.000000e+00 : f32
    %395 = vector.broadcast %cst_155 : f32 to vector<32x4xf32>
    %396 = arith.maximumf %394, %395 : vector<32x4xf32>
    %397 = arith.subf %389, %390 : vector<32x4xf32>
    %cst_156 = arith.constant 9.99999974E-6 : f32
    %398 = vector.broadcast %cst_156 : f32 to vector<32x4xf32>
    %399 = arith.addf %396, %398 : vector<32x4xf32>
    %400 = math.rsqrt %399 : vector<32x4xf32>
    %401 = arith.mulf %397, %400 : vector<32x4xf32>
    %402 = vector.broadcast %233 : vector<1x4xf32> to vector<32x4xf32>
    %403 = arith.mulf %401, %402 : vector<32x4xf32>
    %404 = vector.broadcast %234 : vector<1x4xf32> to vector<32x4xf32>
    %405 = arith.addf %403, %404 : vector<32x4xf32>
    %c1_157 = arith.constant 1 : index
    %c0_158 = arith.constant 0 : index
    %c0_159 = arith.constant 0 : index
    %406 = vector.load %arg6[%c1_157, %c0_158, %c0_159] : memref<3x4x128xf32, #tpu.memory_space<vmem>>, vector<1x4x128xf32>
    %407 = vector.shape_cast %406 : vector<1x4x128xf32> to vector<4x128xf32>
    %cst_160 = arith.constant dense<0.000000e+00> : vector<32x128xf32>
    %408 = tpu.matmul %405, %407, %cst_160 {dimension_numbers = #tpu.dot_dimension_numbers<[1], [0], [0], [1], [0, 0, 1, 1], [], []>} : vector<32x4xf32>, vector<4x128xf32>, vector<32x128xf32> -> vector<32x128xf32>
    %cst_161 = arith.constant dense<0.000000e+00> : vector<32x128xf32>
    %409 = tpu.matmul %408, %229, %cst_161 {dimension_numbers = #tpu.dot_dimension_numbers<[1], [0], [0], [1], [0, 0, 1, 1], [], []>} : vector<32x128xf32>, vector<128x128xf32>, vector<32x128xf32> -> vector<32x128xf32>
    %410 = arith.mulf %408, %408 : vector<32x128xf32>
    %cst_162 = arith.constant dense<0.000000e+00> : vector<32x128xf32>
    %411 = tpu.matmul %410, %229, %cst_162 {dimension_numbers = #tpu.dot_dimension_numbers<[1], [0], [0], [1], [0, 0, 1, 1], [], []>} : vector<32x128xf32>, vector<128x128xf32>, vector<32x128xf32> -> vector<32x128xf32>
    %412 = arith.mulf %409, %409 : vector<32x128xf32>
    %413 = arith.subf %411, %412 : vector<32x128xf32>
    %cst_163 = arith.constant 0.000000e+00 : f32
    %414 = vector.broadcast %cst_163 : f32 to vector<32x128xf32>
    %415 = arith.maximumf %413, %414 : vector<32x128xf32>
    %416 = arith.subf %408, %409 : vector<32x128xf32>
    %cst_164 = arith.constant 9.99999974E-6 : f32
    %417 = vector.broadcast %cst_164 : f32 to vector<32x128xf32>
    %418 = arith.addf %415, %417 : vector<32x128xf32>
    %419 = math.rsqrt %418 : vector<32x128xf32>
    %420 = arith.mulf %416, %419 : vector<32x128xf32>
    %421 = vector.broadcast %235 : vector<1x128xf32> to vector<32x128xf32>
    %422 = arith.mulf %420, %421 : vector<32x128xf32>
    %423 = vector.broadcast %236 : vector<1x128xf32> to vector<32x128xf32>
    %424 = arith.addf %422, %423 : vector<32x128xf32>
    %425 = vector.broadcast %240 : vector<1x128xf32> to vector<32x128xf32>
    %426 = arith.mulf %261, %425 : vector<32x128xf32>
    %427 = arith.addf %424, %426 : vector<32x128xf32>
    %c0_165 = arith.constant 0 : index
    %c0_166 = arith.constant 0 : index
    %c0_167 = arith.constant 0 : index
    %428 = vector.load %arg8[%c0_165, %c0_166, %c0_167] : memref<2x32x32xf32, #tpu.memory_space<vmem>>, vector<1x32x32xf32>
    %429 = vector.shape_cast %428 : vector<1x32x32xf32> to vector<32x32xf32>
    %cst_168 = arith.constant dense<0.000000e+00> : vector<32x128xf32>
    %430 = tpu.matmul %429, %427, %cst_168 {dimension_numbers = #tpu.dot_dimension_numbers<[1], [0], [0], [1], [0, 0, 1, 1], [], []>} : vector<32x32xf32>, vector<32x128xf32>, vector<32x128xf32> -> vector<32x128xf32>
    %cst_169 = arith.constant dense<0.000000e+00> : vector<32x128xf32>
    %431 = tpu.matmul %430, %229, %cst_169 {dimension_numbers = #tpu.dot_dimension_numbers<[1], [0], [0], [1], [0, 0, 1, 1], [], []>} : vector<32x128xf32>, vector<128x128xf32>, vector<32x128xf32> -> vector<32x128xf32>
    %432 = arith.mulf %430, %430 : vector<32x128xf32>
    %cst_170 = arith.constant dense<0.000000e+00> : vector<32x128xf32>
    %433 = tpu.matmul %432, %229, %cst_170 {dimension_numbers = #tpu.dot_dimension_numbers<[1], [0], [0], [1], [0, 0, 1, 1], [], []>} : vector<32x128xf32>, vector<128x128xf32>, vector<32x128xf32> -> vector<32x128xf32>
    %434 = arith.mulf %431, %431 : vector<32x128xf32>
    %435 = arith.subf %433, %434 : vector<32x128xf32>
    %cst_171 = arith.constant 0.000000e+00 : f32
    %436 = vector.broadcast %cst_171 : f32 to vector<32x128xf32>
    %437 = arith.maximumf %435, %436 : vector<32x128xf32>
    %438 = arith.subf %430, %431 : vector<32x128xf32>
    %cst_172 = arith.constant 9.99999974E-6 : f32
    %439 = vector.broadcast %cst_172 : f32 to vector<32x128xf32>
    %440 = arith.addf %437, %439 : vector<32x128xf32>
    %441 = math.rsqrt %440 : vector<32x128xf32>
    %442 = arith.mulf %438, %441 : vector<32x128xf32>
    %443 = vector.broadcast %237 : vector<1x128xf32> to vector<32x128xf32>
    %444 = arith.mulf %442, %443 : vector<32x128xf32>
    %445 = vector.broadcast %238 : vector<1x128xf32> to vector<32x128xf32>
    %446 = arith.addf %444, %445 : vector<32x128xf32>
    %447 = arith.addf %446, %225 : vector<32x128xf32>
    %c2_173 = arith.constant 2 : index
    %c0_174 = arith.constant 0 : index
    %c0_175 = arith.constant 0 : index
    %448 = vector.load %arg9[%c2_173, %c0_174, %c0_175] : memref<3x11x128xf32, #tpu.memory_space<vmem>>, vector<1x11x128xf32>
    %449 = vector.shape_cast %448 : vector<1x11x128xf32> to vector<11x128xf32>
    %c2_176 = arith.constant 2 : index
    %c0_177 = arith.constant 0 : index
    %c0_178 = arith.constant 0 : index
    %450 = vector.load %arg4[%c2_176, %c0_177, %c0_178] : memref<3x128x128xf32, #tpu.memory_space<vmem>>, vector<1x128x128xf32>
    %451 = vector.shape_cast %450 : vector<1x128x128xf32> to vector<128x128xf32>
    %452 = vector.extract_strided_slice %449 {offsets = [0, 0], sizes = [1, 128], strides = [1, 1]} : vector<11x128xf32> to vector<1x128xf32>
    %453 = vector.extract_strided_slice %449 {offsets = [1, 0], sizes = [1, 128], strides = [1, 1]} : vector<11x128xf32> to vector<1x128xf32>
    %454 = vector.extract_strided_slice %449 {offsets = [2, 0], sizes = [1, 128], strides = [1, 1]} : vector<11x128xf32> to vector<1x128xf32>
    %455 = vector.extract_strided_slice %449 {offsets = [3, 0], sizes = [1, 4], strides = [1, 1]} : vector<11x128xf32> to vector<1x4xf32>
    %456 = vector.extract_strided_slice %449 {offsets = [4, 0], sizes = [1, 4], strides = [1, 1]} : vector<11x128xf32> to vector<1x4xf32>
    %457 = vector.extract_strided_slice %449 {offsets = [5, 0], sizes = [1, 128], strides = [1, 1]} : vector<11x128xf32> to vector<1x128xf32>
    %458 = vector.extract_strided_slice %449 {offsets = [6, 0], sizes = [1, 128], strides = [1, 1]} : vector<11x128xf32> to vector<1x128xf32>
    %459 = vector.extract_strided_slice %449 {offsets = [7, 0], sizes = [1, 128], strides = [1, 1]} : vector<11x128xf32> to vector<1x128xf32>
    %460 = vector.extract_strided_slice %449 {offsets = [8, 0], sizes = [1, 128], strides = [1, 1]} : vector<11x128xf32> to vector<1x128xf32>
    %461 = vector.extract_strided_slice %449 {offsets = [9, 0], sizes = [1, 4], strides = [1, 1]} : vector<11x128xf32> to vector<1x4xf32>
    %462 = vector.extract_strided_slice %449 {offsets = [10, 0], sizes = [1, 128], strides = [1, 1]} : vector<11x128xf32> to vector<1x128xf32>
    %c2_179 = arith.constant 2 : index
    %c0_180 = arith.constant 0 : index
    %c0_181 = arith.constant 0 : index
    %463 = vector.load %arg1[%c2_179, %c0_180, %c0_181] : memref<3x128x128xf32, #tpu.memory_space<vmem>>, vector<1x128x128xf32>
    %464 = vector.shape_cast %463 : vector<1x128x128xf32> to vector<128x128xf32>
    %cst_182 = arith.constant dense<0.000000e+00> : vector<32x128xf32>
    %465 = tpu.matmul %447, %464, %cst_182 {dimension_numbers = #tpu.dot_dimension_numbers<[1], [0], [0], [1], [0, 0, 1, 1], [], []>} : vector<32x128xf32>, vector<128x128xf32>, vector<32x128xf32> -> vector<32x128xf32>
    %466 = vector.broadcast %452 : vector<1x128xf32> to vector<32x128xf32>
    %467 = arith.addf %465, %466 : vector<32x128xf32>
    %cst_183 = arith.constant dense<0.000000e+00> : vector<32x128xf32>
    %468 = tpu.matmul %467, %0, %cst_183 {dimension_numbers = #tpu.dot_dimension_numbers<[1], [0], [0], [1], [0, 0, 1, 1], [], []>} : vector<32x128xf32>, vector<128x128xf32>, vector<32x128xf32> -> vector<32x128xf32>
    %469 = arith.mulf %467, %467 : vector<32x128xf32>
    %cst_184 = arith.constant dense<0.000000e+00> : vector<32x128xf32>
    %470 = tpu.matmul %469, %0, %cst_184 {dimension_numbers = #tpu.dot_dimension_numbers<[1], [0], [0], [1], [0, 0, 1, 1], [], []>} : vector<32x128xf32>, vector<128x128xf32>, vector<32x128xf32> -> vector<32x128xf32>
    %471 = arith.mulf %468, %468 : vector<32x128xf32>
    %472 = arith.subf %470, %471 : vector<32x128xf32>
    %cst_185 = arith.constant 0.000000e+00 : f32
    %473 = vector.broadcast %cst_185 : f32 to vector<32x128xf32>
    %474 = arith.maximumf %472, %473 : vector<32x128xf32>
    %475 = arith.subf %467, %468 : vector<32x128xf32>
    %cst_186 = arith.constant 9.99999974E-6 : f32
    %476 = vector.broadcast %cst_186 : f32 to vector<32x128xf32>
    %477 = arith.addf %474, %476 : vector<32x128xf32>
    %478 = math.rsqrt %477 : vector<32x128xf32>
    %479 = arith.mulf %475, %478 : vector<32x128xf32>
    %480 = vector.broadcast %453 : vector<1x128xf32> to vector<32x128xf32>
    %481 = arith.mulf %479, %480 : vector<32x128xf32>
    %482 = vector.broadcast %454 : vector<1x128xf32> to vector<32x128xf32>
    %483 = arith.addf %481, %482 : vector<32x128xf32>
    %c2_187 = arith.constant 2 : index
    %c0_188 = arith.constant 0 : index
    %c0_189 = arith.constant 0 : index
    %c0_190 = arith.constant 0 : index
    %484 = vector.load %arg10[%c2_187, %c0_188, %c0_189, %c0_190] : memref<3x3x5x128xf32, #tpu.memory_space<vmem>>, vector<1x1x5x128xf32>
    %485 = vector.shape_cast %484 : vector<1x1x5x128xf32> to vector<5x128xf32>
    %486 = vector.extract_strided_slice %485 {offsets = [0, 0], sizes = [1, 128], strides = [1, 1]} : vector<5x128xf32> to vector<1x128xf32>
    %487 = vector.extract_strided_slice %485 {offsets = [1, 0], sizes = [1, 128], strides = [1, 1]} : vector<5x128xf32> to vector<1x128xf32>
    %488 = vector.extract_strided_slice %485 {offsets = [2, 0], sizes = [1, 128], strides = [1, 1]} : vector<5x128xf32> to vector<1x128xf32>
    %489 = vector.extract_strided_slice %485 {offsets = [3, 0], sizes = [1, 128], strides = [1, 1]} : vector<5x128xf32> to vector<1x128xf32>
    %490 = vector.extract_strided_slice %485 {offsets = [4, 0], sizes = [1, 128], strides = [1, 1]} : vector<5x128xf32> to vector<1x128xf32>
    %c2_191 = arith.constant 2 : index
    %c0_192 = arith.constant 0 : index
    %c0_193 = arith.constant 0 : index
    %c0_194 = arith.constant 0 : index
    %491 = vector.load %arg2[%c2_191, %c0_192, %c0_193, %c0_194] : memref<3x3x128x128xf32, #tpu.memory_space<vmem>>, vector<1x1x128x128xf32>
    %492 = vector.shape_cast %491 : vector<1x1x128x128xf32> to vector<128x128xf32>
    %cst_195 = arith.constant dense<0.000000e+00> : vector<32x128xf32>
    %493 = tpu.matmul %483, %492, %cst_195 {dimension_numbers = #tpu.dot_dimension_numbers<[1], [0], [0], [1], [0, 0, 1, 1], [], []>} : vector<32x128xf32>, vector<128x128xf32>, vector<32x128xf32> -> vector<32x128xf32>
    %494 = vector.broadcast %486 : vector<1x128xf32> to vector<32x128xf32>
    %495 = arith.addf %493, %494 : vector<32x128xf32>
    %cst_196 = arith.constant 0.000000e+00 : f32
    %496 = vector.broadcast %cst_196 : f32 to vector<1x128xf32>
    %497 = arith.cmpf ogt, %489, %496 : vector<1x128xf32>
    %498 = math.exp %495 : vector<32x128xf32>
    %499 = vector.shape_cast %497 : vector<1x128xi1> to vector<1x128xi1>
    %500 = vector.broadcast %499 : vector<1x128xi1> to vector<32x128xi1>
    %501 = arith.select %500, %498, %495 : vector<32x128xi1>, vector<32x128xf32>
    %cst_197 = arith.constant dense<0.000000e+00> : vector<32x128xf32>
    %502 = tpu.matmul %501, %0, %cst_197 {dimension_numbers = #tpu.dot_dimension_numbers<[1], [0], [0], [1], [0, 0, 1, 1], [], []>} : vector<32x128xf32>, vector<128x128xf32>, vector<32x128xf32> -> vector<32x128xf32>
    %503 = arith.mulf %501, %501 : vector<32x128xf32>
    %cst_198 = arith.constant dense<0.000000e+00> : vector<32x128xf32>
    %504 = tpu.matmul %503, %0, %cst_198 {dimension_numbers = #tpu.dot_dimension_numbers<[1], [0], [0], [1], [0, 0, 1, 1], [], []>} : vector<32x128xf32>, vector<128x128xf32>, vector<32x128xf32> -> vector<32x128xf32>
    %505 = arith.mulf %502, %502 : vector<32x128xf32>
    %506 = arith.subf %504, %505 : vector<32x128xf32>
    %cst_199 = arith.constant 0.000000e+00 : f32
    %507 = vector.broadcast %cst_199 : f32 to vector<32x128xf32>
    %508 = arith.maximumf %506, %507 : vector<32x128xf32>
    %509 = arith.subf %501, %502 : vector<32x128xf32>
    %cst_200 = arith.constant 9.99999974E-6 : f32
    %510 = vector.broadcast %cst_200 : f32 to vector<32x128xf32>
    %511 = arith.addf %508, %510 : vector<32x128xf32>
    %512 = math.rsqrt %511 : vector<32x128xf32>
    %513 = arith.mulf %509, %512 : vector<32x128xf32>
    %514 = vector.broadcast %487 : vector<1x128xf32> to vector<32x128xf32>
    %515 = arith.mulf %513, %514 : vector<32x128xf32>
    %516 = vector.broadcast %488 : vector<1x128xf32> to vector<32x128xf32>
    %517 = arith.addf %515, %516 : vector<32x128xf32>
    %cst_201 = arith.constant 0.000000e+00 : f32
    %518 = vector.broadcast %cst_201 : f32 to vector<1x128xf32>
    %519 = arith.cmpf ogt, %490, %518 : vector<1x128xf32>
    %cst_202 = arith.constant 0.000000e+00 : f32
    %520 = vector.broadcast %cst_202 : f32 to vector<32x128xf32>
    %521 = arith.maximumf %495, %520 : vector<32x128xf32>
    %522 = vector.shape_cast %519 : vector<1x128xi1> to vector<1x128xi1>
    %523 = vector.broadcast %522 : vector<1x128xi1> to vector<32x128xi1>
    %524 = arith.select %523, %521, %517 : vector<32x128xi1>, vector<32x128xf32>
    %c2_203 = arith.constant 2 : index
    %c1_204 = arith.constant 1 : index
    %c0_205 = arith.constant 0 : index
    %c0_206 = arith.constant 0 : index
    %525 = vector.load %arg10[%c2_203, %c1_204, %c0_205, %c0_206] : memref<3x3x5x128xf32, #tpu.memory_space<vmem>>, vector<1x1x5x128xf32>
    %526 = vector.shape_cast %525 : vector<1x1x5x128xf32> to vector<5x128xf32>
    %527 = vector.extract_strided_slice %526 {offsets = [0, 0], sizes = [1, 128], strides = [1, 1]} : vector<5x128xf32> to vector<1x128xf32>
    %528 = vector.extract_strided_slice %526 {offsets = [1, 0], sizes = [1, 128], strides = [1, 1]} : vector<5x128xf32> to vector<1x128xf32>
    %529 = vector.extract_strided_slice %526 {offsets = [2, 0], sizes = [1, 128], strides = [1, 1]} : vector<5x128xf32> to vector<1x128xf32>
    %530 = vector.extract_strided_slice %526 {offsets = [3, 0], sizes = [1, 128], strides = [1, 1]} : vector<5x128xf32> to vector<1x128xf32>
    %531 = vector.extract_strided_slice %526 {offsets = [4, 0], sizes = [1, 128], strides = [1, 1]} : vector<5x128xf32> to vector<1x128xf32>
    %c2_207 = arith.constant 2 : index
    %c1_208 = arith.constant 1 : index
    %c0_209 = arith.constant 0 : index
    %c0_210 = arith.constant 0 : index
    %532 = vector.load %arg2[%c2_207, %c1_208, %c0_209, %c0_210] : memref<3x3x128x128xf32, #tpu.memory_space<vmem>>, vector<1x1x128x128xf32>
    %533 = vector.shape_cast %532 : vector<1x1x128x128xf32> to vector<128x128xf32>
    %cst_211 = arith.constant dense<0.000000e+00> : vector<32x128xf32>
    %534 = tpu.matmul %524, %533, %cst_211 {dimension_numbers = #tpu.dot_dimension_numbers<[1], [0], [0], [1], [0, 0, 1, 1], [], []>} : vector<32x128xf32>, vector<128x128xf32>, vector<32x128xf32> -> vector<32x128xf32>
    %535 = vector.broadcast %527 : vector<1x128xf32> to vector<32x128xf32>
    %536 = arith.addf %534, %535 : vector<32x128xf32>
    %cst_212 = arith.constant 0.000000e+00 : f32
    %537 = vector.broadcast %cst_212 : f32 to vector<1x128xf32>
    %538 = arith.cmpf ogt, %530, %537 : vector<1x128xf32>
    %539 = math.exp %536 : vector<32x128xf32>
    %540 = vector.shape_cast %538 : vector<1x128xi1> to vector<1x128xi1>
    %541 = vector.broadcast %540 : vector<1x128xi1> to vector<32x128xi1>
    %542 = arith.select %541, %539, %536 : vector<32x128xi1>, vector<32x128xf32>
    %cst_213 = arith.constant dense<0.000000e+00> : vector<32x128xf32>
    %543 = tpu.matmul %542, %0, %cst_213 {dimension_numbers = #tpu.dot_dimension_numbers<[1], [0], [0], [1], [0, 0, 1, 1], [], []>} : vector<32x128xf32>, vector<128x128xf32>, vector<32x128xf32> -> vector<32x128xf32>
    %544 = arith.mulf %542, %542 : vector<32x128xf32>
    %cst_214 = arith.constant dense<0.000000e+00> : vector<32x128xf32>
    %545 = tpu.matmul %544, %0, %cst_214 {dimension_numbers = #tpu.dot_dimension_numbers<[1], [0], [0], [1], [0, 0, 1, 1], [], []>} : vector<32x128xf32>, vector<128x128xf32>, vector<32x128xf32> -> vector<32x128xf32>
    %546 = arith.mulf %543, %543 : vector<32x128xf32>
    %547 = arith.subf %545, %546 : vector<32x128xf32>
    %cst_215 = arith.constant 0.000000e+00 : f32
    %548 = vector.broadcast %cst_215 : f32 to vector<32x128xf32>
    %549 = arith.maximumf %547, %548 : vector<32x128xf32>
    %550 = arith.subf %542, %543 : vector<32x128xf32>
    %cst_216 = arith.constant 9.99999974E-6 : f32
    %551 = vector.broadcast %cst_216 : f32 to vector<32x128xf32>
    %552 = arith.addf %549, %551 : vector<32x128xf32>
    %553 = math.rsqrt %552 : vector<32x128xf32>
    %554 = arith.mulf %550, %553 : vector<32x128xf32>
    %555 = vector.broadcast %528 : vector<1x128xf32> to vector<32x128xf32>
    %556 = arith.mulf %554, %555 : vector<32x128xf32>
    %557 = vector.broadcast %529 : vector<1x128xf32> to vector<32x128xf32>
    %558 = arith.addf %556, %557 : vector<32x128xf32>
    %cst_217 = arith.constant 0.000000e+00 : f32
    %559 = vector.broadcast %cst_217 : f32 to vector<1x128xf32>
    %560 = arith.cmpf ogt, %531, %559 : vector<1x128xf32>
    %cst_218 = arith.constant 0.000000e+00 : f32
    %561 = vector.broadcast %cst_218 : f32 to vector<32x128xf32>
    %562 = arith.maximumf %536, %561 : vector<32x128xf32>
    %563 = vector.shape_cast %560 : vector<1x128xi1> to vector<1x128xi1>
    %564 = vector.broadcast %563 : vector<1x128xi1> to vector<32x128xi1>
    %565 = arith.select %564, %562, %558 : vector<32x128xi1>, vector<32x128xf32>
    %c2_219 = arith.constant 2 : index
    %c2_220 = arith.constant 2 : index
    %c0_221 = arith.constant 0 : index
    %c0_222 = arith.constant 0 : index
    %566 = vector.load %arg10[%c2_219, %c2_220, %c0_221, %c0_222] : memref<3x3x5x128xf32, #tpu.memory_space<vmem>>, vector<1x1x5x128xf32>
    %567 = vector.shape_cast %566 : vector<1x1x5x128xf32> to vector<5x128xf32>
    %568 = vector.extract_strided_slice %567 {offsets = [0, 0], sizes = [1, 128], strides = [1, 1]} : vector<5x128xf32> to vector<1x128xf32>
    %569 = vector.extract_strided_slice %567 {offsets = [1, 0], sizes = [1, 128], strides = [1, 1]} : vector<5x128xf32> to vector<1x128xf32>
    %570 = vector.extract_strided_slice %567 {offsets = [2, 0], sizes = [1, 128], strides = [1, 1]} : vector<5x128xf32> to vector<1x128xf32>
    %571 = vector.extract_strided_slice %567 {offsets = [3, 0], sizes = [1, 128], strides = [1, 1]} : vector<5x128xf32> to vector<1x128xf32>
    %572 = vector.extract_strided_slice %567 {offsets = [4, 0], sizes = [1, 128], strides = [1, 1]} : vector<5x128xf32> to vector<1x128xf32>
    %c2_223 = arith.constant 2 : index
    %c2_224 = arith.constant 2 : index
    %c0_225 = arith.constant 0 : index
    %c0_226 = arith.constant 0 : index
    %573 = vector.load %arg2[%c2_223, %c2_224, %c0_225, %c0_226] : memref<3x3x128x128xf32, #tpu.memory_space<vmem>>, vector<1x1x128x128xf32>
    %574 = vector.shape_cast %573 : vector<1x1x128x128xf32> to vector<128x128xf32>
    %cst_227 = arith.constant dense<0.000000e+00> : vector<32x128xf32>
    %575 = tpu.matmul %565, %574, %cst_227 {dimension_numbers = #tpu.dot_dimension_numbers<[1], [0], [0], [1], [0, 0, 1, 1], [], []>} : vector<32x128xf32>, vector<128x128xf32>, vector<32x128xf32> -> vector<32x128xf32>
    %576 = vector.broadcast %568 : vector<1x128xf32> to vector<32x128xf32>
    %577 = arith.addf %575, %576 : vector<32x128xf32>
    %cst_228 = arith.constant 0.000000e+00 : f32
    %578 = vector.broadcast %cst_228 : f32 to vector<1x128xf32>
    %579 = arith.cmpf ogt, %571, %578 : vector<1x128xf32>
    %580 = math.exp %577 : vector<32x128xf32>
    %581 = vector.shape_cast %579 : vector<1x128xi1> to vector<1x128xi1>
    %582 = vector.broadcast %581 : vector<1x128xi1> to vector<32x128xi1>
    %583 = arith.select %582, %580, %577 : vector<32x128xi1>, vector<32x128xf32>
    %cst_229 = arith.constant dense<0.000000e+00> : vector<32x128xf32>
    %584 = tpu.matmul %583, %0, %cst_229 {dimension_numbers = #tpu.dot_dimension_numbers<[1], [0], [0], [1], [0, 0, 1, 1], [], []>} : vector<32x128xf32>, vector<128x128xf32>, vector<32x128xf32> -> vector<32x128xf32>
    %585 = arith.mulf %583, %583 : vector<32x128xf32>
    %cst_230 = arith.constant dense<0.000000e+00> : vector<32x128xf32>
    %586 = tpu.matmul %585, %0, %cst_230 {dimension_numbers = #tpu.dot_dimension_numbers<[1], [0], [0], [1], [0, 0, 1, 1], [], []>} : vector<32x128xf32>, vector<128x128xf32>, vector<32x128xf32> -> vector<32x128xf32>
    %587 = arith.mulf %584, %584 : vector<32x128xf32>
    %588 = arith.subf %586, %587 : vector<32x128xf32>
    %cst_231 = arith.constant 0.000000e+00 : f32
    %589 = vector.broadcast %cst_231 : f32 to vector<32x128xf32>
    %590 = arith.maximumf %588, %589 : vector<32x128xf32>
    %591 = arith.subf %583, %584 : vector<32x128xf32>
    %cst_232 = arith.constant 9.99999974E-6 : f32
    %592 = vector.broadcast %cst_232 : f32 to vector<32x128xf32>
    %593 = arith.addf %590, %592 : vector<32x128xf32>
    %594 = math.rsqrt %593 : vector<32x128xf32>
    %595 = arith.mulf %591, %594 : vector<32x128xf32>
    %596 = vector.broadcast %569 : vector<1x128xf32> to vector<32x128xf32>
    %597 = arith.mulf %595, %596 : vector<32x128xf32>
    %598 = vector.broadcast %570 : vector<1x128xf32> to vector<32x128xf32>
    %599 = arith.addf %597, %598 : vector<32x128xf32>
    %cst_233 = arith.constant 0.000000e+00 : f32
    %600 = vector.broadcast %cst_233 : f32 to vector<1x128xf32>
    %601 = arith.cmpf ogt, %572, %600 : vector<1x128xf32>
    %cst_234 = arith.constant 0.000000e+00 : f32
    %602 = vector.broadcast %cst_234 : f32 to vector<32x128xf32>
    %603 = arith.maximumf %577, %602 : vector<32x128xf32>
    %604 = vector.shape_cast %601 : vector<1x128xi1> to vector<1x128xi1>
    %605 = vector.broadcast %604 : vector<1x128xi1> to vector<32x128xi1>
    %606 = arith.select %605, %603, %599 : vector<32x128xi1>, vector<32x128xf32>
    %c2_235 = arith.constant 2 : index
    %c0_236 = arith.constant 0 : index
    %c0_237 = arith.constant 0 : index
    %607 = vector.load %arg5[%c2_235, %c0_236, %c0_237] : memref<3x128x4xf32, #tpu.memory_space<vmem>>, vector<1x128x4xf32>
    %608 = vector.shape_cast %607 : vector<1x128x4xf32> to vector<128x4xf32>
    %cst_238 = arith.constant dense<0.000000e+00> : vector<32x4xf32>
    %609 = tpu.matmul %606, %608, %cst_238 {dimension_numbers = #tpu.dot_dimension_numbers<[1], [0], [0], [1], [0, 0, 1, 1], [], []>} : vector<32x128xf32>, vector<128x4xf32>, vector<32x4xf32> -> vector<32x4xf32>
    %610 = vector.broadcast %461 : vector<1x4xf32> to vector<32x4xf32>
    %611 = arith.addf %609, %610 : vector<32x4xf32>
    %cst_239 = arith.constant dense<0.000000e+00> : vector<32x4xf32>
    %612 = tpu.matmul %611, %1, %cst_239 {dimension_numbers = #tpu.dot_dimension_numbers<[1], [0], [0], [1], [0, 0, 1, 1], [], []>} : vector<32x4xf32>, vector<4x4xf32>, vector<32x4xf32> -> vector<32x4xf32>
    %613 = arith.mulf %611, %611 : vector<32x4xf32>
    %cst_240 = arith.constant dense<0.000000e+00> : vector<32x4xf32>
    %614 = tpu.matmul %613, %1, %cst_240 {dimension_numbers = #tpu.dot_dimension_numbers<[1], [0], [0], [1], [0, 0, 1, 1], [], []>} : vector<32x4xf32>, vector<4x4xf32>, vector<32x4xf32> -> vector<32x4xf32>
    %615 = arith.mulf %612, %612 : vector<32x4xf32>
    %616 = arith.subf %614, %615 : vector<32x4xf32>
    %cst_241 = arith.constant 0.000000e+00 : f32
    %617 = vector.broadcast %cst_241 : f32 to vector<32x4xf32>
    %618 = arith.maximumf %616, %617 : vector<32x4xf32>
    %619 = arith.subf %611, %612 : vector<32x4xf32>
    %cst_242 = arith.constant 9.99999974E-6 : f32
    %620 = vector.broadcast %cst_242 : f32 to vector<32x4xf32>
    %621 = arith.addf %618, %620 : vector<32x4xf32>
    %622 = math.rsqrt %621 : vector<32x4xf32>
    %623 = arith.mulf %619, %622 : vector<32x4xf32>
    %624 = vector.broadcast %455 : vector<1x4xf32> to vector<32x4xf32>
    %625 = arith.mulf %623, %624 : vector<32x4xf32>
    %626 = vector.broadcast %456 : vector<1x4xf32> to vector<32x4xf32>
    %627 = arith.addf %625, %626 : vector<32x4xf32>
    %c2_243 = arith.constant 2 : index
    %c0_244 = arith.constant 0 : index
    %c0_245 = arith.constant 0 : index
    %628 = vector.load %arg6[%c2_243, %c0_244, %c0_245] : memref<3x4x128xf32, #tpu.memory_space<vmem>>, vector<1x4x128xf32>
    %629 = vector.shape_cast %628 : vector<1x4x128xf32> to vector<4x128xf32>
    %cst_246 = arith.constant dense<0.000000e+00> : vector<32x128xf32>
    %630 = tpu.matmul %627, %629, %cst_246 {dimension_numbers = #tpu.dot_dimension_numbers<[1], [0], [0], [1], [0, 0, 1, 1], [], []>} : vector<32x4xf32>, vector<4x128xf32>, vector<32x128xf32> -> vector<32x128xf32>
    %cst_247 = arith.constant dense<0.000000e+00> : vector<32x128xf32>
    %631 = tpu.matmul %630, %451, %cst_247 {dimension_numbers = #tpu.dot_dimension_numbers<[1], [0], [0], [1], [0, 0, 1, 1], [], []>} : vector<32x128xf32>, vector<128x128xf32>, vector<32x128xf32> -> vector<32x128xf32>
    %632 = arith.mulf %630, %630 : vector<32x128xf32>
    %cst_248 = arith.constant dense<0.000000e+00> : vector<32x128xf32>
    %633 = tpu.matmul %632, %451, %cst_248 {dimension_numbers = #tpu.dot_dimension_numbers<[1], [0], [0], [1], [0, 0, 1, 1], [], []>} : vector<32x128xf32>, vector<128x128xf32>, vector<32x128xf32> -> vector<32x128xf32>
    %634 = arith.mulf %631, %631 : vector<32x128xf32>
    %635 = arith.subf %633, %634 : vector<32x128xf32>
    %cst_249 = arith.constant 0.000000e+00 : f32
    %636 = vector.broadcast %cst_249 : f32 to vector<32x128xf32>
    %637 = arith.maximumf %635, %636 : vector<32x128xf32>
    %638 = arith.subf %630, %631 : vector<32x128xf32>
    %cst_250 = arith.constant 9.99999974E-6 : f32
    %639 = vector.broadcast %cst_250 : f32 to vector<32x128xf32>
    %640 = arith.addf %637, %639 : vector<32x128xf32>
    %641 = math.rsqrt %640 : vector<32x128xf32>
    %642 = arith.mulf %638, %641 : vector<32x128xf32>
    %643 = vector.broadcast %457 : vector<1x128xf32> to vector<32x128xf32>
    %644 = arith.mulf %642, %643 : vector<32x128xf32>
    %645 = vector.broadcast %458 : vector<1x128xf32> to vector<32x128xf32>
    %646 = arith.addf %644, %645 : vector<32x128xf32>
    %c1_251 = arith.constant 1 : index
    %c0_252 = arith.constant 0 : index
    %c0_253 = arith.constant 0 : index
    %647 = vector.load %arg8[%c1_251, %c0_252, %c0_253] : memref<2x32x32xf32, #tpu.memory_space<vmem>>, vector<1x32x32xf32>
    %648 = vector.shape_cast %647 : vector<1x32x32xf32> to vector<32x32xf32>
    %cst_254 = arith.constant dense<0.000000e+00> : vector<32x128xf32>
    %649 = tpu.matmul %648, %646, %cst_254 {dimension_numbers = #tpu.dot_dimension_numbers<[1], [0], [0], [1], [0, 0, 1, 1], [], []>} : vector<32x32xf32>, vector<32x128xf32>, vector<32x128xf32> -> vector<32x128xf32>
    %cst_255 = arith.constant dense<0.000000e+00> : vector<32x128xf32>
    %650 = tpu.matmul %649, %451, %cst_255 {dimension_numbers = #tpu.dot_dimension_numbers<[1], [0], [0], [1], [0, 0, 1, 1], [], []>} : vector<32x128xf32>, vector<128x128xf32>, vector<32x128xf32> -> vector<32x128xf32>
    %651 = arith.mulf %649, %649 : vector<32x128xf32>
    %cst_256 = arith.constant dense<0.000000e+00> : vector<32x128xf32>
    %652 = tpu.matmul %651, %451, %cst_256 {dimension_numbers = #tpu.dot_dimension_numbers<[1], [0], [0], [1], [0, 0, 1, 1], [], []>} : vector<32x128xf32>, vector<128x128xf32>, vector<32x128xf32> -> vector<32x128xf32>
    %653 = arith.mulf %650, %650 : vector<32x128xf32>
    %654 = arith.subf %652, %653 : vector<32x128xf32>
    %cst_257 = arith.constant 0.000000e+00 : f32
    %655 = vector.broadcast %cst_257 : f32 to vector<32x128xf32>
    %656 = arith.maximumf %654, %655 : vector<32x128xf32>
    %657 = arith.subf %649, %650 : vector<32x128xf32>
    %cst_258 = arith.constant 9.99999974E-6 : f32
    %658 = vector.broadcast %cst_258 : f32 to vector<32x128xf32>
    %659 = arith.addf %656, %658 : vector<32x128xf32>
    %660 = math.rsqrt %659 : vector<32x128xf32>
    %661 = arith.mulf %657, %660 : vector<32x128xf32>
    %662 = vector.broadcast %459 : vector<1x128xf32> to vector<32x128xf32>
    %663 = arith.mulf %661, %662 : vector<32x128xf32>
    %664 = vector.broadcast %460 : vector<1x128xf32> to vector<32x128xf32>
    %665 = arith.addf %663, %664 : vector<32x128xf32>
    %cst_259 = arith.constant dense<0xFF800000> : vector<32xf32>
    %666 = vector.multi_reduction <maximumf>, %665, %cst_259 [1] : vector<32x128xf32> to vector<32xf32>
    %667 = vector.shape_cast %666 : vector<32xf32> to vector<32x1xf32>
    %668 = vector.broadcast %667 : vector<32x1xf32> to vector<32x128xf32>
    %669 = arith.subf %665, %668 : vector<32x128xf32>
    %670 = math.exp %669 : vector<32x128xf32>
    %671 = vector.broadcast %462 : vector<1x128xf32> to vector<32x128xf32>
    %672 = arith.mulf %670, %671 : vector<32x128xf32>
    %cst_260 = arith.constant dense<0.000000e+00> : vector<32xf32>
    %673 = vector.multi_reduction <add>, %672, %cst_260 [1] : vector<32x128xf32> to vector<32xf32>
    %674 = vector.shape_cast %673 : vector<32xf32> to vector<32x1xf32>
    %675 = tpu.reciprocal %674 {approx = true} : vector<32x1xf32> -> vector<32x1xf32>
    %676 = vector.broadcast %675 : vector<32x1xf32> to vector<32x128xf32>
    %677 = arith.mulf %672, %676 : vector<32x128xf32>
    %c0_261 = arith.constant 0 : index
    %c0_262 = arith.constant 0 : index
    %678 = vector.load %arg11[%c0_261, %c0_262] : memref<32x128xf32, #tpu.memory_space<vmem>>, vector<32x128xf32>
    tpu.vector_store %arg11[%c0_261, %c0_262], %677 {strides = array<i32>} : memref<32x128xf32, #tpu.memory_space<vmem>>, vector<32x128xf32>,
    return
  }
}

</mosaic_0001>

<bundles_post_ra>
// kernel: eq.1
= control target key start
LH: loop header
LB: loop body
LE: loop exit
PB: predicated region body
PF: predicated region fallthrough
CT: control target
= control target key end

     0   :  { %vm7_vm0 = vcmask 64512   ;;  %vm13_vm1 = vcmask 130112   ;;  %s39_s0 = inlined_call_operand.vmem [shape: s32[2,8], index: 0, kind: input, shape index: {}]   ;;  %s40_s1 = inlined_call_operand.vmem [shape: s32[16], index: 1, kind: output, shape index: {}]  }
   0x1   :  { %v4_v0 = vld [vmem:[%s39_s0] sm:$0x3]  ;;  %s22_s0 = smov 8  }
   0x2   :  { %5 = vst [vmem:[#allocation1] sm:$0x3] %v4_v0 }
   0x9   :  { %v10_v1 = vld [vmem:[#allocation1 + $0x1] sm:$0x1]   ;;  %v6_v2 = vld [vmem:[#allocation1] sm:$0x1]  }
   0xa   :  { %11 = vrot.lane.b32.xlu0 %v10_v1, %s22_s0  ;;  %8 = vst.msk [vmem:[#allocation0] sm:$0x1] %vm7_vm0, %v6_v2  }
  0x7c   :  { %v12_v3 = vpop.permute.xlu0 %11  }
  0x7d   :  { %14 = vst.msk [vmem:[#allocation0] sm:$0x1] %vm13_vm1, %v12_v3  }
  0x84   :  { %v18_v4 = vld [vmem:[#allocation0] sm:$0x1] }
  0x85   :  { %20 = vst [vmem:[%s40_s1] sm:$0x1] %v18_v4 }

// kernel: _forward.1
= control target key start
LH: loop header
LB: loop body
LE: loop exit
PB: predicated region body
PF: predicated region fallthrough
CT: control target
= control target key end

     0   :  { %16 = vsyncpa [#allocation3], 0  ;;  %s14360_s0 = inlined_call_operand.vmem [shape: f32[16,128], index: 0, kind: input, shape index: {}]   ;;  %s14361_s1 = inlined_call_operand.vmem [shape: f32[3,128,128], index: 1, kind: input, shape index: {}]   ;;  %s14362_s2 = inlined_call_operand.hbm [shape: f32[3,3,128,128], index: 2, kind: input, shape index: {}]   ;;  %s14363_s3 = inlined_call_operand.vmem [shape: f32[128,128], index: 3, kind: input, shape index: {}]   ;;  %s14364_s4 = inlined_call_operand.hbm [shape: f32[3,128,128], index: 4, kind: input, shape index: {}]   ;;  %s14365_s5 = inlined_call_operand.vmem [shape: f32[3,128,4], index: 5, kind: input, shape index: {}]   ;;  %s14366_s6 = inlined_call_operand.vmem [shape: f32[3,4,128], index: 6, kind: input, shape index: {}]   ;;  %s14367_s7 = inlined_call_operand.vmem [shape: f32[32,16], index: 7, kind: input, shape index: {}]   ;;  %s14368_s8 = inlined_call_operand.vmem [shape: f32[2,32,32], index: 8, kind: input, shape index: {}]   ;;  %s14369_s9 = inlined_call_operand.vmem [shape: f32[3,11,128], index: 9, kind: input, shape index: {}]   ;;  %s14370_s10 = inlined_call_operand.vmem [shape: f32[3,3,5,128], index: 10, kind: input, shape index: {}]   ;;  %s14371_s11 = inlined_call_operand.hbm [shape: f32[32,128], index: 11, kind: output, shape index: {}]  }
   0x1   :  { %17 = vsyncpa [#allocation6], 0 }
   0x2   :  { %18 = vsyncpa [#allocation4], 0  ;;  %s12183_s17 = smov [#allocation2]   ;;  %s12111_s21 = scalar_lea.hbm %s14362_s2, 18432 }
   0x3   :  { %s28_s18 = sshll.u32 %s12183_s17, 4  ;;  %p12112_p0 = scmp.ne.s32.totalorder %s14362_s2, %s12111_s21  ;;  %s29_s18 = int_to_ptr.vmem [resolvable:$true] %s28_s18 }
   0x4   :  { %p12115_p1 = scmp.lt.u32.totalorder %s12111_s21, %s14362_s2 }
   0x6   :  { %p12117_p2 = pnand %p12115_p1, %p12112_p0 }
   0x8   :  { %12120 = shalt.err (!%p12117_p2)
}
   0x9   :  { %s12121_s26 = scalar_lea.vmem %s29_s18, 18432  ;;  %p12126_p4 = scmp.lt.s32.totalorder %s29_s18, %s29_s18 }
   0xa   :  { %p12122_p3 = scmp.ne.s32.totalorder %s29_s18, %s12121_s26  ;;  %p12127_p5 = scmp.lt.s32.totalorder %s12121_s26, %s12121_s26 }
   0xc   :  { %p12128_p6 = por %p12127_p5, %p12126_p4 }
   0xe   :  { %p12129_p7 = pnand %p12128_p6, %p12122_p3 }
  0x10   :  { %12132 = shalt.err (!%p12129_p7)
}
  0x11   :  { %s12184_s27 = smov 128   ;;  %s12185_s28 = smov 8  }
  0x12   :  { %34 = dma.hbm_to_vmem [thread:$0]  %s14362_s2, 18432, %s29_s18, [#allocation3], %s12184_s27, %s12184_s27, %s12185_s28  }
  0x13   :  { %s12186_s12 = smov [#allocation5]   ;;  %s12133_s16 = scalar_lea.hbm %s14364_s4, 6144 }
  0x14   :  { %s42_s13 = sshll.u32 %s12186_s12, 4  ;;  %p12134_p8 = scmp.ne.s32.totalorder %s14364_s4, %s12133_s16  ;;  %s43_s13 = int_to_ptr.vmem [resolvable:$true] %s42_s13 }
  0x15   :  { %p12137_p9 = scmp.lt.u32.totalorder %s12133_s16, %s14364_s4 }
  0x17   :  { %p12139_p10 = pnand %p12137_p9, %p12134_p8 }
  0x19   :  { %12142 = shalt.err (!%p12139_p10)
}
  0x1a   :  { %s12143_s22 = scalar_lea.vmem %s43_s13, 6144  ;;  %p12148_p12 = scmp.lt.s32.totalorder %s43_s13, %s43_s13 }
  0x1b   :  { %p12144_p11 = scmp.ne.s32.totalorder %s43_s13, %s12143_s22  ;;  %p12149_p13 = scmp.lt.s32.totalorder %s12143_s22, %s12143_s22 }
  0x1d   :  { %p12150_p0 = por %p12149_p13, %p12148_p12 }
  0x1f   :  { %p12151_p1 = pnand %p12150_p0, %p12144_p11 }
  0x21   :  { %12154 = shalt.err (!%p12151_p1)
}
  0x22   :  { %48 = dma.hbm_to_vmem [thread:$0]  %s14364_s4, 6144, %s43_s13, [#allocation6], %s12184_s27, %s12184_s27, %s12185_s28  }
  0x23   :  { %12177 = dma.done.wait [#allocation3], 18432  }
  0x24   :  { %12178 = vsyncadd [#allocation3], 4294948864 }
  0x25   :  { %12179 = dma.done.wait [#allocation6], 6144  }
  0x26   :  { %12180 = vsyncadd [#allocation6], 4294961152  ;;  %v103_v0 = vld [vmem:[%s14361_s1] sm:$0xff]  ;;  %v104_v1 = vld [vmem:[%s14361_s1 + $0x8] sm:$0xff]  ;;  %v119_v53 = vlaneseq  ;;  %vm1370_vm9 = vcmask 1043456   ;;  %vm1363_vm10 = vcmask 31744  }
  0x27   :  { %v105_v2 = vld [vmem:[%s14361_s1 + $0x10] sm:$0xff]  ;;  %v10229_v3 = vpack.c.bf16 %v104_v1, %v103_v0  ;;  %v106_v4 = vld [vmem:[%s14361_s1 + $0x18] sm:$0xff]  ;;  %v107_v6 = vld [vmem:[%s14361_s1 + $0x20] sm:$0xff]  ;;  %vm1833_vm11 = vcmask 130048  }
  0x28   :  { %v10233_v5 = vpack.c.bf16 %v106_v4, %v105_v2  ;;  %v108_v7 = vld [vmem:[%s14361_s1 + $0x28] sm:$0xff]  ;;  %v109_v9 = vld [vmem:[%s14361_s1 + $0x30] sm:$0xff]  ;;  %v110_v10 = vld [vmem:[%s14361_s1 + $0x38] sm:$0xff]  ;;  %v12431_v54 = vshrl.u32 %v119_v53, 7 }
  0x29   :  { %10230 = vmatprep.subr.bf16.mxu0 %v10229_v3  ;;  %v10237_v8 = vpack.c.bf16 %v108_v7, %v107_v6  ;;  %v83_v11 = vld [vmem:[%s14360_s0] sm:$0xff]  ;;  %v68_v13 = vld [vmem:[%s14363_s3 + $0x8] sm:$0xff]  ;;  %v69_v14 = vld [vmem:[%s14363_s3 + $0x10] sm:$0xff]  ;;  %v10241_v20 = vpack.c.bf16 %v110_v10, %v109_v9 }
  0x2a   :  { %10232 = vmatpush3.bf16.msra.mxu0 %v10229_v3  ;;  %8267 = vmatprep.mubr.f32.mxu0 %v83_v11  ;;  %v67_v12 = vld [vmem:[%s14363_s3] sm:$0xff]  ;;  %v70_v16 = vld [vmem:[%s14363_s3 + $0x18] sm:$0xff]  ;;  %v72_v19 = vld [vmem:[%s14363_s3 + $0x28] sm:$0xff]  ;;  %v12434_v55 = vsub.s32 0, %v12431_v54 }
  0x2b   :  { %10234 = vmatprep.subr.bf16.mxu0 %v10233_v5  ;;  %v12316_v15 = vpack.c.bf16 %v68_v13, %v67_v12  ;;  %v12321_v17 = vpack.c.bf16 %v70_v16, %v69_v14  ;;  %v71_v18 = vld [vmem:[%s14363_s3 + $0x20] sm:$0xff]  ;;  %v112_v22 = vld [vmem:[%s14361_s1 + $0x48] sm:$0xff]  ;;  %v73_v24 = vld [vmem:[%s14363_s3 + $0x30] sm:$0xff] }
  0x2c   :  { %v111_v21 = vld [vmem:[%s14361_s1 + $0x40] sm:$0xff]  ;;  %v12338_v23 = vpack.c.bf16 %v72_v19, %v71_v18  ;;  %v74_v25 = vld [vmem:[%s14363_s3 + $0x38] sm:$0xff]  ;;  %v113_v27 = vld [vmem:[%s14361_s1 + $0x50] sm:$0xff] }
  0x2d   :  { %10262 = vmatprep.subr.bf16.mxu1 %v12316_v15  ;;  %v10245_v26 = vpack.c.bf16 %v112_v22, %v111_v21  ;;  %v114_v28 = vld [vmem:[%s14361_s1 + $0x58] sm:$0xff]  ;;  %v12354_v29 = vpack.c.bf16 %v74_v25, %v73_v24  ;;  %v75_v30 = vld [vmem:[%s14363_s3 + $0x40] sm:$0xff]  ;;  %v76_v31 = vld [vmem:[%s14363_s3 + $0x48] sm:$0xff] }
  0x2e   :  { %10236 = vmatpush3.bf16.msra.mxu0 %v10233_v5  ;;  %10264 = vmatpush3.bf16.msra.mxu1 %v12316_v15  ;;  %v10249_v32 = vpack.c.bf16 %v114_v28, %v113_v27  ;;  %v115_v33 = vld [vmem:[%s14361_s1 + $0x60] sm:$0xff]  ;;  %v116_v34 = vld [vmem:[%s14361_s1 + $0x68] sm:$0xff]  ;;  %v12370_v35 = vpack.c.bf16 %v76_v31, %v75_v30  ;;  %v77_v36 = vld [vmem:[%s14363_s3 + $0x50] sm:$0xff] }
  0x2f   :  { %10238 = vmatprep.subr.bf16.mxu0 %v10237_v8  ;;  %10266 = vmatprep.subr.bf16.mxu1 %v12321_v17  ;;  %v78_v37 = vld [vmem:[%s14363_s3 + $0x58] sm:$0xff]  ;;  %v10253_v38 = vpack.c.bf16 %v116_v34, %v115_v33  ;;  %v117_v39 = vld [vmem:[%s14361_s1 + $0x70] sm:$0xff]  ;;  %v79_v42 = vld [vmem:[%s14363_s3 + $0x60] sm:$0xff] }
  0x30   :  { %v118_v40 = vld [vmem:[%s14361_s1 + $0x78] sm:$0xff]  ;;  %v12386_v41 = vpack.c.bf16 %v78_v37, %v77_v36  ;;  %v80_v43 = vld [vmem:[%s14363_s3 + $0x68] sm:$0xff]  ;;  %v81_v47 = vld [vmem:[%s14363_s3 + $0x70] sm:$0xff] }
  0x31   :  { %v10257_v44 = vpack.c.bf16 %v118_v40, %v117_v39  ;;  %v12396_v45 = vpack.c.bf16 %v80_v43, %v79_v42  ;;  %v84_v46 = vld [vmem:[%s14360_s0 + $0x8] sm:$0xff]  ;;  %v82_v48 = vld [vmem:[%s14363_s3 + $0x78] sm:$0xff]  ;;  %v377_v50 = vld [vmem:[#allocation2] sm:$0xff]  ;;  %v12473_v39 = vsub.s32 2, %v12431_v54 }
  0x32   :  { %10240 = vmatpush3.bf16.msra.mxu0 %v10237_v8  ;;  %10268 = vmatpush3.bf16.msra.mxu1 %v12321_v17  ;;  %v12424_v49 = vpack.c.bf16 %v82_v48, %v81_v47  ;;  %v378_v51 = vld [vmem:[#allocation2 + $0x8] sm:$0xff]  ;;  %v12439_v56 = vld [vmem:[%s14369_s9] sm:$0xff]  ;;  %v379_v0 = vld [vmem:[#allocation2 + $0x10] sm:$0xff] }
  0x33   :  { %10242 = vmatprep.subr.bf16.mxu0 %v10241_v20  ;;  %10270 = vmatprep.subr.bf16.mxu1 %v12338_v23  ;;  %v10325_v52 = vpack.c.bf16 %v378_v51, %v377_v50  ;;  %v122_v57 = vrot.slane %v12439_v56, %v12434_v55  ;;  %v380_v1 = vld [vmem:[#allocation2 + $0x18] sm:$0xff]  ;;  %v381_v3 = vld [vmem:[#allocation2 + $0x20] sm:$0xff]  ;;  %v382_v4 = vld [vmem:[#allocation2 + $0x28] sm:$0xff]  ;;  %v373_v50 = vrot.slane %v12439_v56, %v12473_v39 }
  0x34   :  { %v10329_v2 = vpack.c.bf16 %v380_v1, %v379_v0  ;;  %v10333_v5 = vpack.c.bf16 %v382_v4, %v381_v3  ;;  %v383_v6 = vld [vmem:[#allocation2 + $0x30] sm:$0xff]  ;;  %v384_v7 = vld [vmem:[#allocation2 + $0x38] sm:$0xff]  ;;  %v385_v9 = vld [vmem:[#allocation2 + $0x40] sm:$0xff]  ;;  %v12518_v4 = vsub.s32 3, %v12431_v54 }
  0x35   :  { %v10337_v8 = vpack.c.bf16 %v384_v7, %v383_v6  ;;  %v386_v10 = vld [vmem:[#allocation2 + $0x48] sm:$0xff]  ;;  %v387_v12 = vld [vmem:[#allocation2 + $0x50] sm:$0xff]  ;;  %v388_v13 = vld [vmem:[#allocation2 + $0x58] sm:$0xff] }
  0x36   :  { %10244 = vmatpush3.bf16.msra.mxu0 %v10241_v20  ;;  %10272 = vmatpush3.bf16.msra.mxu1 %v12338_v23  ;;  %v10341_v11 = vpack.c.bf16 %v386_v10, %v385_v9  ;;  %v10345_v14 = vpack.c.bf16 %v388_v13, %v387_v12  ;;  %v389_v16 = vld [vmem:[#allocation2 + $0x60] sm:$0xff]  ;;  %v390_v18 = vld [vmem:[#allocation2 + $0x68] sm:$0xff]  ;;  %v391_v20 = vld [vmem:[#allocation2 + $0x70] sm:$0xff] }
  0x37   :  { %10246 = vmatprep.subr.bf16.mxu0 %v10245_v26  ;;  %10274 = vmatprep.subr.bf16.mxu1 %v12354_v29  ;;  %v10349_v19 = vpack.c.bf16 %v390_v18, %v389_v16  ;;  %v392_v21 = vld [vmem:[#allocation2 + $0x78] sm:$0xff] }
  0x38   :  { %v10353_v22 = vpack.c.bf16 %v392_v21, %v391_v20  ;;  %v678_v16 = vld [vmem:[#allocation2 + $0x98] sm:$0xff]  ;;  %v680_v20 = vld [vmem:[#allocation2 + $0xa8] sm:$0xff] }
  0x3a   :  { %10248 = vmatpush3.bf16.msra.mxu0 %v10245_v26  ;;  %10276 = vmatpush3.bf16.msra.mxu1 %v12354_v29 }
  0x3b   :  { %10250 = vmatprep.subr.bf16.mxu0 %v10249_v32  ;;  %10278 = vmatprep.subr.bf16.mxu1 %v12370_v35 }
  0x3e   :  { %10252 = vmatpush3.bf16.msra.mxu0 %v10249_v32  ;;  %10280 = vmatpush3.bf16.msra.mxu1 %v12370_v35 }
  0x3f   :  { %10254 = vmatprep.subr.bf16.mxu0 %v10253_v38  ;;  %10282 = vmatprep.subr.bf16.mxu1 %v12386_v41 }
  0x42   :  { %10256 = vmatpush3.bf16.msra.mxu0 %v10253_v38  ;;  %10284 = vmatpush3.bf16.msra.mxu1 %v12386_v41  ;;  %v12470_v38 = vsub.s32 1, %v12431_v54 }
  0x43   :  { %10258 = vmatprep.subr.bf16.mxu0 %v10257_v44  ;;  %10286 = vmatprep.subr.bf16.mxu1 %v12396_v45 }
  0x44   :  { %v367_v42 = vrot.slane %v12439_v56, %v12470_v38  ;;  %v675_v56 = vld [vmem:[#allocation2 + $0x80] sm:$0xff] }
  0x46   :  { %10260 = vmatpush3.bf16.msra.mxu0 %v10257_v44  ;;  %10288 = vmatpush3.bf16.msra.mxu1 %v12396_v45 }
  0x47   :  { %10294 = vmatprep.subr.bf16.mxu0 %v12316_v15  ;;  %10290 = vmatprep.subr.bf16.mxu1 %v12424_v49 }
  0x49   :  { %8268 = vmatmul.mubr.f32.vlgmr.msra.gmra.mrb[0].mxu0 %v84_v46 }
  0x4a   :  { %10296 = vmatpush3.bf16.msra.mxu0 %v12316_v15  ;;  %10292 = vmatpush3.bf16.msra.mxu1 %v12424_v49 }
  0x4b   :  { %10298 = vmatprep.subr.bf16.mxu0 %v12321_v17  ;;  %10326 = vmatprep.subr.bf16.mxu1 %v10325_v52 }
  0x4e   :  { %10300 = vmatpush3.bf16.msra.mxu0 %v12321_v17 }
  0x4f   :  { %10302 = vmatprep.subr.bf16.mxu0 %v12338_v23 }
  0x52   :  { %10304 = vmatpush3.bf16.msra.mxu0 %v12338_v23 }
  0x53   :  { %10306 = vmatprep.subr.bf16.mxu0 %v12354_v29 }
  0x56   :  { %10308 = vmatpush3.bf16.msra.mxu0 %v12354_v29 }
  0x57   :  { %10310 = vmatprep.subr.bf16.mxu0 %v12370_v35 }
  0x5a   :  { %10312 = vmatpush3.bf16.msra.mxu0 %v12370_v35 }
  0x5b   :  { %10314 = vmatprep.subr.bf16.mxu0 %v12386_v41 }
  0x5e   :  { %10316 = vmatpush3.bf16.msra.mxu0 %v12386_v41 }
  0x5f   :  { %10318 = vmatprep.subr.bf16.mxu0 %v12396_v45 }
  0x62   :  { %10320 = vmatpush3.bf16.msra.mxu0 %v12396_v45 }
  0x63   :  { %10322 = vmatprep.subr.bf16.mxu0 %v12424_v49 }
  0x66   :  { %10324 = vmatpush3.bf16.msra.mxu0 %v12424_v49 }
  0x67   :  { %10358 = vmatprep.subr.bf16.mxu0 %v12316_v15 }
 0x11c   :  { %v8269_v58 = vpop.f32.mrb[0].mxu0 }
 0x11d   :  { %v12443_v59 = vadd.f32 %v8269_v58, %v122_v57  ;;  %v189_v60 = vpop.f32.mrb[1].mxu0  ;;  %v676_v58 = vld [vmem:[#allocation2 + $0x88] sm:$0xff] }
 0x11e   :  { %v12445_v61 = vadd.f32 %v189_v60, %v122_v57  ;;  %v12506_v60 = vld [vmem:[%s14370_s10] sm:$0x1f] }
 0x11f   :  { %v274_v63 = vmul.f32 %v12443_v59, %v12443_v59  ;;  %vm472_vm0 = vcmp.gt.f32.partialorder %v12506_v60, 0.0 }
 0x120   :  { %8302 = vmatprep.mubr.f32.mxu1 %v12445_v61  ;;  %v273_v62 = vmul.f32 %v12445_v61, %v12445_v61 }
 0x121   :  { %8303 = vmatmul.mubr.f32.vlgmr.msra.gmra.mrb[0].mxu1 %v12443_v59 }
 0x122   :  { %8337 = vmatprep.mubr.f32.mxu0 %v273_v62  ;;  %10328 = vmatpush3.bf16.msra.mxu1 %v10325_v52 }
 0x123   :  { %8338 = vmatmul.mubr.f32.vlgmr.msra.gmra.mrb[2].mxu0 %v274_v63  ;;  %10330 = vmatprep.subr.bf16.mxu1 %v10329_v2 }
 0x124   :  { %10360 = vmatpush3.bf16.msra.mxu0 %v12316_v15 }
 0x125   :  { %10362 = vmatprep.subr.bf16.mxu0 %v12321_v17 }
 0x126   :  { %10332 = vmatpush3.bf16.msra.mxu1 %v10329_v2 }
 0x127   :  { %10334 = vmatprep.subr.bf16.mxu1 %v10333_v5 }
 0x128   :  { %10364 = vmatpush3.bf16.msra.mxu0 %v12321_v17 }
 0x129   :  { %10366 = vmatprep.subr.bf16.mxu0 %v12338_v23 }
 0x12a   :  { %10336 = vmatpush3.bf16.msra.mxu1 %v10333_v5  ;;  %v12187_v5 = vmov 0  }
 0x12b   :  { %10338 = vmatprep.subr.bf16.mxu1 %v10337_v8  ;;  %v12521_v6 = vsel %vm472_vm0, 1, %v12187_v5 }
 0x12c   :  { %10368 = vmatpush3.bf16.msra.mxu0 %v12338_v23  ;;  %v481_v7 = vrot.slane %v12521_v6, %v12518_v4 }
 0x12d   :  { %10370 = vmatprep.subr.bf16.mxu0 %v12354_v29 }
 0x12e   :  { %10340 = vmatpush3.bf16.msra.mxu1 %v10337_v8  ;;  %vm482_vm1 = vcmp.eq.s32.totalorder %v481_v7, 1 }
 0x12f   :  { %10342 = vmatprep.subr.bf16.mxu1 %v10341_v11 }
 0x130   :  { %10372 = vmatpush3.bf16.msra.mxu0 %v12354_v29 }
 0x131   :  { %10374 = vmatprep.subr.bf16.mxu0 %v12370_v35 }
 0x132   :  { %10344 = vmatpush3.bf16.msra.mxu1 %v10341_v11 }
 0x133   :  { %10346 = vmatprep.subr.bf16.mxu1 %v10345_v14 }
 0x134   :  { %10376 = vmatpush3.bf16.msra.mxu0 %v12370_v35 }
 0x135   :  { %10378 = vmatprep.subr.bf16.mxu0 %v12386_v41 }
 0x136   :  { %10348 = vmatpush3.bf16.msra.mxu1 %v10345_v14  ;;  %v677_v14 = vld [vmem:[#allocation2 + $0x90] sm:$0xff] }
 0x137   :  { %10350 = vmatprep.subr.bf16.mxu1 %v10349_v19  ;;  %v10425_v18 = vpack.c.bf16 %v678_v16, %v677_v14 }
 0x138   :  { %10380 = vmatpush3.bf16.msra.mxu0 %v12386_v41 }
 0x139   :  { %10382 = vmatprep.subr.bf16.mxu0 %v12396_v45 }
 0x13a   :  { %10352 = vmatpush3.bf16.msra.mxu1 %v10349_v19  ;;  %v679_v19 = vld [vmem:[#allocation2 + $0xa0] sm:$0xff] }
 0x13b   :  { %10354 = vmatprep.subr.bf16.mxu1 %v10353_v22  ;;  %v10429_v21 = vpack.c.bf16 %v680_v20, %v679_v19 }
 0x13c   :  { %10384 = vmatpush3.bf16.msra.mxu0 %v12396_v45 }
 0x13d   :  { %10386 = vmatprep.subr.bf16.mxu0 %v12424_v49 }
 0x13e   :  { %10356 = vmatpush3.bf16.msra.mxu1 %v10353_v22  ;;  %v681_v22 = vld [vmem:[#allocation2 + $0xb0] sm:$0xff] }
 0x13f   :  { %10390 = vmatprep.subr.bf16.mxu1 %v12316_v15 }
 0x140   :  { %10388 = vmatpush3.bf16.msra.mxu0 %v12424_v49 }
 0x1f4   :  { %v8304_v24 = vpop.f32.mrb[0].mxu1 }
 0x1f5   :  { %v351_v25 = vmul.f32 %v8304_v24, %v8304_v24  ;;  %v264_v26 = vpop.f32.mrb[1].mxu1  ;;  %v357_v40 = vsub.f32 %v12443_v59, %v8304_v24  ;;  %v10421_v59 = vpack.c.bf16 %v676_v58, %v675_v56  ;;  %v682_v24 = vld [vmem:[#allocation2 + $0xb8] sm:$0xff] }
 0x1f6   :  { %v350_v27 = vmul.f32 %v264_v26, %v264_v26  ;;  %v8339_v28 = vpop.f32.mrb[2].mxu0  ;;  %v356_v44 = vsub.f32 %v12445_v61, %v264_v26  ;;  %v396_v61 = vrot.slane %v12506_v60, %v12434_v55  ;;  %v683_v26 = vld [vmem:[#allocation2 + $0xc0] sm:$0xff] }
 0x1f7   :  { %v353_v30 = vsub.f32 %v8339_v28, %v351_v25  ;;  %v341_v31 = vpop.f32.mrb[3].mxu0  ;;  %10422 = vmatprep.subr.bf16.mxu0 %v10421_v59  ;;  %v10433_v25 = vpack.c.bf16 %v682_v24, %v681_v22  ;;  %v685_v28 = vld [vmem:[#allocation2 + $0xd0] sm:$0xff] }
 0x1f8   :  { %v352_v32 = vsub.f32 %v341_v31, %v350_v27  ;;  %v684_v27 = vld [vmem:[#allocation2 + $0xc8] sm:$0xff]  ;;  %v686_v31 = vld [vmem:[#allocation2 + $0xd8] sm:$0xff] }
 0x1f9   :  { %v355_v33 = vmax.f32 %v353_v30, 0.0  ;;  %v10437_v30 = vpack.c.bf16 %v684_v27, %v683_v26 }
 0x1fa   :  { %v354_v34 = vmax.f32 %v352_v32, 0.0  ;;  %v10441_v32 = vpack.c.bf16 %v686_v31, %v685_v28 }
 0x1fb   :  { %v359_v36 = vadd.f32 1e-05, %v355_v33  ;;  %v687_v33 = vld [vmem:[#allocation2 + $0xe0] sm:$0xff] }
 0x1fc   :  { %v358_v37 = vadd.f32 1e-05, %v354_v34  ;;  %v688_v34 = vld [vmem:[#allocation2 + $0xe8] sm:$0xff] }
 0x1fd   :  { %11888 = vrsqrt.f32 %v359_v36  ;;  %v10445_v36 = vpack.c.bf16 %v688_v34, %v687_v33 }
 0x1fe   :  { %11890 = vrsqrt.f32 %v358_v37  ;;  %v689_v37 = vld [vmem:[#allocation2 + $0xf0] sm:$0xff] }
 0x207   :  { %v11889_v43 = vpop.eup %11888 }
 0x208   :  { %v11891_v46 = vpop.eup %11890  ;;  %v363_v47 = vmul.f32 %v11889_v43, %v357_v40  ;;  %v690_v40 = vld [vmem:[#allocation2 + $0xf8] sm:$0xff] }
 0x209   :  { %v362_v48 = vmul.f32 %v11891_v46, %v356_v44 }
 0x20a   :  { %v369_v51 = vmul.f32 %v367_v42, %v363_v47 }
 0x20b   :  { %v368_v52 = vmul.f32 %v367_v42, %v362_v48  ;;  %v10449_v42 = vpack.c.bf16 %v690_v40, %v689_v37 }
 0x20c   :  { %v12483_v57 = vadd.f32 %v373_v50, %v369_v51 }
 0x20d   :  { %v12481_v53 = vadd.f32 %v373_v50, %v368_v52 }
 0x20f   :  { %8372 = vmatprep.mubr.f32.mxu1 %v12481_v53 }
 0x210   :  { %8373 = vmatmul.mubr.f32.vlgmr.msra.gmra.mrb[2].mxu1 %v12483_v57 }
 0x211   :  { %10392 = vmatpush3.bf16.msra.mxu1 %v12316_v15 }
 0x212   :  { %10394 = vmatprep.subr.bf16.mxu1 %v12321_v17 }
 0x215   :  { %10396 = vmatpush3.bf16.msra.mxu1 %v12321_v17 }
 0x216   :  { %10398 = vmatprep.subr.bf16.mxu1 %v12338_v23 }
 0x219   :  { %10400 = vmatpush3.bf16.msra.mxu1 %v12338_v23 }
 0x21a   :  { %10402 = vmatprep.subr.bf16.mxu1 %v12354_v29 }
 0x21d   :  { %10404 = vmatpush3.bf16.msra.mxu1 %v12354_v29 }
 0x21e   :  { %10406 = vmatprep.subr.bf16.mxu1 %v12370_v35 }
 0x221   :  { %10408 = vmatpush3.bf16.msra.mxu1 %v12370_v35 }
 0x222   :  { %10410 = vmatprep.subr.bf16.mxu1 %v12386_v41 }
 0x225   :  { %10412 = vmatpush3.bf16.msra.mxu1 %v12386_v41 }
 0x226   :  { %10414 = vmatprep.subr.bf16.mxu1 %v12396_v45 }
 0x229   :  { %10416 = vmatpush3.bf16.msra.mxu1 %v12396_v45 }
 0x22a   :  { %10418 = vmatprep.subr.bf16.mxu1 %v12424_v49 }
 0x22d   :  { %10420 = vmatpush3.bf16.msra.mxu1 %v12424_v49 }
 0x22e   :  { %10454 = vmatprep.subr.bf16.mxu1 %v12316_v15 }
 0x2e3   :  { %v8374_v62 = vpop.f32.mrb[2].mxu1 }
 0x2e4   :  { %v12510_v63 = vadd.f32 %v8374_v62, %v396_v61  ;;  %v463_v0 = vpop.f32.mrb[3].mxu1  ;;  %v12554_v62 = vsub.s32 4, %v12431_v54 }
 0x2e5   :  { %v12512_v1 = vadd.f32 %v463_v0, %v396_v61 }
 0x2e6   :  { %v475_v2 = vmul.f32 1.442695, %v12510_v63 }
 0x2e7   :  { %v473_v3 = vmul.f32 1.442695, %v12512_v1  ;;  %v663_v20 = vmax.f32 %v12512_v1, 0.0 }
 0x2e8   :  { %11892 = vpow2.f32 %v475_v2  ;;  %v654_v2 = vrot.slane %v12506_v60, %v12470_v38 }
 0x2e9   :  { %11894 = vpow2.f32 %v473_v3 }
 0x2f2   :  { %v11893_v8 = vpop.eup %11892 }
 0x2f3   :  { %v11895_v9 = vpop.eup %11894  ;;  %v12526_v10 = vsel %vm482_vm1, %v11893_v8, %v12510_v63  ;;  %v668_v8 = vrot.slane %v12521_v6, %v12554_v62  ;;  %v12585_v6 = vld [vmem:[%s14370_s10 + $0x8] sm:$0x1f] }
 0x2f4   :  { %v12529_v11 = vsel %vm482_vm1, %v11895_v9, %v12512_v1  ;;  %v561_v13 = vmul.f32 %v12526_v10, %v12526_v10  ;;  %v694_v24 = vrot.slane %v12585_v6, %v12434_v55  ;;  %vm770_vm3 = vcmp.gt.f32.partialorder %v12585_v6, 0.0 }
 0x2f5   :  { %8407 = vmatprep.mubr.f32.mxu0 %v12529_v11  ;;  %v560_v12 = vmul.f32 %v12529_v11, %v12529_v11  ;;  %vm669_vm2 = vcmp.eq.s32.totalorder %v668_v8, 1  ;;  %v985_v8 = vld [vmem:[#allocation2 + $0x160] sm:$0xff] }
 0x2f6   :  { %8408 = vmatmul.mubr.f32.vlgmr.msra.gmra.mrb[4].mxu0 %v12526_v10 }
 0x2f7   :  { %8442 = vmatprep.mubr.f32.mxu1 %v560_v12  ;;  %10424 = vmatpush3.bf16.msra.mxu0 %v10421_v59  ;;  %v660_v12 = vrot.slane %v12506_v60, %v12473_v39  ;;  %v973_v60 = vld [vmem:[#allocation2 + $0x100] sm:$0xff] }
 0x2f8   :  { %8443 = vmatmul.mubr.f32.vlgmr.msra.gmra.mrb[4].mxu1 %v561_v13  ;;  %10426 = vmatprep.subr.bf16.mxu0 %v10425_v18 }
 0x2f9   :  { %10456 = vmatpush3.bf16.msra.mxu1 %v12316_v15 }
 0x2fa   :  { %10458 = vmatprep.subr.bf16.mxu1 %v12321_v17 }
 0x2fb   :  { %10428 = vmatpush3.bf16.msra.mxu0 %v10425_v18 }
 0x2fc   :  { %10430 = vmatprep.subr.bf16.mxu0 %v10429_v21 }
 0x2fd   :  { %10460 = vmatpush3.bf16.msra.mxu1 %v12321_v17 }
 0x2fe   :  { %10462 = vmatprep.subr.bf16.mxu1 %v12338_v23 }
 0x2ff   :  { %10432 = vmatpush3.bf16.msra.mxu0 %v10429_v21 }
 0x300   :  { %10434 = vmatprep.subr.bf16.mxu0 %v10433_v25 }
 0x301   :  { %10464 = vmatpush3.bf16.msra.mxu1 %v12338_v23 }
 0x302   :  { %10466 = vmatprep.subr.bf16.mxu1 %v12354_v29 }
 0x303   :  { %10436 = vmatpush3.bf16.msra.mxu0 %v10433_v25 }
 0x304   :  { %10438 = vmatprep.subr.bf16.mxu0 %v10437_v30 }
 0x305   :  { %10468 = vmatpush3.bf16.msra.mxu1 %v12354_v29 }
 0x306   :  { %10470 = vmatprep.subr.bf16.mxu1 %v12370_v35 }
 0x307   :  { %10440 = vmatpush3.bf16.msra.mxu0 %v10437_v30 }
 0x308   :  { %10442 = vmatprep.subr.bf16.mxu0 %v10441_v32 }
 0x309   :  { %10472 = vmatpush3.bf16.msra.mxu1 %v12370_v35 }
 0x30a   :  { %10474 = vmatprep.subr.bf16.mxu1 %v12386_v41 }
 0x30b   :  { %10444 = vmatpush3.bf16.msra.mxu0 %v10441_v32  ;;  %v12597_v32 = vsel %vm770_vm3, 1, %v12187_v5 }
 0x30c   :  { %10446 = vmatprep.subr.bf16.mxu0 %v10445_v36  ;;  %v779_v33 = vrot.slane %v12597_v32, %v12518_v4 }
 0x30d   :  { %10476 = vmatpush3.bf16.msra.mxu1 %v12386_v41 }
 0x30e   :  { %10478 = vmatprep.subr.bf16.mxu1 %v12396_v45  ;;  %vm780_vm4 = vcmp.eq.s32.totalorder %v779_v33, 1 }
 0x30f   :  { %10448 = vmatpush3.bf16.msra.mxu0 %v10445_v36 }
 0x310   :  { %10450 = vmatprep.subr.bf16.mxu0 %v10449_v42 }
 0x311   :  { %10480 = vmatpush3.bf16.msra.mxu1 %v12396_v45 }
 0x312   :  { %10482 = vmatprep.subr.bf16.mxu1 %v12424_v49 }
 0x313   :  { %10452 = vmatpush3.bf16.msra.mxu0 %v10449_v42 }
 0x314   :  { %10486 = vmatprep.subr.bf16.mxu0 %v12316_v15 }
 0x315   :  { %10484 = vmatpush3.bf16.msra.mxu1 %v12424_v49 }
 0x3c9   :  { %v8409_v43 = vpop.f32.mrb[4].mxu0 }
 0x3ca   :  { %v638_v44 = vmul.f32 %v8409_v43, %v8409_v43  ;;  %v551_v46 = vpop.f32.mrb[5].mxu0  ;;  %v644_v0 = vsub.f32 %v12526_v10, %v8409_v43  ;;  %v664_v10 = vmax.f32 %v12510_v63, 0.0  ;;  %v974_v63 = vld [vmem:[#allocation2 + $0x108] sm:$0xff] }
 0x3cb   :  { %v637_v47 = vmul.f32 %v551_v46, %v551_v46  ;;  %v8444_v48 = vpop.f32.mrb[4].mxu1  ;;  %v643_v7 = vsub.f32 %v12529_v11, %v551_v46  ;;  %v10517_v1 = vpack.c.bf16 %v974_v63, %v973_v60  ;;  %v976_v46 = vld [vmem:[#allocation2 + $0x118] sm:$0xff] }
 0x3cc   :  { %v640_v50 = vsub.f32 %v8444_v48, %v638_v44  ;;  %v628_v51 = vpop.f32.mrb[5].mxu1  ;;  %v975_v44 = vld [vmem:[#allocation2 + $0x110] sm:$0xff]  ;;  %v977_v48 = vld [vmem:[#allocation2 + $0x120] sm:$0xff] }
 0x3cd   :  { %v639_v52 = vsub.f32 %v628_v51, %v637_v47  ;;  %10518 = vmatprep.subr.bf16.mxu1 %v10517_v1  ;;  %v10521_v47 = vpack.c.bf16 %v976_v46, %v975_v44 }
 0x3ce   :  { %v642_v56 = vmax.f32 %v640_v50, 0.0  ;;  %v978_v50 = vld [vmem:[#allocation2 + $0x128] sm:$0xff] }
 0x3cf   :  { %v641_v58 = vmax.f32 %v639_v52, 0.0  ;;  %v10525_v51 = vpack.c.bf16 %v978_v50, %v977_v48  ;;  %v979_v52 = vld [vmem:[#allocation2 + $0x130] sm:$0xff] }
 0x3d0   :  { %v646_v59 = vadd.f32 1e-05, %v642_v56  ;;  %v980_v56 = vld [vmem:[#allocation2 + $0x138] sm:$0xff] }
 0x3d1   :  { %v645_v61 = vadd.f32 1e-05, %v641_v58  ;;  %v10529_v58 = vpack.c.bf16 %v980_v56, %v979_v52 }
 0x3d2   :  { %11896 = vrsqrt.f32 %v646_v59  ;;  %v981_v59 = vld [vmem:[#allocation2 + $0x140] sm:$0xff] }
 0x3d3   :  { %11898 = vrsqrt.f32 %v645_v61  ;;  %v982_v61 = vld [vmem:[#allocation2 + $0x148] sm:$0xff] }
 0x3dc   :  { %v11897_v3 = vpop.eup %11896 }
 0x3dd   :  { %v11899_v9 = vpop.eup %11898  ;;  %v650_v13 = vmul.f32 %v11897_v3, %v644_v0  ;;  %v983_v0 = vld [vmem:[#allocation2 + $0x150] sm:$0xff]  ;;  %v984_v3 = vld [vmem:[#allocation2 + $0x158] sm:$0xff] }
 0x3de   :  { %v649_v14 = vmul.f32 %v11899_v9, %v643_v7  ;;  %v10537_v7 = vpack.c.bf16 %v984_v3, %v983_v0  ;;  %v986_v9 = vld [vmem:[#allocation2 + $0x168] sm:$0xff] }
 0x3df   :  { %v656_v16 = vmul.f32 %v654_v2, %v650_v13  ;;  %v987_v13 = vld [vmem:[#allocation2 + $0x170] sm:$0xff] }
 0x3e0   :  { %v655_v18 = vmul.f32 %v654_v2, %v649_v14  ;;  %v10533_v2 = vpack.c.bf16 %v982_v61, %v981_v59  ;;  %v988_v14 = vld [vmem:[#allocation2 + $0x178] sm:$0xff] }
 0x3e1   :  { %v662_v19 = vadd.f32 %v660_v12, %v656_v16  ;;  %v10545_v16 = vpack.c.bf16 %v988_v14, %v987_v13 }
 0x3e2   :  { %v661_v21 = vadd.f32 %v660_v12, %v655_v18  ;;  %v10541_v12 = vpack.c.bf16 %v986_v9, %v985_v8 }
 0x3e3   :  { %v671_v22 = vsel %vm669_vm2, %v664_v10, %v662_v19 }
 0x3e4   :  { %v670_v11 = vsel %vm669_vm2, %v663_v20, %v661_v21 }
 0x3e5   :  { %8477 = vmatprep.mubr.f32.mxu0 %v670_v11 }
 0x3e6   :  { %8478 = vmatmul.mubr.f32.vlgmr.msra.gmra.mrb[6].mxu0 %v671_v22 }
 0x3e7   :  { %10488 = vmatpush3.bf16.msra.mxu0 %v12316_v15 }
 0x3e8   :  { %10490 = vmatprep.subr.bf16.mxu0 %v12321_v17 }
 0x3eb   :  { %10492 = vmatpush3.bf16.msra.mxu0 %v12321_v17 }
 0x3ec   :  { %10494 = vmatprep.subr.bf16.mxu0 %v12338_v23 }
 0x3ef   :  { %10496 = vmatpush3.bf16.msra.mxu0 %v12338_v23 }
 0x3f0   :  { %10498 = vmatprep.subr.bf16.mxu0 %v12354_v29 }
 0x3f3   :  { %10500 = vmatpush3.bf16.msra.mxu0 %v12354_v29 }
 0x3f4   :  { %10502 = vmatprep.subr.bf16.mxu0 %v12370_v35 }
 0x3f7   :  { %10504 = vmatpush3.bf16.msra.mxu0 %v12370_v35 }
 0x3f8   :  { %10506 = vmatprep.subr.bf16.mxu0 %v12386_v41 }
 0x3fb   :  { %10508 = vmatpush3.bf16.msra.mxu0 %v12386_v41 }
 0x3fc   :  { %10510 = vmatprep.subr.bf16.mxu0 %v12396_v45 }
 0x3ff   :  { %10512 = vmatpush3.bf16.msra.mxu0 %v12396_v45 }
 0x400   :  { %10514 = vmatprep.subr.bf16.mxu0 %v12424_v49 }
 0x403   :  { %10516 = vmatpush3.bf16.msra.mxu0 %v12424_v49 }
 0x404   :  { %10550 = vmatprep.subr.bf16.mxu0 %v12316_v15 }
 0x4b9   :  { %v8479_v25 = vpop.f32.mrb[6].mxu0 }
 0x4ba   :  { %v12589_v26 = vadd.f32 %v8479_v25, %v694_v24  ;;  %v761_v27 = vpop.f32.mrb[7].mxu0 }
 0x4bb   :  { %v12591_v28 = vadd.f32 %v761_v27, %v694_v24 }
 0x4bc   :  { %v773_v30 = vmul.f32 1.442695, %v12589_v26 }
 0x4bd   :  { %v771_v31 = vmul.f32 1.442695, %v12591_v28  ;;  %v961_v50 = vmax.f32 %v12591_v28, 0.0 }
 0x4be   :  { %11900 = vpow2.f32 %v773_v30  ;;  %v952_v30 = vrot.slane %v12585_v6, %v12470_v38 }
 0x4bf   :  { %11902 = vpow2.f32 %v771_v31 }
 0x4c8   :  { %v11901_v34 = vpop.eup %11900 }
 0x4c9   :  { %v11903_v36 = vpop.eup %11902  ;;  %v12602_v37 = vsel %vm780_vm4, %v11901_v34, %v12589_v26  ;;  %v966_v34 = vrot.slane %v12597_v32, %v12554_v62  ;;  %v12663_v32 = vld [vmem:[%s14370_s10 + $0x10] sm:$0x1f] }
 0x4ca   :  { %v12605_v40 = vsel %vm780_vm4, %v11903_v36, %v12591_v28  ;;  %v859_v43 = vmul.f32 %v12602_v37, %v12602_v37  ;;  %v992_v56 = vrot.slane %v12663_v32, %v12434_v55  ;;  %vm1068_vm6 = vcmp.gt.f32.partialorder %v12663_v32, 0.0 }
 0x4cb   :  { %8512 = vmatprep.mubr.f32.mxu1 %v12605_v40  ;;  %v858_v42 = vmul.f32 %v12605_v40, %v12605_v40  ;;  %vm967_vm5 = vcmp.eq.s32.totalorder %v966_v34, 1  ;;  %v1280_v34 = vld [vmem:[%s14365_s5 + $0x60] sm:$0xff] }
 0x4cc   :  { %8513 = vmatmul.mubr.f32.vlgmr.msra.gmra.mrb[6].mxu1 %v12602_v37 }
 0x4cd   :  { %8547 = vmatprep.mubr.f32.mxu0 %v858_v42  ;;  %10520 = vmatpush3.bf16.msra.mxu1 %v10517_v1  ;;  %v958_v42 = vrot.slane %v12585_v6, %v12473_v39  ;;  %v1268_v6 = vld [vmem:[%s14365_s5] sm:$0xff] }
 0x4ce   :  { %8548 = vmatmul.mubr.f32.vlgmr.msra.gmra.mrb[8].mxu0 %v859_v43  ;;  %10522 = vmatprep.subr.bf16.mxu1 %v10521_v47 }
 0x4cf   :  { %10552 = vmatpush3.bf16.msra.mxu0 %v12316_v15 }
 0x4d0   :  { %10554 = vmatprep.subr.bf16.mxu0 %v12321_v17 }
 0x4d1   :  { %10524 = vmatpush3.bf16.msra.mxu1 %v10521_v47 }
 0x4d2   :  { %10526 = vmatprep.subr.bf16.mxu1 %v10525_v51 }
 0x4d3   :  { %10556 = vmatpush3.bf16.msra.mxu0 %v12321_v17 }
 0x4d4   :  { %10558 = vmatprep.subr.bf16.mxu0 %v12338_v23 }
 0x4d5   :  { %10528 = vmatpush3.bf16.msra.mxu1 %v10525_v51 }
 0x4d6   :  { %10530 = vmatprep.subr.bf16.mxu1 %v10529_v58 }
 0x4d7   :  { %10560 = vmatpush3.bf16.msra.mxu0 %v12338_v23 }
 0x4d8   :  { %10562 = vmatprep.subr.bf16.mxu0 %v12354_v29 }
 0x4d9   :  { %10532 = vmatpush3.bf16.msra.mxu1 %v10529_v58 }
 0x4da   :  { %10534 = vmatprep.subr.bf16.mxu1 %v10533_v2 }
 0x4db   :  { %10564 = vmatpush3.bf16.msra.mxu0 %v12354_v29 }
 0x4dc   :  { %10566 = vmatprep.subr.bf16.mxu0 %v12370_v35 }
 0x4dd   :  { %10536 = vmatpush3.bf16.msra.mxu1 %v10533_v2 }
 0x4de   :  { %10538 = vmatprep.subr.bf16.mxu1 %v10537_v7 }
 0x4df   :  { %10568 = vmatpush3.bf16.msra.mxu0 %v12370_v35 }
 0x4e0   :  { %10570 = vmatprep.subr.bf16.mxu0 %v12386_v41 }
 0x4e1   :  { %10540 = vmatpush3.bf16.msra.mxu1 %v10537_v7  ;;  %v12675_v7 = vsel %vm1068_vm6, 1, %v12187_v5 }
 0x4e2   :  { %10542 = vmatprep.subr.bf16.mxu1 %v10541_v12  ;;  %v1077_v8 = vrot.slane %v12675_v7, %v12518_v4 }
 0x4e3   :  { %10572 = vmatpush3.bf16.msra.mxu0 %v12386_v41 }
 0x4e4   :  { %10574 = vmatprep.subr.bf16.mxu0 %v12396_v45  ;;  %vm1078_vm7 = vcmp.eq.s32.totalorder %v1077_v8, 1 }
 0x4e5   :  { %10544 = vmatpush3.bf16.msra.mxu1 %v10541_v12 }
 0x4e6   :  { %10546 = vmatprep.subr.bf16.mxu1 %v10545_v16 }
 0x4e7   :  { %10576 = vmatpush3.bf16.msra.mxu0 %v12396_v45 }
 0x4e8   :  { %10578 = vmatprep.subr.bf16.mxu0 %v12424_v49 }
 0x4e9   :  { %10548 = vmatpush3.bf16.msra.mxu1 %v10545_v16 }
 0x4ea   :  { %10582 = vmatprep.subr.bf16.mxu1 %v12316_v15 }
 0x4eb   :  { %10580 = vmatpush3.bf16.msra.mxu0 %v12424_v49 }
 0x59f   :  { %v8514_v18 = vpop.f32.mrb[6].mxu1 }
 0x5a0   :  { %v936_v10 = vmul.f32 %v8514_v18, %v8514_v18  ;;  %v849_v19 = vpop.f32.mrb[7].mxu1  ;;  %v942_v27 = vsub.f32 %v12602_v37, %v8514_v18  ;;  %v962_v37 = vmax.f32 %v12589_v26, 0.0  ;;  %v1269_v26 = vld [vmem:[%s14365_s5 + $0x8] sm:$0xff] }
 0x5a1   :  { %v935_v20 = vmul.f32 %v849_v19, %v849_v19  ;;  %v8549_v21 = vpop.f32.mrb[8].mxu0  ;;  %v941_v33 = vsub.f32 %v12605_v40, %v849_v19  ;;  %v10613_v28 = vpack.c.bf16 %v1269_v26, %v1268_v6  ;;  %v1271_v19 = vld [vmem:[%s14365_s5 + $0x18] sm:$0xff] }
 0x5a2   :  { %v938_v22 = vsub.f32 %v8549_v21, %v936_v10  ;;  %v926_v11 = vpop.f32.mrb[9].mxu0  ;;  %v1270_v10 = vld [vmem:[%s14365_s5 + $0x10] sm:$0xff]  ;;  %v1272_v21 = vld [vmem:[%s14365_s5 + $0x20] sm:$0xff] }
 0x5a3   :  { %v937_v60 = vsub.f32 %v926_v11, %v935_v20  ;;  %10614 = vmatprep.subr.bf16.mxu0 %v10613_v28  ;;  %v10617_v20 = vpack.c.bf16 %v1271_v19, %v1270_v10 }
 0x5a4   :  { %v940_v63 = vmax.f32 %v938_v22, 0.0  ;;  %v1273_v22 = vld [vmem:[%s14365_s5 + $0x28] sm:$0xff] }
 0x5a5   :  { %v939_v1 = vmax.f32 %v937_v60, 0.0  ;;  %v10621_v11 = vpack.c.bf16 %v1273_v22, %v1272_v21  ;;  %v1274_v60 = vld [vmem:[%s14365_s5 + $0x30] sm:$0xff] }
 0x5a6   :  { %v944_v24 = vadd.f32 1e-05, %v940_v63  ;;  %v1275_v63 = vld [vmem:[%s14365_s5 + $0x38] sm:$0xff] }
 0x5a7   :  { %v943_v25 = vadd.f32 1e-05, %v939_v1  ;;  %v10625_v1 = vpack.c.bf16 %v1275_v63, %v1274_v60 }
 0x5a8   :  { %11904 = vrsqrt.f32 %v944_v24  ;;  %v1276_v24 = vld [vmem:[%s14365_s5 + $0x40] sm:$0xff] }
 0x5a9   :  { %11906 = vrsqrt.f32 %v943_v25  ;;  %v1277_v25 = vld [vmem:[%s14365_s5 + $0x48] sm:$0xff] }
 0x5b2   :  { %v11905_v31 = vpop.eup %11904 }
 0x5b3   :  { %v11907_v36 = vpop.eup %11906  ;;  %v948_v43 = vmul.f32 %v11905_v31, %v942_v27  ;;  %v1278_v27 = vld [vmem:[%s14365_s5 + $0x50] sm:$0xff]  ;;  %v1279_v31 = vld [vmem:[%s14365_s5 + $0x58] sm:$0xff] }
 0x5b4   :  { %v947_v44 = vmul.f32 %v11907_v36, %v941_v33  ;;  %v10633_v33 = vpack.c.bf16 %v1279_v31, %v1278_v27  ;;  %v1281_v36 = vld [vmem:[%s14365_s5 + $0x68] sm:$0xff]  ;;  %v87_v31 = vld [vmem:[#allocation5] sm:$0xff] }
 0x5b5   :  { %v954_v46 = vmul.f32 %v952_v30, %v948_v43  ;;  %v1282_v43 = vld [vmem:[%s14365_s5 + $0x70] sm:$0xff] }
 0x5b6   :  { %v953_v47 = vmul.f32 %v952_v30, %v947_v44  ;;  %v10629_v30 = vpack.c.bf16 %v1277_v25, %v1276_v24  ;;  %v1283_v44 = vld [vmem:[%s14365_s5 + $0x78] sm:$0xff] }
 0x5b7   :  { %v960_v48 = vadd.f32 %v958_v42, %v954_v46  ;;  %v10641_v46 = vpack.c.bf16 %v1283_v44, %v1282_v43  ;;  %v91_v44 = vld [vmem:[#allocation5 + $0x20] sm:$0xff] }
 0x5b8   :  { %v959_v51 = vadd.f32 %v958_v42, %v953_v47  ;;  %v10637_v42 = vpack.c.bf16 %v1281_v36, %v1280_v34  ;;  %v89_v36 = vld [vmem:[#allocation5 + $0x10] sm:$0xff] }
 0x5b9   :  { %v969_v52 = vsel %vm967_vm5, %v962_v37, %v960_v48 }
 0x5ba   :  { %v968_v40 = vsel %vm967_vm5, %v961_v50, %v959_v51  ;;  %vm4259_vm5 = vcmask 261120  }
 0x5bb   :  { %8582 = vmatprep.mubr.f32.mxu1 %v968_v40 }
 0x5bc   :  { %8583 = vmatmul.mubr.f32.vlgmr.msra.gmra.mrb[8].mxu1 %v969_v52 }
 0x5bd   :  { %10584 = vmatpush3.bf16.msra.mxu1 %v12316_v15 }
 0x5be   :  { %10586 = vmatprep.subr.bf16.mxu1 %v12321_v17 }
 0x5c1   :  { %10588 = vmatpush3.bf16.msra.mxu1 %v12321_v17 }
 0x5c2   :  { %10590 = vmatprep.subr.bf16.mxu1 %v12338_v23 }
 0x5c5   :  { %10592 = vmatpush3.bf16.msra.mxu1 %v12338_v23 }
 0x5c6   :  { %10594 = vmatprep.subr.bf16.mxu1 %v12354_v29 }
 0x5c9   :  { %10596 = vmatpush3.bf16.msra.mxu1 %v12354_v29 }
 0x5ca   :  { %10598 = vmatprep.subr.bf16.mxu1 %v12370_v35 }
 0x5cd   :  { %10600 = vmatpush3.bf16.msra.mxu1 %v12370_v35 }
 0x5ce   :  { %10602 = vmatprep.subr.bf16.mxu1 %v12386_v41 }
 0x5d1   :  { %10604 = vmatpush3.bf16.msra.mxu1 %v12386_v41 }
 0x5d2   :  { %10606 = vmatprep.subr.bf16.mxu1 %v12396_v45 }
 0x5d5   :  { %10608 = vmatpush3.bf16.msra.mxu1 %v12396_v45 }
 0x5d6   :  { %10610 = vmatprep.subr.bf16.mxu1 %v12424_v49 }
 0x5d9   :  { %10612 = vmatpush3.bf16.msra.mxu1 %v12424_v49 }
 0x68f   :  { %v8584_v58 = vpop.f32.mrb[8].mxu1 }
 0x690   :  { %v12667_v59 = vadd.f32 %v8584_v58, %v992_v56  ;;  %v1059_v61 = vpop.f32.mrb[9].mxu1 }
 0x691   :  { %v12669_v0 = vadd.f32 %v1059_v61, %v992_v56 }
 0x692   :  { %v1071_v2 = vmul.f32 1.442695, %v12667_v59 }
 0x693   :  { %v1069_v3 = vmul.f32 1.442695, %v12669_v0  ;;  %v1259_v22 = vmax.f32 %v12669_v0, 0.0 }
 0x694   :  { %11908 = vpow2.f32 %v1071_v2  ;;  %v1250_v2 = vrot.slane %v12663_v32, %v12470_v38 }
 0x695   :  { %11910 = vpow2.f32 %v1069_v3 }
 0x69e   :  { %v11909_v9 = vpop.eup %11908 }
 0x69f   :  { %v11911_v12 = vpop.eup %11910  ;;  %v12680_v13 = vsel %vm1078_vm7, %v11909_v9, %v12667_v59  ;;  %v1264_v9 = vrot.slane %v12675_v7, %v12554_v62  ;;  %v12188_v7 = vmov 0.25  }
 0x6a0   :  { %v12683_v14 = vsel %vm1078_vm7, %v11911_v12, %v12669_v0  ;;  %v1157_v18 = vmul.f32 %v12680_v13, %v12680_v13  ;;  %8690 = vmatprep.subr.msk.mxu1 %vm1370_vm9, %v12188_v7 }
 0x6a1   :  { %8617 = vmatprep.mubr.f32.mxu0 %v12683_v14  ;;  %v1156_v16 = vmul.f32 %v12683_v14, %v12683_v14  ;;  %vm1265_vm8 = vcmp.eq.s32.totalorder %v1264_v9, 1 }
 0x6a2   :  { %8618 = vmatmul.mubr.f32.vlgmr.msra.gmra.mrb[10].mxu0 %v12680_v13 }
 0x6a3   :  { %8652 = vmatprep.mubr.f32.mxu1 %v1156_v16  ;;  %10616 = vmatpush3.bf16.msra.mxu0 %v10613_v28  ;;  %v1256_v16 = vrot.slane %v12663_v32, %v12473_v39  ;;  %v12752_v32 = vld [vmem:[%s14369_s9 + $0x8] sm:$0x7] }
 0x6a4   :  { %8653 = vmatmul.mubr.f32.vlgmr.msra.gmra.mrb[10].mxu1 %v1157_v18  ;;  %10618 = vmatprep.subr.bf16.mxu0 %v10617_v20 }
 0x6a5   :  { %8691 = vmatpush3.msk.msra.mxu1 %vm1370_vm9, %v12188_v7 }
 0x6a6   :  { %8695 = vmatprep.subr.msk.mxu1 %vm1370_vm9, %v12188_v7 }
 0x6a7   :  { %10620 = vmatpush3.bf16.msra.mxu0 %v10617_v20 }
 0x6a8   :  { %10622 = vmatprep.subr.bf16.mxu0 %v10621_v11 }
 0x6ab   :  { %10624 = vmatpush3.bf16.msra.mxu0 %v10621_v11 }
 0x6ac   :  { %10626 = vmatprep.subr.bf16.mxu0 %v10625_v1 }
 0x6af   :  { %10628 = vmatpush3.bf16.msra.mxu0 %v10625_v1 }
 0x6b0   :  { %10630 = vmatprep.subr.bf16.mxu0 %v10629_v30 }
 0x6b3   :  { %10632 = vmatpush3.bf16.msra.mxu0 %v10629_v30  ;;  %v1558_v30 = vld [vmem:[%s14366_s6] sm:$0xf] }
 0x6b4   :  { %10634 = vmatprep.subr.bf16.mxu0 %v10633_v33 }
 0x6b7   :  { %10636 = vmatpush3.bf16.msra.mxu0 %v10633_v33  ;;  %v88_v33 = vld [vmem:[#allocation5 + $0x8] sm:$0xff] }
 0x6b8   :  { %10638 = vmatprep.subr.bf16.mxu0 %v10637_v42  ;;  %v12777_v34 = vpack.c.bf16 %v88_v33, %v87_v31 }
 0x6bb   :  { %10640 = vmatpush3.bf16.msra.mxu0 %v10637_v42  ;;  %v90_v42 = vld [vmem:[#allocation5 + $0x18] sm:$0xff] }
 0x6bc   :  { %10642 = vmatprep.subr.bf16.mxu0 %v10641_v46  ;;  %v12781_v43 = vpack.c.bf16 %v90_v42, %v89_v36 }
 0x6bf   :  { %10644 = vmatpush3.bf16.msra.mxu0 %v10641_v46  ;;  %v92_v46 = vld [vmem:[#allocation5 + $0x28] sm:$0xff] }
 0x6c0   :  { %10678 = vmatprep.subr.bf16.mxu0 %v12777_v34 }
 0x775   :  { %v8619_v47 = vpop.f32.mrb[10].mxu0 }
 0x776   :  { %v1234_v37 = vmul.f32 %v8619_v47, %v8619_v47  ;;  %v1147_v48 = vpop.f32.mrb[11].mxu0  ;;  %v1240_v61 = vsub.f32 %v12680_v13, %v8619_v47  ;;  %v1260_v13 = vmax.f32 %v12667_v59, 0.0  ;;  %v1287_v59 = vrot.slane %v12752_v32, %v12470_v38 }
 0x777   :  { %v1233_v50 = vmul.f32 %v1147_v48, %v1147_v48  ;;  %v8654_v51 = vpop.f32.mrb[10].mxu1  ;;  %v1239_v8 = vsub.f32 %v12683_v14, %v1147_v48  ;;  %v12785_v47 = vpack.c.bf16 %v92_v46, %v91_v44  ;;  %v94_v48 = vld [vmem:[#allocation5 + $0x38] sm:$0xff] }
 0x778   :  { %v1236_v52 = vsub.f32 %v8654_v51, %v1234_v37  ;;  %v1224_v40 = vpop.f32.mrb[11].mxu1  ;;  %v93_v37 = vld [vmem:[#allocation5 + $0x30] sm:$0xff]  ;;  %v95_v51 = vld [vmem:[#allocation5 + $0x40] sm:$0xff] }
 0x779   :  { %v1235_v6 = vsub.f32 %v1224_v40, %v1233_v50  ;;  %v12789_v50 = vpack.c.bf16 %v94_v48, %v93_v37 }
 0x77a   :  { %v1238_v26 = vmax.f32 %v1236_v52, 0.0  ;;  %v96_v52 = vld [vmem:[#allocation5 + $0x48] sm:$0xff] }
 0x77b   :  { %v1237_v28 = vmax.f32 %v1235_v6, 0.0  ;;  %v12793_v40 = vpack.c.bf16 %v96_v52, %v95_v51  ;;  %v97_v6 = vld [vmem:[#allocation5 + $0x50] sm:$0xff]  ;;  %v1829_v51 = vld [vmem:[%s14367_s7] sm:$0xff] }
 0x77c   :  { %v1242_v56 = vadd.f32 1e-05, %v1238_v26  ;;  %v98_v26 = vld [vmem:[#allocation5 + $0x58] sm:$0xff] }
 0x77d   :  { %v1241_v58 = vadd.f32 1e-05, %v1237_v28  ;;  %v12797_v28 = vpack.c.bf16 %v98_v26, %v97_v6 }
 0x77e   :  { %11912 = vrsqrt.f32 %v1242_v56  ;;  %v99_v56 = vld [vmem:[#allocation5 + $0x60] sm:$0xff] }
 0x77f   :  { %11914 = vrsqrt.f32 %v1241_v58  ;;  %v100_v58 = vld [vmem:[#allocation5 + $0x68] sm:$0xff] }
 0x788   :  { %v11913_v3 = vpop.eup %11912 }
 0x789   :  { %v11915_v12 = vpop.eup %11914  ;;  %v1246_v18 = vmul.f32 %v11913_v3, %v1240_v61  ;;  %v12801_v61 = vpack.c.bf16 %v100_v58, %v99_v56  ;;  %v102_v3 = vld [vmem:[#allocation5 + $0x78] sm:$0xff] }
 0x78a   :  { %v1245_v10 = vmul.f32 %v11915_v12, %v1239_v8 }
 0x78b   :  { %v1252_v19 = vmul.f32 %v1250_v2, %v1246_v18 }
 0x78c   :  { %v1251_v20 = vmul.f32 %v1250_v2, %v1245_v10  ;;  %v101_v2 = vld [vmem:[#allocation5 + $0x70] sm:$0xff] }
 0x78d   :  { %v1258_v21 = vadd.f32 %v1256_v16, %v1252_v19  ;;  %v12805_v8 = vpack.c.bf16 %v102_v3, %v101_v2 }
 0x78e   :  { %v1257_v11 = vadd.f32 %v1256_v16, %v1251_v20 }
 0x78f   :  { %v1267_v60 = vsel %vm1265_vm8, %v1260_v13, %v1258_v21 }
 0x790   :  { %v1266_v14 = vsel %vm1265_vm8, %v1259_v22, %v1257_v11 }
 0x791   :  { %8687 = vmatprep.mubr.f32.mxu0 %v1266_v14 }
 0x792   :  { %8688 = vmatmul.mubr.f32.vlgmr.msra.gmra.mrb[12].mxu0 %v1267_v60 }
 0x793   :  { %10680 = vmatpush3.bf16.msra.mxu0 %v12777_v34 }
 0x794   :  { %10682 = vmatprep.subr.bf16.mxu0 %v12781_v43 }
 0x797   :  { %10684 = vmatpush3.bf16.msra.mxu0 %v12781_v43 }
 0x798   :  { %10686 = vmatprep.subr.bf16.mxu0 %v12785_v47 }
 0x79b   :  { %10688 = vmatpush3.bf16.msra.mxu0 %v12785_v47 }
 0x79c   :  { %10690 = vmatprep.subr.bf16.mxu0 %v12789_v50 }
 0x79f   :  { %10692 = vmatpush3.bf16.msra.mxu0 %v12789_v50 }
 0x7a0   :  { %10694 = vmatprep.subr.bf16.mxu0 %v12793_v40 }
 0x7a3   :  { %10696 = vmatpush3.bf16.msra.mxu0 %v12793_v40 }
 0x7a4   :  { %10698 = vmatprep.subr.bf16.mxu0 %v12797_v28 }
 0x7a7   :  { %10700 = vmatpush3.bf16.msra.mxu0 %v12797_v28 }
 0x7a8   :  { %10702 = vmatprep.subr.bf16.mxu0 %v12801_v61 }
 0x7ab   :  { %10704 = vmatpush3.bf16.msra.mxu0 %v12801_v61 }
 0x7ac   :  { %10706 = vmatprep.subr.bf16.mxu0 %v12805_v8 }
 0x7af   :  { %10708 = vmatpush3.bf16.msra.mxu0 %v12805_v8 }
 0x7b0   :  { %10746 = vmatprep.subr.bf16.mxu0 %v12777_v34 }
 0x865   :  { %v8689_v0 = vpop.f32.mrb[12].mxu0 }
 0x866   :  { %v1354_v63 = vpop.f32.mrb[13].mxu0  ;;  %v12758_v24 = vadd.f32 %v8689_v0, %v1287_v59 }
 0x867   :  { %v12756_v1 = vadd.f32 %v1354_v63, %v1287_v59  ;;  %v12815_v59 = vld [vmem:[%s14369_s9] sm:$0xff] }
 0x868   :  { %v1450_v27 = vmul.f32 %v12758_v24, %v12758_v24  ;;  %v1549_v0 = vrot.slane %v12815_v59, %v12518_v4  ;;  %v1555_v33 = vrot.slane %v12815_v59, %v12554_v62 }
 0x869   :  { %v1449_v25 = vmul.f32 %v12756_v1, %v12756_v1  ;;  %8692 = vmatprep.mubr.msk.f32.mxu1 %vm1363_vm10, %v12756_v1 }
 0x86a   :  { %8693 = vmatmul.mubr.msk.f32.vlgmr.msra.gmra.mrb[12].mxu1 %vm1363_vm10, %v12758_v24 }
 0x86b   :  { %8696 = vmatpush3.msk.msra.mxu1 %vm1370_vm9, %v12188_v7  ;;  %8697 = vmatprep.mubr.msk.f32.mxu1 %vm1363_vm10, %v1449_v25 }
 0x86c   :  { %8700 = vmatprep.subr.msk.mxu1 %vm1370_vm9, %v1558_v30 }
 0x86e   :  { %8698 = vmatmul.mubr.msk.f32.vlgmr.msra.gmra.mrb[14].mxu1 %vm1363_vm10, %v1450_v27 }
 0x86f   :  { %8701 = vmatpush3.msk.msra.mxu1 %vm1370_vm9, %v1558_v30 }
 0x870   :  { %10646 = vmatprep.subr.bf16.mxu1 %v12777_v34 }
 0x93d   :  { %v8694_v9 = vpop.f32.mrb[12].mxu1 }
 0x93e   :  { %v1440_v12 = vpop.f32.mrb[13].mxu1  ;;  %v1533_v16 = vmul.f32 %v8694_v9, %v8694_v9  ;;  %v1539_v14 = vsub.f32 %v12758_v24, %v8694_v9 }
 0x93f   :  { %v1532_v18 = vmul.f32 %v1440_v12, %v1440_v12  ;;  %v1538_v25 = vsub.f32 %v12756_v1, %v1440_v12 }
 0x941   :  { %v8699_v10 = vpop.f32.mrb[14].mxu1 }
 0x942   :  { %v1535_v19 = vsub.f32 %v8699_v10, %v1533_v16  ;;  %v1523_v20 = vpop.f32.mrb[15].mxu1 }
 0x943   :  { %v1534_v13 = vsub.f32 %v1523_v20, %v1532_v18 }
 0x944   :  { %v1537_v21 = vmax.f32 %v1535_v19, 0.0 }
 0x945   :  { %v1536_v22 = vmax.f32 %v1534_v13, 0.0  ;;  %v12860_v13 = vsub.s32 5, %v12431_v54 }
 0x946   :  { %v1541_v11 = vadd.f32 1e-05, %v1537_v21  ;;  %v12863_v21 = vsub.s32 6, %v12431_v54 }
 0x947   :  { %v1540_v60 = vadd.f32 1e-05, %v1536_v22  ;;  %v1812_v22 = vrot.slane %v12815_v59, %v12860_v13 }
 0x948   :  { %11916 = vrsqrt.f32 %v1541_v11 }
 0x949   :  { %11918 = vrsqrt.f32 %v1540_v60 }
 0x952   :  { %v11917_v63 = vpop.eup %11916 }
 0x953   :  { %v11919_v27 = vpop.eup %11918  ;;  %v1545_v30 = vmul.f32 %v11917_v63, %v1539_v14  ;;  %v1824_v14 = vrot.slane %v12752_v32, %v12473_v39  ;;  %v1818_v63 = vrot.slane %v12815_v59, %v12863_v21 }
 0x954   :  { %v1544_v31 = vmul.f32 %v11919_v27, %v1538_v25 }
 0x955   :  { %v1551_v36 = vmul.f32 %v1549_v0, %v1545_v30 }
 0x956   :  { %v1550_v42 = vmul.f32 %v1549_v0, %v1544_v31 }
 0x957   :  { %v1557_v44 = vadd.f32 %v1555_v33, %v1551_v36 }
 0x958   :  { %v1556_v24 = vadd.f32 %v1555_v33, %v1550_v42  ;;  %v1826_v33 = vmul.f32 %v1824_v14, %v12483_v57  ;;  %v1825_v42 = vmul.f32 %v1824_v14, %v12481_v53  ;;  %v1832_v53 = vld [vmem:[%s14367_s7 + $0x18] sm:$0xff]  ;;  %v7068_v57 = vld [vmem:[%s14361_s1 + $0x80] sm:$0xff] }
 0x95a   :  { %8702 = vmatprep.mubr.msk.f32.mxu1 %vm1363_vm10, %v1556_v24 }
 0x95b   :  { %8703 = vmatmul.mubr.msk.f32.vlgmr.msra.gmra.mrb[16].mxu1 %vm1363_vm10, %v1557_v44 }
 0x95c   :  { %10648 = vmatpush3.bf16.msra.mxu1 %v12777_v34 }
 0x95d   :  { %10650 = vmatprep.subr.bf16.mxu1 %v12781_v43 }
 0x960   :  { %10652 = vmatpush3.bf16.msra.mxu1 %v12781_v43 }
 0x961   :  { %10654 = vmatprep.subr.bf16.mxu1 %v12785_v47 }
 0x964   :  { %10656 = vmatpush3.bf16.msra.mxu1 %v12785_v47 }
 0x965   :  { %10658 = vmatprep.subr.bf16.mxu1 %v12789_v50 }
 0x968   :  { %10660 = vmatpush3.bf16.msra.mxu1 %v12789_v50 }
 0x969   :  { %10662 = vmatprep.subr.bf16.mxu1 %v12793_v40 }
 0x96c   :  { %10664 = vmatpush3.bf16.msra.mxu1 %v12793_v40 }
 0x96d   :  { %10666 = vmatprep.subr.bf16.mxu1 %v12797_v28 }
 0x970   :  { %10668 = vmatpush3.bf16.msra.mxu1 %v12797_v28 }
 0x971   :  { %10670 = vmatprep.subr.bf16.mxu1 %v12801_v61 }
 0x974   :  { %10672 = vmatpush3.bf16.msra.mxu1 %v12801_v61 }
 0x975   :  { %10674 = vmatprep.subr.bf16.mxu1 %v12805_v8 }
 0x978   :  { %10676 = vmatpush3.bf16.msra.mxu1 %v12805_v8 }
 0xa2e   :  { %v8704_v1 = vpop.f32.mrb[16].mxu1 }
 0xa2f   :  { %v1634_v46 = vpop.f32.mrb[17].mxu1  ;;  %v1719_v48 = vmul.f32 %v8704_v1, %v8704_v1 }
 0xa30   :  { %v1718_v37 = vmul.f32 %v1634_v46, %v1634_v46  ;;  %8737 = vmatprep.mubr.f32.mxu1 %v1634_v46 }
 0xa31   :  { %8738 = vmatmul.mubr.f32.vlgmr.msra.gmra.mrb[18].mxu1 %v8704_v1 }
 0xa32   :  { %8772 = vmatprep.mubr.f32.mxu0 %v1718_v37  ;;  %8779 = vmatprep.mubr.msk.f32.mxu1 %vm1833_vm11, %v1829_v51  ;;  %v1831_v37 = vld [vmem:[%s14367_s7 + $0x10] sm:$0xff] }
 0xa33   :  { %8773 = vmatmul.mubr.f32.vlgmr.msra.gmra.mrb[14].mxu0 %v1719_v48 }
 0xa34   :  { %10748 = vmatpush3.bf16.msra.mxu0 %v12777_v34 }
 0xa35   :  { %10750 = vmatprep.subr.bf16.mxu0 %v12781_v43 }
 0xa38   :  { %10752 = vmatpush3.bf16.msra.mxu0 %v12781_v43 }
 0xa39   :  { %10754 = vmatprep.subr.bf16.mxu0 %v12785_v47 }
 0xa3c   :  { %10756 = vmatpush3.bf16.msra.mxu0 %v12785_v47 }
 0xa3d   :  { %10758 = vmatprep.subr.bf16.mxu0 %v12789_v50 }
 0xa40   :  { %10760 = vmatpush3.bf16.msra.mxu0 %v12789_v50 }
 0xa41   :  { %10762 = vmatprep.subr.bf16.mxu0 %v12793_v40 }
 0xa44   :  { %10764 = vmatpush3.bf16.msra.mxu0 %v12793_v40 }
 0xa45   :  { %10766 = vmatprep.subr.bf16.mxu0 %v12797_v28 }
 0xa48   :  { %10768 = vmatpush3.bf16.msra.mxu0 %v12797_v28 }
 0xa49   :  { %10770 = vmatprep.subr.bf16.mxu0 %v12801_v61 }
 0xa4c   :  { %10772 = vmatpush3.bf16.msra.mxu0 %v12801_v61 }
 0xa4d   :  { %10774 = vmatprep.subr.bf16.mxu0 %v12805_v8 }
 0xa50   :  { %10776 = vmatpush3.bf16.msra.mxu0 %v12805_v8 }
 0xa51   :  { %10810 = vmatprep.subr.bf16.mxu0 %v12316_v15 }
 0xb04   :  { %v8739_v52 = vpop.f32.mrb[18].mxu1 }
 0xb05   :  { %v1796_v6 = vmul.f32 %v8739_v52, %v8739_v52  ;;  %v1802_v26 = vsub.f32 %v8704_v1, %v8739_v52  ;;  %v1709_v56 = vpop.f32.mrb[19].mxu1  ;;  %v7070_v52 = vld [vmem:[%s14361_s1 + $0x90] sm:$0xff] }
 0xb06   :  { %v1795_v58 = vmul.f32 %v1709_v56, %v1709_v56  ;;  %v1801_v2 = vsub.f32 %v1634_v46, %v1709_v56  ;;  %v8774_v3 = vpop.f32.mrb[14].mxu0  ;;  %v1830_v46 = vld [vmem:[%s14367_s7 + $0x8] sm:$0xff]  ;;  %v7072_v56 = vld [vmem:[%s14361_s1 + $0xa0] sm:$0xff] }
 0xb07   :  { %v1798_v9 = vsub.f32 %v8774_v3, %v1796_v6  ;;  %v1786_v12 = vpop.f32.mrb[15].mxu0  ;;  %v7071_v6 = vld [vmem:[%s14361_s1 + $0x98] sm:$0xff]  ;;  %v7074_v3 = vld [vmem:[%s14361_s1 + $0xb0] sm:$0xff] }
 0xb08   :  { %v1797_v16 = vsub.f32 %v1786_v12, %v1795_v58  ;;  %v7073_v58 = vld [vmem:[%s14361_s1 + $0xa8] sm:$0xff] }
 0xb09   :  { %v1800_v18 = vmax.f32 %v1798_v9, 0.0  ;;  %v7075_v9 = vld [vmem:[%s14361_s1 + $0xb8] sm:$0xff] }
 0xb0a   :  { %v1799_v10 = vmax.f32 %v1797_v16, 0.0  ;;  %v10789_v12 = vpack.c.bf16 %v7075_v9, %v7074_v3  ;;  %v7076_v16 = vld [vmem:[%s14361_s1 + $0xc0] sm:$0xff] }
 0xb0b   :  { %v1804_v19 = vadd.f32 1e-05, %v1800_v18  ;;  %v7077_v18 = vld [vmem:[%s14361_s1 + $0xc8] sm:$0xff] }
 0xb0c   :  { %v1803_v20 = vadd.f32 1e-05, %v1799_v10  ;;  %v10793_v10 = vpack.c.bf16 %v7077_v18, %v7076_v16  ;;  %v2144_v18 = vrot.slane %v12752_v32, %v12434_v55 }
 0xb0d   :  { %11920 = vrsqrt.f32 %v1804_v19  ;;  %v7078_v19 = vld [vmem:[%s14361_s1 + $0xd0] sm:$0xff] }
 0xb0e   :  { %11922 = vrsqrt.f32 %v1803_v20  ;;  %v7079_v20 = vld [vmem:[%s14361_s1 + $0xd8] sm:$0xff] }
 0xb17   :  { %v11921_v11 = vpop.eup %11920 }
 0xb18   :  { %v11923_v60 = vpop.eup %11922  ;;  %v1808_v0 = vmul.f32 %v11921_v11, %v1802_v26  ;;  %v10781_v26 = vpack.c.bf16 %v7071_v6, %v7070_v52  ;;  %v7080_v11 = vld [vmem:[%s14361_s1 + $0xe0] sm:$0xff] }
 0xb19   :  { %v1807_v25 = vmul.f32 %v11923_v60, %v1801_v2  ;;  %v10785_v2 = vpack.c.bf16 %v7073_v58, %v7072_v56  ;;  %v7081_v60 = vld [vmem:[%s14361_s1 + $0xe8] sm:$0xff] }
 0xb1a   :  { %v1814_v27 = vmul.f32 %v1812_v22, %v1808_v0  ;;  %v10801_v14 = vpack.c.bf16 %v7081_v60, %v7080_v11  ;;  %v7082_v0 = vld [vmem:[%s14361_s1 + $0xf0] sm:$0xff] }
 0xb1b   :  { %v1813_v30 = vmul.f32 %v1812_v22, %v1807_v25  ;;  %v10797_v22 = vpack.c.bf16 %v7079_v20, %v7078_v19 }
 0xb1c   :  { %v1820_v31 = vadd.f32 %v1818_v63, %v1814_v27 }
 0xb1d   :  { %v1819_v36 = vadd.f32 %v1818_v63, %v1813_v30  ;;  %v7083_v63 = vld [vmem:[%s14361_s1 + $0xf8] sm:$0xff] }
 0xb1e   :  { %v1828_v24 = vadd.f32 %v1826_v33, %v1820_v31  ;;  %v10805_v25 = vpack.c.bf16 %v7083_v63, %v7082_v0 }
 0xb1f   :  { %v1827_v44 = vadd.f32 %v1825_v42, %v1819_v36 }
 0xb21   :  { %v10709_v1 = vpack.c.bf16 %v1828_v24, %v1827_v44 }
 0xb23   :  { %10710 = vmatprep.subr.bf16.mxu1 %v10709_v1 }
 0xb24   :  { %10712 = vmatpush3.bf16.msra.mxu1 %v10709_v1 }
 0xb25   :  { %10714 = vmatprep.subr.bf16.mxu1 %v12777_v34 }
 0xb27   :  { %8780 = vmatmul.mubr.msk.f32.vlgmr.msra.gmra.mrb[20].mxu1 %vm1833_vm11, %v1830_v46 }
 0xb28   :  { %8782 = vmatprep.mubr.msk.f32.mxu1 %vm1833_vm11, %v1831_v37  ;;  %10716 = vmatpush3.bf16.msra.mxu1 %v12777_v34  ;;  %v7069_v34 = vld [vmem:[%s14361_s1 + $0x88] sm:$0xff] }
 0xb29   :  { %10718 = vmatprep.subr.bf16.mxu1 %v12781_v43 }
 0xb2b   :  { %8783 = vmatmul.mubr.msk.f32.gmra.mrb[22].mxu1 %vm1833_vm11, %v1832_v53 }
 0xb2c   :  { %10720 = vmatpush3.bf16.msra.mxu1 %v12781_v43  ;;  %v10777_v43 = vpack.c.bf16 %v7069_v34, %v7068_v57 }
 0xb2d   :  { %10722 = vmatprep.subr.bf16.mxu1 %v12785_v47 }
 0xb30   :  { %10724 = vmatpush3.bf16.msra.mxu1 %v12785_v47 }
 0xb31   :  { %10726 = vmatprep.subr.bf16.mxu1 %v12789_v50 }
 0xb34   :  { %10728 = vmatpush3.bf16.msra.mxu1 %v12789_v50 }
 0xb35   :  { %10730 = vmatprep.subr.bf16.mxu1 %v12793_v40 }
 0xb38   :  { %10732 = vmatpush3.bf16.msra.mxu1 %v12793_v40 }
 0xb39   :  { %10734 = vmatprep.subr.bf16.mxu1 %v12797_v28 }
 0xb3c   :  { %10736 = vmatpush3.bf16.msra.mxu1 %v12797_v28 }
 0xb3d   :  { %10738 = vmatprep.subr.bf16.mxu1 %v12801_v61 }
 0xb40   :  { %10740 = vmatpush3.bf16.msra.mxu1 %v12801_v61 }
 0xb41   :  { %10742 = vmatprep.subr.bf16.mxu1 %v12805_v8 }
 0xb44   :  { %10744 = vmatpush3.bf16.msra.mxu1 %v12805_v8 }
 0xb45   :  { %10778 = vmatprep.subr.bf16.mxu1 %v10777_v43 }
 0xbfa   :  { %v12907_v47 = vpop.f32.mrb[20].mxu1 }
 0xbfb   :  { %v12909_v50 = vpop.f32.mrb[21].mxu1  ;;  %v2017_v28 = vmul.f32 %v12907_v47, %v12907_v47 }
 0xbfc   :  { %v2016_v40 = vmul.f32 %v12909_v50, %v12909_v50  ;;  %8817 = vmatprep.mubr.f32.mxu1 %v12909_v50 }
 0xbfd   :  { %8818 = vmatmul.mubr.f32.vlgmr.msra.gmra.mrb[24].mxu1 %v12907_v47 }
 0xbfe   :  { %v12917_v61 = vpop.f32.mrb[22].mxu1  ;;  %8855 = vmatprep.mubr.f32.mxu0 %v2016_v40  ;;  %10780 = vmatpush3.bf16.msra.mxu1 %v10777_v43 }
 0xbff   :  { %v12919_v8 = vpop.f32.mrb[23].mxu1  ;;  %8856 = vmatmul.mubr.f32.vlgmr.msra.gmra.mrb[16].mxu0 %v2017_v28  ;;  %v2019_v51 = vmul.f32 %v12917_v61, %v12917_v61  ;;  %10782 = vmatprep.subr.bf16.mxu1 %v10781_v26 }
 0xc00   :  { %v2018_v48 = vmul.f32 %v12919_v8, %v12919_v8  ;;  %8820 = vmatprep.mubr.f32.mxu1 %v12919_v8  ;;  %10812 = vmatpush3.bf16.msra.mxu0 %v12316_v15 }
 0xc01   :  { %8821 = vmatmul.mubr.f32.gmra.mrb[26].mxu1 %v12917_v61  ;;  %10814 = vmatprep.subr.bf16.mxu0 %v12321_v17 }
 0xc02   :  { %8858 = vmatprep.mubr.f32.mxu0 %v2018_v48  ;;  %10784 = vmatpush3.bf16.msra.mxu1 %v10781_v26 }
 0xc03   :  { %8859 = vmatmul.mubr.f32.gmra.mrb[18].mxu0 %v2019_v51  ;;  %10786 = vmatprep.subr.bf16.mxu1 %v10785_v2 }
 0xc04   :  { %10816 = vmatpush3.bf16.msra.mxu0 %v12321_v17 }
 0xc05   :  { %10818 = vmatprep.subr.bf16.mxu0 %v12338_v23 }
 0xc06   :  { %10788 = vmatpush3.bf16.msra.mxu1 %v10785_v2 }
 0xc07   :  { %10790 = vmatprep.subr.bf16.mxu1 %v10789_v12 }
 0xc08   :  { %10820 = vmatpush3.bf16.msra.mxu0 %v12338_v23 }
 0xc09   :  { %10822 = vmatprep.subr.bf16.mxu0 %v12354_v29 }
 0xc0a   :  { %10792 = vmatpush3.bf16.msra.mxu1 %v10789_v12 }
 0xc0b   :  { %10794 = vmatprep.subr.bf16.mxu1 %v10793_v10 }
 0xc0c   :  { %10824 = vmatpush3.bf16.msra.mxu0 %v12354_v29 }
 0xc0d   :  { %10826 = vmatprep.subr.bf16.mxu0 %v12370_v35 }
 0xc0e   :  { %10796 = vmatpush3.bf16.msra.mxu1 %v10793_v10 }
 0xc0f   :  { %10798 = vmatprep.subr.bf16.mxu1 %v10797_v22 }
 0xc10   :  { %10828 = vmatpush3.bf16.msra.mxu0 %v12370_v35 }
 0xc11   :  { %10830 = vmatprep.subr.bf16.mxu0 %v12386_v41 }
 0xc12   :  { %10800 = vmatpush3.bf16.msra.mxu1 %v10797_v22 }
 0xc13   :  { %10802 = vmatprep.subr.bf16.mxu1 %v10801_v14 }
 0xc14   :  { %10832 = vmatpush3.bf16.msra.mxu0 %v12386_v41 }
 0xc15   :  { %10834 = vmatprep.subr.bf16.mxu0 %v12396_v45 }
 0xc16   :  { %10804 = vmatpush3.bf16.msra.mxu1 %v10801_v14 }
 0xc17   :  { %10806 = vmatprep.subr.bf16.mxu1 %v10805_v25 }
 0xc18   :  { %10836 = vmatpush3.bf16.msra.mxu0 %v12396_v45 }
 0xc19   :  { %10838 = vmatprep.subr.bf16.mxu0 %v12424_v49 }
 0xc1a   :  { %10808 = vmatpush3.bf16.msra.mxu1 %v10805_v25 }
 0xc1b   :  { %10842 = vmatprep.subr.bf16.mxu1 %v12316_v15 }
 0xc1c   :  { %10840 = vmatpush3.bf16.msra.mxu0 %v12424_v49 }
 0xcd0   :  { %v8819_v27 = vpop.f32.mrb[24].mxu1 }
 0xcd1   :  { %v2106_v30 = vmul.f32 %v8819_v27, %v8819_v27  ;;  %v2118_v31 = vsub.f32 %v12907_v47, %v8819_v27  ;;  %v1997_v33 = vpop.f32.mrb[25].mxu1  ;;  %v2504_v27 = vld [vmem:[#allocation2 + $0x180] sm:$0xff] }
 0xcd2   :  { %v2105_v36 = vmul.f32 %v1997_v33, %v1997_v33  ;;  %v2117_v42 = vsub.f32 %v12909_v50, %v1997_v33  ;;  %v8857_v24 = vpop.f32.mrb[16].mxu0  ;;  %v13027_v33 = vld [vmem:[%s14369_s9 + $0x10] sm:$0xff] }
 0xcd3   :  { %v2110_v44 = vsub.f32 %v8857_v24, %v2106_v30  ;;  %v2086_v1 = vpop.f32.mrb[17].mxu0  ;;  %v2505_v30 = vld [vmem:[#allocation2 + $0x188] sm:$0xff] }
 0xcd4   :  { %v2109_v46 = vsub.f32 %v2086_v1, %v2105_v36  ;;  %v8822_v37 = vpop.f32.mrb[26].mxu1  ;;  %v2197_v36 = vrot.slane %v13027_v33, %v12434_v55 }
 0xcd5   :  { %v2114_v53 = vmax.f32 %v2110_v44, 0.0  ;;  %v2108_v57 = vmul.f32 %v8822_v37, %v8822_v37  ;;  %v2120_v34 = vsub.f32 %v12917_v61, %v8822_v37  ;;  %v2007_v43 = vpop.f32.mrb[27].mxu1  ;;  %v12990_v61 = vsub.s32 7, %v12431_v54 }
 0xcd6   :  { %v2113_v40 = vmax.f32 %v2109_v46, 0.0  ;;  %v2107_v28 = vmul.f32 %v2007_v43, %v2007_v43  ;;  %v2119_v48 = vsub.f32 %v12919_v8, %v2007_v43  ;;  %v8860_v51 = vpop.f32.mrb[18].mxu0 }
 0xcd7   :  { %v2122_v47 = vadd.f32 1e-05, %v2114_v53  ;;  %v2112_v52 = vsub.f32 %v8860_v51, %v2108_v57  ;;  %v2096_v6 = vpop.f32.mrb[19].mxu0  ;;  %v2136_v8 = vrot.slane %v12815_v59, %v12990_v61  ;;  %v2507_v51 = vld [vmem:[#allocation2 + $0x198] sm:$0xff] }
 0xcd8   :  { %v2121_v26 = vadd.f32 1e-05, %v2113_v40  ;;  %v2111_v50 = vsub.f32 %v2096_v6, %v2107_v28  ;;  %v2509_v6 = vld [vmem:[#allocation2 + $0x1a8] sm:$0xff] }
 0xcd9   :  { %11924 = vrsqrt.f32 %v2122_v47  ;;  %v2116_v56 = vmax.f32 %v2112_v52, 0.0  ;;  %v2508_v52 = vld [vmem:[#allocation2 + $0x1a0] sm:$0xff] }
 0xcda   :  { %11926 = vrsqrt.f32 %v2121_v26  ;;  %v2115_v58 = vmax.f32 %v2111_v50, 0.0  ;;  %v10881_v26 = vpack.c.bf16 %v2509_v6, %v2508_v52  ;;  %v2510_v50 = vld [vmem:[#allocation2 + $0x1b0] sm:$0xff] }
 0xcdb   :  { %v2124_v2 = vadd.f32 1e-05, %v2116_v56  ;;  %v2511_v56 = vld [vmem:[#allocation2 + $0x1b8] sm:$0xff] }
 0xcdc   :  { %v2123_v3 = vadd.f32 1e-05, %v2115_v58  ;;  %v10885_v58 = vpack.c.bf16 %v2511_v56, %v2510_v50 }
 0xcdd   :  { %11928 = vrsqrt.f32 %v2124_v2  ;;  %v2512_v2 = vld [vmem:[#allocation2 + $0x1c0] sm:$0xff] }
 0xcde   :  { %11930 = vrsqrt.f32 %v2123_v3  ;;  %v2513_v3 = vld [vmem:[#allocation2 + $0x1c8] sm:$0xff] }
 0xce3   :  { %v11925_v9 = vpop.eup %11924 }
 0xce4   :  { %v11927_v12 = vpop.eup %11926  ;;  %v2130_v16 = vmul.f32 %v11925_v9, %v2118_v31  ;;  %v10873_v31 = vpack.c.bf16 %v2505_v30, %v2504_v27  ;;  %v2514_v9 = vld [vmem:[#allocation2 + $0x1d0] sm:$0xff] }
 0xce5   :  { %v2129_v10 = vmul.f32 %v11927_v12, %v2117_v42  ;;  %v2515_v12 = vld [vmem:[#allocation2 + $0x1d8] sm:$0xff] }
 0xce6   :  { %v2138_v19 = vmul.f32 %v2136_v8, %v2130_v16  ;;  %10874 = vmatprep.subr.bf16.mxu0 %v10873_v31  ;;  %v10893_v16 = vpack.c.bf16 %v2515_v12, %v2514_v9 }
 0xce7   :  { %v11929_v20 = vpop.eup %11928  ;;  %v2137_v22 = vmul.f32 %v2136_v8, %v2129_v10  ;;  %v2517_v10 = vld [vmem:[#allocation2 + $0x1e8] sm:$0xff] }
 0xce8   :  { %v11931_v11 = vpop.eup %11930  ;;  %v2132_v60 = vmul.f32 %v11929_v20, %v2120_v34  ;;  %v12998_v54 = vadd.f32 %v2144_v18, %v2138_v19  ;;  %v2518_v20 = vld [vmem:[#allocation2 + $0x1f0] sm:$0xff] }
 0xce9   :  { %v12996_v14 = vadd.f32 %v2144_v18, %v2137_v22  ;;  %v2131_v0 = vmul.f32 %v11931_v11, %v2119_v48  ;;  %v2506_v48 = vld [vmem:[#allocation2 + $0x190] sm:$0xff]  ;;  %v2519_v22 = vld [vmem:[#allocation2 + $0x1f8] sm:$0xff] }
 0xcea   :  { %v2140_v63 = vmul.f32 %v2136_v8, %v2132_v60  ;;  %v10877_v47 = vpack.c.bf16 %v2507_v51, %v2506_v48  ;;  %v10901_v11 = vpack.c.bf16 %v2519_v22, %v2518_v20 }
 0xceb   :  { %8893 = vmatprep.mubr.f32.mxu1 %v12996_v14  ;;  %v2139_v59 = vmul.f32 %v2136_v8, %v2131_v0  ;;  %v10889_v8 = vpack.c.bf16 %v2513_v3, %v2512_v2  ;;  %v2488_v2 = vrot.slane %v13027_v33, %v12470_v38 }
 0xcec   :  { %8894 = vmatmul.mubr.f32.vlgmr.msra.gmra.mrb[28].mxu1 %v12998_v54  ;;  %v13005_v32 = vadd.f32 %v2144_v18, %v2140_v63 }
 0xced   :  { %v13002_v25 = vadd.f32 %v2144_v18, %v2139_v59  ;;  %10844 = vmatpush3.bf16.msra.mxu1 %v12316_v15  ;;  %v2516_v18 = vld [vmem:[#allocation2 + $0x1e0] sm:$0xff] }
 0xcee   :  { %10846 = vmatprep.subr.bf16.mxu1 %v12321_v17  ;;  %v10897_v19 = vpack.c.bf16 %v2517_v10, %v2516_v18  ;;  %v2496_v18 = vrot.slane %v13027_v33, %v12473_v39 }
 0xcef   :  { %8896 = vmatprep.mubr.f32.mxu1 %v13002_v25 }
 0xcf0   :  { %8897 = vmatmul.mubr.f32.gmra.mrb[30].mxu1 %v13005_v32 }
 0xcf1   :  { %10848 = vmatpush3.bf16.msra.mxu1 %v12321_v17 }
 0xcf2   :  { %10850 = vmatprep.subr.bf16.mxu1 %v12338_v23 }
 0xcf5   :  { %10852 = vmatpush3.bf16.msra.mxu1 %v12338_v23 }
 0xcf6   :  { %10854 = vmatprep.subr.bf16.mxu1 %v12354_v29 }
 0xcf9   :  { %10856 = vmatpush3.bf16.msra.mxu1 %v12354_v29 }
 0xcfa   :  { %10858 = vmatprep.subr.bf16.mxu1 %v12370_v35 }
 0xcfd   :  { %10860 = vmatpush3.bf16.msra.mxu1 %v12370_v35 }
 0xcfe   :  { %10862 = vmatprep.subr.bf16.mxu1 %v12386_v41 }
 0xd01   :  { %10864 = vmatpush3.bf16.msra.mxu1 %v12386_v41 }
 0xd02   :  { %10866 = vmatprep.subr.bf16.mxu1 %v12396_v45 }
 0xd05   :  { %10868 = vmatpush3.bf16.msra.mxu1 %v12396_v45 }
 0xd06   :  { %10870 = vmatprep.subr.bf16.mxu1 %v12424_v49 }
 0xd09   :  { %10872 = vmatpush3.bf16.msra.mxu1 %v12424_v49 }
 0xd0a   :  { %10906 = vmatprep.subr.bf16.mxu1 %v12316_v15 }
 0xdbf   :  { %v8895_v42 = vpop.f32.mrb[28].mxu1 }
 0xdc0   :  { %v13031_v24 = vadd.f32 %v8895_v42, %v2197_v36  ;;  %v2264_v44 = vpop.f32.mrb[29].mxu1 }
 0xdc1   :  { %v13033_v1 = vadd.f32 %v2264_v44, %v2197_v36 }
 0xdc2   :  { %v2369_v53 = vmul.f32 %v13031_v24, %v13031_v24 }
 0xdc3   :  { %v8898_v46 = vpop.f32.mrb[30].mxu1  ;;  %8931 = vmatprep.mubr.f32.mxu0 %v13033_v1  ;;  %v2368_v37 = vmul.f32 %v13033_v1, %v13033_v1 }
 0xdc4   :  { %v13040_v57 = vadd.f32 %v8898_v46, %v2197_v36  ;;  %v2274_v34 = vpop.f32.mrb[31].mxu1  ;;  %8932 = vmatmul.mubr.f32.vlgmr.msra.gmra.mrb[20].mxu0 %v13031_v24 }
 0xdc5   :  { %v13043_v43 = vadd.f32 %v2274_v34, %v2197_v36  ;;  %8969 = vmatprep.mubr.f32.mxu1 %v2368_v37  ;;  %10876 = vmatpush3.bf16.msra.mxu0 %v10873_v31 }
 0xdc6   :  { %8970 = vmatmul.mubr.f32.vlgmr.msra.gmra.mrb[32].mxu1 %v2369_v53  ;;  %v2371_v28 = vmul.f32 %v13040_v57, %v13040_v57  ;;  %10878 = vmatprep.subr.bf16.mxu0 %v10877_v47 }
 0xdc7   :  { %8934 = vmatprep.mubr.f32.mxu0 %v13043_v43  ;;  %v2370_v40 = vmul.f32 %v13043_v43, %v13043_v43  ;;  %10908 = vmatpush3.bf16.msra.mxu1 %v12316_v15 }
 0xdc8   :  { %8935 = vmatmul.mubr.f32.gmra.mrb[22].mxu0 %v13040_v57  ;;  %10910 = vmatprep.subr.bf16.mxu1 %v12321_v17 }
 0xdc9   :  { %8972 = vmatprep.mubr.f32.mxu1 %v2370_v40  ;;  %10880 = vmatpush3.bf16.msra.mxu0 %v10877_v47 }
 0xdca   :  { %8973 = vmatmul.mubr.f32.gmra.mrb[34].mxu1 %v2371_v28  ;;  %10882 = vmatprep.subr.bf16.mxu0 %v10881_v26 }
 0xdcb   :  { %10912 = vmatpush3.bf16.msra.mxu1 %v12321_v17 }
 0xdcc   :  { %10914 = vmatprep.subr.bf16.mxu1 %v12338_v23 }
 0xdcd   :  { %10884 = vmatpush3.bf16.msra.mxu0 %v10881_v26 }
 0xdce   :  { %10886 = vmatprep.subr.bf16.mxu0 %v10885_v58 }
 0xdcf   :  { %10916 = vmatpush3.bf16.msra.mxu1 %v12338_v23 }
 0xdd0   :  { %10918 = vmatprep.subr.bf16.mxu1 %v12354_v29 }
 0xdd1   :  { %10888 = vmatpush3.bf16.msra.mxu0 %v10885_v58 }
 0xdd2   :  { %10890 = vmatprep.subr.bf16.mxu0 %v10889_v8 }
 0xdd3   :  { %10920 = vmatpush3.bf16.msra.mxu1 %v12354_v29 }
 0xdd4   :  { %10922 = vmatprep.subr.bf16.mxu1 %v12370_v35 }
 0xdd5   :  { %10892 = vmatpush3.bf16.msra.mxu0 %v10889_v8 }
 0xdd6   :  { %10894 = vmatprep.subr.bf16.mxu0 %v10893_v16 }
 0xdd7   :  { %10924 = vmatpush3.bf16.msra.mxu1 %v12370_v35 }
 0xdd8   :  { %10926 = vmatprep.subr.bf16.mxu1 %v12386_v41 }
 0xdd9   :  { %10896 = vmatpush3.bf16.msra.mxu0 %v10893_v16 }
 0xdda   :  { %10898 = vmatprep.subr.bf16.mxu0 %v10897_v19 }
 0xddb   :  { %10928 = vmatpush3.bf16.msra.mxu1 %v12386_v41 }
 0xddc   :  { %10930 = vmatprep.subr.bf16.mxu1 %v12396_v45 }
 0xddd   :  { %10900 = vmatpush3.bf16.msra.mxu0 %v10897_v19 }
 0xdde   :  { %10902 = vmatprep.subr.bf16.mxu0 %v10901_v11 }
 0xddf   :  { %10932 = vmatpush3.bf16.msra.mxu1 %v12396_v45 }
 0xde0   :  { %10934 = vmatprep.subr.bf16.mxu1 %v12424_v49 }
 0xde1   :  { %10904 = vmatpush3.bf16.msra.mxu0 %v10901_v11 }
 0xde2   :  { %10938 = vmatprep.subr.bf16.mxu0 %v12316_v15 }
 0xde3   :  { %10936 = vmatpush3.bf16.msra.mxu1 %v12424_v49 }
 0xe97   :  { %v8933_v60 = vpop.f32.mrb[20].mxu0 }
 0xe98   :  { %v2458_v0 = vmul.f32 %v8933_v60, %v8933_v60  ;;  %v2349_v63 = vpop.f32.mrb[21].mxu0  ;;  %v2470_v58 = vsub.f32 %v13031_v24, %v8933_v60 }
 0xe99   :  { %v2457_v59 = vmul.f32 %v2349_v63, %v2349_v63  ;;  %v8971_v27 = vpop.f32.mrb[32].mxu1  ;;  %v2469_v8 = vsub.f32 %v13033_v1, %v2349_v63 }
 0xe9a   :  { %v2462_v30 = vsub.f32 %v8971_v27, %v2458_v0  ;;  %v2438_v31 = vpop.f32.mrb[33].mxu1 }
 0xe9b   :  { %v2461_v36 = vsub.f32 %v2438_v31, %v2457_v59  ;;  %v8936_v42 = vpop.f32.mrb[22].mxu0 }
 0xe9c   :  { %v2466_v44 = vmax.f32 %v2462_v30, 0.0  ;;  %v2460_v46 = vmul.f32 %v8936_v42, %v8936_v42  ;;  %v2359_v37 = vpop.f32.mrb[23].mxu0  ;;  %v2472_v10 = vsub.f32 %v13040_v57, %v8936_v42  ;;  %v2863_v30 = vld [vmem:[#allocation2 + $0x208] sm:$0xff] }
 0xe9d   :  { %v2465_v53 = vmax.f32 %v2461_v36, 0.0  ;;  %v2459_v34 = vmul.f32 %v2359_v37, %v2359_v37  ;;  %v8974_v40 = vpop.f32.mrb[34].mxu1  ;;  %v2471_v22 = vsub.f32 %v13043_v43, %v2359_v37  ;;  %v2862_v43 = vld [vmem:[#allocation2 + $0x200] sm:$0xff]  ;;  %v13106_v36 = vld [vmem:[%s14370_s10 + $0x18] sm:$0x1f] }
 0xe9e   :  { %v2474_v28 = vadd.f32 1e-05, %v2466_v44  ;;  %v2464_v48 = vsub.f32 %v8974_v40, %v2460_v46  ;;  %v2448_v51 = vpop.f32.mrb[35].mxu1  ;;  %v10969_v31 = vpack.c.bf16 %v2863_v30, %v2862_v43  ;;  %v2523_v42 = vrot.slane %v13106_v36, %v12434_v55  ;;  %v2869_v43 = vld [vmem:[#allocation2 + $0x238] sm:$0xff] }
 0xe9f   :  { %v2473_v47 = vadd.f32 1e-05, %v2465_v53  ;;  %v2463_v52 = vsub.f32 %v2448_v51, %v2459_v34  ;;  %vm2609_vm12 = vcmp.gt.f32.partialorder %v13106_v36, 0.0 }
 0xea0   :  { %11932 = vrsqrt.f32 %v2474_v28  ;;  %v2468_v6 = vmax.f32 %v2464_v48, 0.0  ;;  %10970 = vmatprep.subr.bf16.mxu1 %v10969_v31 }
 0xea1   :  { %11934 = vrsqrt.f32 %v2473_v47  ;;  %v2467_v26 = vmax.f32 %v2463_v52, 0.0  ;;  %v13120_v47 = vsel %vm2609_vm12, 1, %v12187_v5 }
 0xea2   :  { %v2476_v50 = vadd.f32 1e-05, %v2468_v6 }
 0xea3   :  { %v2475_v56 = vadd.f32 1e-05, %v2467_v26 }
 0xea4   :  { %11936 = vrsqrt.f32 %v2476_v50  ;;  %v2622_v50 = vrot.slane %v13120_v47, %v12518_v4 }
 0xea5   :  { %11938 = vrsqrt.f32 %v2475_v56 }
 0xea6   :  { %vm2623_vm13 = vcmp.eq.s32.totalorder %v2622_v50, 1  ;;  %v2877_v50 = vld [vmem:[#allocation2 + $0x278] sm:$0xff] }
 0xeaa   :  { %v11933_v3 = vpop.eup %11932 }
 0xeab   :  { %v11935_v9 = vpop.eup %11934  ;;  %v2482_v12 = vmul.f32 %v11933_v3, %v2470_v58 }
 0xeac   :  { %v2481_v16 = vmul.f32 %v11935_v9, %v2469_v8 }
 0xead   :  { %v2490_v19 = vmul.f32 %v2488_v2, %v2482_v12 }
 0xeae   :  { %v11937_v20 = vpop.eup %11936  ;;  %v2489_v11 = vmul.f32 %v2488_v2, %v2481_v16 }
 0xeaf   :  { %v11939_v24 = vpop.eup %11938  ;;  %v2484_v60 = vmul.f32 %v11937_v20, %v2472_v10  ;;  %v13077_v27 = vadd.f32 %v2496_v18, %v2490_v19 }
 0xeb0   :  { %v13075_v0 = vadd.f32 %v2496_v18, %v2489_v11  ;;  %v2483_v59 = vmul.f32 %v11939_v24, %v2471_v22  ;;  %v2864_v22 = vld [vmem:[#allocation2 + $0x210] sm:$0xff]  ;;  %v2865_v11 = vld [vmem:[#allocation2 + $0x218] sm:$0xff] }
 0xeb1   :  { %v2492_v1 = vmul.f32 %v2488_v2, %v2484_v60  ;;  %v10973_v24 = vpack.c.bf16 %v2865_v11, %v2864_v22  ;;  %v2866_v60 = vld [vmem:[#allocation2 + $0x220] sm:$0xff] }
 0xeb2   :  { %9007 = vmatprep.mubr.f32.mxu0 %v13075_v0  ;;  %v2491_v63 = vmul.f32 %v2488_v2, %v2483_v59  ;;  %v2867_v59 = vld [vmem:[#allocation2 + $0x228] sm:$0xff] }
 0xeb3   :  { %9008 = vmatmul.mubr.f32.vlgmr.msra.gmra.mrb[24].mxu0 %v13077_v27  ;;  %v13084_v57 = vadd.f32 %v2496_v18, %v2492_v1  ;;  %v10977_v1 = vpack.c.bf16 %v2867_v59, %v2866_v60 }
 0xeb4   :  { %v13081_v33 = vadd.f32 %v2496_v18, %v2491_v63  ;;  %10940 = vmatpush3.bf16.msra.mxu0 %v12316_v15  ;;  %v2868_v63 = vld [vmem:[#allocation2 + $0x230] sm:$0xff] }
 0xeb5   :  { %10942 = vmatprep.subr.bf16.mxu0 %v12321_v17  ;;  %v10981_v30 = vpack.c.bf16 %v2869_v43, %v2868_v63 }
 0xeb6   :  { %9010 = vmatprep.mubr.f32.mxu0 %v13081_v33 }
 0xeb7   :  { %9011 = vmatmul.mubr.f32.gmra.mrb[26].mxu0 %v13084_v57 }
 0xeb8   :  { %10944 = vmatpush3.bf16.msra.mxu0 %v12321_v17 }
 0xeb9   :  { %10946 = vmatprep.subr.bf16.mxu0 %v12338_v23 }
 0xebc   :  { %10948 = vmatpush3.bf16.msra.mxu0 %v12338_v23 }
 0xebd   :  { %10950 = vmatprep.subr.bf16.mxu0 %v12354_v29 }
 0xec0   :  { %10952 = vmatpush3.bf16.msra.mxu0 %v12354_v29 }
 0xec1   :  { %10954 = vmatprep.subr.bf16.mxu0 %v12370_v35 }
 0xec4   :  { %10956 = vmatpush3.bf16.msra.mxu0 %v12370_v35 }
 0xec5   :  { %10958 = vmatprep.subr.bf16.mxu0 %v12386_v41 }
 0xec8   :  { %10960 = vmatpush3.bf16.msra.mxu0 %v12386_v41 }
 0xec9   :  { %10962 = vmatprep.subr.bf16.mxu0 %v12396_v45 }
 0xecc   :  { %10964 = vmatpush3.bf16.msra.mxu0 %v12396_v45 }
 0xecd   :  { %10966 = vmatprep.subr.bf16.mxu0 %v12424_v49 }
 0xed0   :  { %10968 = vmatpush3.bf16.msra.mxu0 %v12424_v49 }
 0xed1   :  { %11002 = vmatprep.subr.bf16.mxu0 %v12316_v15 }
 0xf86   :  { %v9009_v44 = vpop.f32.mrb[24].mxu0 }
 0xf87   :  { %v13110_v46 = vadd.f32 %v9009_v44, %v2523_v42  ;;  %v2590_v37 = vpop.f32.mrb[25].mxu0 }
 0xf88   :  { %v13112_v53 = vadd.f32 %v2590_v37, %v2523_v42  ;;  %v2872_v37 = vld [vmem:[#allocation2 + $0x250] sm:$0xff] }
 0xf89   :  { %v2612_v34 = vmul.f32 1.442695, %v13110_v46 }
 0xf8a   :  { %v2610_v40 = vmul.f32 1.442695, %v13112_v53  ;;  %v9012_v28 = vpop.f32.mrb[26].mxu0 }
 0xf8b   :  { %11940 = vpow2.f32 %v2612_v34  ;;  %v13117_v48 = vadd.f32 %v9012_v28, %v2523_v42  ;;  %v2600_v51 = vpop.f32.mrb[27].mxu0  ;;  %v2873_v34 = vld [vmem:[#allocation2 + $0x258] sm:$0xff]  ;;  %v2874_v28 = vld [vmem:[#allocation2 + $0x260] sm:$0xff] }
 0xf8c   :  { %11942 = vpow2.f32 %v2610_v40  ;;  %v13122_v52 = vadd.f32 %v2600_v51, %v2523_v42  ;;  %v2871_v42 = vld [vmem:[#allocation2 + $0x248] sm:$0xff]  ;;  %v10989_v40 = vpack.c.bf16 %v2873_v34, %v2872_v37 }
 0xf8d   :  { %v2616_v6 = vmul.f32 1.442695, %v13117_v48  ;;  %v2875_v51 = vld [vmem:[#allocation2 + $0x268] sm:$0xff] }
 0xf8e   :  { %v2614_v26 = vmul.f32 1.442695, %v13122_v52 }
 0xf8f   :  { %11944 = vpow2.f32 %v2616_v6  ;;  %v10993_v6 = vpack.c.bf16 %v2875_v51, %v2874_v28 }
 0xf90   :  { %11946 = vpow2.f32 %v2614_v26  ;;  %v2876_v26 = vld [vmem:[#allocation2 + $0x270] sm:$0xff] }
 0xf95   :  { %v11941_v56 = vpop.eup %11940 }
 0xf96   :  { %v11943_v58 = vpop.eup %11942  ;;  %v13129_v2 = vsel %vm2623_vm13, %v11941_v56, %v13110_v46  ;;  %v10997_v56 = vpack.c.bf16 %v2877_v50, %v2876_v26  ;;  %v2833_v26 = vrot.slane %v13106_v36, %v12470_v38 }
 0xf97   :  { %v13132_v3 = vsel %vm2623_vm13, %v11943_v58, %v13112_v53  ;;  %v2714_v12 = vmul.f32 %v13129_v2, %v13129_v2 }
 0xf98   :  { %9045 = vmatprep.mubr.f32.mxu1 %v13132_v3  ;;  %v2713_v8 = vmul.f32 %v13132_v3, %v13132_v3 }
 0xf99   :  { %v11945_v9 = vpop.eup %11944  ;;  %9046 = vmatmul.mubr.f32.vlgmr.msra.gmra.mrb[36].mxu1 %v13129_v2 }
 0xf9a   :  { %v11947_v16 = vpop.eup %11946  ;;  %9083 = vmatprep.mubr.f32.mxu0 %v2713_v8  ;;  %v13141_v18 = vsel %vm2623_vm13, %v11945_v9, %v13117_v48  ;;  %10972 = vmatpush3.bf16.msra.mxu1 %v10969_v31  ;;  %v2870_v31 = vld [vmem:[#allocation2 + $0x240] sm:$0xff] }
 0xf9b   :  { %9084 = vmatmul.mubr.f32.vlgmr.msra.gmra.mrb[28].mxu0 %v2714_v12  ;;  %v13144_v10 = vsel %vm2623_vm13, %v11947_v16, %v13122_v52  ;;  %v2716_v20 = vmul.f32 %v13141_v18, %v13141_v18  ;;  %10974 = vmatprep.subr.bf16.mxu1 %v10973_v24  ;;  %v10985_v44 = vpack.c.bf16 %v2871_v42, %v2870_v31 }
 0xf9c   :  { %9048 = vmatprep.mubr.f32.mxu1 %v13144_v10  ;;  %v2715_v19 = vmul.f32 %v13144_v10, %v13144_v10  ;;  %11004 = vmatpush3.bf16.msra.mxu0 %v12316_v15 }
 0xf9d   :  { %9049 = vmatmul.mubr.f32.gmra.mrb[38].mxu1 %v13141_v18  ;;  %11006 = vmatprep.subr.bf16.mxu0 %v12321_v17 }
 0xf9e   :  { %9086 = vmatprep.mubr.f32.mxu0 %v2715_v19  ;;  %10976 = vmatpush3.bf16.msra.mxu1 %v10973_v24 }
 0xf9f   :  { %9087 = vmatmul.mubr.f32.gmra.mrb[30].mxu0 %v2716_v20  ;;  %10978 = vmatprep.subr.bf16.mxu1 %v10977_v1 }
 0xfa0   :  { %11008 = vmatpush3.bf16.msra.mxu0 %v12321_v17 }
 0xfa1   :  { %11010 = vmatprep.subr.bf16.mxu0 %v12338_v23 }
 0xfa2   :  { %10980 = vmatpush3.bf16.msra.mxu1 %v10977_v1 }
 0xfa3   :  { %10982 = vmatprep.subr.bf16.mxu1 %v10981_v30 }
 0xfa4   :  { %11012 = vmatpush3.bf16.msra.mxu0 %v12338_v23 }
 0xfa5   :  { %11014 = vmatprep.subr.bf16.mxu0 %v12354_v29 }
 0xfa6   :  { %10984 = vmatpush3.bf16.msra.mxu1 %v10981_v30 }
 0xfa7   :  { %10986 = vmatprep.subr.bf16.mxu1 %v10985_v44 }
 0xfa8   :  { %11016 = vmatpush3.bf16.msra.mxu0 %v12354_v29 }
 0xfa9   :  { %11018 = vmatprep.subr.bf16.mxu0 %v12370_v35 }
 0xfaa   :  { %10988 = vmatpush3.bf16.msra.mxu1 %v10985_v44 }
 0xfab   :  { %10990 = vmatprep.subr.bf16.mxu1 %v10989_v40 }
 0xfac   :  { %11020 = vmatpush3.bf16.msra.mxu0 %v12370_v35 }
 0xfad   :  { %11022 = vmatprep.subr.bf16.mxu0 %v12386_v41 }
 0xfae   :  { %10992 = vmatpush3.bf16.msra.mxu1 %v10989_v40 }
 0xfaf   :  { %10994 = vmatprep.subr.bf16.mxu1 %v10993_v6 }
 0xfb0   :  { %11024 = vmatpush3.bf16.msra.mxu0 %v12386_v41 }
 0xfb1   :  { %11026 = vmatprep.subr.bf16.mxu0 %v12396_v45 }
 0xfb2   :  { %10996 = vmatpush3.bf16.msra.mxu1 %v10993_v6 }
 0xfb3   :  { %10998 = vmatprep.subr.bf16.mxu1 %v10997_v56 }
 0xfb4   :  { %11028 = vmatpush3.bf16.msra.mxu0 %v12396_v45 }
 0xfb5   :  { %11030 = vmatprep.subr.bf16.mxu0 %v12424_v49 }
 0xfb6   :  { %11000 = vmatpush3.bf16.msra.mxu1 %v10997_v56 }
 0xfb7   :  { %11034 = vmatprep.subr.bf16.mxu1 %v12316_v15 }
 0xfb8   :  { %11032 = vmatpush3.bf16.msra.mxu0 %v12424_v49 }
0x106c   :  { %v9047_v58 = vpop.f32.mrb[36].mxu1 }
0x106d   :  { %v2803_v8 = vmul.f32 %v9047_v58, %v9047_v58  ;;  %v2694_v9 = vpop.f32.mrb[37].mxu1  ;;  %v2815_v6 = vsub.f32 %v13129_v2, %v9047_v58 }
0x106e   :  { %v2802_v12 = vmul.f32 %v2694_v9, %v2694_v9  ;;  %v9085_v16 = vpop.f32.mrb[28].mxu0  ;;  %v2814_v56 = vsub.f32 %v13132_v3, %v2694_v9 }
0x106f   :  { %v2807_v19 = vsub.f32 %v9085_v16, %v2803_v8  ;;  %v2783_v20 = vpop.f32.mrb[29].mxu0  ;;  %v2853_v8 = vrot.slane %v13120_v47, %v12554_v62  ;;  %v2847_v47 = vmax.f32 %v13110_v46, 0.0  ;;  %v2848_v46 = vmax.f32 %v13122_v52, 0.0  ;;  %v3221_v52 = vld [vmem:[#allocation2 + $0x288] sm:$0xff] }
0x1070   :  { %v2806_v22 = vsub.f32 %v2783_v20, %v2802_v12  ;;  %v9050_v11 = vpop.f32.mrb[38].mxu1 }
0x1071   :  { %v2811_v24 = vmax.f32 %v2807_v19, 0.0  ;;  %v2805_v60 = vmul.f32 %v9050_v11, %v9050_v11  ;;  %v2704_v59 = vpop.f32.mrb[39].mxu1  ;;  %v2841_v19 = vrot.slane %v13106_v36, %v12473_v39  ;;  %vm13178_vm14 = vcmp.eq.s32.totalorder %v2853_v8, 1 }
0x1072   :  { %v2810_v1 = vmax.f32 %v2806_v22, 0.0  ;;  %v2804_v63 = vmul.f32 %v2704_v59, %v2704_v59  ;;  %v9088_v43 = vpop.f32.mrb[30].mxu0  ;;  %v2817_v22 = vsub.f32 %v13141_v18, %v9050_v11  ;;  %v2816_v2 = vsub.f32 %v13144_v10, %v2704_v59 }
0x1073   :  { %v2819_v30 = vadd.f32 1e-05, %v2811_v24  ;;  %v2809_v31 = vsub.f32 %v9088_v43, %v2805_v60  ;;  %v2793_v42 = vpop.f32.mrb[31].mxu0  ;;  %v2846_v43 = vmax.f32 %v13112_v53, 0.0 }
0x1074   :  { %v2818_v44 = vadd.f32 1e-05, %v2810_v1  ;;  %v2808_v37 = vsub.f32 %v2793_v42, %v2804_v63 }
0x1075   :  { %11948 = vrsqrt.f32 %v2819_v30  ;;  %v2813_v34 = vmax.f32 %v2809_v31, 0.0  ;;  %v2849_v31 = vmax.f32 %v13117_v48, 0.0  ;;  %v3220_v48 = vld [vmem:[#allocation2 + $0x280] sm:$0xff] }
0x1076   :  { %11950 = vrsqrt.f32 %v2818_v44  ;;  %v2812_v40 = vmax.f32 %v2808_v37, 0.0 }
0x1077   :  { %v2821_v28 = vadd.f32 1e-05, %v2813_v34  ;;  %v11065_v34 = vpack.c.bf16 %v3221_v52, %v3220_v48  ;;  %v3227_v48 = vld [vmem:[#allocation2 + $0x2b8] sm:$0xff] }
0x1078   :  { %v2820_v51 = vadd.f32 1e-05, %v2812_v40  ;;  %v13213_v40 = vld [vmem:[%s14370_s10 + $0x20] sm:$0x1f] }
0x1079   :  { %11952 = vrsqrt.f32 %v2821_v28  ;;  %11066 = vmatprep.subr.bf16.mxu0 %v11065_v34  ;;  %v2881_v28 = vrot.slane %v13213_v40, %v12434_v55  ;;  %vm2967_vm15 = vcmp.gt.f32.partialorder %v13213_v40, 0.0 }
0x107a   :  { %11954 = vrsqrt.f32 %v2820_v51 }
0x107f   :  { %v11949_v50 = vpop.eup %11948 }
0x1080   :  { %v11951_v12 = vpop.eup %11950  ;;  %v2827_v16 = vmul.f32 %v11949_v50, %v2815_v6 }
0x1081   :  { %v2826_v20 = vmul.f32 %v11951_v12, %v2814_v56 }
0x1082   :  { %v2835_v24 = vmul.f32 %v2833_v26, %v2827_v16 }
0x1083   :  { %v11953_v60 = vpop.eup %11952  ;;  %v2834_v58 = vmul.f32 %v2833_v26, %v2826_v20  ;;  %v13227_v20 = vsel %vm2967_vm15, 1, %v12187_v5 }
0x1084   :  { %v11955_v3 = vpop.eup %11954  ;;  %v2843_v9 = vadd.f32 %v2841_v19, %v2835_v24  ;;  %v2829_v63 = vmul.f32 %v11953_v60, %v2817_v22 }
0x1085   :  { %v2842_v36 = vadd.f32 %v2841_v19, %v2834_v58  ;;  %v2828_v30 = vmul.f32 %v11955_v3, %v2816_v2  ;;  %v2980_v2 = vrot.slane %v13227_v20, %v12518_v4 }
0x1086   :  { %v2856_v18 = vsel %vm13178_vm14, %v2847_v47, %v2843_v9  ;;  %v2837_v11 = vmul.f32 %v2833_v26, %v2829_v63 }
0x1087   :  { %v2855_v10 = vsel %vm13178_vm14, %v2846_v43, %v2842_v36  ;;  %v2836_v59 = vmul.f32 %v2833_v26, %v2828_v30  ;;  %vm2981_vm0 = vcmp.eq.s32.totalorder %v2980_v2, 1  ;;  %v3235_v2 = vld [vmem:[#allocation2 + $0x2f8] sm:$0xff] }
0x1088   :  { %9121 = vmatprep.mubr.f32.mxu1 %v2855_v10  ;;  %v2845_v42 = vadd.f32 %v2841_v19, %v2837_v11 }
0x1089   :  { %9122 = vmatmul.mubr.f32.vlgmr.msra.gmra.mrb[40].mxu1 %v2856_v18  ;;  %v2844_v44 = vadd.f32 %v2841_v19, %v2836_v59  ;;  %v3222_v59 = vld [vmem:[#allocation2 + $0x290] sm:$0xff] }
0x108a   :  { %v2858_v53 = vsel %vm13178_vm14, %v2849_v31, %v2845_v42  ;;  %11036 = vmatpush3.bf16.msra.mxu1 %v12316_v15  ;;  %v3223_v31 = vld [vmem:[#allocation2 + $0x298] sm:$0xff] }
0x108b   :  { %v2857_v37 = vsel %vm13178_vm14, %v2848_v46, %v2844_v44  ;;  %11038 = vmatprep.subr.bf16.mxu1 %v12321_v17  ;;  %v11069_v42 = vpack.c.bf16 %v3223_v31, %v3222_v59  ;;  %v3224_v46 = vld [vmem:[#allocation2 + $0x2a0] sm:$0xff]  ;;  %v3225_v44 = vld [vmem:[#allocation2 + $0x2a8] sm:$0xff] }
0x108c   :  { %9124 = vmatprep.mubr.f32.mxu1 %v2857_v37  ;;  %v3226_v37 = vld [vmem:[#allocation2 + $0x2b0] sm:$0xff] }
0x108d   :  { %9125 = vmatmul.mubr.f32.gmra.mrb[42].mxu1 %v2858_v53  ;;  %v11073_v53 = vpack.c.bf16 %v3225_v44, %v3224_v46  ;;  %v11077_v52 = vpack.c.bf16 %v3227_v48, %v3226_v37 }
0x108e   :  { %11040 = vmatpush3.bf16.msra.mxu1 %v12321_v17 }
0x108f   :  { %11042 = vmatprep.subr.bf16.mxu1 %v12338_v23 }
0x1092   :  { %11044 = vmatpush3.bf16.msra.mxu1 %v12338_v23 }
0x1093   :  { %11046 = vmatprep.subr.bf16.mxu1 %v12354_v29 }
0x1096   :  { %11048 = vmatpush3.bf16.msra.mxu1 %v12354_v29 }
0x1097   :  { %11050 = vmatprep.subr.bf16.mxu1 %v12370_v35 }
0x109a   :  { %11052 = vmatpush3.bf16.msra.mxu1 %v12370_v35 }
0x109b   :  { %11054 = vmatprep.subr.bf16.mxu1 %v12386_v41 }
0x109e   :  { %11056 = vmatpush3.bf16.msra.mxu1 %v12386_v41 }
0x109f   :  { %11058 = vmatprep.subr.bf16.mxu1 %v12396_v45 }
0x10a2   :  { %11060 = vmatpush3.bf16.msra.mxu1 %v12396_v45 }
0x10a3   :  { %11062 = vmatprep.subr.bf16.mxu1 %v12424_v49 }
0x10a6   :  { %11064 = vmatpush3.bf16.msra.mxu1 %v12424_v49 }
0x10a7   :  { %11098 = vmatprep.subr.bf16.mxu1 %v12316_v15 }
0x115c   :  { %v9123_v51 = vpop.f32.mrb[40].mxu1 }
0x115d   :  { %v13217_v6 = vadd.f32 %v9123_v51, %v2881_v28  ;;  %v2948_v26 = vpop.f32.mrb[41].mxu1 }
0x115e   :  { %v13219_v50 = vadd.f32 %v2948_v26, %v2881_v28  ;;  %v3230_v26 = vld [vmem:[#allocation2 + $0x2d0] sm:$0xff] }
0x115f   :  { %v2970_v56 = vmul.f32 1.442695, %v13217_v6 }
0x1160   :  { %v2968_v8 = vmul.f32 1.442695, %v13219_v50  ;;  %v9126_v12 = vpop.f32.mrb[42].mxu1 }
0x1161   :  { %11956 = vpow2.f32 %v2970_v56  ;;  %v13224_v16 = vadd.f32 %v9126_v12, %v2881_v28  ;;  %v2958_v19 = vpop.f32.mrb[43].mxu1  ;;  %v3231_v56 = vld [vmem:[#allocation2 + $0x2d8] sm:$0xff]  ;;  %v3232_v12 = vld [vmem:[#allocation2 + $0x2e0] sm:$0xff] }
0x1162   :  { %11958 = vpow2.f32 %v2968_v8  ;;  %v13229_v22 = vadd.f32 %v2958_v19, %v2881_v28  ;;  %v3229_v28 = vld [vmem:[#allocation2 + $0x2c8] sm:$0xff]  ;;  %v11085_v8 = vpack.c.bf16 %v3231_v56, %v3230_v26 }
0x1163   :  { %v2974_v24 = vmul.f32 1.442695, %v13224_v16  ;;  %v3233_v19 = vld [vmem:[#allocation2 + $0x2e8] sm:$0xff] }
0x1164   :  { %v2972_v60 = vmul.f32 1.442695, %v13229_v22 }
0x1165   :  { %11960 = vpow2.f32 %v2974_v24  ;;  %v11089_v24 = vpack.c.bf16 %v3233_v19, %v3232_v12 }
0x1166   :  { %11962 = vpow2.f32 %v2972_v60  ;;  %v3234_v60 = vld [vmem:[#allocation2 + $0x2f0] sm:$0xff] }
0x116b   :  { %v11957_v58 = vpop.eup %11956 }
0x116c   :  { %v11959_v1 = vpop.eup %11958  ;;  %v13236_v3 = vsel %vm2981_vm0, %v11957_v58, %v13217_v6  ;;  %v11093_v58 = vpack.c.bf16 %v3235_v2, %v3234_v60  ;;  %v3191_v60 = vrot.slane %v13213_v40, %v12470_v38 }
0x116d   :  { %v13239_v47 = vsel %vm2981_vm0, %v11959_v1, %v13219_v50  ;;  %v3072_v43 = vmul.f32 %v13236_v3, %v13236_v3 }
0x116e   :  { %9159 = vmatprep.mubr.f32.mxu0 %v13239_v47  ;;  %v3071_v9 = vmul.f32 %v13239_v47, %v13239_v47 }
0x116f   :  { %v11961_v63 = vpop.eup %11960  ;;  %9160 = vmatmul.mubr.f32.vlgmr.msra.gmra.mrb[32].mxu0 %v13236_v3 }
0x1170   :  { %v11963_v36 = vpop.eup %11962  ;;  %9197 = vmatprep.mubr.f32.mxu1 %v3071_v9  ;;  %v13248_v30 = vsel %vm2981_vm0, %v11961_v63, %v13224_v16  ;;  %11068 = vmatpush3.bf16.msra.mxu0 %v11065_v34  ;;  %v3228_v34 = vld [vmem:[#allocation2 + $0x2c0] sm:$0xff] }
0x1171   :  { %9198 = vmatmul.mubr.f32.vlgmr.msra.gmra.mrb[44].mxu1 %v3072_v43  ;;  %v13251_v18 = vsel %vm2981_vm0, %v11963_v36, %v13229_v22  ;;  %v3074_v10 = vmul.f32 %v13248_v30, %v13248_v30  ;;  %11070 = vmatprep.subr.bf16.mxu0 %v11069_v42  ;;  %v11081_v51 = vpack.c.bf16 %v3229_v28, %v3228_v34 }
0x1172   :  { %9162 = vmatprep.mubr.f32.mxu0 %v13251_v18  ;;  %v3073_v11 = vmul.f32 %v13251_v18, %v13251_v18  ;;  %11100 = vmatpush3.bf16.msra.mxu1 %v12316_v15 }
0x1173   :  { %9163 = vmatmul.mubr.f32.gmra.mrb[34].mxu0 %v13248_v30  ;;  %11102 = vmatprep.subr.bf16.mxu1 %v12321_v17 }
0x1174   :  { %9200 = vmatprep.mubr.f32.mxu1 %v3073_v11  ;;  %11072 = vmatpush3.bf16.msra.mxu0 %v11069_v42 }
0x1175   :  { %9201 = vmatmul.mubr.f32.gmra.mrb[46].mxu1 %v3074_v10  ;;  %11074 = vmatprep.subr.bf16.mxu0 %v11073_v53 }
0x1176   :  { %11104 = vmatpush3.bf16.msra.mxu1 %v12321_v17 }
0x1177   :  { %11106 = vmatprep.subr.bf16.mxu1 %v12338_v23 }
0x1178   :  { %11076 = vmatpush3.bf16.msra.mxu0 %v11073_v53 }
0x1179   :  { %11078 = vmatprep.subr.bf16.mxu0 %v11077_v52 }
0x117a   :  { %11108 = vmatpush3.bf16.msra.mxu1 %v12338_v23 }
0x117b   :  { %11110 = vmatprep.subr.bf16.mxu1 %v12354_v29 }
0x117c   :  { %11080 = vmatpush3.bf16.msra.mxu0 %v11077_v52 }
0x117d   :  { %11082 = vmatprep.subr.bf16.mxu0 %v11081_v51 }
0x117e   :  { %11112 = vmatpush3.bf16.msra.mxu1 %v12354_v29 }
0x117f   :  { %11114 = vmatprep.subr.bf16.mxu1 %v12370_v35 }
0x1180   :  { %11084 = vmatpush3.bf16.msra.mxu0 %v11081_v51 }
0x1181   :  { %11086 = vmatprep.subr.bf16.mxu0 %v11085_v8 }
0x1182   :  { %11116 = vmatpush3.bf16.msra.mxu1 %v12370_v35 }
0x1183   :  { %11118 = vmatprep.subr.bf16.mxu1 %v12386_v41 }
0x1184   :  { %11088 = vmatpush3.bf16.msra.mxu0 %v11085_v8 }
0x1185   :  { %11090 = vmatprep.subr.bf16.mxu0 %v11089_v24 }
0x1186   :  { %11120 = vmatpush3.bf16.msra.mxu1 %v12386_v41 }
0x1187   :  { %11122 = vmatprep.subr.bf16.mxu1 %v12396_v45 }
0x1188   :  { %11092 = vmatpush3.bf16.msra.mxu0 %v11089_v24 }
0x1189   :  { %11094 = vmatprep.subr.bf16.mxu0 %v11093_v58 }
0x118a   :  { %11124 = vmatpush3.bf16.msra.mxu1 %v12396_v45 }
0x118b   :  { %11126 = vmatprep.subr.bf16.mxu1 %v12424_v49 }
0x118c   :  { %11096 = vmatpush3.bf16.msra.mxu0 %v11093_v58 }
0x118d   :  { %11130 = vmatprep.subr.bf16.mxu0 %v12316_v15 }
0x118e   :  { %11128 = vmatpush3.bf16.msra.mxu1 %v12424_v49 }
0x1242   :  { %v9161_v1 = vpop.f32.mrb[32].mxu0 }
0x1243   :  { %v3161_v9 = vmul.f32 %v9161_v1, %v9161_v1  ;;  %v3052_v63 = vpop.f32.mrb[33].mxu0  ;;  %v3173_v24 = vsub.f32 %v13236_v3, %v9161_v1 }
0x1244   :  { %v3160_v43 = vmul.f32 %v3052_v63, %v3052_v63  ;;  %v9199_v36 = vpop.f32.mrb[44].mxu1  ;;  %v3172_v58 = vsub.f32 %v13239_v47, %v3052_v63 }
0x1245   :  { %v3165_v11 = vsub.f32 %v9199_v36, %v3161_v9  ;;  %v3141_v10 = vpop.f32.mrb[45].mxu1  ;;  %v3211_v9 = vrot.slane %v13227_v20, %v12554_v62  ;;  %v3205_v20 = vmax.f32 %v13217_v6, 0.0  ;;  %v3206_v6 = vmax.f32 %v13229_v22, 0.0  ;;  %v7088_v22 = vld [vmem:[%s14365_s5 + $0x88] sm:$0xff] }
0x1246   :  { %v3164_v59 = vsub.f32 %v3141_v10, %v3160_v43  ;;  %v9164_v31 = vpop.f32.mrb[34].mxu0 }
0x1247   :  { %v3169_v42 = vmax.f32 %v3165_v11, 0.0  ;;  %v3163_v46 = vmul.f32 %v9164_v31, %v9164_v31  ;;  %v3062_v44 = vpop.f32.mrb[35].mxu0  ;;  %v3199_v11 = vrot.slane %v13213_v40, %v12473_v39  ;;  %vm13285_vm1 = vcmp.eq.s32.totalorder %v3211_v9, 1 }
0x1248   :  { %v3168_v53 = vmax.f32 %v3164_v59, 0.0  ;;  %v3162_v37 = vmul.f32 %v3062_v44, %v3062_v44  ;;  %v9202_v48 = vpop.f32.mrb[46].mxu1  ;;  %v3175_v59 = vsub.f32 %v13248_v30, %v9164_v31  ;;  %v3174_v3 = vsub.f32 %v13251_v18, %v3062_v44 }
0x1249   :  { %v3177_v52 = vadd.f32 1e-05, %v3169_v42  ;;  %v3167_v34 = vsub.f32 %v9202_v48, %v3163_v46  ;;  %v3151_v28 = vpop.f32.mrb[47].mxu1  ;;  %v3204_v48 = vmax.f32 %v13219_v50, 0.0 }
0x124a   :  { %v3176_v51 = vadd.f32 1e-05, %v3168_v53  ;;  %v3166_v26 = vsub.f32 %v3151_v28, %v3162_v37 }
0x124b   :  { %11964 = vrsqrt.f32 %v3177_v52  ;;  %v3171_v56 = vmax.f32 %v3167_v34, 0.0  ;;  %v3207_v34 = vmax.f32 %v13224_v16, 0.0  ;;  %v7087_v16 = vld [vmem:[%s14365_s5 + $0x80] sm:$0xff] }
0x124c   :  { %11966 = vrsqrt.f32 %v3176_v51  ;;  %v3170_v8 = vmax.f32 %v3166_v26, 0.0 }
0x124d   :  { %v3179_v12 = vadd.f32 1e-05, %v3171_v56  ;;  %v11161_v56 = vpack.c.bf16 %v7088_v22, %v7087_v16  ;;  %v7094_v16 = vld [vmem:[%s14365_s5 + $0xb8] sm:$0xff] }
0x124e   :  { %v3178_v19 = vadd.f32 1e-05, %v3170_v8  ;;  %v13327_v8 = vld [vmem:[%s14370_s10 + $0x28] sm:$0x1f] }
0x124f   :  { %11968 = vrsqrt.f32 %v3179_v12  ;;  %11162 = vmatprep.subr.bf16.mxu1 %v11161_v56  ;;  %v3239_v12 = vrot.slane %v13327_v8, %v12434_v55  ;;  %vm3325_vm2 = vcmp.gt.f32.partialorder %v13327_v8, 0.0 }
0x1250   :  { %11970 = vrsqrt.f32 %v3178_v19 }
0x1255   :  { %v11965_v2 = vpop.eup %11964 }
0x1256   :  { %v11967_v43 = vpop.eup %11966  ;;  %v3185_v36 = vmul.f32 %v11965_v2, %v3173_v24 }
0x1257   :  { %v3184_v10 = vmul.f32 %v11967_v43, %v3172_v58 }
0x1258   :  { %v3193_v42 = vmul.f32 %v3191_v60, %v3185_v36 }
0x1259   :  { %v11969_v46 = vpop.eup %11968  ;;  %v3192_v1 = vmul.f32 %v3191_v60, %v3184_v10  ;;  %v13341_v10 = vsel %vm3325_vm2, 1, %v12187_v5 }
0x125a   :  { %v11971_v47 = vpop.eup %11970  ;;  %v3201_v63 = vadd.f32 %v3199_v11, %v3193_v42  ;;  %v3187_v37 = vmul.f32 %v11969_v46, %v3175_v59 }
0x125b   :  { %v3200_v40 = vadd.f32 %v3199_v11, %v3192_v1  ;;  %v3186_v52 = vmul.f32 %v11971_v47, %v3174_v3  ;;  %v3338_v3 = vrot.slane %v13341_v10, %v12518_v4 }
0x125c   :  { %v3214_v30 = vsel %vm13285_vm1, %v3205_v20, %v3201_v63  ;;  %v3195_v31 = vmul.f32 %v3191_v60, %v3187_v37 }
0x125d   :  { %v3213_v18 = vsel %vm13285_vm1, %v3204_v48, %v3200_v40  ;;  %v3194_v44 = vmul.f32 %v3191_v60, %v3186_v52  ;;  %vm3339_vm3 = vcmp.eq.s32.totalorder %v3338_v3, 1  ;;  %v7102_v3 = vld [vmem:[%s14365_s5 + $0xf8] sm:$0xff] }
0x125e   :  { %9235 = vmatprep.mubr.f32.mxu0 %v3213_v18  ;;  %v3203_v28 = vadd.f32 %v3199_v11, %v3195_v31 }
0x125f   :  { %9236 = vmatmul.mubr.f32.vlgmr.msra.gmra.mrb[36].mxu0 %v3214_v30  ;;  %v3202_v51 = vadd.f32 %v3199_v11, %v3194_v44  ;;  %v7089_v44 = vld [vmem:[%s14365_s5 + $0x90] sm:$0xff] }
0x1260   :  { %v3216_v50 = vsel %vm13285_vm1, %v3207_v34, %v3203_v28  ;;  %11132 = vmatpush3.bf16.msra.mxu0 %v12316_v15  ;;  %v7090_v34 = vld [vmem:[%s14365_s5 + $0x98] sm:$0xff] }
0x1261   :  { %v3215_v26 = vsel %vm13285_vm1, %v3206_v6, %v3202_v51  ;;  %11134 = vmatprep.subr.bf16.mxu0 %v12321_v17  ;;  %v11165_v28 = vpack.c.bf16 %v7090_v34, %v7089_v44  ;;  %v7091_v6 = vld [vmem:[%s14365_s5 + $0xa0] sm:$0xff]  ;;  %v7092_v51 = vld [vmem:[%s14365_s5 + $0xa8] sm:$0xff] }
0x1262   :  { %9238 = vmatprep.mubr.f32.mxu0 %v3215_v26  ;;  %v7093_v26 = vld [vmem:[%s14365_s5 + $0xb0] sm:$0xff] }
0x1263   :  { %9239 = vmatmul.mubr.f32.gmra.mrb[38].mxu0 %v3216_v50  ;;  %v11169_v50 = vpack.c.bf16 %v7092_v51, %v7091_v6  ;;  %v11173_v22 = vpack.c.bf16 %v7094_v16, %v7093_v26 }
0x1264   :  { %11136 = vmatpush3.bf16.msra.mxu0 %v12321_v17 }
0x1265   :  { %11138 = vmatprep.subr.bf16.mxu0 %v12338_v23 }
0x1268   :  { %11140 = vmatpush3.bf16.msra.mxu0 %v12338_v23 }
0x1269   :  { %11142 = vmatprep.subr.bf16.mxu0 %v12354_v29 }
0x126c   :  { %11144 = vmatpush3.bf16.msra.mxu0 %v12354_v29 }
0x126d   :  { %11146 = vmatprep.subr.bf16.mxu0 %v12370_v35 }
0x1270   :  { %11148 = vmatpush3.bf16.msra.mxu0 %v12370_v35 }
0x1271   :  { %11150 = vmatprep.subr.bf16.mxu0 %v12386_v41 }
0x1274   :  { %11152 = vmatpush3.bf16.msra.mxu0 %v12386_v41 }
0x1275   :  { %11154 = vmatprep.subr.bf16.mxu0 %v12396_v45 }
0x1278   :  { %11156 = vmatpush3.bf16.msra.mxu0 %v12396_v45 }
0x1279   :  { %11158 = vmatprep.subr.bf16.mxu0 %v12424_v49 }
0x127c   :  { %11160 = vmatpush3.bf16.msra.mxu0 %v12424_v49 }
0x127d   :  { %9355 = vmatprep.subr.msk.mxu0 %vm1370_vm9, %v12188_v7 }
0x1332   :  { %v9237_v19 = vpop.f32.mrb[36].mxu0 }
0x1333   :  { %v13331_v24 = vadd.f32 %v9237_v19, %v3239_v12  ;;  %v3306_v60 = vpop.f32.mrb[37].mxu0 }
0x1334   :  { %v13333_v2 = vadd.f32 %v3306_v60, %v3239_v12  ;;  %v7097_v60 = vld [vmem:[%s14365_s5 + $0xd0] sm:$0xff] }
0x1335   :  { %v3328_v58 = vmul.f32 1.442695, %v13331_v24 }
0x1336   :  { %v3326_v9 = vmul.f32 1.442695, %v13333_v2  ;;  %v9240_v43 = vpop.f32.mrb[38].mxu0 }
0x1337   :  { %11972 = vpow2.f32 %v3328_v58  ;;  %v13338_v36 = vadd.f32 %v9240_v43, %v3239_v12  ;;  %v3316_v11 = vpop.f32.mrb[39].mxu0  ;;  %v7098_v58 = vld [vmem:[%s14365_s5 + $0xd8] sm:$0xff]  ;;  %v7099_v43 = vld [vmem:[%s14365_s5 + $0xe0] sm:$0xff] }
0x1338   :  { %11974 = vpow2.f32 %v3326_v9  ;;  %v13343_v59 = vadd.f32 %v3316_v11, %v3239_v12  ;;  %v7096_v12 = vld [vmem:[%s14365_s5 + $0xc8] sm:$0xff]  ;;  %v11181_v9 = vpack.c.bf16 %v7098_v58, %v7097_v60 }
0x1339   :  { %v3332_v42 = vmul.f32 1.442695, %v13338_v36  ;;  %v7100_v11 = vld [vmem:[%s14365_s5 + $0xe8] sm:$0xff] }
0x133a   :  { %v3330_v46 = vmul.f32 1.442695, %v13343_v59 }
0x133b   :  { %11976 = vpow2.f32 %v3332_v42  ;;  %v11185_v42 = vpack.c.bf16 %v7100_v11, %v7099_v43 }
0x133c   :  { %11978 = vpow2.f32 %v3330_v46  ;;  %v7101_v46 = vld [vmem:[%s14365_s5 + $0xf0] sm:$0xff] }
0x1341   :  { %v11973_v1 = vpop.eup %11972 }
0x1342   :  { %v11975_v53 = vpop.eup %11974  ;;  %v13350_v47 = vsel %vm3339_vm3, %v11973_v1, %v13331_v24  ;;  %v11189_v1 = vpack.c.bf16 %v7102_v3, %v7101_v46  ;;  %v3549_v46 = vrot.slane %v13327_v8, %v12470_v38 }
0x1343   :  { %v13353_v20 = vsel %vm3339_vm3, %v11975_v53, %v13333_v2  ;;  %v3430_v48 = vmul.f32 %v13350_v47, %v13350_v47 }
0x1344   :  { %9273 = vmatprep.mubr.f32.mxu1 %v13353_v20  ;;  %v3429_v63 = vmul.f32 %v13353_v20, %v13353_v20 }
0x1345   :  { %v11977_v37 = vpop.eup %11976  ;;  %9274 = vmatmul.mubr.f32.vlgmr.msra.gmra.mrb[48].mxu1 %v13350_v47 }
0x1346   :  { %v11979_v40 = vpop.eup %11978  ;;  %9311 = vmatprep.mubr.f32.mxu0 %v3429_v63  ;;  %v13362_v52 = vsel %vm3339_vm3, %v11977_v37, %v13338_v36  ;;  %11164 = vmatpush3.bf16.msra.mxu1 %v11161_v56  ;;  %v7095_v56 = vld [vmem:[%s14365_s5 + $0xc0] sm:$0xff] }
0x1347   :  { %9312 = vmatmul.mubr.f32.vlgmr.msra.gmra.mrb[40].mxu0 %v3430_v48  ;;  %v13365_v30 = vsel %vm3339_vm3, %v11979_v40, %v13343_v59  ;;  %v3432_v18 = vmul.f32 %v13362_v52, %v13362_v52  ;;  %11166 = vmatprep.subr.bf16.mxu1 %v11165_v28  ;;  %v11177_v19 = vpack.c.bf16 %v7096_v12, %v7095_v56 }
0x1348   :  { %9276 = vmatprep.mubr.f32.mxu1 %v13365_v30  ;;  %v3431_v31 = vmul.f32 %v13365_v30, %v13365_v30  ;;  %9356 = vmatpush3.msk.msra.mxu0 %vm1370_vm9, %v12188_v7 }
0x1349   :  { %9277 = vmatmul.mubr.f32.gmra.mrb[50].mxu1 %v13362_v52  ;;  %9363 = vmatprep.subr.msk.mxu0 %vm1370_vm9, %v12188_v7 }
0x134a   :  { %9314 = vmatprep.mubr.f32.mxu0 %v3431_v31  ;;  %11168 = vmatpush3.bf16.msra.mxu1 %v11165_v28 }
0x134b   :  { %9315 = vmatmul.mubr.f32.gmra.mrb[42].mxu0 %v3432_v18  ;;  %11170 = vmatprep.subr.bf16.mxu1 %v11169_v50 }
0x134e   :  { %11172 = vmatpush3.bf16.msra.mxu1 %v11169_v50 }
0x134f   :  { %11174 = vmatprep.subr.bf16.mxu1 %v11173_v22 }
0x1352   :  { %11176 = vmatpush3.bf16.msra.mxu1 %v11173_v22 }
0x1353   :  { %11178 = vmatprep.subr.bf16.mxu1 %v11177_v19 }
0x1356   :  { %11180 = vmatpush3.bf16.msra.mxu1 %v11177_v19 }
0x1357   :  { %11182 = vmatprep.subr.bf16.mxu1 %v11181_v9 }
0x135a   :  { %11184 = vmatpush3.bf16.msra.mxu1 %v11181_v9 }
0x135b   :  { %11186 = vmatprep.subr.bf16.mxu1 %v11185_v42 }
0x135e   :  { %11188 = vmatpush3.bf16.msra.mxu1 %v11185_v42 }
0x135f   :  { %11190 = vmatprep.subr.bf16.mxu1 %v11189_v1 }
0x1362   :  { %11192 = vmatpush3.bf16.msra.mxu1 %v11189_v1 }
0x1418   :  { %v9275_v53 = vpop.f32.mrb[48].mxu1 }
0x1419   :  { %v3519_v63 = vmul.f32 %v9275_v53, %v9275_v53  ;;  %v3410_v37 = vpop.f32.mrb[49].mxu1  ;;  %v3531_v42 = vsub.f32 %v13350_v47, %v9275_v53 }
0x141a   :  { %v3518_v48 = vmul.f32 %v3410_v37, %v3410_v37  ;;  %v9313_v40 = vpop.f32.mrb[40].mxu0  ;;  %v3530_v1 = vsub.f32 %v13353_v20, %v3410_v37 }
0x141b   :  { %v3523_v31 = vsub.f32 %v9313_v40, %v3519_v63  ;;  %v3499_v18 = vpop.f32.mrb[41].mxu0  ;;  %v3569_v63 = vrot.slane %v13341_v10, %v12554_v62  ;;  %v3563_v10 = vmax.f32 %v13331_v24, 0.0  ;;  %v3564_v24 = vmax.f32 %v13343_v59, 0.0 }
0x141c   :  { %v3522_v44 = vsub.f32 %v3499_v18, %v3518_v48  ;;  %v9278_v34 = vpop.f32.mrb[50].mxu1 }
0x141d   :  { %v3527_v28 = vmax.f32 %v3523_v31, 0.0  ;;  %v3521_v6 = vmul.f32 %v9278_v34, %v9278_v34  ;;  %v3420_v51 = vpop.f32.mrb[51].mxu1  ;;  %v3557_v31 = vrot.slane %v13327_v8, %v12473_v39  ;;  %vm13429_vm4 = vcmp.eq.s32.totalorder %v3569_v63, 1 }
0x141e   :  { %v3526_v50 = vmax.f32 %v3522_v44, 0.0  ;;  %v3520_v26 = vmul.f32 %v3420_v51, %v3420_v51  ;;  %v9316_v16 = vpop.f32.mrb[42].mxu0  ;;  %v3533_v44 = vsub.f32 %v13362_v52, %v9278_v34  ;;  %v3532_v47 = vsub.f32 %v13365_v30, %v3420_v51 }
0x141f   :  { %v3535_v22 = vadd.f32 1e-05, %v3527_v28  ;;  %v3525_v56 = vsub.f32 %v9316_v16, %v3521_v6  ;;  %v3509_v12 = vpop.f32.mrb[43].mxu0  ;;  %v3562_v16 = vmax.f32 %v13333_v2, 0.0 }
0x1420   :  { %v3534_v19 = vadd.f32 1e-05, %v3526_v50  ;;  %v3524_v60 = vsub.f32 %v3509_v12, %v3520_v26 }
0x1421   :  { %11980 = vrsqrt.f32 %v3535_v22  ;;  %v3529_v58 = vmax.f32 %v3525_v56, 0.0  ;;  %v3565_v56 = vmax.f32 %v13338_v36, 0.0 }
0x1422   :  { %11982 = vrsqrt.f32 %v3534_v19  ;;  %v3528_v9 = vmax.f32 %v3524_v60, 0.0 }
0x1423   :  { %v3537_v43 = vadd.f32 1e-05, %v3529_v58  ;;  %v13448_v58 = vld [vmem:[%s14369_s9 + $0x18] sm:$0x7] }
0x1424   :  { %v3536_v11 = vadd.f32 1e-05, %v3528_v9  ;;  %v3595_v36 = vrot.slane %v13448_v58, %v12470_v38 }
0x1425   :  { %11984 = vrsqrt.f32 %v3537_v43 }
0x1426   :  { %11986 = vrsqrt.f32 %v3536_v11 }
0x142b   :  { %v11981_v3 = vpop.eup %11980 }
0x142c   :  { %v11983_v48 = vpop.eup %11982  ;;  %v3543_v40 = vmul.f32 %v11981_v3, %v3531_v42 }
0x142d   :  { %v3542_v18 = vmul.f32 %v11983_v48, %v3530_v1 }
0x142e   :  { %v3551_v28 = vmul.f32 %v3549_v46, %v3543_v40 }
0x142f   :  { %v11985_v6 = vpop.eup %11984  ;;  %v3550_v53 = vmul.f32 %v3549_v46, %v3542_v18  ;;  %v7113_v18 = vld [vmem:[%s14366_s6 + $0x4] sm:$0xf] }
0x1430   :  { %v11987_v20 = vpop.eup %11986  ;;  %v3559_v37 = vadd.f32 %v3557_v31, %v3551_v28  ;;  %v3545_v26 = vmul.f32 %v11985_v6, %v3533_v44  ;;  %v2161_v44 = vld [vmem:[#allocation5 + $0x80] sm:$0xff]  ;;  %v2162_v28 = vld [vmem:[#allocation5 + $0x88] sm:$0xff]  ;;  %v2163_v6 = vld [vmem:[#allocation5 + $0x90] sm:$0xff] }
0x1431   :  { %v3558_v8 = vadd.f32 %v3557_v31, %v3550_v53  ;;  %v3544_v22 = vmul.f32 %v11987_v20, %v3532_v47  ;;  %v13487_v47 = vpack.c.bf16 %v2162_v28, %v2161_v44  ;;  %v2164_v53 = vld [vmem:[#allocation5 + $0x98] sm:$0xff]  ;;  %v2165_v20 = vld [vmem:[#allocation5 + $0xa0] sm:$0xff] }
0x1432   :  { %v3572_v52 = vsel %vm13429_vm4, %v3563_v10, %v3559_v37  ;;  %v3553_v34 = vmul.f32 %v3549_v46, %v3545_v26  ;;  %v13489_v50 = vpack.c.bf16 %v2164_v53, %v2163_v6  ;;  %v2166_v10 = vld [vmem:[#allocation5 + $0xa8] sm:$0xff]  ;;  %v2167_v26 = vld [vmem:[#allocation5 + $0xb0] sm:$0xff] }
0x1433   :  { %v3571_v30 = vsel %vm13429_vm4, %v3562_v16, %v3558_v8  ;;  %v3552_v51 = vmul.f32 %v3549_v46, %v3544_v22  ;;  %11194 = vmatprep.subr.bf16.mxu1 %v13487_v47  ;;  %v13495_v37 = vpack.c.bf16 %v2166_v10, %v2165_v20  ;;  %v2168_v16 = vld [vmem:[#allocation5 + $0xb8] sm:$0xff]  ;;  %v2169_v22 = vld [vmem:[#allocation5 + $0xc0] sm:$0xff] }
0x1434   :  { %9349 = vmatprep.mubr.f32.mxu1 %v3571_v30  ;;  %v3561_v12 = vadd.f32 %v3557_v31, %v3553_v34  ;;  %v13499_v8 = vpack.c.bf16 %v2168_v16, %v2167_v26  ;;  %v2171_v30 = vld [vmem:[#allocation5 + $0xd0] sm:$0xff] }
0x1435   :  { %9350 = vmatmul.mubr.f32.vlgmr.msra.gmra.mrb[52].mxu1 %v3572_v52  ;;  %v3560_v19 = vadd.f32 %v3557_v31, %v3552_v51  ;;  %v2170_v52 = vld [vmem:[#allocation5 + $0xc8] sm:$0xff]  ;;  %v2172_v51 = vld [vmem:[#allocation5 + $0xd8] sm:$0xff] }
0x1436   :  { %v3574_v2 = vsel %vm13429_vm4, %v3565_v56, %v3561_v12  ;;  %11196 = vmatpush3.bf16.msra.mxu1 %v13487_v47  ;;  %v13503_v34 = vpack.c.bf16 %v2170_v52, %v2169_v22  ;;  %v13507_v56 = vpack.c.bf16 %v2172_v51, %v2171_v30  ;;  %v2173_v12 = vld [vmem:[#allocation5 + $0xe0] sm:$0xff] }
0x1437   :  { %v3573_v60 = vsel %vm13429_vm4, %v3564_v24, %v3560_v19  ;;  %11198 = vmatprep.subr.bf16.mxu1 %v13489_v50  ;;  %v2174_v24 = vld [vmem:[#allocation5 + $0xe8] sm:$0xff] }
0x1438   :  { %9352 = vmatprep.mubr.f32.mxu1 %v3573_v60  ;;  %v13511_v19 = vpack.c.bf16 %v2174_v24, %v2173_v12  ;;  %v2176_v60 = vld [vmem:[#allocation5 + $0xf8] sm:$0xff] }
0x1439   :  { %9353 = vmatmul.mubr.f32.gmra.mrb[54].mxu1 %v3574_v2  ;;  %v2175_v2 = vld [vmem:[#allocation5 + $0xf0] sm:$0xff] }
0x143a   :  { %11200 = vmatpush3.bf16.msra.mxu1 %v13489_v50 }
0x143b   :  { %11202 = vmatprep.subr.bf16.mxu1 %v13495_v37 }
0x143e   :  { %11204 = vmatpush3.bf16.msra.mxu1 %v13495_v37 }
0x143f   :  { %11206 = vmatprep.subr.bf16.mxu1 %v13499_v8 }
0x1442   :  { %11208 = vmatpush3.bf16.msra.mxu1 %v13499_v8 }
0x1443   :  { %11210 = vmatprep.subr.bf16.mxu1 %v13503_v34 }
0x1446   :  { %11212 = vmatpush3.bf16.msra.mxu1 %v13503_v34 }
0x1447   :  { %11214 = vmatprep.subr.bf16.mxu1 %v13507_v56 }
0x144a   :  { %11216 = vmatpush3.bf16.msra.mxu1 %v13507_v56 }
0x144b   :  { %11218 = vmatprep.subr.bf16.mxu1 %v13511_v19 }
0x144e   :  { %11220 = vmatpush3.bf16.msra.mxu1 %v13511_v19 }
0x1508   :  { %v9351_v9 = vpop.f32.mrb[52].mxu1 }
0x1509   :  { %v3662_v59 = vpop.f32.mrb[53].mxu1  ;;  %v13454_v11 = vadd.f32 %v9351_v9, %v3595_v36 }
0x150a   :  { %v13452_v43 = vadd.f32 %v3662_v59, %v3595_v36 }
0x150b   :  { %v3779_v48 = vmul.f32 %v13454_v11, %v13454_v11 }
0x150c   :  { %v9354_v42 = vpop.f32.mrb[54].mxu1  ;;  %9357 = vmatprep.mubr.msk.f32.mxu0 %vm1363_vm10, %v13452_v43  ;;  %v3778_v63 = vmul.f32 %v13452_v43, %v13452_v43 }
0x150d   :  { %v3672_v46 = vpop.f32.mrb[55].mxu1  ;;  %9358 = vmatmul.mubr.msk.f32.vlgmr.msra.gmra.mrb[44].mxu0 %vm1363_vm10, %v13454_v11  ;;  %v13464_v1 = vadd.f32 %v9354_v42, %v3595_v36 }
0x150e   :  { %v13460_v3 = vadd.f32 %v3672_v46, %v3595_v36  ;;  %9364 = vmatpush3.msk.msra.mxu0 %vm1370_vm9, %v12188_v7  ;;  %v13515_v36 = vpack.c.bf16 %v2176_v60, %v2175_v2 }
0x150f   :  { %v3781_v31 = vmul.f32 %v13464_v1, %v13464_v1  ;;  %9371 = vmatprep.subr.msk.mxu0 %vm1370_vm9, %v7113_v18 }
0x1510   :  { %9360 = vmatprep.mubr.msk.f32.mxu0 %vm1363_vm10, %v13460_v3  ;;  %v3780_v40 = vmul.f32 %v13460_v3, %v13460_v3  ;;  %11222 = vmatprep.subr.bf16.mxu1 %v13515_v36 }
0x1511   :  { %9361 = vmatmul.mubr.msk.f32.gmra.mrb[46].mxu0 %vm1363_vm10, %v13464_v1  ;;  %11224 = vmatpush3.bf16.msra.mxu1 %v13515_v36 }
0x1512   :  { %9365 = vmatprep.mubr.msk.f32.mxu0 %vm1363_vm10, %v3778_v63 }
0x1515   :  { %9366 = vmatmul.mubr.msk.f32.vlgmr.msra.gmra.mrb[48].mxu0 %vm1363_vm10, %v3779_v48 }
0x1516   :  { %9368 = vmatprep.mubr.msk.f32.mxu0 %vm1363_vm10, %v3780_v40  ;;  %9372 = vmatpush3.msk.msra.mxu0 %vm1370_vm9, %v7113_v18 }
0x1517   :  { %11226 = vmatprep.subr.bf16.mxu0 %v13487_v47 }
0x1519   :  { %9369 = vmatmul.mubr.msk.f32.gmra.mrb[50].mxu0 %vm1363_vm10, %v3781_v31 }
0x15e0   :  { %v9359_v9 = vpop.f32.mrb[44].mxu0 }
0x15e1   :  { %v3759_v59 = vpop.f32.mrb[45].mxu0  ;;  %v3880_v63 = vmul.f32 %v9359_v9, %v9359_v9  ;;  %v3892_v60 = vsub.f32 %v13454_v11, %v9359_v9 }
0x15e2   :  { %v3879_v48 = vmul.f32 %v3759_v59, %v3759_v59 }
0x15e4   :  { %v9362_v42 = vpop.f32.mrb[46].mxu0 }
0x15e5   :  { %v3769_v46 = vpop.f32.mrb[47].mxu0  ;;  %v3882_v28 = vmul.f32 %v9362_v42, %v9362_v42 }
0x15e6   :  { %v3881_v53 = vmul.f32 %v3769_v46, %v3769_v46 }
0x15e8   :  { %v9367_v40 = vpop.f32.mrb[48].mxu0 }
0x15e9   :  { %v3884_v31 = vsub.f32 %v9367_v40, %v3880_v63  ;;  %v3860_v18 = vpop.f32.mrb[49].mxu0  ;;  %v13524_v63 = vld [vmem:[%s14369_s9 + $0x10] sm:$0xff] }
0x15ea   :  { %v3883_v44 = vsub.f32 %v3860_v18, %v3879_v48  ;;  %v3910_v48 = vrot.slane %v13524_v63, %v12518_v4 }
0x15eb   :  { %v3888_v6 = vmax.f32 %v3884_v31, 0.0  ;;  %v3891_v31 = vsub.f32 %v13452_v43, %v3759_v59 }
0x15ec   :  { %v3887_v20 = vmax.f32 %v3883_v44, 0.0  ;;  %v9370_v10 = vpop.f32.mrb[50].mxu0 }
0x15ed   :  { %v3896_v26 = vadd.f32 1e-05, %v3888_v6  ;;  %v3886_v16 = vsub.f32 %v9370_v10, %v3882_v28  ;;  %v3870_v22 = vpop.f32.mrb[51].mxu0  ;;  %v3918_v6 = vrot.slane %v13524_v63, %v12554_v62 }
0x15ee   :  { %v3895_v52 = vadd.f32 1e-05, %v3887_v20  ;;  %v3885_v30 = vsub.f32 %v3870_v22, %v3881_v53  ;;  %v3894_v53 = vsub.f32 %v13464_v1, %v9362_v42  ;;  %v3893_v20 = vsub.f32 %v13460_v3, %v3769_v46 }
0x15ef   :  { %11988 = vrsqrt.f32 %v3896_v26  ;;  %v3890_v51 = vmax.f32 %v3886_v16, 0.0 }
0x15f0   :  { %11990 = vrsqrt.f32 %v3895_v52  ;;  %v3889_v12 = vmax.f32 %v3885_v30, 0.0 }
0x15f1   :  { %v3898_v24 = vadd.f32 1e-05, %v3890_v51 }
0x15f2   :  { %v3897_v2 = vadd.f32 1e-05, %v3889_v12 }
0x15f3   :  { %11992 = vrsqrt.f32 %v3898_v24 }
0x15f4   :  { %11994 = vrsqrt.f32 %v3897_v2 }
0x15f9   :  { %v11989_v40 = vpop.eup %11988 }
0x15fa   :  { %v11991_v18 = vpop.eup %11990  ;;  %v3904_v44 = vmul.f32 %v11989_v40, %v3892_v60  ;;  %v4255_v40 = vld [vmem:[%s14368_s8] sm:$0xff] }
0x15fb   :  { %v3903_v28 = vmul.f32 %v11991_v18, %v3891_v31 }
0x15fc   :  { %v3912_v11 = vmul.f32 %v3910_v48, %v3904_v44 }
0x15fd   :  { %v11993_v9 = vpop.eup %11992  ;;  %v3911_v10 = vmul.f32 %v3910_v48, %v3903_v28 }
0x15fe   :  { %v11995_v26 = vpop.eup %11994  ;;  %v3906_v16 = vmul.f32 %v11993_v9, %v3894_v53  ;;  %v3920_v30 = vadd.f32 %v3918_v6, %v3912_v11 }
0x15ff   :  { %v3919_v22 = vadd.f32 %v3918_v6, %v3911_v10  ;;  %v3905_v52 = vmul.f32 %v11995_v26, %v3893_v20 }
0x1600   :  { %v3914_v51 = vmul.f32 %v3910_v48, %v3906_v16 }
0x1601   :  { %9373 = vmatprep.mubr.msk.f32.mxu0 %vm1363_vm10, %v3919_v22  ;;  %v3913_v43 = vmul.f32 %v3910_v48, %v3905_v52 }
0x1602   :  { %9374 = vmatmul.mubr.msk.f32.vlgmr.msra.gmra.mrb[52].mxu0 %vm1363_vm10, %v3920_v30  ;;  %v3922_v1 = vadd.f32 %v3918_v6, %v3914_v51 }
0x1603   :  { %v3921_v59 = vadd.f32 %v3918_v6, %v3913_v43  ;;  %11228 = vmatpush3.bf16.msra.mxu0 %v13487_v47 }
0x1604   :  { %11230 = vmatprep.subr.bf16.mxu0 %v13489_v50 }
0x1605   :  { %9376 = vmatprep.mubr.msk.f32.mxu0 %vm1363_vm10, %v3921_v59 }
0x1606   :  { %9377 = vmatmul.mubr.msk.f32.gmra.mrb[54].mxu0 %vm1363_vm10, %v3922_v1 }
0x1607   :  { %11232 = vmatpush3.bf16.msra.mxu0 %v13489_v50 }
0x1608   :  { %11234 = vmatprep.subr.bf16.mxu0 %v13495_v37 }
0x160b   :  { %11236 = vmatpush3.bf16.msra.mxu0 %v13495_v37 }
0x160c   :  { %11238 = vmatprep.subr.bf16.mxu0 %v13499_v8 }
0x160f   :  { %11240 = vmatpush3.bf16.msra.mxu0 %v13499_v8 }
0x1610   :  { %11242 = vmatprep.subr.bf16.mxu0 %v13503_v34 }
0x1613   :  { %11244 = vmatpush3.bf16.msra.mxu0 %v13503_v34 }
0x1614   :  { %11246 = vmatprep.subr.bf16.mxu0 %v13507_v56 }
0x1617   :  { %11248 = vmatpush3.bf16.msra.mxu0 %v13507_v56 }
0x1618   :  { %11250 = vmatprep.subr.bf16.mxu0 %v13511_v19 }
0x161b   :  { %11252 = vmatpush3.bf16.msra.mxu0 %v13511_v19 }
0x161c   :  { %11254 = vmatprep.subr.bf16.mxu0 %v13515_v36 }
0x161f   :  { %11256 = vmatpush3.bf16.msra.mxu0 %v13515_v36 }
0x1620   :  { %11266 = vmatprep.subr.bf16.mxu0 %v13487_v47 }
0x16d5   :  { %v13553_v3 = vpop.f32.mrb[52].mxu0 }
0x16d6   :  { %v13555_v42 = vpop.f32.mrb[53].mxu0  ;;  %v4111_v12 = vmul.f32 %v13553_v3, %v13553_v3 }
0x16d7   :  { %v4110_v46 = vmul.f32 %v13555_v42, %v13555_v42  ;;  %9411 = vmatprep.mubr.f32.mxu1 %v13555_v42 }
0x16d8   :  { %9412 = vmatmul.mubr.f32.vlgmr.msra.gmra.mrb[56].mxu1 %v13553_v3 }
0x16d9   :  { %v13563_v24 = vpop.f32.mrb[54].mxu0  ;;  %9449 = vmatprep.mubr.f32.mxu0 %v4110_v46 }
0x16da   :  { %v13565_v2 = vpop.f32.mrb[55].mxu0  ;;  %9450 = vmatmul.mubr.f32.vlgmr.msra.gmra.mrb[56].mxu0 %v4111_v12  ;;  %v4113_v48 = vmul.f32 %v13563_v24, %v13563_v24 }
0x16db   :  { %v4112_v60 = vmul.f32 %v13565_v2, %v13565_v2  ;;  %9414 = vmatprep.mubr.f32.mxu1 %v13565_v2  ;;  %11268 = vmatpush3.bf16.msra.mxu0 %v13487_v47 }
0x16dc   :  { %9415 = vmatmul.mubr.f32.gmra.mrb[58].mxu1 %v13563_v24  ;;  %11270 = vmatprep.subr.bf16.mxu0 %v13489_v50 }
0x16dd   :  { %9452 = vmatprep.mubr.f32.mxu0 %v4112_v60  ;;  %9463 = vmatprep.mubr.msk.f32.mxu1 %vm4259_vm5, %v4255_v40 }
0x16de   :  { %9453 = vmatmul.mubr.f32.gmra.mrb[58].mxu0 %v4113_v48 }
0x16df   :  { %11272 = vmatpush3.bf16.msra.mxu0 %v13489_v50 }
0x16e0   :  { %11274 = vmatprep.subr.bf16.mxu0 %v13495_v37 }
0x16e3   :  { %11276 = vmatpush3.bf16.msra.mxu0 %v13495_v37 }
0x16e4   :  { %11278 = vmatprep.subr.bf16.mxu0 %v13499_v8 }
0x16e7   :  { %11280 = vmatpush3.bf16.msra.mxu0 %v13499_v8 }
0x16e8   :  { %11282 = vmatprep.subr.bf16.mxu0 %v13503_v34 }
0x16eb   :  { %11284 = vmatpush3.bf16.msra.mxu0 %v13503_v34 }
0x16ec   :  { %11286 = vmatprep.subr.bf16.mxu0 %v13507_v56 }
0x16ef   :  { %11288 = vmatpush3.bf16.msra.mxu0 %v13507_v56 }
0x16f0   :  { %11290 = vmatprep.subr.bf16.mxu0 %v13511_v19 }
0x16f3   :  { %11292 = vmatpush3.bf16.msra.mxu0 %v13511_v19 }
0x16f4   :  { %11294 = vmatprep.subr.bf16.mxu0 %v13515_v36 }
0x16f7   :  { %11296 = vmatpush3.bf16.msra.mxu0 %v13515_v36 }
0x17ab   :  { %v9413_v31 = vpop.f32.mrb[56].mxu1 }
0x17ac   :  { %v4200_v18 = vmul.f32 %v9413_v31, %v9413_v31  ;;  %v4212_v44 = vsub.f32 %v13553_v3, %v9413_v31  ;;  %v4091_v28 = vpop.f32.mrb[57].mxu1 }
0x17ad   :  { %v4199_v6 = vmul.f32 %v4091_v28, %v4091_v28  ;;  %v4211_v53 = vsub.f32 %v13555_v42, %v4091_v28  ;;  %v9451_v11 = vpop.f32.mrb[56].mxu0 }
0x17ae   :  { %v4204_v9 = vsub.f32 %v9451_v11, %v4200_v18  ;;  %v4180_v20 = vpop.f32.mrb[57].mxu0 }
0x17af   :  { %v4203_v10 = vsub.f32 %v4180_v20, %v4199_v6  ;;  %v9416_v26 = vpop.f32.mrb[58].mxu1 }
0x17b0   :  { %v4208_v16 = vmax.f32 %v4204_v9, 0.0  ;;  %v4202_v22 = vmul.f32 %v9416_v26, %v9416_v26  ;;  %v4214_v52 = vsub.f32 %v13563_v24, %v9416_v26  ;;  %v4101_v30 = vpop.f32.mrb[59].mxu1  ;;  %v4230_v24 = vrot.slane %v13524_v63, %v12860_v13 }
0x17b1   :  { %v4207_v51 = vmax.f32 %v4203_v10, 0.0  ;;  %v4201_v43 = vmul.f32 %v4101_v30, %v4101_v30  ;;  %v4213_v59 = vsub.f32 %v13565_v2, %v4101_v30  ;;  %v9454_v1 = vpop.f32.mrb[58].mxu0  ;;  %v4246_v2 = vrot.slane %v13448_v58, %v12473_v39 }
0x17b2   :  { %v4216_v3 = vadd.f32 1e-05, %v4208_v16  ;;  %v4206_v46 = vsub.f32 %v9454_v1, %v4202_v22  ;;  %v4190_v12 = vpop.f32.mrb[59].mxu0  ;;  %v4238_v9 = vrot.slane %v13524_v63, %v12863_v21 }
0x17b3   :  { %v4215_v60 = vadd.f32 1e-05, %v4207_v51  ;;  %v4205_v42 = vsub.f32 %v4190_v12, %v4201_v43  ;;  %v4248_v51 = vmul.f32 %v4246_v2, %v13077_v27  ;;  %v4247_v1 = vmul.f32 %v4246_v2, %v13075_v0  ;;  %v4256_v0 = vld [vmem:[%s14368_s8 + $0x8] sm:$0xff] }
0x17b4   :  { %11996 = vrsqrt.f32 %v4216_v3  ;;  %v4210_v48 = vmax.f32 %v4206_v46, 0.0 }
0x17b5   :  { %11998 = vrsqrt.f32 %v4215_v60  ;;  %v4209_v40 = vmax.f32 %v4205_v42, 0.0 }
0x17b6   :  { %v4218_v31 = vadd.f32 1e-05, %v4210_v48  ;;  %v4250_v48 = vmul.f32 %v4246_v2, %v13084_v57  ;;  %v4257_v57 = vld [vmem:[%s14368_s8 + $0x10] sm:$0xff] }
0x17b7   :  { %v4217_v18 = vadd.f32 1e-05, %v4209_v40 }
0x17b8   :  { %12000 = vrsqrt.f32 %v4218_v31 }
0x17b9   :  { %12002 = vrsqrt.f32 %v4217_v18 }
0x17be   :  { %v11997_v28 = vpop.eup %11996 }
0x17bf   :  { %v11999_v6 = vpop.eup %11998  ;;  %v4224_v11 = vmul.f32 %v11997_v28, %v4212_v44 }
0x17c0   :  { %v4223_v20 = vmul.f32 %v11999_v6, %v4211_v53  ;;  %v4249_v53 = vmul.f32 %v4246_v2, %v13081_v33  ;;  %v4258_v33 = vld [vmem:[%s14368_s8 + $0x18] sm:$0xff]  ;;  %v7127_v2 = vld [vmem:[%s14361_s1 + $0x110] sm:$0xff] }
0x17c1   :  { %v4232_v10 = vmul.f32 %v4230_v24, %v4224_v11  ;;  %v7128_v11 = vld [vmem:[%s14361_s1 + $0x118] sm:$0xff] }
0x17c2   :  { %v12001_v26 = vpop.eup %12000  ;;  %v4231_v16 = vmul.f32 %v4230_v24, %v4223_v20  ;;  %v7129_v20 = vld [vmem:[%s14361_s1 + $0x120] sm:$0xff] }
0x17c3   :  { %v12003_v22 = vpop.eup %12002  ;;  %v4240_v30 = vadd.f32 %v4238_v9, %v4232_v10  ;;  %v4226_v43 = vmul.f32 %v12001_v26, %v4214_v52  ;;  %v7130_v10 = vld [vmem:[%s14361_s1 + $0x128] sm:$0xff] }
0x17c4   :  { %v4239_v3 = vadd.f32 %v4238_v9, %v4231_v16  ;;  %v4225_v46 = vmul.f32 %v12003_v22, %v4213_v59  ;;  %v11337_v26 = vpack.c.bf16 %v7130_v10, %v7129_v20  ;;  %v7131_v16 = vld [vmem:[%s14361_s1 + $0x130] sm:$0xff]  ;;  %v7132_v22 = vld [vmem:[%s14361_s1 + $0x138] sm:$0xff] }
0x17c5   :  { %v4252_v12 = vadd.f32 %v4248_v51, %v4240_v30  ;;  %v4234_v60 = vmul.f32 %v4230_v24, %v4226_v43  ;;  %v11341_v30 = vpack.c.bf16 %v7132_v22, %v7131_v16  ;;  %v7133_v51 = vld [vmem:[%s14361_s1 + $0x140] sm:$0xff]  ;;  %v7134_v43 = vld [vmem:[%s14361_s1 + $0x148] sm:$0xff] }
0x17c6   :  { %v4251_v42 = vadd.f32 %v4247_v1, %v4239_v3  ;;  %v4233_v44 = vmul.f32 %v4230_v24, %v4225_v46  ;;  %v11345_v1 = vpack.c.bf16 %v7134_v43, %v7133_v51  ;;  %v7135_v3 = vld [vmem:[%s14361_s1 + $0x150] sm:$0xff]  ;;  %v7136_v46 = vld [vmem:[%s14361_s1 + $0x158] sm:$0xff] }
0x17c7   :  { %v4242_v40 = vadd.f32 %v4238_v9, %v4234_v60  ;;  %v7137_v60 = vld [vmem:[%s14361_s1 + $0x160] sm:$0xff] }
0x17c8   :  { %v11257_v31 = vpack.c.bf16 %v4252_v12, %v4251_v42  ;;  %v4241_v18 = vadd.f32 %v4238_v9, %v4233_v44  ;;  %v11333_v9 = vpack.c.bf16 %v7128_v11, %v7127_v2  ;;  %v11349_v12 = vpack.c.bf16 %v7136_v46, %v7135_v3  ;;  %v7138_v42 = vld [vmem:[%s14361_s1 + $0x168] sm:$0xff] }
0x17c9   :  { %v4254_v28 = vadd.f32 %v4250_v48, %v4242_v40  ;;  %v11353_v44 = vpack.c.bf16 %v7138_v42, %v7137_v60  ;;  %v7139_v48 = vld [vmem:[%s14361_s1 + $0x170] sm:$0xff]  ;;  %v7140_v40 = vld [vmem:[%s14361_s1 + $0x178] sm:$0xff]  ;;  %v4570_v46 = vrot.slane %v13448_v58, %v12434_v55 }
0x17ca   :  { %11258 = vmatprep.subr.bf16.mxu1 %v11257_v31  ;;  %v4253_v6 = vadd.f32 %v4249_v53, %v4241_v18  ;;  %v11357_v53 = vpack.c.bf16 %v7140_v40, %v7139_v48 }
0x17cb   :  { %11260 = vmatpush3.bf16.msra.mxu1 %v11257_v31 }
0x17cc   :  { %v11261_v27 = vpack.c.bf16 %v4254_v28, %v4253_v6 }
0x17ce   :  { %11262 = vmatprep.subr.bf16.mxu1 %v11261_v27 }
0x17cf   :  { %11264 = vmatpush3.bf16.msra.mxu1 %v11261_v27 }
0x17d0   :  { %11298 = vmatprep.subr.bf16.mxu1 %v13487_v47 }
0x17d2   :  { %9464 = vmatmul.mubr.msk.f32.vlgmr.msra.gmra.mrb[60].mxu1 %vm4259_vm5, %v4256_v0 }
0x17d3   :  { %9466 = vmatprep.mubr.msk.f32.mxu1 %vm4259_vm5, %v4257_v57  ;;  %11300 = vmatpush3.bf16.msra.mxu1 %v13487_v47  ;;  %v7125_v47 = vld [vmem:[%s14361_s1 + $0x100] sm:$0xff] }
0x17d4   :  { %11302 = vmatprep.subr.bf16.mxu1 %v13489_v50 }
0x17d6   :  { %9467 = vmatmul.mubr.msk.f32.gmra.mrb[62].mxu1 %vm4259_vm5, %v4258_v33 }
0x17d7   :  { %11304 = vmatpush3.bf16.msra.mxu1 %v13489_v50  ;;  %v7126_v50 = vld [vmem:[%s14361_s1 + $0x108] sm:$0xff] }
0x17d8   :  { %11306 = vmatprep.subr.bf16.mxu1 %v13495_v37 }
0x17db   :  { %11308 = vmatpush3.bf16.msra.mxu1 %v13495_v37  ;;  %v11329_v37 = vpack.c.bf16 %v7126_v50, %v7125_v47 }
0x17dc   :  { %11310 = vmatprep.subr.bf16.mxu1 %v13499_v8 }
0x17dd   :  { %11330 = vmatprep.subr.bf16.mxu0 %v11329_v37 }
0x17df   :  { %11312 = vmatpush3.bf16.msra.mxu1 %v13499_v8 }
0x17e0   :  { %11314 = vmatprep.subr.bf16.mxu1 %v13503_v34 }
0x17e3   :  { %11316 = vmatpush3.bf16.msra.mxu1 %v13503_v34 }
0x17e4   :  { %11318 = vmatprep.subr.bf16.mxu1 %v13507_v56 }
0x17e7   :  { %11320 = vmatpush3.bf16.msra.mxu1 %v13507_v56 }
0x17e8   :  { %11322 = vmatprep.subr.bf16.mxu1 %v13511_v19 }
0x17eb   :  { %11324 = vmatpush3.bf16.msra.mxu1 %v13511_v19 }
0x17ec   :  { %11326 = vmatprep.subr.bf16.mxu1 %v13515_v36 }
0x17ef   :  { %11328 = vmatpush3.bf16.msra.mxu1 %v13515_v36 }
0x17f0   :  { %11362 = vmatprep.subr.bf16.mxu1 %v12316_v15 }
0x18a5   :  { %v13641_v8 = vpop.f32.mrb[60].mxu1 }
0x18a6   :  { %v13643_v34 = vpop.f32.mrb[61].mxu1  ;;  %v4443_v19 = vmul.f32 %v13641_v8, %v13641_v8 }
0x18a7   :  { %v4442_v56 = vmul.f32 %v13643_v34, %v13643_v34  ;;  %9501 = vmatprep.mubr.f32.mxu0 %v13643_v34 }
0x18a8   :  { %9502 = vmatmul.mubr.f32.vlgmr.msra.gmra.mrb[60].mxu0 %v13641_v8 }
0x18a9   :  { %v13651_v36 = vpop.f32.mrb[62].mxu1  ;;  %9539 = vmatprep.mubr.f32.mxu1 %v4442_v56  ;;  %11332 = vmatpush3.bf16.msra.mxu0 %v11329_v37 }
0x18aa   :  { %v13653_v52 = vpop.f32.mrb[63].mxu1  ;;  %9540 = vmatmul.mubr.f32.vlgmr.msra.gmra.mrb[64].mxu1 %v4443_v19  ;;  %v4445_v24 = vmul.f32 %v13651_v36, %v13651_v36  ;;  %11334 = vmatprep.subr.bf16.mxu0 %v11333_v9 }
0x18ab   :  { %v4444_v59 = vmul.f32 %v13653_v52, %v13653_v52  ;;  %9504 = vmatprep.mubr.f32.mxu0 %v13653_v52  ;;  %11364 = vmatpush3.bf16.msra.mxu1 %v12316_v15 }
0x18ac   :  { %9505 = vmatmul.mubr.f32.gmra.mrb[62].mxu0 %v13651_v36  ;;  %11366 = vmatprep.subr.bf16.mxu1 %v12321_v17 }
0x18ad   :  { %9542 = vmatprep.mubr.f32.mxu1 %v4444_v59  ;;  %11336 = vmatpush3.bf16.msra.mxu0 %v11333_v9 }
0x18ae   :  { %9543 = vmatmul.mubr.f32.gmra.mrb[66].mxu1 %v4445_v24  ;;  %11338 = vmatprep.subr.bf16.mxu0 %v11337_v26 }
0x18af   :  { %11368 = vmatpush3.bf16.msra.mxu1 %v12321_v17 }
0x18b0   :  { %11370 = vmatprep.subr.bf16.mxu1 %v12338_v23 }
0x18b1   :  { %11340 = vmatpush3.bf16.msra.mxu0 %v11337_v26 }
0x18b2   :  { %11342 = vmatprep.subr.bf16.mxu0 %v11341_v30 }
0x18b3   :  { %11372 = vmatpush3.bf16.msra.mxu1 %v12338_v23 }
0x18b4   :  { %11374 = vmatprep.subr.bf16.mxu1 %v12354_v29 }
0x18b5   :  { %11344 = vmatpush3.bf16.msra.mxu0 %v11341_v30 }
0x18b6   :  { %11346 = vmatprep.subr.bf16.mxu0 %v11345_v1 }
0x18b7   :  { %11376 = vmatpush3.bf16.msra.mxu1 %v12354_v29 }
0x18b8   :  { %11378 = vmatprep.subr.bf16.mxu1 %v12370_v35 }
0x18b9   :  { %11348 = vmatpush3.bf16.msra.mxu0 %v11345_v1 }
0x18ba   :  { %11350 = vmatprep.subr.bf16.mxu0 %v11349_v12 }
0x18bb   :  { %11380 = vmatpush3.bf16.msra.mxu1 %v12370_v35 }
0x18bc   :  { %11382 = vmatprep.subr.bf16.mxu1 %v12386_v41 }
0x18bd   :  { %11352 = vmatpush3.bf16.msra.mxu0 %v11349_v12 }
0x18be   :  { %11354 = vmatprep.subr.bf16.mxu0 %v11353_v44 }
0x18bf   :  { %11384 = vmatpush3.bf16.msra.mxu1 %v12386_v41 }
0x18c0   :  { %11386 = vmatprep.subr.bf16.mxu1 %v12396_v45 }
0x18c1   :  { %11356 = vmatpush3.bf16.msra.mxu0 %v11353_v44 }
0x18c2   :  { %11358 = vmatprep.subr.bf16.mxu0 %v11357_v53 }
0x18c3   :  { %11388 = vmatpush3.bf16.msra.mxu1 %v12396_v45 }
0x18c4   :  { %11390 = vmatprep.subr.bf16.mxu1 %v12424_v49 }
0x18c5   :  { %11360 = vmatpush3.bf16.msra.mxu0 %v11357_v53 }
0x18c6   :  { %11394 = vmatprep.subr.bf16.mxu0 %v12316_v15 }
0x18c7   :  { %11392 = vmatpush3.bf16.msra.mxu1 %v12424_v49 }
0x197b   :  { %v9503_v31 = vpop.f32.mrb[60].mxu0 }
0x197c   :  { %v4532_v18 = vmul.f32 %v9503_v31, %v9503_v31  ;;  %v4544_v28 = vsub.f32 %v13641_v8, %v9503_v31  ;;  %v4423_v6 = vpop.f32.mrb[61].mxu0 }
0x197d   :  { %v4531_v27 = vmul.f32 %v4423_v6, %v4423_v6  ;;  %v4543_v0 = vsub.f32 %v13643_v34, %v4423_v6  ;;  %v9541_v57 = vpop.f32.mrb[64].mxu1 }
0x197e   :  { %v4536_v33 = vsub.f32 %v9541_v57, %v4532_v18  ;;  %v4512_v47 = vpop.f32.mrb[65].mxu1 }
0x197f   :  { %v4535_v50 = vsub.f32 %v4512_v47, %v4531_v27  ;;  %v9506_v37 = vpop.f32.mrb[62].mxu0 }
0x1980   :  { %v4540_v56 = vmax.f32 %v4536_v33, 0.0  ;;  %v4534_v19 = vmul.f32 %v9506_v37, %v9506_v37  ;;  %v4546_v59 = vsub.f32 %v13651_v36, %v9506_v37  ;;  %v4433_v24 = vpop.f32.mrb[63].mxu0  ;;  %v4562_v36 = vrot.slane %v13524_v63, %v12990_v61 }
0x1981   :  { %v4539_v2 = vmax.f32 %v4535_v50, 0.0  ;;  %v4533_v11 = vmul.f32 %v4433_v24, %v4433_v24  ;;  %v4545_v9 = vsub.f32 %v13653_v52, %v4433_v24  ;;  %v9544_v20 = vpop.f32.mrb[66].mxu1 }
0x1982   :  { %v4548_v8 = vadd.f32 1e-05, %v4540_v56  ;;  %v4538_v10 = vsub.f32 %v9544_v20, %v4534_v19  ;;  %v4522_v26 = vpop.f32.mrb[67].mxu1 }
0x1983   :  { %v4547_v16 = vadd.f32 1e-05, %v4539_v2  ;;  %v4537_v34 = vsub.f32 %v4522_v26, %v4533_v11  ;;  %v4928_v26 = vld [vmem:[#allocation2 + $0x310] sm:$0xff] }
0x1984   :  { %12004 = vrsqrt.f32 %v4548_v8  ;;  %v4542_v22 = vmax.f32 %v4538_v10, 0.0 }
0x1985   :  { %12006 = vrsqrt.f32 %v4547_v16  ;;  %v4541_v30 = vmax.f32 %v4537_v34, 0.0  ;;  %v4929_v16 = vld [vmem:[#allocation2 + $0x318] sm:$0xff] }
0x1986   :  { %v4550_v51 = vadd.f32 1e-05, %v4542_v22  ;;  %v11429_v34 = vpack.c.bf16 %v4929_v16, %v4928_v26  ;;  %v4930_v22 = vld [vmem:[#allocation2 + $0x320] sm:$0xff] }
0x1987   :  { %v4549_v43 = vadd.f32 1e-05, %v4541_v30  ;;  %v4931_v30 = vld [vmem:[#allocation2 + $0x328] sm:$0xff] }
0x1988   :  { %12008 = vrsqrt.f32 %v4550_v51  ;;  %v11433_v51 = vpack.c.bf16 %v4931_v30, %v4930_v22 }
0x1989   :  { %12010 = vrsqrt.f32 %v4549_v43  ;;  %v4932_v43 = vld [vmem:[#allocation2 + $0x330] sm:$0xff] }
0x198e   :  { %v12005_v1 = vpop.eup %12004 }
0x198f   :  { %v12007_v3 = vpop.eup %12006  ;;  %v4556_v52 = vmul.f32 %v12005_v1, %v4544_v28 }
0x1990   :  { %v4555_v12 = vmul.f32 %v12007_v3, %v4543_v0  ;;  %v4934_v3 = vld [vmem:[#allocation2 + $0x340] sm:$0xff] }
0x1991   :  { %v4564_v60 = vmul.f32 %v4562_v36, %v4556_v52  ;;  %v4935_v52 = vld [vmem:[#allocation2 + $0x348] sm:$0xff] }
0x1992   :  { %v12009_v42 = vpop.eup %12008  ;;  %v4563_v44 = vmul.f32 %v4562_v36, %v4555_v12  ;;  %v4936_v12 = vld [vmem:[#allocation2 + $0x350] sm:$0xff] }
0x1993   :  { %v12011_v48 = vpop.eup %12010  ;;  %v4572_v40 = vadd.f32 %v4570_v46, %v4564_v60  ;;  %v4558_v53 = vmul.f32 %v12009_v42, %v4546_v59  ;;  %v4937_v60 = vld [vmem:[#allocation2 + $0x358] sm:$0xff] }
0x1994   :  { %v4571_v31 = vadd.f32 %v4570_v46, %v4563_v44  ;;  %v4557_v18 = vmul.f32 %v12011_v48, %v4545_v9  ;;  %v11445_v42 = vpack.c.bf16 %v4937_v60, %v4936_v12  ;;  %v4938_v44 = vld [vmem:[#allocation2 + $0x360] sm:$0xff]  ;;  %v4939_v48 = vld [vmem:[#allocation2 + $0x368] sm:$0xff] }
0x1995   :  { %v4566_v6 = vmul.f32 %v4562_v36, %v4558_v53  ;;  %v4576_v63 = vadd.f32 %v4572_v40, %v12998_v54  ;;  %v4927_v54 = vld [vmem:[#allocation2 + $0x308] sm:$0xff]  ;;  %v11449_v40 = vpack.c.bf16 %v4939_v48, %v4938_v44  ;;  %v4940_v53 = vld [vmem:[#allocation2 + $0x370] sm:$0xff] }
0x1996   :  { %v4575_v27 = vadd.f32 %v4571_v31, %v12996_v14  ;;  %v4565_v57 = vmul.f32 %v4562_v36, %v4557_v18  ;;  %v4926_v14 = vld [vmem:[#allocation2 + $0x300] sm:$0xff]  ;;  %v4933_v36 = vld [vmem:[#allocation2 + $0x338] sm:$0xff] }
0x1997   :  { %v4574_v33 = vadd.f32 %v4570_v46, %v4566_v6  ;;  %v11437_v1 = vpack.c.bf16 %v4933_v36, %v4932_v43  ;;  %v4941_v31 = vld [vmem:[#allocation2 + $0x378] sm:$0xff] }
0x1998   :  { %9577 = vmatprep.mubr.f32.mxu0 %v4575_v27  ;;  %v4573_v28 = vadd.f32 %v4570_v46, %v4565_v57  ;;  %v11441_v46 = vpack.c.bf16 %v4935_v52, %v4934_v3  ;;  %v11453_v18 = vpack.c.bf16 %v4941_v31, %v4940_v53 }
0x1999   :  { %9578 = vmatmul.mubr.f32.vlgmr.msra.gmra.mrb[64].mxu0 %v4576_v63  ;;  %v4578_v0 = vadd.f32 %v4574_v33, %v13005_v32  ;;  %v13750_v32 = vld [vmem:[%s14369_s9 + $0x20] sm:$0xff] }
0x199a   :  { %v4577_v58 = vadd.f32 %v4573_v28, %v13002_v25  ;;  %11396 = vmatpush3.bf16.msra.mxu0 %v12316_v15  ;;  %v11425_v25 = vpack.c.bf16 %v4927_v54, %v4926_v14  ;;  %v4619_v47 = vrot.slane %v13750_v32, %v12434_v55 }
0x199b   :  { %11398 = vmatprep.subr.bf16.mxu0 %v12321_v17 }
0x199c   :  { %9580 = vmatprep.mubr.f32.mxu0 %v4577_v58  ;;  %11426 = vmatprep.subr.bf16.mxu1 %v11425_v25 }
0x199d   :  { %9581 = vmatmul.mubr.f32.gmra.mrb[66].mxu0 %v4578_v0 }
0x199e   :  { %11400 = vmatpush3.bf16.msra.mxu0 %v12321_v17 }
0x199f   :  { %11402 = vmatprep.subr.bf16.mxu0 %v12338_v23 }
0x19a2   :  { %11404 = vmatpush3.bf16.msra.mxu0 %v12338_v23 }
0x19a3   :  { %11406 = vmatprep.subr.bf16.mxu0 %v12354_v29 }
0x19a6   :  { %11408 = vmatpush3.bf16.msra.mxu0 %v12354_v29 }
0x19a7   :  { %11410 = vmatprep.subr.bf16.mxu0 %v12370_v35 }
0x19aa   :  { %11412 = vmatpush3.bf16.msra.mxu0 %v12370_v35 }
0x19ab   :  { %11414 = vmatprep.subr.bf16.mxu0 %v12386_v41 }
0x19ae   :  { %11416 = vmatpush3.bf16.msra.mxu0 %v12386_v41 }
0x19af   :  { %11418 = vmatprep.subr.bf16.mxu0 %v12396_v45 }
0x19b2   :  { %11420 = vmatpush3.bf16.msra.mxu0 %v12396_v45 }
0x19b3   :  { %11422 = vmatprep.subr.bf16.mxu0 %v12424_v49 }
0x19b6   :  { %11424 = vmatpush3.bf16.msra.mxu0 %v12424_v49 }
0x19b7   :  { %11458 = vmatprep.subr.bf16.mxu0 %v12316_v15 }
0x1a6c   :  { %v9579_v50 = vpop.f32.mrb[64].mxu0 }
0x1a6d   :  { %v13754_v37 = vadd.f32 %v9579_v50, %v4619_v47  ;;  %v4686_v56 = vpop.f32.mrb[65].mxu0 }
0x1a6e   :  { %v13756_v19 = vadd.f32 %v4686_v56, %v4619_v47 }
0x1a6f   :  { %v4791_v2 = vmul.f32 %v13754_v37, %v13754_v37 }
0x1a70   :  { %v9582_v59 = vpop.f32.mrb[66].mxu0  ;;  %9615 = vmatprep.mubr.f32.mxu1 %v13756_v19  ;;  %v4790_v24 = vmul.f32 %v13756_v19, %v13756_v19 }
0x1a71   :  { %v13763_v11 = vadd.f32 %v9582_v59, %v4619_v47  ;;  %v4696_v9 = vpop.f32.mrb[67].mxu0  ;;  %9616 = vmatmul.mubr.f32.vlgmr.msra.gmra.mrb[68].mxu1 %v13754_v37 }
0x1a72   :  { %v13766_v20 = vadd.f32 %v4696_v9, %v4619_v47  ;;  %9653 = vmatprep.mubr.f32.mxu0 %v4790_v24  ;;  %11428 = vmatpush3.bf16.msra.mxu1 %v11425_v25 }
0x1a73   :  { %9654 = vmatmul.mubr.f32.vlgmr.msra.gmra.mrb[68].mxu0 %v4791_v2  ;;  %v4793_v10 = vmul.f32 %v13763_v11, %v13763_v11  ;;  %11430 = vmatprep.subr.bf16.mxu1 %v11429_v34 }
0x1a74   :  { %9618 = vmatprep.mubr.f32.mxu1 %v13766_v20  ;;  %v4792_v8 = vmul.f32 %v13766_v20, %v13766_v20  ;;  %11460 = vmatpush3.bf16.msra.mxu0 %v12316_v15 }
0x1a75   :  { %9619 = vmatmul.mubr.f32.gmra.mrb[70].mxu1 %v13763_v11  ;;  %11462 = vmatprep.subr.bf16.mxu0 %v12321_v17 }
0x1a76   :  { %9656 = vmatprep.mubr.f32.mxu0 %v4792_v8  ;;  %11432 = vmatpush3.bf16.msra.mxu1 %v11429_v34 }
0x1a77   :  { %9657 = vmatmul.mubr.f32.gmra.mrb[70].mxu0 %v4793_v10  ;;  %11434 = vmatprep.subr.bf16.mxu1 %v11433_v51 }
0x1a78   :  { %11464 = vmatpush3.bf16.msra.mxu0 %v12321_v17 }
0x1a79   :  { %11466 = vmatprep.subr.bf16.mxu0 %v12338_v23 }
0x1a7a   :  { %11436 = vmatpush3.bf16.msra.mxu1 %v11433_v51  ;;  %v4910_v51 = vrot.slane %v13750_v32, %v12470_v38 }
0x1a7b   :  { %11438 = vmatprep.subr.bf16.mxu1 %v11437_v1 }
0x1a7c   :  { %11468 = vmatpush3.bf16.msra.mxu0 %v12338_v23 }
0x1a7d   :  { %11470 = vmatprep.subr.bf16.mxu0 %v12354_v29 }
0x1a7e   :  { %11440 = vmatpush3.bf16.msra.mxu1 %v11437_v1 }
0x1a7f   :  { %11442 = vmatprep.subr.bf16.mxu1 %v11441_v46 }
0x1a80   :  { %11472 = vmatpush3.bf16.msra.mxu0 %v12354_v29 }
0x1a81   :  { %11474 = vmatprep.subr.bf16.mxu0 %v12370_v35 }
0x1a82   :  { %11444 = vmatpush3.bf16.msra.mxu1 %v11441_v46  ;;  %v4918_v46 = vrot.slane %v13750_v32, %v12473_v39 }
0x1a83   :  { %11446 = vmatprep.subr.bf16.mxu1 %v11445_v42 }
0x1a84   :  { %11476 = vmatpush3.bf16.msra.mxu0 %v12370_v35 }
0x1a85   :  { %11478 = vmatprep.subr.bf16.mxu0 %v12386_v41 }
0x1a86   :  { %11448 = vmatpush3.bf16.msra.mxu1 %v11445_v42 }
0x1a87   :  { %11450 = vmatprep.subr.bf16.mxu1 %v11449_v40 }
0x1a88   :  { %11480 = vmatpush3.bf16.msra.mxu0 %v12386_v41 }
0x1a89   :  { %11482 = vmatprep.subr.bf16.mxu0 %v12396_v45 }
0x1a8a   :  { %11452 = vmatpush3.bf16.msra.mxu1 %v11449_v40 }
0x1a8b   :  { %11454 = vmatprep.subr.bf16.mxu1 %v11453_v18 }
0x1a8c   :  { %11484 = vmatpush3.bf16.msra.mxu0 %v12396_v45 }
0x1a8d   :  { %11486 = vmatprep.subr.bf16.mxu0 %v12424_v49 }
0x1a8e   :  { %11456 = vmatpush3.bf16.msra.mxu1 %v11453_v18 }
0x1a8f   :  { %11490 = vmatprep.subr.bf16.mxu1 %v12316_v15 }
0x1a90   :  { %11488 = vmatpush3.bf16.msra.mxu0 %v12424_v49 }
0x1b44   :  { %v9617_v6 = vpop.f32.mrb[68].mxu1 }
0x1b45   :  { %v4880_v27 = vmul.f32 %v9617_v6, %v9617_v6  ;;  %v4771_v57 = vpop.f32.mrb[69].mxu1  ;;  %v4892_v30 = vsub.f32 %v13754_v37, %v9617_v6 }
0x1b46   :  { %v4879_v63 = vmul.f32 %v4771_v57, %v4771_v57  ;;  %v9655_v33 = vpop.f32.mrb[68].mxu0  ;;  %v4891_v36 = vsub.f32 %v13756_v19, %v4771_v57 }
0x1b47   :  { %v4884_v28 = vsub.f32 %v9655_v33, %v4880_v27  ;;  %v4860_v58 = vpop.f32.mrb[69].mxu0 }
0x1b48   :  { %v4883_v0 = vsub.f32 %v4860_v58, %v4879_v63  ;;  %v9620_v14 = vpop.f32.mrb[70].mxu1  ;;  %v13817_v63 = vld [vmem:[%s14370_s10 + $0x30] sm:$0x1f] }
0x1b49   :  { %v4888_v54 = vmax.f32 %v4884_v28, 0.0  ;;  %v4882_v25 = vmul.f32 %v9620_v14, %v9620_v14  ;;  %v4781_v47 = vpop.f32.mrb[71].mxu1  ;;  %v4894_v12 = vsub.f32 %v13763_v11, %v9620_v14  ;;  %v5284_v11 = vld [vmem:[#allocation2 + $0x380] sm:$0xff]  ;;  %v4945_v33 = vrot.slane %v13817_v63, %v12434_v55 }
0x1b4a   :  { %v4887_v50 = vmax.f32 %v4883_v0, 0.0  ;;  %v4881_v56 = vmul.f32 %v4781_v47, %v4781_v47  ;;  %v9658_v59 = vpop.f32.mrb[70].mxu0  ;;  %v4893_v44 = vsub.f32 %v13766_v20, %v4781_v47  ;;  %v5285_v20 = vld [vmem:[#allocation2 + $0x388] sm:$0xff]  ;;  %vm5031_vm6 = vcmp.gt.f32.partialorder %v13817_v63, 0.0 }
0x1b4b   :  { %v4896_v24 = vadd.f32 1e-05, %v4888_v54  ;;  %v4886_v2 = vsub.f32 %v9658_v59, %v4882_v25  ;;  %v4870_v9 = vpop.f32.mrb[71].mxu0  ;;  %v11521_v57 = vpack.c.bf16 %v5285_v20, %v5284_v11  ;;  %v13831_v59 = vsel %vm5031_vm6, 1, %v12187_v5  ;;  %v5296_v11 = vld [vmem:[#allocation2 + $0x3e0] sm:$0xff]  ;;  %v5297_v20 = vld [vmem:[#allocation2 + $0x3e8] sm:$0xff] }
0x1b4c   :  { %v4895_v8 = vadd.f32 1e-05, %v4887_v50  ;;  %v4885_v10 = vsub.f32 %v4870_v9, %v4881_v56 }
0x1b4d   :  { %12012 = vrsqrt.f32 %v4896_v24  ;;  %v4890_v26 = vmax.f32 %v4886_v2, 0.0  ;;  %11522 = vmatprep.subr.bf16.mxu0 %v11521_v57 }
0x1b4e   :  { %12014 = vrsqrt.f32 %v4895_v8  ;;  %v4889_v16 = vmax.f32 %v4885_v10, 0.0  ;;  %v5044_v8 = vrot.slane %v13831_v59, %v12518_v4 }
0x1b4f   :  { %v4898_v34 = vadd.f32 1e-05, %v4890_v26 }
0x1b50   :  { %v4897_v22 = vadd.f32 1e-05, %v4889_v16  ;;  %vm5045_vm7 = vcmp.eq.s32.totalorder %v5044_v8, 1 }
0x1b51   :  { %12016 = vrsqrt.f32 %v4898_v34 }
0x1b52   :  { %12018 = vrsqrt.f32 %v4897_v22 }
0x1b57   :  { %v12013_v43 = vpop.eup %12012 }
0x1b58   :  { %v12015_v1 = vpop.eup %12014  ;;  %v4904_v3 = vmul.f32 %v12013_v43, %v4892_v30 }
0x1b59   :  { %v4903_v52 = vmul.f32 %v12015_v1, %v4891_v36 }
0x1b5a   :  { %v4912_v60 = vmul.f32 %v4910_v51, %v4904_v3 }
0x1b5b   :  { %v12017_v42 = vpop.eup %12016  ;;  %v4911_v48 = vmul.f32 %v4910_v51, %v4903_v52 }
0x1b5c   :  { %v12019_v37 = vpop.eup %12018  ;;  %v4906_v40 = vmul.f32 %v12017_v42, %v4894_v12  ;;  %v4920_v18 = vadd.f32 %v4918_v46, %v4912_v60  ;;  %v5287_v12 = vld [vmem:[#allocation2 + $0x398] sm:$0xff]  ;;  %v5288_v42 = vld [vmem:[#allocation2 + $0x3a0] sm:$0xff] }
0x1b5d   :  { %v4919_v53 = vadd.f32 %v4918_v46, %v4911_v48  ;;  %v4905_v31 = vmul.f32 %v12019_v37, %v4893_v44  ;;  %v5289_v44 = vld [vmem:[#allocation2 + $0x3a8] sm:$0xff]  ;;  %v5290_v37 = vld [vmem:[#allocation2 + $0x3b0] sm:$0xff] }
0x1b5e   :  { %v4914_v6 = vmul.f32 %v4910_v51, %v4906_v40  ;;  %v11529_v48 = vpack.c.bf16 %v5289_v44, %v5288_v42  ;;  %v5291_v40 = vld [vmem:[#allocation2 + $0x3b8] sm:$0xff] }
0x1b5f   :  { %9691 = vmatprep.mubr.f32.mxu1 %v4919_v53  ;;  %v4913_v19 = vmul.f32 %v4910_v51, %v4905_v31  ;;  %v11533_v53 = vpack.c.bf16 %v5291_v40, %v5290_v37  ;;  %v5292_v31 = vld [vmem:[#allocation2 + $0x3c0] sm:$0xff] }
0x1b60   :  { %9692 = vmatmul.mubr.f32.vlgmr.msra.gmra.mrb[72].mxu1 %v4920_v18  ;;  %v4922_v32 = vadd.f32 %v4918_v46, %v4914_v6  ;;  %v5293_v18 = vld [vmem:[#allocation2 + $0x3c8] sm:$0xff] }
0x1b61   :  { %v4921_v27 = vadd.f32 %v4918_v46, %v4913_v19  ;;  %11492 = vmatpush3.bf16.msra.mxu1 %v12316_v15  ;;  %v5286_v46 = vld [vmem:[#allocation2 + $0x390] sm:$0xff]  ;;  %v11537_v6 = vpack.c.bf16 %v5293_v18, %v5292_v31  ;;  %v5255_v18 = vrot.slane %v13817_v63, %v12470_v38 }
0x1b62   :  { %11494 = vmatprep.subr.bf16.mxu1 %v12321_v17  ;;  %v11525_v60 = vpack.c.bf16 %v5287_v12, %v5286_v46  ;;  %v5294_v19 = vld [vmem:[#allocation2 + $0x3d0] sm:$0xff] }
0x1b63   :  { %9694 = vmatprep.mubr.f32.mxu1 %v4921_v27  ;;  %v5295_v27 = vld [vmem:[#allocation2 + $0x3d8] sm:$0xff] }
0x1b64   :  { %9695 = vmatmul.mubr.f32.gmra.mrb[74].mxu1 %v4922_v32  ;;  %v11541_v32 = vpack.c.bf16 %v5295_v27, %v5294_v19  ;;  %v5275_v27 = vrot.slane %v13831_v59, %v12554_v62 }
0x1b65   :  { %11496 = vmatpush3.bf16.msra.mxu1 %v12321_v17 }
0x1b66   :  { %11498 = vmatprep.subr.bf16.mxu1 %v12338_v23  ;;  %vm13889_vm8 = vcmp.eq.s32.totalorder %v5275_v27, 1 }
0x1b69   :  { %11500 = vmatpush3.bf16.msra.mxu1 %v12338_v23 }
0x1b6a   :  { %11502 = vmatprep.subr.bf16.mxu1 %v12354_v29 }
0x1b6d   :  { %11504 = vmatpush3.bf16.msra.mxu1 %v12354_v29 }
0x1b6e   :  { %11506 = vmatprep.subr.bf16.mxu1 %v12370_v35 }
0x1b71   :  { %11508 = vmatpush3.bf16.msra.mxu1 %v12370_v35 }
0x1b72   :  { %11510 = vmatprep.subr.bf16.mxu1 %v12386_v41 }
0x1b75   :  { %11512 = vmatpush3.bf16.msra.mxu1 %v12386_v41 }
0x1b76   :  { %11514 = vmatprep.subr.bf16.mxu1 %v12396_v45 }
0x1b79   :  { %11516 = vmatpush3.bf16.msra.mxu1 %v12396_v45 }
0x1b7a   :  { %11518 = vmatprep.subr.bf16.mxu1 %v12424_v49 }
0x1b7d   :  { %11520 = vmatpush3.bf16.msra.mxu1 %v12424_v49 }
0x1b7e   :  { %11554 = vmatprep.subr.bf16.mxu1 %v12316_v15 }
0x1c33   :  { %v9693_v28 = vpop.f32.mrb[72].mxu1 }
0x1c34   :  { %v13821_v58 = vadd.f32 %v9693_v28, %v4945_v33  ;;  %v5012_v0 = vpop.f32.mrb[73].mxu1  ;;  %v5299_v28 = vld [vmem:[#allocation2 + $0x3f8] sm:$0xff] }
0x1c35   :  { %v13823_v14 = vadd.f32 %v5012_v0, %v4945_v33 }
0x1c36   :  { %v5034_v54 = vmul.f32 1.442695, %v13821_v58  ;;  %v5269_v59 = vmax.f32 %v13821_v58, 0.0 }
0x1c37   :  { %v5032_v25 = vmul.f32 1.442695, %v13823_v14  ;;  %v9696_v47 = vpop.f32.mrb[74].mxu1 }
0x1c38   :  { %12020 = vpow2.f32 %v5034_v54  ;;  %v13828_v50 = vadd.f32 %v9696_v47, %v4945_v33  ;;  %v5022_v56 = vpop.f32.mrb[75].mxu1 }
0x1c39   :  { %12022 = vpow2.f32 %v5032_v25  ;;  %v13833_v24 = vadd.f32 %v5022_v56, %v4945_v33  ;;  %v5298_v33 = vld [vmem:[#allocation2 + $0x3f0] sm:$0xff] }
0x1c3a   :  { %v5038_v2 = vmul.f32 1.442695, %v13828_v50  ;;  %v11549_v0 = vpack.c.bf16 %v5299_v28, %v5298_v33 }
0x1c3b   :  { %v5036_v9 = vmul.f32 1.442695, %v13833_v24 }
0x1c3c   :  { %12024 = vpow2.f32 %v5038_v2 }
0x1c3d   :  { %12026 = vpow2.f32 %v5036_v9 }
0x1c42   :  { %v12021_v10 = vpop.eup %12020 }
0x1c43   :  { %v12023_v26 = vpop.eup %12022  ;;  %v13840_v16 = vsel %vm5045_vm7, %v12021_v10, %v13821_v58  ;;  %v5270_v58 = vmax.f32 %v13833_v24, 0.0 }
0x1c44   :  { %v13843_v34 = vsel %vm5045_vm7, %v12023_v26, %v13823_v14  ;;  %v5136_v51 = vmul.f32 %v13840_v16, %v13840_v16 }
0x1c45   :  { %9729 = vmatprep.mubr.f32.mxu0 %v13843_v34  ;;  %v5135_v22 = vmul.f32 %v13843_v34, %v13843_v34 }
0x1c46   :  { %v12025_v30 = vpop.eup %12024  ;;  %9730 = vmatmul.mubr.f32.vlgmr.msra.gmra.mrb[72].mxu0 %v13840_v16 }
0x1c47   :  { %v12027_v43 = vpop.eup %12026  ;;  %9767 = vmatprep.mubr.f32.mxu1 %v5135_v22  ;;  %v13852_v36 = vsel %vm5045_vm7, %v12025_v30, %v13828_v50  ;;  %11524 = vmatpush3.bf16.msra.mxu0 %v11521_v57  ;;  %v11545_v57 = vpack.c.bf16 %v5297_v20, %v5296_v11  ;;  %v5263_v20 = vrot.slane %v13817_v63, %v12473_v39 }
0x1c48   :  { %9768 = vmatmul.mubr.f32.vlgmr.msra.gmra.mrb[76].mxu1 %v5136_v51  ;;  %v13855_v1 = vsel %vm5045_vm7, %v12027_v43, %v13833_v24  ;;  %v5138_v52 = vmul.f32 %v13852_v36, %v13852_v36  ;;  %11526 = vmatprep.subr.bf16.mxu0 %v11525_v60  ;;  %v5643_v24 = vld [vmem:[#allocation2 + $0x408] sm:$0xff] }
0x1c49   :  { %9732 = vmatprep.mubr.f32.mxu0 %v13855_v1  ;;  %v5137_v3 = vmul.f32 %v13855_v1, %v13855_v1  ;;  %11556 = vmatpush3.bf16.msra.mxu1 %v12316_v15 }
0x1c4a   :  { %9733 = vmatmul.mubr.f32.gmra.mrb[74].mxu0 %v13852_v36  ;;  %11558 = vmatprep.subr.bf16.mxu1 %v12321_v17 }
0x1c4b   :  { %9770 = vmatprep.mubr.f32.mxu1 %v5137_v3  ;;  %11528 = vmatpush3.bf16.msra.mxu0 %v11525_v60 }
0x1c4c   :  { %9771 = vmatmul.mubr.f32.gmra.mrb[78].mxu1 %v5138_v52  ;;  %11530 = vmatprep.subr.bf16.mxu0 %v11529_v48 }
0x1c4d   :  { %11560 = vmatpush3.bf16.msra.mxu1 %v12321_v17 }
0x1c4e   :  { %11562 = vmatprep.subr.bf16.mxu1 %v12338_v23 }
0x1c4f   :  { %11532 = vmatpush3.bf16.msra.mxu0 %v11529_v48 }
0x1c50   :  { %11534 = vmatprep.subr.bf16.mxu0 %v11533_v53 }
0x1c51   :  { %11564 = vmatpush3.bf16.msra.mxu1 %v12338_v23 }
0x1c52   :  { %11566 = vmatprep.subr.bf16.mxu1 %v12354_v29 }
0x1c53   :  { %11536 = vmatpush3.bf16.msra.mxu0 %v11533_v53 }
0x1c54   :  { %11538 = vmatprep.subr.bf16.mxu0 %v11537_v6 }
0x1c55   :  { %11568 = vmatpush3.bf16.msra.mxu1 %v12354_v29 }
0x1c56   :  { %11570 = vmatprep.subr.bf16.mxu1 %v12370_v35 }
0x1c57   :  { %11540 = vmatpush3.bf16.msra.mxu0 %v11537_v6 }
0x1c58   :  { %11542 = vmatprep.subr.bf16.mxu0 %v11541_v32 }
0x1c59   :  { %11572 = vmatpush3.bf16.msra.mxu1 %v12370_v35 }
0x1c5a   :  { %11574 = vmatprep.subr.bf16.mxu1 %v12386_v41 }
0x1c5b   :  { %11544 = vmatpush3.bf16.msra.mxu0 %v11541_v32 }
0x1c5c   :  { %11546 = vmatprep.subr.bf16.mxu0 %v11545_v57 }
0x1c5d   :  { %11576 = vmatpush3.bf16.msra.mxu1 %v12386_v41 }
0x1c5e   :  { %11578 = vmatprep.subr.bf16.mxu1 %v12396_v45 }
0x1c5f   :  { %11548 = vmatpush3.bf16.msra.mxu0 %v11545_v57 }
0x1c60   :  { %11550 = vmatprep.subr.bf16.mxu0 %v11549_v0 }
0x1c61   :  { %11580 = vmatpush3.bf16.msra.mxu1 %v12396_v45 }
0x1c62   :  { %11582 = vmatprep.subr.bf16.mxu1 %v12424_v49 }
0x1c63   :  { %11552 = vmatpush3.bf16.msra.mxu0 %v11549_v0 }
0x1c64   :  { %11586 = vmatprep.subr.bf16.mxu0 %v12316_v15 }
0x1c65   :  { %11584 = vmatpush3.bf16.msra.mxu1 %v12424_v49 }
0x1d19   :  { %v9731_v54 = vpop.f32.mrb[72].mxu0 }
0x1d1a   :  { %v5225_v25 = vmul.f32 %v9731_v54, %v9731_v54  ;;  %v5116_v47 = vpop.f32.mrb[73].mxu0  ;;  %v5237_v31 = vsub.f32 %v13840_v16, %v9731_v54 }
0x1d1b   :  { %v5224_v56 = vmul.f32 %v5116_v47, %v5116_v47  ;;  %v9769_v2 = vpop.f32.mrb[76].mxu1  ;;  %v5236_v19 = vsub.f32 %v13843_v34, %v5116_v47 }
0x1d1c   :  { %v5229_v9 = vsub.f32 %v9769_v2, %v5225_v25  ;;  %v5205_v8 = vpop.f32.mrb[77].mxu1  ;;  %v5268_v2 = vmax.f32 %v13823_v14, 0.0 }
0x1d1d   :  { %v5228_v10 = vsub.f32 %v5205_v8, %v5224_v56  ;;  %v9734_v26 = vpop.f32.mrb[74].mxu0 }
0x1d1e   :  { %v5233_v22 = vmax.f32 %v5229_v9, 0.0  ;;  %v5227_v30 = vmul.f32 %v9734_v26, %v9734_v26  ;;  %v5126_v51 = vpop.f32.mrb[75].mxu0  ;;  %v5239_v33 = vsub.f32 %v13852_v36, %v9734_v26  ;;  %v5271_v26 = vmax.f32 %v13828_v50, 0.0  ;;  %v5642_v50 = vld [vmem:[#allocation2 + $0x400] sm:$0xff] }
0x1d1f   :  { %v5232_v43 = vmax.f32 %v5228_v10, 0.0  ;;  %v5226_v3 = vmul.f32 %v5126_v51, %v5126_v51  ;;  %v9772_v52 = vpop.f32.mrb[78].mxu1  ;;  %v5238_v16 = vsub.f32 %v13855_v1, %v5126_v51 }
0x1d20   :  { %v5241_v46 = vadd.f32 1e-05, %v5233_v22  ;;  %v5231_v12 = vsub.f32 %v9772_v52, %v5227_v30  ;;  %v5215_v60 = vpop.f32.mrb[79].mxu1 }
0x1d21   :  { %v5240_v42 = vadd.f32 1e-05, %v5232_v43  ;;  %v5230_v44 = vsub.f32 %v5215_v60, %v5226_v3  ;;  %v11617_v43 = vpack.c.bf16 %v5643_v24, %v5642_v50  ;;  %v13924_v3 = vld [vmem:[%s14370_s10 + $0x38] sm:$0x1f]  ;;  %v5654_v50 = vld [vmem:[#allocation2 + $0x460] sm:$0xff]  ;;  %v5655_v24 = vld [vmem:[#allocation2 + $0x468] sm:$0xff] }
0x1d22   :  { %12028 = vrsqrt.f32 %v5241_v46  ;;  %v5235_v48 = vmax.f32 %v5231_v12, 0.0  ;;  %v5303_v52 = vrot.slane %v13924_v3, %v12434_v55  ;;  %vm5389_vm11 = vcmp.gt.f32.partialorder %v13924_v3, 0.0 }
0x1d23   :  { %12030 = vrsqrt.f32 %v5240_v42  ;;  %v5234_v37 = vmax.f32 %v5230_v44, 0.0  ;;  %11618 = vmatprep.subr.bf16.mxu1 %v11617_v43 }
0x1d24   :  { %v5243_v40 = vadd.f32 1e-05, %v5235_v48 }
0x1d25   :  { %v5242_v53 = vadd.f32 1e-05, %v5234_v37 }
0x1d26   :  { %12032 = vrsqrt.f32 %v5243_v40 }
0x1d27   :  { %12034 = vrsqrt.f32 %v5242_v53 }
0x1d2c   :  { %v12029_v6 = vpop.eup %12028 }
0x1d2d   :  { %v12031_v32 = vpop.eup %12030  ;;  %v5249_v11 = vmul.f32 %v12029_v6, %v5237_v31  ;;  %v13938_v31 = vsel %vm5389_vm11, 1, %v12187_v5 }
0x1d2e   :  { %v5248_v57 = vmul.f32 %v12031_v32, %v5236_v19  ;;  %v5402_v27 = vrot.slane %v13938_v31, %v12518_v4 }
0x1d2f   :  { %v5257_v28 = vmul.f32 %v5255_v18, %v5249_v11 }
0x1d30   :  { %v12033_v0 = vpop.eup %12032  ;;  %v5256_v54 = vmul.f32 %v5255_v18, %v5248_v57  ;;  %vm5403_vm12 = vcmp.eq.s32.totalorder %v5402_v27, 1 }
0x1d31   :  { %v12035_v34 = vpop.eup %12034  ;;  %v5265_v47 = vadd.f32 %v5263_v20, %v5257_v28  ;;  %v5251_v56 = vmul.f32 %v12033_v0, %v5239_v33 }
0x1d32   :  { %v5264_v63 = vadd.f32 %v5263_v20, %v5256_v54  ;;  %v5250_v9 = vmul.f32 %v12035_v34, %v5238_v16 }
0x1d33   :  { %v5278_v36 = vsel %vm13889_vm8, %v5269_v59, %v5265_v47  ;;  %v5259_v8 = vmul.f32 %v5255_v18, %v5251_v56  ;;  %v5644_v47 = vld [vmem:[#allocation2 + $0x410] sm:$0xff]  ;;  %v5645_v56 = vld [vmem:[#allocation2 + $0x418] sm:$0xff] }
0x1d34   :  { %v5277_v1 = vsel %vm13889_vm8, %v5268_v2, %v5264_v63  ;;  %v5258_v10 = vmul.f32 %v5255_v18, %v5250_v9  ;;  %v11621_v2 = vpack.c.bf16 %v5645_v56, %v5644_v47  ;;  %v5646_v63 = vld [vmem:[#allocation2 + $0x420] sm:$0xff]  ;;  %v5647_v9 = vld [vmem:[#allocation2 + $0x428] sm:$0xff] }
0x1d35   :  { %9805 = vmatprep.mubr.f32.mxu0 %v5277_v1  ;;  %v5267_v22 = vadd.f32 %v5263_v20, %v5259_v8  ;;  %v5648_v8 = vld [vmem:[#allocation2 + $0x430] sm:$0xff]  ;;  %v5649_v1 = vld [vmem:[#allocation2 + $0x438] sm:$0xff] }
0x1d36   :  { %9806 = vmatmul.mubr.f32.vlgmr.msra.gmra.mrb[76].mxu0 %v5278_v36  ;;  %v5266_v30 = vadd.f32 %v5263_v20, %v5258_v10  ;;  %v11625_v36 = vpack.c.bf16 %v5647_v9, %v5646_v63  ;;  %v11629_v10 = vpack.c.bf16 %v5649_v1, %v5648_v8 }
0x1d37   :  { %v5280_v14 = vsel %vm13889_vm8, %v5271_v26, %v5267_v22  ;;  %11588 = vmatpush3.bf16.msra.mxu0 %v12316_v15  ;;  %v5650_v26 = vld [vmem:[#allocation2 + $0x440] sm:$0xff]  ;;  %v5651_v22 = vld [vmem:[#allocation2 + $0x448] sm:$0xff] }
0x1d38   :  { %v5279_v51 = vsel %vm13889_vm8, %v5270_v58, %v5266_v30  ;;  %11590 = vmatprep.subr.bf16.mxu0 %v12321_v17  ;;  %v11633_v58 = vpack.c.bf16 %v5651_v22, %v5650_v26  ;;  %v5652_v30 = vld [vmem:[#allocation2 + $0x450] sm:$0xff]  ;;  %v5613_v22 = vrot.slane %v13924_v3, %v12470_v38 }
0x1d39   :  { %9808 = vmatprep.mubr.f32.mxu0 %v5279_v51 }
0x1d3a   :  { %9809 = vmatmul.mubr.f32.gmra.mrb[78].mxu0 %v5280_v14  ;;  %v5653_v14 = vld [vmem:[#allocation2 + $0x458] sm:$0xff] }
0x1d3b   :  { %11592 = vmatpush3.bf16.msra.mxu0 %v12321_v17  ;;  %v11637_v51 = vpack.c.bf16 %v5653_v14, %v5652_v30  ;;  %v5633_v14 = vrot.slane %v13938_v31, %v12554_v62 }
0x1d3c   :  { %11594 = vmatprep.subr.bf16.mxu0 %v12338_v23 }
0x1d3d   :  { %vm13996_vm13 = vcmp.eq.s32.totalorder %v5633_v14, 1 }
0x1d3f   :  { %11596 = vmatpush3.bf16.msra.mxu0 %v12338_v23 }
0x1d40   :  { %11598 = vmatprep.subr.bf16.mxu0 %v12354_v29 }
0x1d43   :  { %11600 = vmatpush3.bf16.msra.mxu0 %v12354_v29 }
0x1d44   :  { %11602 = vmatprep.subr.bf16.mxu0 %v12370_v35 }
0x1d47   :  { %11604 = vmatpush3.bf16.msra.mxu0 %v12370_v35 }
0x1d48   :  { %11606 = vmatprep.subr.bf16.mxu0 %v12386_v41 }
0x1d4b   :  { %11608 = vmatpush3.bf16.msra.mxu0 %v12386_v41 }
0x1d4c   :  { %11610 = vmatprep.subr.bf16.mxu0 %v12396_v45 }
0x1d4f   :  { %11612 = vmatpush3.bf16.msra.mxu0 %v12396_v45 }
0x1d50   :  { %11614 = vmatprep.subr.bf16.mxu0 %v12424_v49 }
0x1d53   :  { %11616 = vmatpush3.bf16.msra.mxu0 %v12424_v49 }
0x1d54   :  { %11650 = vmatprep.subr.bf16.mxu0 %v12316_v15 }
0x1e09   :  { %v9807_v46 = vpop.f32.mrb[76].mxu0 }
0x1e0a   :  { %v13928_v12 = vadd.f32 %v9807_v46, %v5303_v52  ;;  %v5370_v60 = vpop.f32.mrb[77].mxu0  ;;  %v5657_v46 = vld [vmem:[#allocation2 + $0x478] sm:$0xff] }
0x1e0b   :  { %v13930_v42 = vadd.f32 %v5370_v60, %v5303_v52 }
0x1e0c   :  { %v5392_v44 = vmul.f32 1.442695, %v13928_v12  ;;  %v5627_v31 = vmax.f32 %v13928_v12, 0.0 }
0x1e0d   :  { %v5390_v48 = vmul.f32 1.442695, %v13930_v42  ;;  %v9810_v37 = vpop.f32.mrb[78].mxu0 }
0x1e0e   :  { %12036 = vpow2.f32 %v5392_v44  ;;  %v13935_v40 = vadd.f32 %v9810_v37, %v5303_v52  ;;  %v5380_v53 = vpop.f32.mrb[79].mxu0 }
0x1e0f   :  { %12038 = vpow2.f32 %v5390_v48  ;;  %v13940_v18 = vadd.f32 %v5380_v53, %v5303_v52  ;;  %v5656_v52 = vld [vmem:[#allocation2 + $0x470] sm:$0xff] }
0x1e10   :  { %v5396_v6 = vmul.f32 1.442695, %v13935_v40  ;;  %v11645_v60 = vpack.c.bf16 %v5657_v46, %v5656_v52 }
0x1e11   :  { %v5394_v19 = vmul.f32 1.442695, %v13940_v18 }
0x1e12   :  { %12040 = vpow2.f32 %v5396_v6 }
0x1e13   :  { %12042 = vpow2.f32 %v5394_v19 }
0x1e18   :  { %v12037_v32 = vpop.eup %12036 }
0x1e19   :  { %v12039_v11 = vpop.eup %12038  ;;  %v13947_v20 = vsel %vm5403_vm12, %v12037_v32, %v13928_v12  ;;  %v5628_v12 = vmax.f32 %v13940_v18, 0.0 }
0x1e1a   :  { %v13950_v57 = vsel %vm5403_vm12, %v12039_v11, %v13930_v42  ;;  %v5494_v0 = vmul.f32 %v13947_v20, %v13947_v20 }
0x1e1b   :  { %9843 = vmatprep.mubr.f32.mxu1 %v13950_v57  ;;  %v5493_v33 = vmul.f32 %v13950_v57, %v13950_v57 }
0x1e1c   :  { %v12041_v28 = vpop.eup %12040  ;;  %9844 = vmatmul.mubr.f32.vlgmr.msra.gmra.mrb[80].mxu1 %v13947_v20 }
0x1e1d   :  { %v12043_v16 = vpop.eup %12042  ;;  %9881 = vmatprep.mubr.f32.mxu0 %v5493_v33  ;;  %v13959_v54 = vsel %vm5403_vm12, %v12041_v28, %v13935_v40  ;;  %11620 = vmatpush3.bf16.msra.mxu1 %v11617_v43  ;;  %v11641_v43 = vpack.c.bf16 %v5655_v24, %v5654_v50  ;;  %v5621_v24 = vrot.slane %v13924_v3, %v12473_v39 }
0x1e1e   :  { %9882 = vmatmul.mubr.f32.vlgmr.msra.gmra.mrb[80].mxu0 %v5494_v0  ;;  %v13962_v25 = vsel %vm5403_vm12, %v12043_v16, %v13940_v18  ;;  %v5496_v59 = vmul.f32 %v13959_v54, %v13959_v54  ;;  %11622 = vmatprep.subr.bf16.mxu1 %v11621_v2 }
0x1e1f   :  { %9846 = vmatprep.mubr.f32.mxu1 %v13962_v25  ;;  %v5495_v34 = vmul.f32 %v13962_v25, %v13962_v25  ;;  %11652 = vmatpush3.bf16.msra.mxu0 %v12316_v15 }
0x1e20   :  { %9847 = vmatmul.mubr.f32.gmra.mrb[82].mxu1 %v13959_v54  ;;  %11654 = vmatprep.subr.bf16.mxu0 %v12321_v17 }
0x1e21   :  { %9884 = vmatprep.mubr.f32.mxu0 %v5495_v34  ;;  %11624 = vmatpush3.bf16.msra.mxu1 %v11621_v2 }
0x1e22   :  { %9885 = vmatmul.mubr.f32.gmra.mrb[82].mxu0 %v5496_v59  ;;  %11626 = vmatprep.subr.bf16.mxu1 %v11625_v36 }
0x1e23   :  { %11656 = vmatpush3.bf16.msra.mxu0 %v12321_v17 }
0x1e24   :  { %11658 = vmatprep.subr.bf16.mxu0 %v12338_v23 }
0x1e25   :  { %11628 = vmatpush3.bf16.msra.mxu1 %v11625_v36 }
0x1e26   :  { %11630 = vmatprep.subr.bf16.mxu1 %v11629_v10 }
0x1e27   :  { %11660 = vmatpush3.bf16.msra.mxu0 %v12338_v23 }
0x1e28   :  { %11662 = vmatprep.subr.bf16.mxu0 %v12354_v29 }
0x1e29   :  { %11632 = vmatpush3.bf16.msra.mxu1 %v11629_v10 }
0x1e2a   :  { %11634 = vmatprep.subr.bf16.mxu1 %v11633_v58 }
0x1e2b   :  { %11664 = vmatpush3.bf16.msra.mxu0 %v12354_v29 }
0x1e2c   :  { %11666 = vmatprep.subr.bf16.mxu0 %v12370_v35 }
0x1e2d   :  { %11636 = vmatpush3.bf16.msra.mxu1 %v11633_v58 }
0x1e2e   :  { %11638 = vmatprep.subr.bf16.mxu1 %v11637_v51 }
0x1e2f   :  { %11668 = vmatpush3.bf16.msra.mxu0 %v12370_v35 }
0x1e30   :  { %11670 = vmatprep.subr.bf16.mxu0 %v12386_v41 }
0x1e31   :  { %11640 = vmatpush3.bf16.msra.mxu1 %v11637_v51 }
0x1e32   :  { %11642 = vmatprep.subr.bf16.mxu1 %v11641_v43 }
0x1e33   :  { %11672 = vmatpush3.bf16.msra.mxu0 %v12386_v41 }
0x1e34   :  { %11674 = vmatprep.subr.bf16.mxu0 %v12396_v45 }
0x1e35   :  { %11644 = vmatpush3.bf16.msra.mxu1 %v11641_v43 }
0x1e36   :  { %11646 = vmatprep.subr.bf16.mxu1 %v11645_v60 }
0x1e37   :  { %11676 = vmatpush3.bf16.msra.mxu0 %v12396_v45 }
0x1e38   :  { %11678 = vmatprep.subr.bf16.mxu0 %v12424_v49 }
0x1e39   :  { %11648 = vmatpush3.bf16.msra.mxu1 %v11645_v60 }
0x1e3a   :  { %11682 = vmatprep.subr.bf16.mxu1 %v12316_v15 }
0x1e3b   :  { %11680 = vmatpush3.bf16.msra.mxu0 %v12424_v49 }
0x1eef   :  { %v9845_v44 = vpop.f32.mrb[80].mxu1 }
0x1ef0   :  { %v5583_v48 = vmul.f32 %v9845_v44, %v9845_v44  ;;  %v5474_v37 = vpop.f32.mrb[81].mxu1  ;;  %v5595_v26 = vsub.f32 %v13947_v20, %v9845_v44 }
0x1ef1   :  { %v5582_v53 = vmul.f32 %v5474_v37, %v5474_v37  ;;  %v9883_v6 = vpop.f32.mrb[80].mxu0  ;;  %v5594_v30 = vsub.f32 %v13950_v57, %v5474_v37 }
0x1ef2   :  { %v5587_v19 = vsub.f32 %v9883_v6, %v5583_v48  ;;  %v5563_v27 = vpop.f32.mrb[81].mxu0  ;;  %v5626_v6 = vmax.f32 %v13930_v42, 0.0  ;;  %v7150_v48 = vld [vmem:[%s14365_s5 + $0x130] sm:$0xff] }
0x1ef3   :  { %v5586_v32 = vsub.f32 %v5563_v27, %v5582_v53  ;;  %v9848_v11 = vpop.f32.mrb[82].mxu1 }
0x1ef4   :  { %v5591_v33 = vmax.f32 %v5587_v19, 0.0  ;;  %v5585_v28 = vmul.f32 %v9848_v11, %v9848_v11  ;;  %v5484_v0 = vpop.f32.mrb[83].mxu1  ;;  %v5597_v52 = vsub.f32 %v13959_v54, %v9848_v11  ;;  %v5629_v11 = vmax.f32 %v13935_v40, 0.0 }
0x1ef5   :  { %v5590_v16 = vmax.f32 %v5586_v32, 0.0  ;;  %v5584_v34 = vmul.f32 %v5484_v0, %v5484_v0  ;;  %v9886_v59 = vpop.f32.mrb[82].mxu0  ;;  %v5596_v20 = vsub.f32 %v13962_v25, %v5484_v0 }
0x1ef6   :  { %v5599_v47 = vadd.f32 1e-05, %v5591_v33  ;;  %v5589_v56 = vsub.f32 %v9886_v59, %v5585_v28  ;;  %v5573_v2 = vpop.f32.mrb[83].mxu0 }
0x1ef7   :  { %v5598_v63 = vadd.f32 1e-05, %v5590_v16  ;;  %v5588_v9 = vsub.f32 %v5573_v2, %v5584_v34 }
0x1ef8   :  { %12044 = vrsqrt.f32 %v5599_v47  ;;  %v5593_v36 = vmax.f32 %v5589_v56, 0.0 }
0x1ef9   :  { %12046 = vrsqrt.f32 %v5598_v63  ;;  %v5592_v8 = vmax.f32 %v5588_v9, 0.0 }
0x1efa   :  { %v5601_v1 = vadd.f32 1e-05, %v5593_v36 }
0x1efb   :  { %v5600_v10 = vadd.f32 1e-05, %v5592_v8 }
0x1efc   :  { %12048 = vrsqrt.f32 %v5601_v1 }
0x1efd   :  { %12050 = vrsqrt.f32 %v5600_v10 }
0x1f02   :  { %v12045_v58 = vpop.eup %12044 }
0x1f03   :  { %v12047_v51 = vpop.eup %12046  ;;  %v5607_v50 = vmul.f32 %v12045_v58, %v5595_v26 }
0x1f04   :  { %v5606_v43 = vmul.f32 %v12047_v51, %v5594_v30 }
0x1f05   :  { %v5615_v46 = vmul.f32 %v5613_v22, %v5607_v50 }
0x1f06   :  { %v12049_v60 = vpop.eup %12048  ;;  %v5614_v44 = vmul.f32 %v5613_v22, %v5606_v43  ;;  %v7146_v43 = vld [vmem:[%s14365_s5 + $0x110] sm:$0xff] }
0x1f07   :  { %v12051_v57 = vpop.eup %12050  ;;  %v5623_v37 = vadd.f32 %v5621_v24, %v5615_v46  ;;  %v5609_v53 = vmul.f32 %v12049_v60, %v5597_v52  ;;  %v7147_v52 = vld [vmem:[%s14365_s5 + $0x118] sm:$0xff]  ;;  %v7148_v60 = vld [vmem:[%s14365_s5 + $0x120] sm:$0xff] }
0x1f08   :  { %v5622_v3 = vadd.f32 %v5621_v24, %v5614_v44  ;;  %v5608_v19 = vmul.f32 %v12051_v57, %v5596_v20  ;;  %v11717_v46 = vpack.c.bf16 %v7147_v52, %v7146_v43  ;;  %v7149_v20 = vld [vmem:[%s14365_s5 + $0x128] sm:$0xff]  ;;  %v7151_v57 = vld [vmem:[%s14365_s5 + $0x138] sm:$0xff] }
0x1f09   :  { %v5636_v54 = vsel %vm13996_vm13, %v5627_v31, %v5623_v37  ;;  %v5617_v27 = vmul.f32 %v5613_v22, %v5609_v53  ;;  %v11721_v44 = vpack.c.bf16 %v7149_v20, %v7148_v60  ;;  %v11725_v31 = vpack.c.bf16 %v7151_v57, %v7150_v48  ;;  %v7152_v37 = vld [vmem:[%s14365_s5 + $0x140] sm:$0xff]  ;;  %v7153_v53 = vld [vmem:[%s14365_s5 + $0x148] sm:$0xff] }
0x1f0a   :  { %v5635_v25 = vsel %vm13996_vm13, %v5626_v6, %v5622_v3  ;;  %v5616_v32 = vmul.f32 %v5613_v22, %v5608_v19  ;;  %v11729_v6 = vpack.c.bf16 %v7153_v53, %v7152_v37  ;;  %v7154_v3 = vld [vmem:[%s14365_s5 + $0x150] sm:$0xff]  ;;  %v7155_v19 = vld [vmem:[%s14365_s5 + $0x158] sm:$0xff] }
0x1f0b   :  { %9919 = vmatprep.mubr.f32.mxu1 %v5635_v25  ;;  %v5625_v33 = vadd.f32 %v5621_v24, %v5617_v27  ;;  %v7156_v27 = vld [vmem:[%s14365_s5 + $0x160] sm:$0xff]  ;;  %v7157_v25 = vld [vmem:[%s14365_s5 + $0x168] sm:$0xff] }
0x1f0c   :  { %9920 = vmatmul.mubr.f32.vlgmr.msra.gmra.mrb[84].mxu1 %v5636_v54  ;;  %v5624_v28 = vadd.f32 %v5621_v24, %v5616_v32  ;;  %v11733_v54 = vpack.c.bf16 %v7155_v19, %v7154_v3  ;;  %v11737_v32 = vpack.c.bf16 %v7157_v25, %v7156_v27 }
0x1f0d   :  { %v5638_v42 = vsel %vm13996_vm13, %v5629_v11, %v5625_v33  ;;  %11684 = vmatpush3.bf16.msra.mxu1 %v12316_v15  ;;  %v7144_v15 = vld [vmem:[%s14365_s5 + $0x100] sm:$0xff]  ;;  %v7158_v11 = vld [vmem:[%s14365_s5 + $0x170] sm:$0xff]  ;;  %v7159_v33 = vld [vmem:[%s14365_s5 + $0x178] sm:$0xff] }
0x1f0e   :  { %v5637_v0 = vsel %vm13996_vm13, %v5628_v12, %v5624_v28  ;;  %11686 = vmatprep.subr.bf16.mxu1 %v12321_v17  ;;  %v11741_v12 = vpack.c.bf16 %v7159_v33, %v7158_v11 }
0x1f0f   :  { %9922 = vmatprep.mubr.f32.mxu1 %v5637_v0 }
0x1f10   :  { %9923 = vmatmul.mubr.f32.gmra.mrb[86].mxu1 %v5638_v42 }
0x1f11   :  { %11688 = vmatpush3.bf16.msra.mxu1 %v12321_v17  ;;  %v7145_v17 = vld [vmem:[%s14365_s5 + $0x108] sm:$0xff] }
0x1f12   :  { %11690 = vmatprep.subr.bf16.mxu1 %v12338_v23 }
0x1f15   :  { %11692 = vmatpush3.bf16.msra.mxu1 %v12338_v23  ;;  %v11713_v23 = vpack.c.bf16 %v7145_v17, %v7144_v15 }
0x1f16   :  { %11694 = vmatprep.subr.bf16.mxu1 %v12354_v29 }
0x1f17   :  { %11714 = vmatprep.subr.bf16.mxu0 %v11713_v23 }
0x1f19   :  { %11696 = vmatpush3.bf16.msra.mxu1 %v12354_v29  ;;  %v14038_v29 = vld [vmem:[%s14370_s10 + $0x40] sm:$0x1f] }
0x1f1a   :  { %11698 = vmatprep.subr.bf16.mxu1 %v12370_v35  ;;  %vm5747_vm14 = vcmp.gt.f32.partialorder %v14038_v29, 0.0  ;;  %v5971_v52 = vrot.slane %v14038_v29, %v12470_v38  ;;  %v5979_v57 = vrot.slane %v14038_v29, %v12473_v39 }
0x1f1b   :  { %v14052_v56 = vsel %vm5747_vm14, 1, %v12187_v5 }
0x1f1c   :  { %v5760_v36 = vrot.slane %v14052_v56, %v12518_v4  ;;  %v5991_v20 = vrot.slane %v14052_v56, %v12554_v62 }
0x1f1d   :  { %11700 = vmatpush3.bf16.msra.mxu1 %v12370_v35  ;;  %v5661_v35 = vrot.slane %v14038_v29, %v12434_v55 }
0x1f1e   :  { %11702 = vmatprep.subr.bf16.mxu1 %v12386_v41  ;;  %vm5761_vm15 = vcmp.eq.s32.totalorder %v5760_v36, 1  ;;  %vm14140_vm0 = vcmp.eq.s32.totalorder %v5991_v20, 1 }
0x1f21   :  { %11704 = vmatpush3.bf16.msra.mxu1 %v12386_v41 }
0x1f22   :  { %11706 = vmatprep.subr.bf16.mxu1 %v12396_v45 }
0x1f25   :  { %11708 = vmatpush3.bf16.msra.mxu1 %v12396_v45 }
0x1f26   :  { %11710 = vmatprep.subr.bf16.mxu1 %v12424_v49 }
0x1f29   :  { %11712 = vmatpush3.bf16.msra.mxu1 %v12424_v49 }
0x1f2a   :  { %10039 = vmatprep.subr.msk.mxu1 %vm1370_vm9, %v12188_v7 }
0x1fdf   :  { %v9921_v41 = vpop.f32.mrb[84].mxu1 }
0x1fe0   :  { %v14042_v45 = vadd.f32 %v9921_v41, %v5661_v35  ;;  %v5728_v49 = vpop.f32.mrb[85].mxu1 }
0x1fe1   :  { %v14044_v40 = vadd.f32 %v5728_v49, %v5661_v35 }
0x1fe2   :  { %v5750_v18 = vmul.f32 1.442695, %v14042_v45  ;;  %v5985_v56 = vmax.f32 %v14042_v45, 0.0 }
0x1fe3   :  { %v5748_v16 = vmul.f32 1.442695, %v14044_v40  ;;  %v9924_v34 = vpop.f32.mrb[86].mxu1  ;;  %v5984_v25 = vmax.f32 %v14044_v40, 0.0 }
0x1fe4   :  { %12052 = vpow2.f32 %v5750_v18  ;;  %v14049_v59 = vadd.f32 %v9924_v34, %v5661_v35  ;;  %v5738_v47 = vpop.f32.mrb[87].mxu1 }
0x1fe5   :  { %12054 = vpow2.f32 %v5748_v16  ;;  %v14054_v2 = vadd.f32 %v5738_v47, %v5661_v35 }
0x1fe6   :  { %v5754_v63 = vmul.f32 1.442695, %v14049_v59 }
0x1fe7   :  { %v5752_v9 = vmul.f32 1.442695, %v14054_v2 }
0x1fe8   :  { %12056 = vpow2.f32 %v5754_v63 }
0x1fe9   :  { %12058 = vpow2.f32 %v5752_v9 }
0x1fee   :  { %v12053_v8 = vpop.eup %12052 }
0x1fef   :  { %v12055_v1 = vpop.eup %12054  ;;  %v14061_v10 = vsel %vm5761_vm15, %v12053_v8, %v14042_v45  ;;  %v5986_v45 = vmax.f32 %v14054_v2, 0.0 }
0x1ff0   :  { %v14064_v5 = vsel %vm5761_vm15, %v12055_v1, %v14044_v40  ;;  %v5852_v58 = vmul.f32 %v14061_v10, %v14061_v10 }
0x1ff1   :  { %9957 = vmatprep.mubr.f32.mxu0 %v14064_v5  ;;  %v5851_v26 = vmul.f32 %v14064_v5, %v14064_v5 }
0x1ff2   :  { %v12057_v22 = vpop.eup %12056  ;;  %9958 = vmatmul.mubr.f32.vlgmr.msra.gmra.mrb[84].mxu0 %v14061_v10 }
0x1ff3   :  { %v12059_v30 = vpop.eup %12058  ;;  %9995 = vmatprep.mubr.f32.mxu1 %v5851_v26  ;;  %v14073_v14 = vsel %vm5761_vm15, %v12057_v22, %v14049_v59  ;;  %11716 = vmatpush3.bf16.msra.mxu0 %v11713_v23 }
0x1ff4   :  { %9996 = vmatmul.mubr.f32.vlgmr.msra.gmra.mrb[88].mxu1 %v5852_v58  ;;  %v14076_v51 = vsel %vm5761_vm15, %v12059_v30, %v14054_v2  ;;  %v5854_v24 = vmul.f32 %v14073_v14, %v14073_v14  ;;  %11718 = vmatprep.subr.bf16.mxu0 %v11717_v46 }
0x1ff5   :  { %9960 = vmatprep.mubr.f32.mxu0 %v14076_v51  ;;  %v5853_v50 = vmul.f32 %v14076_v51, %v14076_v51  ;;  %10040 = vmatpush3.msk.msra.mxu1 %vm1370_vm9, %v12188_v7 }
0x1ff6   :  { %9961 = vmatmul.mubr.f32.gmra.mrb[86].mxu0 %v14073_v14  ;;  %10047 = vmatprep.subr.msk.mxu1 %vm1370_vm9, %v12188_v7 }
0x1ff7   :  { %9998 = vmatprep.mubr.f32.mxu1 %v5853_v50  ;;  %11720 = vmatpush3.bf16.msra.mxu0 %v11717_v46 }
0x1ff8   :  { %9999 = vmatmul.mubr.f32.gmra.mrb[90].mxu1 %v5854_v24  ;;  %11722 = vmatprep.subr.bf16.mxu0 %v11721_v44 }
0x1ffb   :  { %11724 = vmatpush3.bf16.msra.mxu0 %v11721_v44 }
0x1ffc   :  { %11726 = vmatprep.subr.bf16.mxu0 %v11725_v31 }
0x1fff   :  { %11728 = vmatpush3.bf16.msra.mxu0 %v11725_v31 }
0x2000   :  { %11730 = vmatprep.subr.bf16.mxu0 %v11729_v6 }
0x2003   :  { %11732 = vmatpush3.bf16.msra.mxu0 %v11729_v6 }
0x2004   :  { %11734 = vmatprep.subr.bf16.mxu0 %v11733_v54 }
0x2007   :  { %11736 = vmatpush3.bf16.msra.mxu0 %v11733_v54 }
0x2008   :  { %11738 = vmatprep.subr.bf16.mxu0 %v11737_v32 }
0x200b   :  { %11740 = vmatpush3.bf16.msra.mxu0 %v11737_v32 }
0x200c   :  { %11742 = vmatprep.subr.bf16.mxu0 %v11741_v12 }
0x200f   :  { %11744 = vmatpush3.bf16.msra.mxu0 %v11741_v12  ;;  %v5987_v12 = vmax.f32 %v14049_v59, 0.0 }
0x20c5   :  { %v9959_v28 = vpop.f32.mrb[84].mxu0 }
0x20c6   :  { %v5941_v42 = vmul.f32 %v9959_v28, %v9959_v28  ;;  %v5832_v0 = vpop.f32.mrb[85].mxu0  ;;  %v5953_v43 = vsub.f32 %v14061_v10, %v9959_v28 }
0x20c7   :  { %v5940_v15 = vmul.f32 %v5832_v0, %v5832_v0  ;;  %v9997_v17 = vpop.f32.mrb[88].mxu1  ;;  %v5952_v60 = vsub.f32 %v14064_v5, %v5832_v0 }
0x20c8   :  { %v5945_v23 = vsub.f32 %v9997_v17, %v5941_v42  ;;  %v5921_v35 = vpop.f32.mrb[89].mxu1 }
0x20c9   :  { %v5944_v41 = vsub.f32 %v5921_v35, %v5940_v15  ;;  %v9962_v49 = vpop.f32.mrb[86].mxu0  ;;  %v14159_v15 = vld [vmem:[%s14369_s9 + $0x28] sm:$0x7] }
0x20ca   :  { %v5949_v18 = vmax.f32 %v5945_v23, 0.0  ;;  %v5943_v16 = vmul.f32 %v9962_v49, %v9962_v49  ;;  %v5842_v34 = vpop.f32.mrb[87].mxu0  ;;  %v5955_v37 = vsub.f32 %v14073_v14, %v9962_v49  ;;  %v6017_v59 = vrot.slane %v14159_v15, %v12470_v38 }
0x20cb   :  { %v5948_v47 = vmax.f32 %v5944_v41, 0.0  ;;  %v5942_v63 = vmul.f32 %v5842_v34, %v5842_v34  ;;  %v10000_v9 = vpop.f32.mrb[90].mxu1  ;;  %v5954_v10 = vsub.f32 %v14076_v51, %v5842_v34 }
0x20cc   :  { %v5957_v36 = vadd.f32 1e-05, %v5949_v18  ;;  %v5947_v8 = vsub.f32 %v10000_v9, %v5943_v16  ;;  %v5931_v1 = vpop.f32.mrb[91].mxu1  ;;  %v4583_v9 = vld [vmem:[#allocation5 + $0x100] sm:$0xff] }
0x20cd   :  { %v5956_v26 = vadd.f32 1e-05, %v5948_v47  ;;  %v5946_v22 = vsub.f32 %v5931_v1, %v5942_v63  ;;  %v7170_v63 = vld [vmem:[%s14366_s6 + $0x8] sm:$0xf] }
0x20ce   :  { %12060 = vrsqrt.f32 %v5957_v36  ;;  %v5951_v58 = vmax.f32 %v5947_v8, 0.0  ;;  %v4584_v36 = vld [vmem:[#allocation5 + $0x108] sm:$0xff]  ;;  %v4585_v8 = vld [vmem:[#allocation5 + $0x110] sm:$0xff] }
0x20cf   :  { %12062 = vrsqrt.f32 %v5956_v26  ;;  %v5950_v30 = vmax.f32 %v5946_v22, 0.0  ;;  %v14198_v1 = vpack.c.bf16 %v4584_v36, %v4583_v9  ;;  %v4586_v26 = vld [vmem:[#allocation5 + $0x118] sm:$0xff] }
0x20d0   :  { %v5959_v50 = vadd.f32 1e-05, %v5951_v58  ;;  %v14202_v22 = vpack.c.bf16 %v4586_v26, %v4585_v8  ;;  %v4587_v58 = vld [vmem:[#allocation5 + $0x120] sm:$0xff] }
0x20d1   :  { %v5958_v24 = vadd.f32 1e-05, %v5950_v30  ;;  %11778 = vmatprep.subr.bf16.mxu0 %v14198_v1  ;;  %v4588_v30 = vld [vmem:[#allocation5 + $0x128] sm:$0xff] }
0x20d2   :  { %12064 = vrsqrt.f32 %v5959_v50  ;;  %v14206_v50 = vpack.c.bf16 %v4588_v30, %v4587_v58 }
0x20d3   :  { %12066 = vrsqrt.f32 %v5958_v24  ;;  %v4589_v24 = vld [vmem:[#allocation5 + $0x130] sm:$0xff] }
0x20d8   :  { %v12061_v46 = vpop.eup %12060 }
0x20d9   :  { %v12063_v44 = vpop.eup %12062  ;;  %v5965_v48 = vmul.f32 %v12061_v46, %v5953_v43  ;;  %v4590_v43 = vld [vmem:[#allocation5 + $0x138] sm:$0xff]  ;;  %v4591_v46 = vld [vmem:[#allocation5 + $0x140] sm:$0xff] }
0x20da   :  { %v5964_v31 = vmul.f32 %v12063_v44, %v5952_v60  ;;  %v4592_v60 = vld [vmem:[#allocation5 + $0x148] sm:$0xff]  ;;  %v4593_v44 = vld [vmem:[#allocation5 + $0x150] sm:$0xff] }
0x20db   :  { %v5973_v53 = vmul.f32 %v5971_v52, %v5965_v48  ;;  %v14214_v20 = vpack.c.bf16 %v4592_v60, %v4591_v46  ;;  %v4594_v48 = vld [vmem:[#allocation5 + $0x158] sm:$0xff] }
0x20dc   :  { %v12065_v6 = vpop.eup %12064  ;;  %v5972_v3 = vmul.f32 %v5971_v52, %v5964_v31  ;;  %v4595_v31 = vld [vmem:[#allocation5 + $0x160] sm:$0xff] }
0x20dd   :  { %v12067_v5 = vpop.eup %12066  ;;  %v5981_v54 = vadd.f32 %v5979_v57, %v5973_v53  ;;  %v5967_v27 = vmul.f32 %v12065_v6, %v5955_v37  ;;  %v4596_v37 = vld [vmem:[#allocation5 + $0x168] sm:$0xff]  ;;  %v4597_v6 = vld [vmem:[#allocation5 + $0x170] sm:$0xff] }
0x20de   :  { %v5980_v29 = vadd.f32 %v5979_v57, %v5972_v3  ;;  %v5966_v32 = vmul.f32 %v12067_v5, %v5954_v10  ;;  %v14222_v53 = vpack.c.bf16 %v4596_v37, %v4595_v31  ;;  %v4598_v10 = vld [vmem:[#allocation5 + $0x178] sm:$0xff] }
0x20df   :  { %v5994_v14 = vsel %vm14140_vm0, %v5985_v56, %v5981_v54  ;;  %v5975_v11 = vmul.f32 %v5971_v52, %v5967_v27  ;;  %v14226_v3 = vpack.c.bf16 %v4598_v10, %v4597_v6 }
0x20e0   :  { %v5993_v51 = vsel %vm14140_vm0, %v5984_v25, %v5980_v29  ;;  %v5974_v33 = vmul.f32 %v5971_v52, %v5966_v32  ;;  %v14210_v52 = vpack.c.bf16 %v4590_v43, %v4589_v24 }
0x20e1   :  { %10033 = vmatprep.mubr.f32.mxu0 %v5993_v51  ;;  %v5983_v28 = vadd.f32 %v5979_v57, %v5975_v11 }
0x20e2   :  { %10034 = vmatmul.mubr.f32.vlgmr.msra.gmra.mrb[88].mxu0 %v5994_v14  ;;  %v5982_v42 = vadd.f32 %v5979_v57, %v5974_v33  ;;  %v14218_v57 = vpack.c.bf16 %v4594_v48, %v4593_v44 }
0x20e3   :  { %v5996_v40 = vsel %vm14140_vm0, %v5987_v12, %v5983_v28  ;;  %11780 = vmatpush3.bf16.msra.mxu0 %v14198_v1 }
0x20e4   :  { %v5995_v0 = vsel %vm14140_vm0, %v5986_v45, %v5982_v42  ;;  %11782 = vmatprep.subr.bf16.mxu0 %v14202_v22 }
0x20e5   :  { %10036 = vmatprep.mubr.f32.mxu0 %v5995_v0 }
0x20e6   :  { %10037 = vmatmul.mubr.f32.gmra.mrb[90].mxu0 %v5996_v40 }
0x20e7   :  { %11784 = vmatpush3.bf16.msra.mxu0 %v14202_v22 }
0x20e8   :  { %11786 = vmatprep.subr.bf16.mxu0 %v14206_v50 }
0x20eb   :  { %11788 = vmatpush3.bf16.msra.mxu0 %v14206_v50 }
0x20ec   :  { %11790 = vmatprep.subr.bf16.mxu0 %v14210_v52 }
0x20ef   :  { %11792 = vmatpush3.bf16.msra.mxu0 %v14210_v52 }
0x20f0   :  { %11794 = vmatprep.subr.bf16.mxu0 %v14214_v20 }
0x20f3   :  { %11796 = vmatpush3.bf16.msra.mxu0 %v14214_v20 }
0x20f4   :  { %11798 = vmatprep.subr.bf16.mxu0 %v14218_v57 }
0x20f7   :  { %11800 = vmatpush3.bf16.msra.mxu0 %v14218_v57 }
0x20f8   :  { %11802 = vmatprep.subr.bf16.mxu0 %v14222_v53 }
0x20fb   :  { %11804 = vmatpush3.bf16.msra.mxu0 %v14222_v53 }
0x20fc   :  { %11806 = vmatprep.subr.bf16.mxu0 %v14226_v3 }
0x20ff   :  { %11808 = vmatpush3.bf16.msra.mxu0 %v14226_v3 }
0x2100   :  { %11818 = vmatprep.subr.bf16.mxu0 %v14198_v1 }
0x21b5   :  { %v10035_v17 = vpop.f32.mrb[88].mxu0 }
0x21b6   :  { %v6084_v2 = vpop.f32.mrb[89].mxu0  ;;  %v14165_v35 = vadd.f32 %v10035_v17, %v6017_v59 }
0x21b7   :  { %v14163_v23 = vadd.f32 %v6084_v2, %v6017_v59 }
0x21b8   :  { %v6201_v34 = vmul.f32 %v14165_v35, %v14165_v35 }
0x21b9   :  { %v10038_v41 = vpop.f32.mrb[90].mxu0  ;;  %10041 = vmatprep.mubr.msk.f32.mxu1 %vm1363_vm10, %v14163_v23  ;;  %v6200_v16 = vmul.f32 %v14163_v23, %v14163_v23 }
0x21ba   :  { %v6094_v49 = vpop.f32.mrb[91].mxu0  ;;  %10042 = vmatmul.mubr.msk.f32.vlgmr.msra.gmra.mrb[92].mxu1 %vm1363_vm10, %v14165_v35  ;;  %v14175_v38 = vadd.f32 %v10038_v41, %v6017_v59 }
0x21bb   :  { %v14171_v18 = vadd.f32 %v6094_v49, %v6017_v59  ;;  %10048 = vmatpush3.msk.msra.mxu1 %vm1370_vm9, %v12188_v7 }
0x21bc   :  { %v6203_v7 = vmul.f32 %v14175_v38, %v14175_v38  ;;  %10055 = vmatprep.subr.msk.mxu1 %vm1370_vm9, %v7170_v63 }
0x21bd   :  { %10044 = vmatprep.mubr.msk.f32.mxu1 %vm1363_vm10, %v14171_v18  ;;  %v6202_v47 = vmul.f32 %v14171_v18, %v14171_v18 }
0x21be   :  { %10045 = vmatmul.mubr.msk.f32.gmra.mrb[94].mxu1 %vm1363_vm10, %v14175_v38 }
0x21bf   :  { %10049 = vmatprep.mubr.msk.f32.mxu1 %vm1363_vm10, %v6200_v16 }
0x21c2   :  { %10050 = vmatmul.mubr.msk.f32.vlgmr.msra.gmra.mrb[96].mxu1 %vm1363_vm10, %v6201_v34 }
0x21c3   :  { %10052 = vmatprep.mubr.msk.f32.mxu1 %vm1363_vm10, %v6202_v47  ;;  %10056 = vmatpush3.msk.msra.mxu1 %vm1370_vm9, %v7170_v63  ;;  %v14236_v47 = vld [vmem:[%s14369_s9 + $0x20] sm:$0xff] }
0x21c4   :  { %11746 = vmatprep.subr.bf16.mxu1 %v14198_v1  ;;  %v6340_v58 = vrot.slane %v14236_v47, %v12554_v62 }
0x21c6   :  { %10053 = vmatmul.mubr.msk.f32.gmra.mrb[98].mxu1 %vm1363_vm10, %v6203_v7  ;;  %v6332_v7 = vrot.slane %v14236_v47, %v12518_v4 }
0x228d   :  { %v10043_v19 = vpop.f32.mrb[92].mxu1 }
0x228e   :  { %v6181_v5 = vpop.f32.mrb[93].mxu1  ;;  %v6302_v27 = vmul.f32 %v10043_v19, %v10043_v19  ;;  %v6314_v34 = vsub.f32 %v14165_v35, %v10043_v19 }
0x228f   :  { %v6301_v25 = vmul.f32 %v6181_v5, %v6181_v5  ;;  %v6313_v9 = vsub.f32 %v14163_v23, %v6181_v5 }
0x2291   :  { %v10046_v56 = vpop.f32.mrb[94].mxu1 }
0x2292   :  { %v6191_v54 = vpop.f32.mrb[95].mxu1  ;;  %v6304_v51 = vmul.f32 %v10046_v56, %v10046_v56  ;;  %v6316_v30 = vsub.f32 %v14175_v38, %v10046_v56 }
0x2293   :  { %v6303_v12 = vmul.f32 %v6191_v54, %v6191_v54  ;;  %v6315_v43 = vsub.f32 %v14171_v18, %v6191_v54 }
0x2295   :  { %v10051_v29 = vpop.f32.mrb[96].mxu1 }
0x2296   :  { %v6306_v32 = vsub.f32 %v10051_v29, %v6302_v27  ;;  %v6282_v14 = vpop.f32.mrb[97].mxu1 }
0x2297   :  { %v6305_v11 = vsub.f32 %v6282_v14, %v6301_v25  ;;  %v7176_v25 = vld [vmem:[%s14368_s8 + $0x20] sm:$0xff] }
0x2298   :  { %v6310_v33 = vmax.f32 %v6306_v32, 0.0 }
0x2299   :  { %v6309_v28 = vmax.f32 %v6305_v11, 0.0  ;;  %v10054_v45 = vpop.f32.mrb[98].mxu1 }
0x229a   :  { %v6318_v42 = vadd.f32 1e-05, %v6310_v33  ;;  %v6308_v40 = vsub.f32 %v10054_v45, %v6304_v51  ;;  %v6292_v0 = vpop.f32.mrb[99].mxu1 }
0x229b   :  { %v6317_v59 = vadd.f32 1e-05, %v6309_v28  ;;  %v6307_v17 = vsub.f32 %v6292_v0, %v6303_v12 }
0x229c   :  { %12068 = vrsqrt.f32 %v6318_v42  ;;  %v6312_v2 = vmax.f32 %v6308_v40, 0.0 }
0x229d   :  { %12070 = vrsqrt.f32 %v6317_v59  ;;  %v6311_v41 = vmax.f32 %v6307_v17, 0.0 }
0x229e   :  { %v6320_v49 = vadd.f32 1e-05, %v6312_v2 }
0x229f   :  { %v6319_v16 = vadd.f32 1e-05, %v6311_v41 }
0x22a0   :  { %12072 = vrsqrt.f32 %v6320_v49 }
0x22a1   :  { %12074 = vrsqrt.f32 %v6319_v16 }
0x22a6   :  { %v12069_v63 = vpop.eup %12068 }
0x22a7   :  { %v12071_v36 = vpop.eup %12070  ;;  %v6326_v8 = vmul.f32 %v12069_v63, %v6314_v34 }
0x22a8   :  { %v6325_v26 = vmul.f32 %v12071_v36, %v6313_v9 }
0x22a9   :  { %v6334_v35 = vmul.f32 %v6332_v7, %v6326_v8 }
0x22aa   :  { %v12073_v24 = vpop.eup %12072  ;;  %v6333_v46 = vmul.f32 %v6332_v7, %v6325_v26 }
0x22ab   :  { %v12075_v60 = vpop.eup %12074  ;;  %v6328_v44 = vmul.f32 %v12073_v24, %v6316_v30  ;;  %v6342_v31 = vadd.f32 %v6340_v58, %v6334_v35  ;;  %v6652_v24 = vrot.slane %v14236_v47, %v12860_v13 }
0x22ac   :  { %v6341_v48 = vadd.f32 %v6340_v58, %v6333_v46  ;;  %v6327_v4 = vmul.f32 %v12075_v60, %v6315_v43 }
0x22ad   :  { %v6336_v37 = vmul.f32 %v6332_v7, %v6328_v44  ;;  %v6660_v44 = vrot.slane %v14236_v47, %v12863_v21  ;;  %v7177_v21 = vld [vmem:[%s14368_s8 + $0x28] sm:$0xff] }
0x22ae   :  { %10057 = vmatprep.mubr.msk.f32.mxu1 %vm1363_vm10, %v6341_v48  ;;  %v6335_v23 = vmul.f32 %v6332_v7, %v6327_v4 }
0x22af   :  { %10058 = vmatmul.mubr.msk.f32.vlgmr.msra.gmra.mrb[100].mxu1 %vm1363_vm10, %v6342_v31  ;;  %v6344_v62 = vadd.f32 %v6340_v58, %v6336_v37 }
0x22b0   :  { %v6343_v6 = vadd.f32 %v6340_v58, %v6335_v23  ;;  %11748 = vmatpush3.bf16.msra.mxu1 %v14198_v1 }
0x22b1   :  { %11750 = vmatprep.subr.bf16.mxu1 %v14202_v22 }
0x22b2   :  { %10060 = vmatprep.mubr.msk.f32.mxu1 %vm1363_vm10, %v6343_v6 }
0x22b3   :  { %10061 = vmatmul.mubr.msk.f32.gmra.mrb[102].mxu1 %vm1363_vm10, %v6344_v62 }
0x22b4   :  { %11752 = vmatpush3.bf16.msra.mxu1 %v14202_v22 }
0x22b5   :  { %11754 = vmatprep.subr.bf16.mxu1 %v14206_v50 }
0x22b8   :  { %11756 = vmatpush3.bf16.msra.mxu1 %v14206_v50 }
0x22b9   :  { %11758 = vmatprep.subr.bf16.mxu1 %v14210_v52 }
0x22bc   :  { %11760 = vmatpush3.bf16.msra.mxu1 %v14210_v52 }
0x22bd   :  { %11762 = vmatprep.subr.bf16.mxu1 %v14214_v20 }
0x22c0   :  { %11764 = vmatpush3.bf16.msra.mxu1 %v14214_v20 }
0x22c1   :  { %11766 = vmatprep.subr.bf16.mxu1 %v14218_v57 }
0x22c4   :  { %11768 = vmatpush3.bf16.msra.mxu1 %v14218_v57 }
0x22c5   :  { %11770 = vmatprep.subr.bf16.mxu1 %v14222_v53 }
0x22c8   :  { %11772 = vmatpush3.bf16.msra.mxu1 %v14222_v53 }
0x22c9   :  { %11774 = vmatprep.subr.bf16.mxu1 %v14226_v3 }
0x22cc   :  { %11776 = vmatpush3.bf16.msra.mxu1 %v14226_v3 }
0x2382   :  { %v14264_v18 = vpop.f32.mrb[100].mxu1 }
0x2383   :  { %v14266_v38 = vpop.f32.mrb[101].mxu1  ;;  %v6533_v19 = vmul.f32 %v14264_v18, %v14264_v18 }
0x2384   :  { %v6532_v10 = vmul.f32 %v14266_v38, %v14266_v38  ;;  %10095 = vmatprep.mubr.f32.mxu1 %v14266_v38 }
0x2385   :  { %10096 = vmatmul.mubr.f32.vlgmr.msra.gmra.mrb[104].mxu1 %v14264_v18 }
0x2386   :  { %v14274_v5 = vpop.f32.mrb[102].mxu1  ;;  %10133 = vmatprep.mubr.f32.mxu0 %v6532_v10 }
0x2387   :  { %v14276_v56 = vpop.f32.mrb[103].mxu1  ;;  %10134 = vmatmul.mubr.f32.vlgmr.msra.gmra.mrb[92].mxu0 %v6533_v19  ;;  %v6535_v27 = vmul.f32 %v14274_v5, %v14274_v5 }
0x2388   :  { %v6534_v54 = vmul.f32 %v14276_v56, %v14276_v56  ;;  %10098 = vmatprep.mubr.f32.mxu1 %v14276_v56  ;;  %11820 = vmatpush3.bf16.msra.mxu0 %v14198_v1 }
0x2389   :  { %10099 = vmatmul.mubr.f32.gmra.mrb[106].mxu1 %v14274_v5  ;;  %11822 = vmatprep.subr.bf16.mxu0 %v14202_v22 }
0x238a   :  { %10136 = vmatprep.mubr.f32.mxu0 %v6534_v54  ;;  %10147 = vmatprep.mubr.msk.f32.mxu1 %vm4259_vm5, %v7176_v25  ;;  %v7179_v25 = vld [vmem:[%s14368_s8 + $0x38] sm:$0xff] }
0x238b   :  { %10137 = vmatmul.mubr.f32.gmra.mrb[94].mxu0 %v6535_v27  ;;  %v7178_v27 = vld [vmem:[%s14368_s8 + $0x30] sm:$0xff]  ;;  %s12189_s8 = smov [#allocation7]  }
0x238c   :  { %11824 = vmatpush3.bf16.msra.mxu0 %v14202_v22  ;;  %s7038_s3 = sshll.u32 %s12189_s8, 4  ;;  %s7039_s3 = int_to_ptr.vmem [resolvable:$true] %s7038_s3 }
0x238d   :  { %11826 = vmatprep.subr.bf16.mxu0 %v14206_v50  ;;  %s12155_s15 = scalar_lea.vmem %s7039_s3, 512  ;;  %p12160_p3 = scmp.lt.s32.totalorder %s7039_s3, %s7039_s3 }
0x238e   :  { %p12156_p2 = scmp.ne.s32.totalorder %s7039_s3, %s12155_s15  ;;  %p12161_p4 = scmp.lt.s32.totalorder %s12155_s15, %s12155_s15 }
0x2390   :  { %11828 = vmatpush3.bf16.msra.mxu0 %v14206_v50  ;;  %p12162_p5 = por %p12161_p4, %p12160_p3 }
0x2391   :  { %11830 = vmatprep.subr.bf16.mxu0 %v14210_v52 }
0x2392   :  { %p12163_p6 = pnand %p12162_p5, %p12156_p2 }
0x2394   :  { %11832 = vmatpush3.bf16.msra.mxu0 %v14210_v52 }
0x2395   :  { %11834 = vmatprep.subr.bf16.mxu0 %v14214_v20 }
0x2398   :  { %11836 = vmatpush3.bf16.msra.mxu0 %v14214_v20 }
0x2399   :  { %11838 = vmatprep.subr.bf16.mxu0 %v14218_v57 }
0x239c   :  { %11840 = vmatpush3.bf16.msra.mxu0 %v14218_v57 }
0x239d   :  { %11842 = vmatprep.subr.bf16.mxu0 %v14222_v53 }
0x23a0   :  { %11844 = vmatpush3.bf16.msra.mxu0 %v14222_v53 }
0x23a1   :  { %11846 = vmatprep.subr.bf16.mxu0 %v14226_v3 }
0x23a4   :  { %11848 = vmatpush3.bf16.msra.mxu0 %v14226_v3 }
0x2458   :  { %v10097_v29 = vpop.f32.mrb[104].mxu1 }
0x2459   :  { %v6622_v32 = vmul.f32 %v10097_v29, %v10097_v29  ;;  %v6634_v14 = vsub.f32 %v14264_v18, %v10097_v29  ;;  %v6513_v11 = vpop.f32.mrb[105].mxu1 }
0x245a   :  { %v6621_v51 = vmul.f32 %v6513_v11, %v6513_v11  ;;  %v6633_v33 = vsub.f32 %v14266_v38, %v6513_v11  ;;  %v10135_v12 = vpop.f32.mrb[92].mxu0 }
0x245b   :  { %v6626_v28 = vsub.f32 %v10135_v12, %v6622_v32  ;;  %v6602_v45 = vpop.f32.mrb[93].mxu0 }
0x245c   :  { %v6625_v42 = vsub.f32 %v6602_v45, %v6621_v51  ;;  %v10100_v40 = vpop.f32.mrb[106].mxu1 }
0x245d   :  { %v6630_v0 = vmax.f32 %v6626_v28, 0.0  ;;  %v6624_v59 = vmul.f32 %v10100_v40, %v10100_v40  ;;  %v6636_v17 = vsub.f32 %v14274_v5, %v10100_v40  ;;  %v6523_v2 = vpop.f32.mrb[107].mxu1 }
0x245e   :  { %v6629_v41 = vmax.f32 %v6625_v42, 0.0  ;;  %v6623_v49 = vmul.f32 %v6523_v2, %v6523_v2  ;;  %v6635_v16 = vsub.f32 %v14276_v56, %v6523_v2  ;;  %v10138_v34 = vpop.f32.mrb[94].mxu0 }
0x245f   :  { %v6638_v7 = vadd.f32 1e-05, %v6630_v0  ;;  %v6628_v63 = vsub.f32 %v10138_v34, %v6624_v59  ;;  %v6612_v9 = vpop.f32.mrb[95].mxu0 }
0x2460   :  { %v6637_v36 = vadd.f32 1e-05, %v6629_v41  ;;  %v6627_v8 = vsub.f32 %v6612_v9, %v6623_v49 }
0x2461   :  { %12076 = vrsqrt.f32 %v6638_v7  ;;  %v6632_v26 = vmax.f32 %v6628_v63, 0.0 }
0x2462   :  { %12078 = vrsqrt.f32 %v6637_v36  ;;  %v6631_v58 = vmax.f32 %v6627_v8, 0.0 }
0x2463   :  { %v6640_v30 = vadd.f32 1e-05, %v6632_v26 }
0x2464   :  { %v6639_v35 = vadd.f32 1e-05, %v6631_v58 }
0x2465   :  { %12080 = vrsqrt.f32 %v6640_v30 }
0x2466   :  { %12082 = vrsqrt.f32 %v6639_v35 }
0x246b   :  { %v12077_v43 = vpop.eup %12076 }
0x246c   :  { %v12079_v46 = vpop.eup %12078  ;;  %v6646_v60 = vmul.f32 %v12077_v43, %v6634_v14  ;;  %v6972_v43 = vrot.slane %v14236_v47, %v12990_v61 }
0x246d   :  { %v6645_v48 = vmul.f32 %v12079_v46, %v6633_v33 }
0x246e   :  { %v6654_v4 = vmul.f32 %v6652_v24, %v6646_v60 }
0x246f   :  { %v12081_v31 = vpop.eup %12080  ;;  %v6653_v37 = vmul.f32 %v6652_v24, %v6645_v48  ;;  %v6980_v48 = vrot.slane %v14159_v15, %v12434_v55 }
0x2470   :  { %v12083_v23 = vpop.eup %12082  ;;  %v6662_v6 = vadd.f32 %v6660_v44, %v6654_v4  ;;  %v6648_v62 = vmul.f32 %v12081_v31, %v6636_v17 }
0x2471   :  { %v6661_v18 = vadd.f32 %v6660_v44, %v6653_v37  ;;  %v6647_v38 = vmul.f32 %v12083_v23, %v6635_v16 }
0x2472   :  { %v6656_v10 = vmul.f32 %v6652_v24, %v6648_v62 }
0x2473   :  { %v11809_v19 = vpack.c.bf16 %v6662_v6, %v6661_v18  ;;  %v6655_v5 = vmul.f32 %v6652_v24, %v6647_v38 }
0x2474   :  { %v6664_v56 = vadd.f32 %v6660_v44, %v6656_v10 }
0x2475   :  { %11810 = vmatprep.subr.bf16.mxu1 %v11809_v19  ;;  %v6663_v13 = vadd.f32 %v6660_v44, %v6655_v5 }
0x2476   :  { %11812 = vmatpush3.bf16.msra.mxu1 %v11809_v19 }
0x2477   :  { %v11813_v54 = vpack.c.bf16 %v6664_v56, %v6663_v13 }
0x2479   :  { %11814 = vmatprep.subr.bf16.mxu1 %v11813_v54 }
0x247a   :  { %11816 = vmatpush3.bf16.msra.mxu1 %v11813_v54 }
0x247b   :  { %11850 = vmatprep.subr.bf16.mxu1 %v14198_v1 }
0x247d   :  { %10148 = vmatmul.mubr.msk.f32.vlgmr.msra.gmra.mrb[108].mxu1 %vm4259_vm5, %v7177_v21 }
0x247e   :  { %10150 = vmatprep.mubr.msk.f32.mxu1 %vm4259_vm5, %v7178_v27  ;;  %11852 = vmatpush3.bf16.msra.mxu1 %v14198_v1 }
0x247f   :  { %11854 = vmatprep.subr.bf16.mxu1 %v14202_v22 }
0x2481   :  { %10151 = vmatmul.mubr.msk.f32.gmra.mrb[110].mxu1 %vm4259_vm5, %v7179_v25 }
0x2482   :  { %11856 = vmatpush3.bf16.msra.mxu1 %v14202_v22 }
0x2483   :  { %11858 = vmatprep.subr.bf16.mxu1 %v14206_v50 }
0x2486   :  { %11860 = vmatpush3.bf16.msra.mxu1 %v14206_v50 }
0x2487   :  { %11862 = vmatprep.subr.bf16.mxu1 %v14210_v52 }
0x248a   :  { %11864 = vmatpush3.bf16.msra.mxu1 %v14210_v52 }
0x248b   :  { %11866 = vmatprep.subr.bf16.mxu1 %v14214_v20 }
0x248e   :  { %11868 = vmatpush3.bf16.msra.mxu1 %v14214_v20 }
0x248f   :  { %11870 = vmatprep.subr.bf16.mxu1 %v14218_v57 }
0x2492   :  { %11872 = vmatpush3.bf16.msra.mxu1 %v14218_v57 }
0x2493   :  { %11874 = vmatprep.subr.bf16.mxu1 %v14222_v53 }
0x2496   :  { %11876 = vmatpush3.bf16.msra.mxu1 %v14222_v53 }
0x2497   :  { %11878 = vmatprep.subr.bf16.mxu1 %v14226_v3 }
0x249a   :  { %11880 = vmatpush3.bf16.msra.mxu1 %v14226_v3 }
0x2550   :  { %v10149_v1 = vpop.f32.mrb[108].mxu1 }
0x2551   :  { %v6748_v22 = vpop.f32.mrb[109].mxu1  ;;  %v6853_v52 = vmul.f32 %v10149_v1, %v10149_v1 }
0x2552   :  { %v6852_v50 = vmul.f32 %v6748_v22, %v6748_v22  ;;  %10185 = vmatprep.mubr.f32.mxu0 %v6748_v22 }
0x2553   :  { %10186 = vmatmul.mubr.f32.vlgmr.msra.gmra.mrb[96].mxu0 %v10149_v1 }
0x2554   :  { %v10152_v29 = vpop.f32.mrb[110].mxu1  ;;  %10223 = vmatprep.mubr.f32.mxu1 %v6852_v50 }
0x2555   :  { %v6758_v20 = vpop.f32.mrb[111].mxu1  ;;  %10224 = vmatmul.mubr.f32.vlgmr.msra.gmra.mrb[112].mxu1 %v6853_v52  ;;  %v6855_v57 = vmul.f32 %v10152_v29, %v10152_v29 }
0x2556   :  { %v6854_v32 = vmul.f32 %v6758_v20, %v6758_v20  ;;  %10188 = vmatprep.mubr.f32.mxu0 %v6758_v20 }
0x2557   :  { %10189 = vmatmul.mubr.f32.gmra.mrb[98].mxu0 %v10152_v29 }
0x2558   :  { %10226 = vmatprep.mubr.f32.mxu1 %v6854_v32 }
0x2559   :  { %10227 = vmatmul.mubr.f32.gmra.mrb[114].mxu1 %v6855_v57 }
0x2626   :  { %v10187_v53 = vpop.f32.mrb[96].mxu0 }
0x2627   :  { %v6942_v14 = vmul.f32 %v10187_v53, %v10187_v53  ;;  %v6954_v11 = vsub.f32 %v10149_v1, %v10187_v53  ;;  %v6833_v3 = vpop.f32.mrb[97].mxu0 }
0x2628   :  { %v6941_v51 = vmul.f32 %v6833_v3, %v6833_v3  ;;  %v6953_v33 = vsub.f32 %v6748_v22, %v6833_v3  ;;  %v10225_v12 = vpop.f32.mrb[112].mxu1 }
0x2629   :  { %v6946_v28 = vsub.f32 %v10225_v12, %v6942_v14  ;;  %v6922_v45 = vpop.f32.mrb[113].mxu1 }
0x262a   :  { %v6945_v42 = vsub.f32 %v6922_v45, %v6941_v51  ;;  %v10190_v40 = vpop.f32.mrb[98].mxu0 }
0x262b   :  { %v6950_v0 = vmax.f32 %v6946_v28, 0.0  ;;  %v6944_v59 = vmul.f32 %v10190_v40, %v10190_v40  ;;  %v6956_v17 = vsub.f32 %v10152_v29, %v10190_v40  ;;  %v6843_v2 = vpop.f32.mrb[99].mxu0  ;;  %v7008_v29 = vrot.slane %v14159_v15, %v12473_v39 }
0x262c   :  { %v6949_v41 = vmax.f32 %v6945_v42, 0.0  ;;  %v6943_v49 = vmul.f32 %v6843_v2, %v6843_v2  ;;  %v6955_v16 = vsub.f32 %v6758_v20, %v6843_v2  ;;  %v10228_v34 = vpop.f32.mrb[114].mxu1 }
0x262d   :  { %v6958_v7 = vadd.f32 1e-05, %v6950_v0  ;;  %v6948_v63 = vsub.f32 %v10228_v34, %v6944_v59  ;;  %v6932_v9 = vpop.f32.mrb[115].mxu1 }
0x262e   :  { %v6957_v36 = vadd.f32 1e-05, %v6949_v41  ;;  %v6947_v8 = vsub.f32 %v6932_v9, %v6943_v49 }
0x262f   :  { %12084 = vrsqrt.f32 %v6958_v7  ;;  %v6952_v26 = vmax.f32 %v6948_v63, 0.0 }
0x2630   :  { %12086 = vrsqrt.f32 %v6957_v36  ;;  %v6951_v58 = vmax.f32 %v6947_v8, 0.0 }
0x2631   :  { %v6960_v30 = vadd.f32 1e-05, %v6952_v26 }
0x2632   :  { %v6959_v35 = vadd.f32 1e-05, %v6951_v58 }
0x2633   :  { %12088 = vrsqrt.f32 %v6960_v30 }
0x2634   :  { %12090 = vrsqrt.f32 %v6959_v35 }
0x2639   :  { %v12085_v24 = vpop.eup %12084 }
0x263a   :  { %v12087_v46 = vpop.eup %12086  ;;  %v6966_v60 = vmul.f32 %v12085_v24, %v6954_v11 }
0x263b   :  { %v6965_v44 = vmul.f32 %v12087_v46, %v6953_v33 }
0x263c   :  { %v6974_v62 = vmul.f32 %v6972_v43, %v6966_v60 }
0x263d   :  { %v12089_v4 = vpop.eup %12088  ;;  %v6973_v31 = vmul.f32 %v6972_v43, %v6965_v44 }
0x263e   :  { %v12091_v37 = vpop.eup %12090  ;;  %v6968_v23 = vmul.f32 %v12089_v4, %v6956_v17  ;;  %v6982_v10 = vadd.f32 %v6980_v48, %v6974_v62 }
0x263f   :  { %v6981_v6 = vadd.f32 %v6980_v48, %v6973_v31  ;;  %v6967_v18 = vmul.f32 %v12091_v37, %v6955_v16 }
0x2640   :  { %v6976_v5 = vmul.f32 %v6972_v43, %v6968_v23 }
0x2641   :  { %6985 = vmax.xlane.f32.xlu0 %v6981_v6  ;;  %v6975_v38 = vmul.f32 %v6972_v43, %v6967_v18 }
0x2642   :  { %v6984_v61 = vadd.f32 %v6980_v48, %v6976_v5 }
0x2643   :  { %v6983_v19 = vadd.f32 %v6980_v48, %v6975_v38 }
0x2645   :  { %6987 = vmax.xlane.f32.xlu0 %v6982_v10  ;;  %6989 = vmax.xlane.f32.xlu1 %v6983_v19 }
0x2649   :  { %6991 = vmax.xlane.f32.xlu1 %v6984_v61 }
0x26ce   :  { %v6986_v47 = vpop.xlane.xlu0 %6985 }
0x26cf   :  { %v6993_v56 = vsub.f32 %v6981_v6, %v6986_v47 }
0x26d1   :  { %v6997_v13 = vmul.f32 1.442695, %v6993_v56 }
0x26d2   :  { %v6988_v55 = vpop.xlane.xlu0 %6987  ;;  %v6990_v54 = vpop.xlane.xlu1 %6989 }
0x26d3   :  { %12092 = vpow2.f32 %v6997_v13  ;;  %v6994_v21 = vsub.f32 %v6982_v10, %v6988_v55  ;;  %v6995_v27 = vsub.f32 %v6983_v19, %v6990_v54 }
0x26d5   :  { %v6999_v25 = vmul.f32 1.442695, %v6994_v21  ;;  %v7001_v1 = vmul.f32 1.442695, %v6995_v27 }
0x26d6   :  { %v6992_v22 = vpop.xlane.xlu1 %6991 }
0x26d7   :  { %12094 = vpow2.f32 %v6999_v25  ;;  %v6996_v50 = vsub.f32 %v6984_v61, %v6992_v22 }
0x26d8   :  { %12096 = vpow2.f32 %v7001_v1 }
0x26d9   :  { %v7003_v52 = vmul.f32 1.442695, %v6996_v50 }
0x26db   :  { %12098 = vpow2.f32 %v7003_v52 }
0x26dd   :  { %v12093_v20 = vpop.eup %12092 }
0x26de   :  { %v7009_v32 = vmul.f32 %v12093_v20, %v7008_v29 }
0x26e0   :  { %7013 = vadd.xlane.f32.xlu0 %v7009_v32 }
0x26e1   :  { %v12095_v57 = vpop.eup %12094 }
0x26e2   :  { %v12097_v53 = vpop.eup %12096  ;;  %v7010_v14 = vmul.f32 %v12095_v57, %v7008_v29 }
0x26e3   :  { %v7011_v11 = vmul.f32 %v12097_v53, %v7008_v29 }
0x26e4   :  { %7015 = vadd.xlane.f32.xlu1 %v7010_v14 }
0x26e5   :  { %v12099_v3 = vpop.eup %12098  ;;  %7017 = vadd.xlane.f32.xlu0 %v7011_v11 }
0x26e6   :  { %v7012_v51 = vmul.f32 %v12099_v3, %v7008_v29 }
0x26e8   :  { %7019 = vadd.xlane.f32.xlu1 %v7012_v51 }
0x276d   :  { %v7014_v33 = vpop.xlane.xlu0 %7013 }
0x276e   :  { %12100 = vrcp.f32 %v7014_v33 }
0x2771   :  { %v7016_v12 = vpop.xlane.xlu1 %7015 }
0x2772   :  { %v7018_v28 = vpop.xlane.xlu0 %7017  ;;  %12102 = vrcp.f32 %v7016_v12 }
0x2773   :  { %12104 = vrcp.f32 %v7018_v28 }
0x2775   :  { %v7020_v39 = vpop.xlane.xlu1 %7019 }
0x2776   :  { %12106 = vrcp.f32 %v7020_v39 }
0x2778   :  { %v12101_v15 = vpop.eup %12100 }
0x2779   :  { %v7025_v45 = vmul.f32 %v12101_v15, %v7009_v32 }
0x277b   :  { %7029 = vst [vmem:[#allocation7] sm:$0xff] %v7025_v45 }
0x277c   :  { %v12103_v42 = vpop.eup %12102 }
0x277d   :  { %v12105_v40 = vpop.eup %12104  ;;  %v7026_v0 = vmul.f32 %v12103_v42, %v7010_v14 }
0x277e   :  { %v7027_v59 = vmul.f32 %v12105_v40, %v7011_v11 }
0x277f   :  { %7030 = vst [vmem:[#allocation7 + $0x8] sm:$0xff] %v7026_v0 }
0x2780   :  { %v12107_v17 = vpop.eup %12106  ;;  %7031 = vst [vmem:[#allocation7 + $0x10] sm:$0xff] %v7027_v59 }
0x2781   :  { %v7028_v2 = vmul.f32 %v12107_v17, %v7012_v51 }
0x2783   :  { %7032 = vst [vmem:[#allocation7 + $0x18] sm:$0xff] %v7028_v2 }
0x2784   :  { %12166 = shalt.err (!%p12163_p6)
}
0x2785   :  { %s12167_s19 = scalar_lea.hbm %s14371_s11, 512 }
0x2786   :  { %p12168_p7 = scmp.ne.s32.totalorder %s14371_s11, %s12167_s19  ;;  %p12171_p8 = scmp.lt.u32.totalorder %s12167_s19, %s14371_s11 }
0x2788   :  { %p12173_p9 = pnand %p12171_p8, %p12168_p7 }
0x278a   :  { %12176 = shalt.err (!%p12173_p9)
}
0x278b   :  { %7044 = dma.vmem_to_hbm [thread:$0]  %s7039_s3, 512, %s14371_s11, [#allocation4], %s12184_s27, %s12184_s27, %s12185_s28  }
0x278c   :  { %12181 = dma.done.wait [#allocation4], 512  }
0x278d   :  { %12182 = vsyncadd [#allocation4], 4294966784 }
0x278e   :  { %7048 = vsyncpa [#allocation3], 1 }
0x278f   :  { %7049 = vsyncpa [#allocation6], 1 }
0x2790   :  { %7050 = vsyncpa [#allocation4], 1 }

</bundles_post_ra>
